<compile_context>
chip_gen: v7x
topology: tpu7x:2x2x1
jax: 0.10.0
libtpu: 0.0.40
codegen_flags: <defaults>
</compile_context>

<pallas_src>
import functools
import math

import jax
import jax.numpy as jnp
import numpy as np
from jax import lax
from jax.experimental import pallas as pl
from jax.experimental.pallas import tpu as pltpu


# ---------------------------------------------------------------------------
# Fused kernel: QKV projection + multi-head attention for ONE batch element.
# ---------------------------------------------------------------------------
def _mha_fused_kernel(x_ref, w_ref, b_ref, o_ref,
                      qkv_flat, qkv_head, out_head,
                      *, num_heads, d, p, t):
    # x_ref:    (1, C, p*t)   bf16, lane-dense
    # w_ref:    (3C, C)       bf16, rows ordered (d, qkv, h), scale folded in q
    # b_ref:    (3C, 1)       f32,  same row order
    # o_ref:    (1, h, d, p*t) out dtype, lane-dense
    # qkv_flat: VMEM (3C, p*t)      f32 scratch
    # qkv_head: VMEM (3h, p, d*t)   f32 scratch  (rows ordered (qkv, h))
    # out_head: VMEM (h,  p, d*t)   f32 scratch
    h = num_heads
    H3 = 3 * h

    # ---- QKV projection: one MXU matmul, N = p*t lanes wide, f32 accumulate.
    acc = jnp.dot(w_ref[...], x_ref[0], preferred_element_type=jnp.float32)
    qkv_flat[...] = acc + b_ref[...]                       # (3C, p*t) f32

    # ---- conv -> per-head (p, d*t) relayout through VMEM.
    # Thanks to the wrapper-side weight-row permutation, every copy below is a
    # contiguous rectangle (no strided accesses, no value reshapes/transposes).
    for di in range(d):
        for pi in range(p):
            qkv_head[:, pi, pl.ds(di * t, t)] = (
                qkv_flat[pl.ds(di * H3, H3), pl.ds(pi * t, t)])

    q_p = qkv_head[0:h]              # (h, p, d*t); scale already in Wq / bq
    k_p = qkv_head[h:2 * h]          # (h, p, d*t)
    v_p = qkv_head[2 * h:3 * h]      # (h, p, d*t)

    # ---- scores: one batched matmul (batch=h), contracting the full (d t)
    # feature axis (K = d*t) -- equivalent to q @ k^T of the reference layout.
    s = lax.dot_general(q_p, k_p, (((2,), (2,)), ((0,), (0,))),
                        preferred_element_type=jnp.float32)      # (h, p, p)

    # ---- softmax over keys, f32 math; divide goes to the EUP.
    m = jnp.max(s, axis=-1, keepdims=True)
    ex = jnp.exp(s - m)
    den = jnp.sum(ex, axis=-1, keepdims=True)
    attn = ex * pl.reciprocal(den, approx=True)                  # (h, p, p)

    # ---- PV: batched matmul, N = d*t lanes per head.
    o_p = lax.dot_general(attn, v_p, (((2,), (1,)), ((0,), (0,))),
                          preferred_element_type=jnp.float32)    # (h, p, d*t)
    out_head[...] = o_p

    # ---- head -> conv relayout straight into the lane-dense output block.
    for di in range(d):
        for pi in range(p):
            o_ref[0, :, di, pl.ds(pi * t, t)] = (
                out_head[:, pi, pl.ds(di * t, t)].astype(o_ref.dtype))


# ---------------------------------------------------------------------------
# Wrapper: only free (contiguous) reshapes on activations; the tiny weight
# permutation / scale fold is a one-time XLA op outside the kernel.
# ---------------------------------------------------------------------------
def mha_forward(x, w_qkv, b_qkv, num_heads, *, matmul_dtype=jnp.bfloat16):
    """x: (b, C, p, t).  w_qkv: (3C, C) 1x1-conv weight.  b_qkv: (3C,)."""
    b, C, p, t = x.shape
    h = num_heads
    assert C % h == 0
    d = C // h
    PT = p * t
    e = d * t
    scale = 1.0 / math.sqrt(d * 32)

    # Fold the attention scale into the q projection (free at runtime) and
    # permute the QKV output-channel order (qkv, h, d) -> (d, qkv, h) so the
    # in-kernel conv->head relayout only needs contiguous slices.
    qkv_scale = jnp.array([scale, 1.0, 1.0], jnp.float32)
    w4 = w_qkv.astype(jnp.float32).reshape(3, h, d, C) * qkv_scale[:, None, None, None]
    b4 = b_qkv.astype(jnp.float32).reshape(3, h, d) * qkv_scale[:, None, None]
    w_perm = jnp.transpose(w4, (2, 0, 1, 3)).reshape(3 * C, C).astype(matmul_dtype)
    b_perm = jnp.transpose(b4, (2, 0, 1)).reshape(3 * C, 1)           # f32

    # Lane-dense activation view: (b, C, p*t). Contiguous -> free reshape.
    x2 = x.reshape(b, C, PT).astype(matmul_dtype)

    kernel = functools.partial(_mha_fused_kernel,
                               num_heads=h, d=d, p=p, t=t)

    # One fat grid step per batch element; with b >= 2 both v7x TCs are fed.
    out = pl.pallas_call(
        kernel,
        out_shape=jax.ShapeDtypeStruct((b, h, d, PT), x.dtype),
        grid=(b,),
        in_specs=[
            pl.BlockSpec((1, C, PT), lambda i: (i, 0, 0)),
            pl.BlockSpec((3 * C, C), lambda i: (0, 0)),
            pl.BlockSpec((3 * C, 1), lambda i: (0, 0)),
        ],
        out_specs=pl.BlockSpec((1, h, d, PT), lambda i: (i, 0, 0, 0)),
        scratch_shapes=[
            pltpu.VMEM((3 * C, PT), jnp.float32),    # qkv, conv layout
            pltpu.VMEM((3 * h, p, e), jnp.float32),  # qkv, per-head layout
            pltpu.VMEM((h, p, e), jnp.float32),      # attention output
        ],
        compiler_params=pltpu.CompilerParams(
            dimension_semantics=("parallel",)),
    )(x2, w_perm, b_perm)

    # (b, h, d, p*t) -> (b, C, p, t): contiguous, zero-cost reshape.
    return out.reshape(b, C, p, t)


# ---------------------------------------------------------------------------
# Pure-JAX reference (mirrors the PyTorch forward) for a correctness check.
# ---------------------------------------------------------------------------
def mha_reference(x, w_qkv, b_qkv, num_heads):
    b, C, p, t = x.shape
    h = num_heads
    d = C // h
    scale = 1.0 / math.sqrt(d * 32)

    x_flat = jnp.transpose(x, (0, 2, 3, 1)).reshape(b * p * t, C)
    qkv_flat = x_flat @ w_qkv.T + b_qkv
    qkv = jnp.transpose(qkv_flat.reshape(b, p, t, 3 * C), (0, 3, 1, 2))
    qkv6 = qkv.reshape(b, 3, h, d, p, t)
    q = jnp.transpose(qkv6[:, 0], (0, 1, 3, 2, 4)).reshape(b, h, p, d * t)
    k = jnp.transpose(qkv6[:, 1], (0, 1, 2, 4, 3)).reshape(b, h, d * t, p)
    v = jnp.transpose(qkv6[:, 2], (0, 1, 3, 2, 4)).reshape(b, h, p, d * t)
    dots = jnp.einsum("bhpe,bhen->bhpn", q, k) * scale
    attn = jax.nn.softmax(dots, axis=-1)
    out = jnp.einsum("bhpn,bhne->bhpe", attn, v)
    out = out.reshape(b, h, p, d, t)
    out = jnp.transpose(out, (0, 1, 3, 2, 4)).reshape(b, C, p, t)
    return out


if __name__ == "__main__":
    # Small shapes consistent with the module: channels=32, num_heads=8 -> d=4.
    b, C, p, t = 2, 32, 8, 16
    num_heads = 8

    key = jax.random.PRNGKey(0)
    kx, kw, kb = jax.random.split(key, 3)

    x = jax.random.normal(kx, (b, C, p, t), dtype=jnp.float32)
    # Conv2d(C, 3C, kernel_size=1) weight: (3C, C, 1, 1) squeezed to (3C, C).
    w_qkv = jax.random.normal(kw, (3 * C, C), dtype=jnp.float32) * 0.05
    b_qkv = jax.random.normal(kb, (3 * C,), dtype=jnp.float32) * 0.05

    fwd = jax.jit(functools.partial(mha_forward, num_heads=num_heads))
    out = jax.block_until_ready(fwd(x, w_qkv, b_qkv))

    ref = mha_reference(x, w_qkv, b_qkv, num_heads)
    # bf16 x/W on the projection MXU path -> compare at bf16-level tolerance.
    np.testing.assert_allclose(np.asarray(out), np.asarray(ref),
                               rtol=2e-2, atol=2e-2)

    print("KERNEL_OK")
</pallas_src>

<mosaic_0001>
module attributes {stable_mosaic.version = 11 : i64} {
  func.func @_mha_fused_kernel(%arg0: i32, %arg1: memref<1x32x128xbf16, #tpu.memory_space<vmem>>, %arg2: memref<96x32xbf16, #tpu.memory_space<vmem>>, %arg3: memref<96x1xf32, #tpu.memory_space<vmem>>, %arg4: memref<1x8x4x128xf32, #tpu.memory_space<vmem>>, %arg5: memref<96x128xf32, #tpu.memory_space<vmem>>, %arg6: memref<24x8x64xf32, #tpu.memory_space<vmem>>, %arg7: memref<8x8x64xf32, #tpu.memory_space<vmem>>) attributes {dimension_semantics = [#tpu.dimension_semantics<parallel>], iteration_bounds = array<i64: 2>, scalar_prefetch = 0 : i64, scratch_operands = 3 : i64, tpu.core_type = #tpu.core_type<tc>, window_params = [{transform_indices = @transform_0, window_bounds = array<i64: 1, 32, 128>}, {pipeline_mode = #tpu.pipeline_mode<synchronous>, transform_indices = @transform_1, window_bounds = array<i64: 96, 32>}, {pipeline_mode = #tpu.pipeline_mode<synchronous>, transform_indices = @transform_2, window_bounds = array<i64: 96, 1>}, {transform_indices = @transform_3, window_bounds = array<i64: 1, 8, 4, 128>}]} {
    %c0 = arith.constant 0 : index
    %c0_0 = arith.constant 0 : index
    %0 = vector.load %arg2[%c0, %c0_0] : memref<96x32xbf16, #tpu.memory_space<vmem>>, vector<96x32xbf16>
    %c0_1 = arith.constant 0 : index
    %c0_2 = arith.constant 0 : index
    %c0_3 = arith.constant 0 : index
    %1 = vector.load %arg1[%c0_1, %c0_2, %c0_3] : memref<1x32x128xbf16, #tpu.memory_space<vmem>>, vector<1x32x128xbf16>
    %2 = vector.shape_cast %1 : vector<1x32x128xbf16> to vector<32x128xbf16>
    %cst = arith.constant dense<0.000000e+00> : vector<96x128xf32>
    %3 = tpu.matmul %0, %2, %cst {dimension_numbers = #tpu.dot_dimension_numbers<[1], [0], [0], [1], [0, 0, 1, 1], [], []>} : vector<96x32xbf16>, vector<32x128xbf16>, vector<96x128xf32> -> vector<96x128xf32>
    %c0_4 = arith.constant 0 : index
    %c0_5 = arith.constant 0 : index
    %4 = vector.load %arg3[%c0_4, %c0_5] : memref<96x1xf32, #tpu.memory_space<vmem>>, vector<96x1xf32>
    %5 = vector.broadcast %4 : vector<96x1xf32> to vector<96x128xf32>
    %6 = arith.addf %3, %5 : vector<96x128xf32>
    %c0_6 = arith.constant 0 : index
    %c0_7 = arith.constant 0 : index
    %7 = vector.load %arg5[%c0_6, %c0_7] : memref<96x128xf32, #tpu.memory_space<vmem>>, vector<96x128xf32>
    tpu.vector_store %arg5[%c0_6, %c0_7], %6 {strides = array<i32>} : memref<96x128xf32, #tpu.memory_space<vmem>>, vector<96x128xf32>,
    %c0_8 = arith.constant 0 : index
    %c0_9 = arith.constant 0 : index
    %8 = vector.load %arg5[%c0_8, %c0_9] : memref<96x128xf32, #tpu.memory_space<vmem>>, vector<24x16xf32>
    %c0_10 = arith.constant 0 : index
    %c0_11 = arith.constant 0 : index
    %c0_12 = arith.constant 0 : index
    %9 = vector.load %arg6[%c0_10, %c0_11, %c0_12] : memref<24x8x64xf32, #tpu.memory_space<vmem>>, vector<24x1x16xf32>
    %10 = vector.shape_cast %9 : vector<24x1x16xf32> to vector<24x16xf32>
    %11 = vector.shape_cast %8 : vector<24x16xf32> to vector<24x1x16xf32>
    tpu.vector_store %arg6[%c0_10, %c0_11, %c0_12], %11 {strides = array<i32>} : memref<24x8x64xf32, #tpu.memory_space<vmem>>, vector<24x1x16xf32>,
    %c0_13 = arith.constant 0 : index
    %c16 = arith.constant 16 : index
    %12 = vector.load %arg5[%c0_13, %c16] : memref<96x128xf32, #tpu.memory_space<vmem>>, vector<24x16xf32>
    %c0_14 = arith.constant 0 : index
    %c1 = arith.constant 1 : index
    %c0_15 = arith.constant 0 : index
    %13 = vector.load %arg6[%c0_14, %c1, %c0_15] : memref<24x8x64xf32, #tpu.memory_space<vmem>>, vector<24x1x16xf32>
    %14 = vector.shape_cast %13 : vector<24x1x16xf32> to vector<24x16xf32>
    %15 = vector.shape_cast %12 : vector<24x16xf32> to vector<24x1x16xf32>
    tpu.vector_store %arg6[%c0_14, %c1, %c0_15], %15 {strides = array<i32>} : memref<24x8x64xf32, #tpu.memory_space<vmem>>, vector<24x1x16xf32>,
    %c0_16 = arith.constant 0 : index
    %c32 = arith.constant 32 : index
    %16 = vector.load %arg5[%c0_16, %c32] : memref<96x128xf32, #tpu.memory_space<vmem>>, vector<24x16xf32>
    %c0_17 = arith.constant 0 : index
    %c2 = arith.constant 2 : index
    %c0_18 = arith.constant 0 : index
    %17 = vector.load %arg6[%c0_17, %c2, %c0_18] : memref<24x8x64xf32, #tpu.memory_space<vmem>>, vector<24x1x16xf32>
    %18 = vector.shape_cast %17 : vector<24x1x16xf32> to vector<24x16xf32>
    %19 = vector.shape_cast %16 : vector<24x16xf32> to vector<24x1x16xf32>
    tpu.vector_store %arg6[%c0_17, %c2, %c0_18], %19 {strides = array<i32>} : memref<24x8x64xf32, #tpu.memory_space<vmem>>, vector<24x1x16xf32>,
    %c0_19 = arith.constant 0 : index
    %c48 = arith.constant 48 : index
    %20 = vector.load %arg5[%c0_19, %c48] : memref<96x128xf32, #tpu.memory_space<vmem>>, vector<24x16xf32>
    %c0_20 = arith.constant 0 : index
    %c3 = arith.constant 3 : index
    %c0_21 = arith.constant 0 : index
    %21 = vector.load %arg6[%c0_20, %c3, %c0_21] : memref<24x8x64xf32, #tpu.memory_space<vmem>>, vector<24x1x16xf32>
    %22 = vector.shape_cast %21 : vector<24x1x16xf32> to vector<24x16xf32>
    %23 = vector.shape_cast %20 : vector<24x16xf32> to vector<24x1x16xf32>
    tpu.vector_store %arg6[%c0_20, %c3, %c0_21], %23 {strides = array<i32>} : memref<24x8x64xf32, #tpu.memory_space<vmem>>, vector<24x1x16xf32>,
    %c0_22 = arith.constant 0 : index
    %c64 = arith.constant 64 : index
    %24 = vector.load %arg5[%c0_22, %c64] : memref<96x128xf32, #tpu.memory_space<vmem>>, vector<24x16xf32>
    %c0_23 = arith.constant 0 : index
    %c4 = arith.constant 4 : index
    %c0_24 = arith.constant 0 : index
    %25 = vector.load %arg6[%c0_23, %c4, %c0_24] : memref<24x8x64xf32, #tpu.memory_space<vmem>>, vector<24x1x16xf32>
    %26 = vector.shape_cast %25 : vector<24x1x16xf32> to vector<24x16xf32>
    %27 = vector.shape_cast %24 : vector<24x16xf32> to vector<24x1x16xf32>
    tpu.vector_store %arg6[%c0_23, %c4, %c0_24], %27 {strides = array<i32>} : memref<24x8x64xf32, #tpu.memory_space<vmem>>, vector<24x1x16xf32>,
    %c0_25 = arith.constant 0 : index
    %c80 = arith.constant 80 : index
    %28 = vector.load %arg5[%c0_25, %c80] : memref<96x128xf32, #tpu.memory_space<vmem>>, vector<24x16xf32>
    %c0_26 = arith.constant 0 : index
    %c5 = arith.constant 5 : index
    %c0_27 = arith.constant 0 : index
    %29 = vector.load %arg6[%c0_26, %c5, %c0_27] : memref<24x8x64xf32, #tpu.memory_space<vmem>>, vector<24x1x16xf32>
    %30 = vector.shape_cast %29 : vector<24x1x16xf32> to vector<24x16xf32>
    %31 = vector.shape_cast %28 : vector<24x16xf32> to vector<24x1x16xf32>
    tpu.vector_store %arg6[%c0_26, %c5, %c0_27], %31 {strides = array<i32>} : memref<24x8x64xf32, #tpu.memory_space<vmem>>, vector<24x1x16xf32>,
    %c0_28 = arith.constant 0 : index
    %c96 = arith.constant 96 : index
    %32 = vector.load %arg5[%c0_28, %c96] : memref<96x128xf32, #tpu.memory_space<vmem>>, vector<24x16xf32>
    %c0_29 = arith.constant 0 : index
    %c6 = arith.constant 6 : index
    %c0_30 = arith.constant 0 : index
    %33 = vector.load %arg6[%c0_29, %c6, %c0_30] : memref<24x8x64xf32, #tpu.memory_space<vmem>>, vector<24x1x16xf32>
    %34 = vector.shape_cast %33 : vector<24x1x16xf32> to vector<24x16xf32>
    %35 = vector.shape_cast %32 : vector<24x16xf32> to vector<24x1x16xf32>
    tpu.vector_store %arg6[%c0_29, %c6, %c0_30], %35 {strides = array<i32>} : memref<24x8x64xf32, #tpu.memory_space<vmem>>, vector<24x1x16xf32>,
    %c0_31 = arith.constant 0 : index
    %c112 = arith.constant 112 : index
    %36 = vector.load %arg5[%c0_31, %c112] : memref<96x128xf32, #tpu.memory_space<vmem>>, vector<24x16xf32>
    %c0_32 = arith.constant 0 : index
    %c7 = arith.constant 7 : index
    %c0_33 = arith.constant 0 : index
    %37 = vector.load %arg6[%c0_32, %c7, %c0_33] : memref<24x8x64xf32, #tpu.memory_space<vmem>>, vector<24x1x16xf32>
    %38 = vector.shape_cast %37 : vector<24x1x16xf32> to vector<24x16xf32>
    %39 = vector.shape_cast %36 : vector<24x16xf32> to vector<24x1x16xf32>
    tpu.vector_store %arg6[%c0_32, %c7, %c0_33], %39 {strides = array<i32>} : memref<24x8x64xf32, #tpu.memory_space<vmem>>, vector<24x1x16xf32>,
    %c24 = arith.constant 24 : index
    %c0_34 = arith.constant 0 : index
    %40 = vector.load %arg5[%c24, %c0_34] : memref<96x128xf32, #tpu.memory_space<vmem>>, vector<24x16xf32>
    %c0_35 = arith.constant 0 : index
    %c0_36 = arith.constant 0 : index
    %c16_37 = arith.constant 16 : index
    %41 = vector.load %arg6[%c0_35, %c0_36, %c16_37] : memref<24x8x64xf32, #tpu.memory_space<vmem>>, vector<24x1x16xf32>
    %42 = vector.shape_cast %41 : vector<24x1x16xf32> to vector<24x16xf32>
    %43 = vector.shape_cast %40 : vector<24x16xf32> to vector<24x1x16xf32>
    tpu.vector_store %arg6[%c0_35, %c0_36, %c16_37], %43 {strides = array<i32>} : memref<24x8x64xf32, #tpu.memory_space<vmem>>, vector<24x1x16xf32>,
    %c24_38 = arith.constant 24 : index
    %c16_39 = arith.constant 16 : index
    %44 = vector.load %arg5[%c24_38, %c16_39] : memref<96x128xf32, #tpu.memory_space<vmem>>, vector<24x16xf32>
    %c0_40 = arith.constant 0 : index
    %c1_41 = arith.constant 1 : index
    %c16_42 = arith.constant 16 : index
    %45 = vector.load %arg6[%c0_40, %c1_41, %c16_42] : memref<24x8x64xf32, #tpu.memory_space<vmem>>, vector<24x1x16xf32>
    %46 = vector.shape_cast %45 : vector<24x1x16xf32> to vector<24x16xf32>
    %47 = vector.shape_cast %44 : vector<24x16xf32> to vector<24x1x16xf32>
    tpu.vector_store %arg6[%c0_40, %c1_41, %c16_42], %47 {strides = array<i32>} : memref<24x8x64xf32, #tpu.memory_space<vmem>>, vector<24x1x16xf32>,
    %c24_43 = arith.constant 24 : index
    %c32_44 = arith.constant 32 : index
    %48 = vector.load %arg5[%c24_43, %c32_44] : memref<96x128xf32, #tpu.memory_space<vmem>>, vector<24x16xf32>
    %c0_45 = arith.constant 0 : index
    %c2_46 = arith.constant 2 : index
    %c16_47 = arith.constant 16 : index
    %49 = vector.load %arg6[%c0_45, %c2_46, %c16_47] : memref<24x8x64xf32, #tpu.memory_space<vmem>>, vector<24x1x16xf32>
    %50 = vector.shape_cast %49 : vector<24x1x16xf32> to vector<24x16xf32>
    %51 = vector.shape_cast %48 : vector<24x16xf32> to vector<24x1x16xf32>
    tpu.vector_store %arg6[%c0_45, %c2_46, %c16_47], %51 {strides = array<i32>} : memref<24x8x64xf32, #tpu.memory_space<vmem>>, vector<24x1x16xf32>,
    %c24_48 = arith.constant 24 : index
    %c48_49 = arith.constant 48 : index
    %52 = vector.load %arg5[%c24_48, %c48_49] : memref<96x128xf32, #tpu.memory_space<vmem>>, vector<24x16xf32>
    %c0_50 = arith.constant 0 : index
    %c3_51 = arith.constant 3 : index
    %c16_52 = arith.constant 16 : index
    %53 = vector.load %arg6[%c0_50, %c3_51, %c16_52] : memref<24x8x64xf32, #tpu.memory_space<vmem>>, vector<24x1x16xf32>
    %54 = vector.shape_cast %53 : vector<24x1x16xf32> to vector<24x16xf32>
    %55 = vector.shape_cast %52 : vector<24x16xf32> to vector<24x1x16xf32>
    tpu.vector_store %arg6[%c0_50, %c3_51, %c16_52], %55 {strides = array<i32>} : memref<24x8x64xf32, #tpu.memory_space<vmem>>, vector<24x1x16xf32>,
    %c24_53 = arith.constant 24 : index
    %c64_54 = arith.constant 64 : index
    %56 = vector.load %arg5[%c24_53, %c64_54] : memref<96x128xf32, #tpu.memory_space<vmem>>, vector<24x16xf32>
    %c0_55 = arith.constant 0 : index
    %c4_56 = arith.constant 4 : index
    %c16_57 = arith.constant 16 : index
    %57 = vector.load %arg6[%c0_55, %c4_56, %c16_57] : memref<24x8x64xf32, #tpu.memory_space<vmem>>, vector<24x1x16xf32>
    %58 = vector.shape_cast %57 : vector<24x1x16xf32> to vector<24x16xf32>
    %59 = vector.shape_cast %56 : vector<24x16xf32> to vector<24x1x16xf32>
    tpu.vector_store %arg6[%c0_55, %c4_56, %c16_57], %59 {strides = array<i32>} : memref<24x8x64xf32, #tpu.memory_space<vmem>>, vector<24x1x16xf32>,
    %c24_58 = arith.constant 24 : index
    %c80_59 = arith.constant 80 : index
    %60 = vector.load %arg5[%c24_58, %c80_59] : memref<96x128xf32, #tpu.memory_space<vmem>>, vector<24x16xf32>
    %c0_60 = arith.constant 0 : index
    %c5_61 = arith.constant 5 : index
    %c16_62 = arith.constant 16 : index
    %61 = vector.load %arg6[%c0_60, %c5_61, %c16_62] : memref<24x8x64xf32, #tpu.memory_space<vmem>>, vector<24x1x16xf32>
    %62 = vector.shape_cast %61 : vector<24x1x16xf32> to vector<24x16xf32>
    %63 = vector.shape_cast %60 : vector<24x16xf32> to vector<24x1x16xf32>
    tpu.vector_store %arg6[%c0_60, %c5_61, %c16_62], %63 {strides = array<i32>} : memref<24x8x64xf32, #tpu.memory_space<vmem>>, vector<24x1x16xf32>,
    %c24_63 = arith.constant 24 : index
    %c96_64 = arith.constant 96 : index
    %64 = vector.load %arg5[%c24_63, %c96_64] : memref<96x128xf32, #tpu.memory_space<vmem>>, vector<24x16xf32>
    %c0_65 = arith.constant 0 : index
    %c6_66 = arith.constant 6 : index
    %c16_67 = arith.constant 16 : index
    %65 = vector.load %arg6[%c0_65, %c6_66, %c16_67] : memref<24x8x64xf32, #tpu.memory_space<vmem>>, vector<24x1x16xf32>
    %66 = vector.shape_cast %65 : vector<24x1x16xf32> to vector<24x16xf32>
    %67 = vector.shape_cast %64 : vector<24x16xf32> to vector<24x1x16xf32>
    tpu.vector_store %arg6[%c0_65, %c6_66, %c16_67], %67 {strides = array<i32>} : memref<24x8x64xf32, #tpu.memory_space<vmem>>, vector<24x1x16xf32>,
    %c24_68 = arith.constant 24 : index
    %c112_69 = arith.constant 112 : index
    %68 = vector.load %arg5[%c24_68, %c112_69] : memref<96x128xf32, #tpu.memory_space<vmem>>, vector<24x16xf32>
    %c0_70 = arith.constant 0 : index
    %c7_71 = arith.constant 7 : index
    %c16_72 = arith.constant 16 : index
    %69 = vector.load %arg6[%c0_70, %c7_71, %c16_72] : memref<24x8x64xf32, #tpu.memory_space<vmem>>, vector<24x1x16xf32>
    %70 = vector.shape_cast %69 : vector<24x1x16xf32> to vector<24x16xf32>
    %71 = vector.shape_cast %68 : vector<24x16xf32> to vector<24x1x16xf32>
    tpu.vector_store %arg6[%c0_70, %c7_71, %c16_72], %71 {strides = array<i32>} : memref<24x8x64xf32, #tpu.memory_space<vmem>>, vector<24x1x16xf32>,
    %c48_73 = arith.constant 48 : index
    %c0_74 = arith.constant 0 : index
    %72 = vector.load %arg5[%c48_73, %c0_74] : memref<96x128xf32, #tpu.memory_space<vmem>>, vector<24x16xf32>
    %c0_75 = arith.constant 0 : index
    %c0_76 = arith.constant 0 : index
    %c32_77 = arith.constant 32 : index
    %73 = vector.load %arg6[%c0_75, %c0_76, %c32_77] : memref<24x8x64xf32, #tpu.memory_space<vmem>>, vector<24x1x16xf32>
    %74 = vector.shape_cast %73 : vector<24x1x16xf32> to vector<24x16xf32>
    %75 = vector.shape_cast %72 : vector<24x16xf32> to vector<24x1x16xf32>
    tpu.vector_store %arg6[%c0_75, %c0_76, %c32_77], %75 {strides = array<i32>} : memref<24x8x64xf32, #tpu.memory_space<vmem>>, vector<24x1x16xf32>,
    %c48_78 = arith.constant 48 : index
    %c16_79 = arith.constant 16 : index
    %76 = vector.load %arg5[%c48_78, %c16_79] : memref<96x128xf32, #tpu.memory_space<vmem>>, vector<24x16xf32>
    %c0_80 = arith.constant 0 : index
    %c1_81 = arith.constant 1 : index
    %c32_82 = arith.constant 32 : index
    %77 = vector.load %arg6[%c0_80, %c1_81, %c32_82] : memref<24x8x64xf32, #tpu.memory_space<vmem>>, vector<24x1x16xf32>
    %78 = vector.shape_cast %77 : vector<24x1x16xf32> to vector<24x16xf32>
    %79 = vector.shape_cast %76 : vector<24x16xf32> to vector<24x1x16xf32>
    tpu.vector_store %arg6[%c0_80, %c1_81, %c32_82], %79 {strides = array<i32>} : memref<24x8x64xf32, #tpu.memory_space<vmem>>, vector<24x1x16xf32>,
    %c48_83 = arith.constant 48 : index
    %c32_84 = arith.constant 32 : index
    %80 = vector.load %arg5[%c48_83, %c32_84] : memref<96x128xf32, #tpu.memory_space<vmem>>, vector<24x16xf32>
    %c0_85 = arith.constant 0 : index
    %c2_86 = arith.constant 2 : index
    %c32_87 = arith.constant 32 : index
    %81 = vector.load %arg6[%c0_85, %c2_86, %c32_87] : memref<24x8x64xf32, #tpu.memory_space<vmem>>, vector<24x1x16xf32>
    %82 = vector.shape_cast %81 : vector<24x1x16xf32> to vector<24x16xf32>
    %83 = vector.shape_cast %80 : vector<24x16xf32> to vector<24x1x16xf32>
    tpu.vector_store %arg6[%c0_85, %c2_86, %c32_87], %83 {strides = array<i32>} : memref<24x8x64xf32, #tpu.memory_space<vmem>>, vector<24x1x16xf32>,
    %c48_88 = arith.constant 48 : index
    %c48_89 = arith.constant 48 : index
    %84 = vector.load %arg5[%c48_88, %c48_89] : memref<96x128xf32, #tpu.memory_space<vmem>>, vector<24x16xf32>
    %c0_90 = arith.constant 0 : index
    %c3_91 = arith.constant 3 : index
    %c32_92 = arith.constant 32 : index
    %85 = vector.load %arg6[%c0_90, %c3_91, %c32_92] : memref<24x8x64xf32, #tpu.memory_space<vmem>>, vector<24x1x16xf32>
    %86 = vector.shape_cast %85 : vector<24x1x16xf32> to vector<24x16xf32>
    %87 = vector.shape_cast %84 : vector<24x16xf32> to vector<24x1x16xf32>
    tpu.vector_store %arg6[%c0_90, %c3_91, %c32_92], %87 {strides = array<i32>} : memref<24x8x64xf32, #tpu.memory_space<vmem>>, vector<24x1x16xf32>,
    %c48_93 = arith.constant 48 : index
    %c64_94 = arith.constant 64 : index
    %88 = vector.load %arg5[%c48_93, %c64_94] : memref<96x128xf32, #tpu.memory_space<vmem>>, vector<24x16xf32>
    %c0_95 = arith.constant 0 : index
    %c4_96 = arith.constant 4 : index
    %c32_97 = arith.constant 32 : index
    %89 = vector.load %arg6[%c0_95, %c4_96, %c32_97] : memref<24x8x64xf32, #tpu.memory_space<vmem>>, vector<24x1x16xf32>
    %90 = vector.shape_cast %89 : vector<24x1x16xf32> to vector<24x16xf32>
    %91 = vector.shape_cast %88 : vector<24x16xf32> to vector<24x1x16xf32>
    tpu.vector_store %arg6[%c0_95, %c4_96, %c32_97], %91 {strides = array<i32>} : memref<24x8x64xf32, #tpu.memory_space<vmem>>, vector<24x1x16xf32>,
    %c48_98 = arith.constant 48 : index
    %c80_99 = arith.constant 80 : index
    %92 = vector.load %arg5[%c48_98, %c80_99] : memref<96x128xf32, #tpu.memory_space<vmem>>, vector<24x16xf32>
    %c0_100 = arith.constant 0 : index
    %c5_101 = arith.constant 5 : index
    %c32_102 = arith.constant 32 : index
    %93 = vector.load %arg6[%c0_100, %c5_101, %c32_102] : memref<24x8x64xf32, #tpu.memory_space<vmem>>, vector<24x1x16xf32>
    %94 = vector.shape_cast %93 : vector<24x1x16xf32> to vector<24x16xf32>
    %95 = vector.shape_cast %92 : vector<24x16xf32> to vector<24x1x16xf32>
    tpu.vector_store %arg6[%c0_100, %c5_101, %c32_102], %95 {strides = array<i32>} : memref<24x8x64xf32, #tpu.memory_space<vmem>>, vector<24x1x16xf32>,
    %c48_103 = arith.constant 48 : index
    %c96_104 = arith.constant 96 : index
    %96 = vector.load %arg5[%c48_103, %c96_104] : memref<96x128xf32, #tpu.memory_space<vmem>>, vector<24x16xf32>
    %c0_105 = arith.constant 0 : index
    %c6_106 = arith.constant 6 : index
    %c32_107 = arith.constant 32 : index
    %97 = vector.load %arg6[%c0_105, %c6_106, %c32_107] : memref<24x8x64xf32, #tpu.memory_space<vmem>>, vector<24x1x16xf32>
    %98 = vector.shape_cast %97 : vector<24x1x16xf32> to vector<24x16xf32>
    %99 = vector.shape_cast %96 : vector<24x16xf32> to vector<24x1x16xf32>
    tpu.vector_store %arg6[%c0_105, %c6_106, %c32_107], %99 {strides = array<i32>} : memref<24x8x64xf32, #tpu.memory_space<vmem>>, vector<24x1x16xf32>,
    %c48_108 = arith.constant 48 : index
    %c112_109 = arith.constant 112 : index
    %100 = vector.load %arg5[%c48_108, %c112_109] : memref<96x128xf32, #tpu.memory_space<vmem>>, vector<24x16xf32>
    %c0_110 = arith.constant 0 : index
    %c7_111 = arith.constant 7 : index
    %c32_112 = arith.constant 32 : index
    %101 = vector.load %arg6[%c0_110, %c7_111, %c32_112] : memref<24x8x64xf32, #tpu.memory_space<vmem>>, vector<24x1x16xf32>
    %102 = vector.shape_cast %101 : vector<24x1x16xf32> to vector<24x16xf32>
    %103 = vector.shape_cast %100 : vector<24x16xf32> to vector<24x1x16xf32>
    tpu.vector_store %arg6[%c0_110, %c7_111, %c32_112], %103 {strides = array<i32>} : memref<24x8x64xf32, #tpu.memory_space<vmem>>, vector<24x1x16xf32>,
    %c72 = arith.constant 72 : index
    %c0_113 = arith.constant 0 : index
    %104 = vector.load %arg5[%c72, %c0_113] : memref<96x128xf32, #tpu.memory_space<vmem>>, vector<24x16xf32>
    %c0_114 = arith.constant 0 : index
    %c0_115 = arith.constant 0 : index
    %c48_116 = arith.constant 48 : index
    %105 = vector.load %arg6[%c0_114, %c0_115, %c48_116] : memref<24x8x64xf32, #tpu.memory_space<vmem>>, vector<24x1x16xf32>
    %106 = vector.shape_cast %105 : vector<24x1x16xf32> to vector<24x16xf32>
    %107 = vector.shape_cast %104 : vector<24x16xf32> to vector<24x1x16xf32>
    tpu.vector_store %arg6[%c0_114, %c0_115, %c48_116], %107 {strides = array<i32>} : memref<24x8x64xf32, #tpu.memory_space<vmem>>, vector<24x1x16xf32>,
    %c72_117 = arith.constant 72 : index
    %c16_118 = arith.constant 16 : index
    %108 = vector.load %arg5[%c72_117, %c16_118] : memref<96x128xf32, #tpu.memory_space<vmem>>, vector<24x16xf32>
    %c0_119 = arith.constant 0 : index
    %c1_120 = arith.constant 1 : index
    %c48_121 = arith.constant 48 : index
    %109 = vector.load %arg6[%c0_119, %c1_120, %c48_121] : memref<24x8x64xf32, #tpu.memory_space<vmem>>, vector<24x1x16xf32>
    %110 = vector.shape_cast %109 : vector<24x1x16xf32> to vector<24x16xf32>
    %111 = vector.shape_cast %108 : vector<24x16xf32> to vector<24x1x16xf32>
    tpu.vector_store %arg6[%c0_119, %c1_120, %c48_121], %111 {strides = array<i32>} : memref<24x8x64xf32, #tpu.memory_space<vmem>>, vector<24x1x16xf32>,
    %c72_122 = arith.constant 72 : index
    %c32_123 = arith.constant 32 : index
    %112 = vector.load %arg5[%c72_122, %c32_123] : memref<96x128xf32, #tpu.memory_space<vmem>>, vector<24x16xf32>
    %c0_124 = arith.constant 0 : index
    %c2_125 = arith.constant 2 : index
    %c48_126 = arith.constant 48 : index
    %113 = vector.load %arg6[%c0_124, %c2_125, %c48_126] : memref<24x8x64xf32, #tpu.memory_space<vmem>>, vector<24x1x16xf32>
    %114 = vector.shape_cast %113 : vector<24x1x16xf32> to vector<24x16xf32>
    %115 = vector.shape_cast %112 : vector<24x16xf32> to vector<24x1x16xf32>
    tpu.vector_store %arg6[%c0_124, %c2_125, %c48_126], %115 {strides = array<i32>} : memref<24x8x64xf32, #tpu.memory_space<vmem>>, vector<24x1x16xf32>,
    %c72_127 = arith.constant 72 : index
    %c48_128 = arith.constant 48 : index
    %116 = vector.load %arg5[%c72_127, %c48_128] : memref<96x128xf32, #tpu.memory_space<vmem>>, vector<24x16xf32>
    %c0_129 = arith.constant 0 : index
    %c3_130 = arith.constant 3 : index
    %c48_131 = arith.constant 48 : index
    %117 = vector.load %arg6[%c0_129, %c3_130, %c48_131] : memref<24x8x64xf32, #tpu.memory_space<vmem>>, vector<24x1x16xf32>
    %118 = vector.shape_cast %117 : vector<24x1x16xf32> to vector<24x16xf32>
    %119 = vector.shape_cast %116 : vector<24x16xf32> to vector<24x1x16xf32>
    tpu.vector_store %arg6[%c0_129, %c3_130, %c48_131], %119 {strides = array<i32>} : memref<24x8x64xf32, #tpu.memory_space<vmem>>, vector<24x1x16xf32>,
    %c72_132 = arith.constant 72 : index
    %c64_133 = arith.constant 64 : index
    %120 = vector.load %arg5[%c72_132, %c64_133] : memref<96x128xf32, #tpu.memory_space<vmem>>, vector<24x16xf32>
    %c0_134 = arith.constant 0 : index
    %c4_135 = arith.constant 4 : index
    %c48_136 = arith.constant 48 : index
    %121 = vector.load %arg6[%c0_134, %c4_135, %c48_136] : memref<24x8x64xf32, #tpu.memory_space<vmem>>, vector<24x1x16xf32>
    %122 = vector.shape_cast %121 : vector<24x1x16xf32> to vector<24x16xf32>
    %123 = vector.shape_cast %120 : vector<24x16xf32> to vector<24x1x16xf32>
    tpu.vector_store %arg6[%c0_134, %c4_135, %c48_136], %123 {strides = array<i32>} : memref<24x8x64xf32, #tpu.memory_space<vmem>>, vector<24x1x16xf32>,
    %c72_137 = arith.constant 72 : index
    %c80_138 = arith.constant 80 : index
    %124 = vector.load %arg5[%c72_137, %c80_138] : memref<96x128xf32, #tpu.memory_space<vmem>>, vector<24x16xf32>
    %c0_139 = arith.constant 0 : index
    %c5_140 = arith.constant 5 : index
    %c48_141 = arith.constant 48 : index
    %125 = vector.load %arg6[%c0_139, %c5_140, %c48_141] : memref<24x8x64xf32, #tpu.memory_space<vmem>>, vector<24x1x16xf32>
    %126 = vector.shape_cast %125 : vector<24x1x16xf32> to vector<24x16xf32>
    %127 = vector.shape_cast %124 : vector<24x16xf32> to vector<24x1x16xf32>
    tpu.vector_store %arg6[%c0_139, %c5_140, %c48_141], %127 {strides = array<i32>} : memref<24x8x64xf32, #tpu.memory_space<vmem>>, vector<24x1x16xf32>,
    %c72_142 = arith.constant 72 : index
    %c96_143 = arith.constant 96 : index
    %128 = vector.load %arg5[%c72_142, %c96_143] : memref<96x128xf32, #tpu.memory_space<vmem>>, vector<24x16xf32>
    %c0_144 = arith.constant 0 : index
    %c6_145 = arith.constant 6 : index
    %c48_146 = arith.constant 48 : index
    %129 = vector.load %arg6[%c0_144, %c6_145, %c48_146] : memref<24x8x64xf32, #tpu.memory_space<vmem>>, vector<24x1x16xf32>
    %130 = vector.shape_cast %129 : vector<24x1x16xf32> to vector<24x16xf32>
    %131 = vector.shape_cast %128 : vector<24x16xf32> to vector<24x1x16xf32>
    tpu.vector_store %arg6[%c0_144, %c6_145, %c48_146], %131 {strides = array<i32>} : memref<24x8x64xf32, #tpu.memory_space<vmem>>, vector<24x1x16xf32>,
    %c72_147 = arith.constant 72 : index
    %c112_148 = arith.constant 112 : index
    %132 = vector.load %arg5[%c72_147, %c112_148] : memref<96x128xf32, #tpu.memory_space<vmem>>, vector<24x16xf32>
    %c0_149 = arith.constant 0 : index
    %c7_150 = arith.constant 7 : index
    %c48_151 = arith.constant 48 : index
    %133 = vector.load %arg6[%c0_149, %c7_150, %c48_151] : memref<24x8x64xf32, #tpu.memory_space<vmem>>, vector<24x1x16xf32>
    %134 = vector.shape_cast %133 : vector<24x1x16xf32> to vector<24x16xf32>
    %135 = vector.shape_cast %132 : vector<24x16xf32> to vector<24x1x16xf32>
    tpu.vector_store %arg6[%c0_149, %c7_150, %c48_151], %135 {strides = array<i32>} : memref<24x8x64xf32, #tpu.memory_space<vmem>>, vector<24x1x16xf32>,
    %c0_152 = arith.constant 0 : index
    %c0_153 = arith.constant 0 : index
    %c0_154 = arith.constant 0 : index
    %136 = vector.load %arg6[%c0_152, %c0_153, %c0_154] : memref<24x8x64xf32, #tpu.memory_space<vmem>>, vector<8x8x64xf32>
    %c8 = arith.constant 8 : index
    %c0_155 = arith.constant 0 : index
    %c0_156 = arith.constant 0 : index
    %137 = vector.load %arg6[%c8, %c0_155, %c0_156] : memref<24x8x64xf32, #tpu.memory_space<vmem>>, vector<8x8x64xf32>
    %c16_157 = arith.constant 16 : index
    %c0_158 = arith.constant 0 : index
    %c0_159 = arith.constant 0 : index
    %138 = vector.load %arg6[%c16_157, %c0_158, %c0_159] : memref<24x8x64xf32, #tpu.memory_space<vmem>>, vector<8x8x64xf32>
    %cst_160 = arith.constant dense<0.000000e+00> : vector<8x8x8xf32>
    %139 = tpu.matmul %136, %137, %cst_160 {dimension_numbers = #tpu.dot_dimension_numbers<[2], [2], [1], [1], [0, 0, 0, 1, 1, 1], [0], [0]>} : vector<8x8x64xf32>, vector<8x8x64xf32>, vector<8x8x8xf32> -> vector<8x8x8xf32>
    %cst_161 = arith.constant dense<0xFF800000> : vector<8x8xf32>
    %140 = vector.multi_reduction <maximumf>, %139, %cst_161 [2] : vector<8x8x8xf32> to vector<8x8xf32>
    %141 = vector.shape_cast %140 : vector<8x8xf32> to vector<8x8x1xf32>
    %142 = vector.broadcast %141 : vector<8x8x1xf32> to vector<8x8x8xf32>
    %143 = arith.subf %139, %142 : vector<8x8x8xf32>
    %144 = math.exp %143 : vector<8x8x8xf32>
    %cst_162 = arith.constant dense<0.000000e+00> : vector<8x8xf32>
    %145 = vector.multi_reduction <add>, %144, %cst_162 [2] : vector<8x8x8xf32> to vector<8x8xf32>
    %146 = vector.shape_cast %145 : vector<8x8xf32> to vector<8x8x1xf32>
    %147 = tpu.reciprocal %146 {approx = true} : vector<8x8x1xf32> -> vector<8x8x1xf32>
    %148 = vector.broadcast %147 : vector<8x8x1xf32> to vector<8x8x8xf32>
    %149 = arith.mulf %144, %148 : vector<8x8x8xf32>
    %cst_163 = arith.constant dense<0.000000e+00> : vector<8x8x64xf32>
    %150 = tpu.matmul %149, %138, %cst_163 {dimension_numbers = #tpu.dot_dimension_numbers<[2], [1], [1], [2], [0, 0, 0, 1, 1, 2], [0], [0]>} : vector<8x8x8xf32>, vector<8x8x64xf32>, vector<8x8x64xf32> -> vector<8x8x64xf32>
    %c0_164 = arith.constant 0 : index
    %c0_165 = arith.constant 0 : index
    %c0_166 = arith.constant 0 : index
    %151 = vector.load %arg7[%c0_164, %c0_165, %c0_166] : memref<8x8x64xf32, #tpu.memory_space<vmem>>, vector<8x8x64xf32>
    tpu.vector_store %arg7[%c0_164, %c0_165, %c0_166], %150 {strides = array<i32>} : memref<8x8x64xf32, #tpu.memory_space<vmem>>, vector<8x8x64xf32>,
    %c0_167 = arith.constant 0 : index
    %c0_168 = arith.constant 0 : index
    %c0_169 = arith.constant 0 : index
    %152 = vector.load %arg7[%c0_167, %c0_168, %c0_169] : memref<8x8x64xf32, #tpu.memory_space<vmem>>, vector<8x1x16xf32>
    %153 = vector.shape_cast %152 : vector<8x1x16xf32> to vector<8x16xf32>
    %c0_170 = arith.constant 0 : index
    %c0_171 = arith.constant 0 : index
    %c0_172 = arith.constant 0 : index
    %c0_173 = arith.constant 0 : index
    %154 = vector.load %arg4[%c0_170, %c0_171, %c0_172, %c0_173] : memref<1x8x4x128xf32, #tpu.memory_space<vmem>>, vector<1x8x1x16xf32>
    %155 = vector.shape_cast %154 : vector<1x8x1x16xf32> to vector<8x16xf32>
    %156 = vector.shape_cast %153 : vector<8x16xf32> to vector<1x8x1x16xf32>
    tpu.vector_store %arg4[%c0_170, %c0_171, %c0_172, %c0_173], %156 {strides = array<i32>} : memref<1x8x4x128xf32, #tpu.memory_space<vmem>>, vector<1x8x1x16xf32>,
    %c0_174 = arith.constant 0 : index
    %c1_175 = arith.constant 1 : index
    %c0_176 = arith.constant 0 : index
    %157 = vector.load %arg7[%c0_174, %c1_175, %c0_176] : memref<8x8x64xf32, #tpu.memory_space<vmem>>, vector<8x1x16xf32>
    %158 = vector.shape_cast %157 : vector<8x1x16xf32> to vector<8x16xf32>
    %c0_177 = arith.constant 0 : index
    %c0_178 = arith.constant 0 : index
    %c0_179 = arith.constant 0 : index
    %c16_180 = arith.constant 16 : index
    %159 = vector.load %arg4[%c0_177, %c0_178, %c0_179, %c16_180] : memref<1x8x4x128xf32, #tpu.memory_space<vmem>>, vector<1x8x1x16xf32>
    %160 = vector.shape_cast %159 : vector<1x8x1x16xf32> to vector<8x16xf32>
    %161 = vector.shape_cast %158 : vector<8x16xf32> to vector<1x8x1x16xf32>
    tpu.vector_store %arg4[%c0_177, %c0_178, %c0_179, %c16_180], %161 {strides = array<i32>} : memref<1x8x4x128xf32, #tpu.memory_space<vmem>>, vector<1x8x1x16xf32>,
    %c0_181 = arith.constant 0 : index
    %c2_182 = arith.constant 2 : index
    %c0_183 = arith.constant 0 : index
    %162 = vector.load %arg7[%c0_181, %c2_182, %c0_183] : memref<8x8x64xf32, #tpu.memory_space<vmem>>, vector<8x1x16xf32>
    %163 = vector.shape_cast %162 : vector<8x1x16xf32> to vector<8x16xf32>
    %c0_184 = arith.constant 0 : index
    %c0_185 = arith.constant 0 : index
    %c0_186 = arith.constant 0 : index
    %c32_187 = arith.constant 32 : index
    %164 = vector.load %arg4[%c0_184, %c0_185, %c0_186, %c32_187] : memref<1x8x4x128xf32, #tpu.memory_space<vmem>>, vector<1x8x1x16xf32>
    %165 = vector.shape_cast %164 : vector<1x8x1x16xf32> to vector<8x16xf32>
    %166 = vector.shape_cast %163 : vector<8x16xf32> to vector<1x8x1x16xf32>
    tpu.vector_store %arg4[%c0_184, %c0_185, %c0_186, %c32_187], %166 {strides = array<i32>} : memref<1x8x4x128xf32, #tpu.memory_space<vmem>>, vector<1x8x1x16xf32>,
    %c0_188 = arith.constant 0 : index
    %c3_189 = arith.constant 3 : index
    %c0_190 = arith.constant 0 : index
    %167 = vector.load %arg7[%c0_188, %c3_189, %c0_190] : memref<8x8x64xf32, #tpu.memory_space<vmem>>, vector<8x1x16xf32>
    %168 = vector.shape_cast %167 : vector<8x1x16xf32> to vector<8x16xf32>
    %c0_191 = arith.constant 0 : index
    %c0_192 = arith.constant 0 : index
    %c0_193 = arith.constant 0 : index
    %c48_194 = arith.constant 48 : index
    %169 = vector.load %arg4[%c0_191, %c0_192, %c0_193, %c48_194] : memref<1x8x4x128xf32, #tpu.memory_space<vmem>>, vector<1x8x1x16xf32>
    %170 = vector.shape_cast %169 : vector<1x8x1x16xf32> to vector<8x16xf32>
    %171 = vector.shape_cast %168 : vector<8x16xf32> to vector<1x8x1x16xf32>
    tpu.vector_store %arg4[%c0_191, %c0_192, %c0_193, %c48_194], %171 {strides = array<i32>} : memref<1x8x4x128xf32, #tpu.memory_space<vmem>>, vector<1x8x1x16xf32>,
    %c0_195 = arith.constant 0 : index
    %c4_196 = arith.constant 4 : index
    %c0_197 = arith.constant 0 : index
    %172 = vector.load %arg7[%c0_195, %c4_196, %c0_197] : memref<8x8x64xf32, #tpu.memory_space<vmem>>, vector<8x1x16xf32>
    %173 = vector.shape_cast %172 : vector<8x1x16xf32> to vector<8x16xf32>
    %c0_198 = arith.constant 0 : index
    %c0_199 = arith.constant 0 : index
    %c0_200 = arith.constant 0 : index
    %c64_201 = arith.constant 64 : index
    %174 = vector.load %arg4[%c0_198, %c0_199, %c0_200, %c64_201] : memref<1x8x4x128xf32, #tpu.memory_space<vmem>>, vector<1x8x1x16xf32>
    %175 = vector.shape_cast %174 : vector<1x8x1x16xf32> to vector<8x16xf32>
    %176 = vector.shape_cast %173 : vector<8x16xf32> to vector<1x8x1x16xf32>
    tpu.vector_store %arg4[%c0_198, %c0_199, %c0_200, %c64_201], %176 {strides = array<i32>} : memref<1x8x4x128xf32, #tpu.memory_space<vmem>>, vector<1x8x1x16xf32>,
    %c0_202 = arith.constant 0 : index
    %c5_203 = arith.constant 5 : index
    %c0_204 = arith.constant 0 : index
    %177 = vector.load %arg7[%c0_202, %c5_203, %c0_204] : memref<8x8x64xf32, #tpu.memory_space<vmem>>, vector<8x1x16xf32>
    %178 = vector.shape_cast %177 : vector<8x1x16xf32> to vector<8x16xf32>
    %c0_205 = arith.constant 0 : index
    %c0_206 = arith.constant 0 : index
    %c0_207 = arith.constant 0 : index
    %c80_208 = arith.constant 80 : index
    %179 = vector.load %arg4[%c0_205, %c0_206, %c0_207, %c80_208] : memref<1x8x4x128xf32, #tpu.memory_space<vmem>>, vector<1x8x1x16xf32>
    %180 = vector.shape_cast %179 : vector<1x8x1x16xf32> to vector<8x16xf32>
    %181 = vector.shape_cast %178 : vector<8x16xf32> to vector<1x8x1x16xf32>
    tpu.vector_store %arg4[%c0_205, %c0_206, %c0_207, %c80_208], %181 {strides = array<i32>} : memref<1x8x4x128xf32, #tpu.memory_space<vmem>>, vector<1x8x1x16xf32>,
    %c0_209 = arith.constant 0 : index
    %c6_210 = arith.constant 6 : index
    %c0_211 = arith.constant 0 : index
    %182 = vector.load %arg7[%c0_209, %c6_210, %c0_211] : memref<8x8x64xf32, #tpu.memory_space<vmem>>, vector<8x1x16xf32>
    %183 = vector.shape_cast %182 : vector<8x1x16xf32> to vector<8x16xf32>
    %c0_212 = arith.constant 0 : index
    %c0_213 = arith.constant 0 : index
    %c0_214 = arith.constant 0 : index
    %c96_215 = arith.constant 96 : index
    %184 = vector.load %arg4[%c0_212, %c0_213, %c0_214, %c96_215] : memref<1x8x4x128xf32, #tpu.memory_space<vmem>>, vector<1x8x1x16xf32>
    %185 = vector.shape_cast %184 : vector<1x8x1x16xf32> to vector<8x16xf32>
    %186 = vector.shape_cast %183 : vector<8x16xf32> to vector<1x8x1x16xf32>
    tpu.vector_store %arg4[%c0_212, %c0_213, %c0_214, %c96_215], %186 {strides = array<i32>} : memref<1x8x4x128xf32, #tpu.memory_space<vmem>>, vector<1x8x1x16xf32>,
    %c0_216 = arith.constant 0 : index
    %c7_217 = arith.constant 7 : index
    %c0_218 = arith.constant 0 : index
    %187 = vector.load %arg7[%c0_216, %c7_217, %c0_218] : memref<8x8x64xf32, #tpu.memory_space<vmem>>, vector<8x1x16xf32>
    %188 = vector.shape_cast %187 : vector<8x1x16xf32> to vector<8x16xf32>
    %c0_219 = arith.constant 0 : index
    %c0_220 = arith.constant 0 : index
    %c0_221 = arith.constant 0 : index
    %c112_222 = arith.constant 112 : index
    %189 = vector.load %arg4[%c0_219, %c0_220, %c0_221, %c112_222] : memref<1x8x4x128xf32, #tpu.memory_space<vmem>>, vector<1x8x1x16xf32>
    %190 = vector.shape_cast %189 : vector<1x8x1x16xf32> to vector<8x16xf32>
    %191 = vector.shape_cast %188 : vector<8x16xf32> to vector<1x8x1x16xf32>
    tpu.vector_store %arg4[%c0_219, %c0_220, %c0_221, %c112_222], %191 {strides = array<i32>} : memref<1x8x4x128xf32, #tpu.memory_space<vmem>>, vector<1x8x1x16xf32>,
    %c0_223 = arith.constant 0 : index
    %c0_224 = arith.constant 0 : index
    %c16_225 = arith.constant 16 : index
    %192 = vector.load %arg7[%c0_223, %c0_224, %c16_225] : memref<8x8x64xf32, #tpu.memory_space<vmem>>, vector<8x1x16xf32>
    %193 = vector.shape_cast %192 : vector<8x1x16xf32> to vector<8x16xf32>
    %c0_226 = arith.constant 0 : index
    %c0_227 = arith.constant 0 : index
    %c1_228 = arith.constant 1 : index
    %c0_229 = arith.constant 0 : index
    %194 = vector.load %arg4[%c0_226, %c0_227, %c1_228, %c0_229] : memref<1x8x4x128xf32, #tpu.memory_space<vmem>>, vector<1x8x1x16xf32>
    %195 = vector.shape_cast %194 : vector<1x8x1x16xf32> to vector<8x16xf32>
    %196 = vector.shape_cast %193 : vector<8x16xf32> to vector<1x8x1x16xf32>
    tpu.vector_store %arg4[%c0_226, %c0_227, %c1_228, %c0_229], %196 {strides = array<i32>} : memref<1x8x4x128xf32, #tpu.memory_space<vmem>>, vector<1x8x1x16xf32>,
    %c0_230 = arith.constant 0 : index
    %c1_231 = arith.constant 1 : index
    %c16_232 = arith.constant 16 : index
    %197 = vector.load %arg7[%c0_230, %c1_231, %c16_232] : memref<8x8x64xf32, #tpu.memory_space<vmem>>, vector<8x1x16xf32>
    %198 = vector.shape_cast %197 : vector<8x1x16xf32> to vector<8x16xf32>
    %c0_233 = arith.constant 0 : index
    %c0_234 = arith.constant 0 : index
    %c1_235 = arith.constant 1 : index
    %c16_236 = arith.constant 16 : index
    %199 = vector.load %arg4[%c0_233, %c0_234, %c1_235, %c16_236] : memref<1x8x4x128xf32, #tpu.memory_space<vmem>>, vector<1x8x1x16xf32>
    %200 = vector.shape_cast %199 : vector<1x8x1x16xf32> to vector<8x16xf32>
    %201 = vector.shape_cast %198 : vector<8x16xf32> to vector<1x8x1x16xf32>
    tpu.vector_store %arg4[%c0_233, %c0_234, %c1_235, %c16_236], %201 {strides = array<i32>} : memref<1x8x4x128xf32, #tpu.memory_space<vmem>>, vector<1x8x1x16xf32>,
    %c0_237 = arith.constant 0 : index
    %c2_238 = arith.constant 2 : index
    %c16_239 = arith.constant 16 : index
    %202 = vector.load %arg7[%c0_237, %c2_238, %c16_239] : memref<8x8x64xf32, #tpu.memory_space<vmem>>, vector<8x1x16xf32>
    %203 = vector.shape_cast %202 : vector<8x1x16xf32> to vector<8x16xf32>
    %c0_240 = arith.constant 0 : index
    %c0_241 = arith.constant 0 : index
    %c1_242 = arith.constant 1 : index
    %c32_243 = arith.constant 32 : index
    %204 = vector.load %arg4[%c0_240, %c0_241, %c1_242, %c32_243] : memref<1x8x4x128xf32, #tpu.memory_space<vmem>>, vector<1x8x1x16xf32>
    %205 = vector.shape_cast %204 : vector<1x8x1x16xf32> to vector<8x16xf32>
    %206 = vector.shape_cast %203 : vector<8x16xf32> to vector<1x8x1x16xf32>
    tpu.vector_store %arg4[%c0_240, %c0_241, %c1_242, %c32_243], %206 {strides = array<i32>} : memref<1x8x4x128xf32, #tpu.memory_space<vmem>>, vector<1x8x1x16xf32>,
    %c0_244 = arith.constant 0 : index
    %c3_245 = arith.constant 3 : index
    %c16_246 = arith.constant 16 : index
    %207 = vector.load %arg7[%c0_244, %c3_245, %c16_246] : memref<8x8x64xf32, #tpu.memory_space<vmem>>, vector<8x1x16xf32>
    %208 = vector.shape_cast %207 : vector<8x1x16xf32> to vector<8x16xf32>
    %c0_247 = arith.constant 0 : index
    %c0_248 = arith.constant 0 : index
    %c1_249 = arith.constant 1 : index
    %c48_250 = arith.constant 48 : index
    %209 = vector.load %arg4[%c0_247, %c0_248, %c1_249, %c48_250] : memref<1x8x4x128xf32, #tpu.memory_space<vmem>>, vector<1x8x1x16xf32>
    %210 = vector.shape_cast %209 : vector<1x8x1x16xf32> to vector<8x16xf32>
    %211 = vector.shape_cast %208 : vector<8x16xf32> to vector<1x8x1x16xf32>
    tpu.vector_store %arg4[%c0_247, %c0_248, %c1_249, %c48_250], %211 {strides = array<i32>} : memref<1x8x4x128xf32, #tpu.memory_space<vmem>>, vector<1x8x1x16xf32>,
    %c0_251 = arith.constant 0 : index
    %c4_252 = arith.constant 4 : index
    %c16_253 = arith.constant 16 : index
    %212 = vector.load %arg7[%c0_251, %c4_252, %c16_253] : memref<8x8x64xf32, #tpu.memory_space<vmem>>, vector<8x1x16xf32>
    %213 = vector.shape_cast %212 : vector<8x1x16xf32> to vector<8x16xf32>
    %c0_254 = arith.constant 0 : index
    %c0_255 = arith.constant 0 : index
    %c1_256 = arith.constant 1 : index
    %c64_257 = arith.constant 64 : index
    %214 = vector.load %arg4[%c0_254, %c0_255, %c1_256, %c64_257] : memref<1x8x4x128xf32, #tpu.memory_space<vmem>>, vector<1x8x1x16xf32>
    %215 = vector.shape_cast %214 : vector<1x8x1x16xf32> to vector<8x16xf32>
    %216 = vector.shape_cast %213 : vector<8x16xf32> to vector<1x8x1x16xf32>
    tpu.vector_store %arg4[%c0_254, %c0_255, %c1_256, %c64_257], %216 {strides = array<i32>} : memref<1x8x4x128xf32, #tpu.memory_space<vmem>>, vector<1x8x1x16xf32>,
    %c0_258 = arith.constant 0 : index
    %c5_259 = arith.constant 5 : index
    %c16_260 = arith.constant 16 : index
    %217 = vector.load %arg7[%c0_258, %c5_259, %c16_260] : memref<8x8x64xf32, #tpu.memory_space<vmem>>, vector<8x1x16xf32>
    %218 = vector.shape_cast %217 : vector<8x1x16xf32> to vector<8x16xf32>
    %c0_261 = arith.constant 0 : index
    %c0_262 = arith.constant 0 : index
    %c1_263 = arith.constant 1 : index
    %c80_264 = arith.constant 80 : index
    %219 = vector.load %arg4[%c0_261, %c0_262, %c1_263, %c80_264] : memref<1x8x4x128xf32, #tpu.memory_space<vmem>>, vector<1x8x1x16xf32>
    %220 = vector.shape_cast %219 : vector<1x8x1x16xf32> to vector<8x16xf32>
    %221 = vector.shape_cast %218 : vector<8x16xf32> to vector<1x8x1x16xf32>
    tpu.vector_store %arg4[%c0_261, %c0_262, %c1_263, %c80_264], %221 {strides = array<i32>} : memref<1x8x4x128xf32, #tpu.memory_space<vmem>>, vector<1x8x1x16xf32>,
    %c0_265 = arith.constant 0 : index
    %c6_266 = arith.constant 6 : index
    %c16_267 = arith.constant 16 : index
    %222 = vector.load %arg7[%c0_265, %c6_266, %c16_267] : memref<8x8x64xf32, #tpu.memory_space<vmem>>, vector<8x1x16xf32>
    %223 = vector.shape_cast %222 : vector<8x1x16xf32> to vector<8x16xf32>
    %c0_268 = arith.constant 0 : index
    %c0_269 = arith.constant 0 : index
    %c1_270 = arith.constant 1 : index
    %c96_271 = arith.constant 96 : index
    %224 = vector.load %arg4[%c0_268, %c0_269, %c1_270, %c96_271] : memref<1x8x4x128xf32, #tpu.memory_space<vmem>>, vector<1x8x1x16xf32>
    %225 = vector.shape_cast %224 : vector<1x8x1x16xf32> to vector<8x16xf32>
    %226 = vector.shape_cast %223 : vector<8x16xf32> to vector<1x8x1x16xf32>
    tpu.vector_store %arg4[%c0_268, %c0_269, %c1_270, %c96_271], %226 {strides = array<i32>} : memref<1x8x4x128xf32, #tpu.memory_space<vmem>>, vector<1x8x1x16xf32>,
    %c0_272 = arith.constant 0 : index
    %c7_273 = arith.constant 7 : index
    %c16_274 = arith.constant 16 : index
    %227 = vector.load %arg7[%c0_272, %c7_273, %c16_274] : memref<8x8x64xf32, #tpu.memory_space<vmem>>, vector<8x1x16xf32>
    %228 = vector.shape_cast %227 : vector<8x1x16xf32> to vector<8x16xf32>
    %c0_275 = arith.constant 0 : index
    %c0_276 = arith.constant 0 : index
    %c1_277 = arith.constant 1 : index
    %c112_278 = arith.constant 112 : index
    %229 = vector.load %arg4[%c0_275, %c0_276, %c1_277, %c112_278] : memref<1x8x4x128xf32, #tpu.memory_space<vmem>>, vector<1x8x1x16xf32>
    %230 = vector.shape_cast %229 : vector<1x8x1x16xf32> to vector<8x16xf32>
    %231 = vector.shape_cast %228 : vector<8x16xf32> to vector<1x8x1x16xf32>
    tpu.vector_store %arg4[%c0_275, %c0_276, %c1_277, %c112_278], %231 {strides = array<i32>} : memref<1x8x4x128xf32, #tpu.memory_space<vmem>>, vector<1x8x1x16xf32>,
    %c0_279 = arith.constant 0 : index
    %c0_280 = arith.constant 0 : index
    %c32_281 = arith.constant 32 : index
    %232 = vector.load %arg7[%c0_279, %c0_280, %c32_281] : memref<8x8x64xf32, #tpu.memory_space<vmem>>, vector<8x1x16xf32>
    %233 = vector.shape_cast %232 : vector<8x1x16xf32> to vector<8x16xf32>
    %c0_282 = arith.constant 0 : index
    %c0_283 = arith.constant 0 : index
    %c2_284 = arith.constant 2 : index
    %c0_285 = arith.constant 0 : index
    %234 = vector.load %arg4[%c0_282, %c0_283, %c2_284, %c0_285] : memref<1x8x4x128xf32, #tpu.memory_space<vmem>>, vector<1x8x1x16xf32>
    %235 = vector.shape_cast %234 : vector<1x8x1x16xf32> to vector<8x16xf32>
    %236 = vector.shape_cast %233 : vector<8x16xf32> to vector<1x8x1x16xf32>
    tpu.vector_store %arg4[%c0_282, %c0_283, %c2_284, %c0_285], %236 {strides = array<i32>} : memref<1x8x4x128xf32, #tpu.memory_space<vmem>>, vector<1x8x1x16xf32>,
    %c0_286 = arith.constant 0 : index
    %c1_287 = arith.constant 1 : index
    %c32_288 = arith.constant 32 : index
    %237 = vector.load %arg7[%c0_286, %c1_287, %c32_288] : memref<8x8x64xf32, #tpu.memory_space<vmem>>, vector<8x1x16xf32>
    %238 = vector.shape_cast %237 : vector<8x1x16xf32> to vector<8x16xf32>
    %c0_289 = arith.constant 0 : index
    %c0_290 = arith.constant 0 : index
    %c2_291 = arith.constant 2 : index
    %c16_292 = arith.constant 16 : index
    %239 = vector.load %arg4[%c0_289, %c0_290, %c2_291, %c16_292] : memref<1x8x4x128xf32, #tpu.memory_space<vmem>>, vector<1x8x1x16xf32>
    %240 = vector.shape_cast %239 : vector<1x8x1x16xf32> to vector<8x16xf32>
    %241 = vector.shape_cast %238 : vector<8x16xf32> to vector<1x8x1x16xf32>
    tpu.vector_store %arg4[%c0_289, %c0_290, %c2_291, %c16_292], %241 {strides = array<i32>} : memref<1x8x4x128xf32, #tpu.memory_space<vmem>>, vector<1x8x1x16xf32>,
    %c0_293 = arith.constant 0 : index
    %c2_294 = arith.constant 2 : index
    %c32_295 = arith.constant 32 : index
    %242 = vector.load %arg7[%c0_293, %c2_294, %c32_295] : memref<8x8x64xf32, #tpu.memory_space<vmem>>, vector<8x1x16xf32>
    %243 = vector.shape_cast %242 : vector<8x1x16xf32> to vector<8x16xf32>
    %c0_296 = arith.constant 0 : index
    %c0_297 = arith.constant 0 : index
    %c2_298 = arith.constant 2 : index
    %c32_299 = arith.constant 32 : index
    %244 = vector.load %arg4[%c0_296, %c0_297, %c2_298, %c32_299] : memref<1x8x4x128xf32, #tpu.memory_space<vmem>>, vector<1x8x1x16xf32>
    %245 = vector.shape_cast %244 : vector<1x8x1x16xf32> to vector<8x16xf32>
    %246 = vector.shape_cast %243 : vector<8x16xf32> to vector<1x8x1x16xf32>
    tpu.vector_store %arg4[%c0_296, %c0_297, %c2_298, %c32_299], %246 {strides = array<i32>} : memref<1x8x4x128xf32, #tpu.memory_space<vmem>>, vector<1x8x1x16xf32>,
    %c0_300 = arith.constant 0 : index
    %c3_301 = arith.constant 3 : index
    %c32_302 = arith.constant 32 : index
    %247 = vector.load %arg7[%c0_300, %c3_301, %c32_302] : memref<8x8x64xf32, #tpu.memory_space<vmem>>, vector<8x1x16xf32>
    %248 = vector.shape_cast %247 : vector<8x1x16xf32> to vector<8x16xf32>
    %c0_303 = arith.constant 0 : index
    %c0_304 = arith.constant 0 : index
    %c2_305 = arith.constant 2 : index
    %c48_306 = arith.constant 48 : index
    %249 = vector.load %arg4[%c0_303, %c0_304, %c2_305, %c48_306] : memref<1x8x4x128xf32, #tpu.memory_space<vmem>>, vector<1x8x1x16xf32>
    %250 = vector.shape_cast %249 : vector<1x8x1x16xf32> to vector<8x16xf32>
    %251 = vector.shape_cast %248 : vector<8x16xf32> to vector<1x8x1x16xf32>
    tpu.vector_store %arg4[%c0_303, %c0_304, %c2_305, %c48_306], %251 {strides = array<i32>} : memref<1x8x4x128xf32, #tpu.memory_space<vmem>>, vector<1x8x1x16xf32>,
    %c0_307 = arith.constant 0 : index
    %c4_308 = arith.constant 4 : index
    %c32_309 = arith.constant 32 : index
    %252 = vector.load %arg7[%c0_307, %c4_308, %c32_309] : memref<8x8x64xf32, #tpu.memory_space<vmem>>, vector<8x1x16xf32>
    %253 = vector.shape_cast %252 : vector<8x1x16xf32> to vector<8x16xf32>
    %c0_310 = arith.constant 0 : index
    %c0_311 = arith.constant 0 : index
    %c2_312 = arith.constant 2 : index
    %c64_313 = arith.constant 64 : index
    %254 = vector.load %arg4[%c0_310, %c0_311, %c2_312, %c64_313] : memref<1x8x4x128xf32, #tpu.memory_space<vmem>>, vector<1x8x1x16xf32>
    %255 = vector.shape_cast %254 : vector<1x8x1x16xf32> to vector<8x16xf32>
    %256 = vector.shape_cast %253 : vector<8x16xf32> to vector<1x8x1x16xf32>
    tpu.vector_store %arg4[%c0_310, %c0_311, %c2_312, %c64_313], %256 {strides = array<i32>} : memref<1x8x4x128xf32, #tpu.memory_space<vmem>>, vector<1x8x1x16xf32>,
    %c0_314 = arith.constant 0 : index
    %c5_315 = arith.constant 5 : index
    %c32_316 = arith.constant 32 : index
    %257 = vector.load %arg7[%c0_314, %c5_315, %c32_316] : memref<8x8x64xf32, #tpu.memory_space<vmem>>, vector<8x1x16xf32>
    %258 = vector.shape_cast %257 : vector<8x1x16xf32> to vector<8x16xf32>
    %c0_317 = arith.constant 0 : index
    %c0_318 = arith.constant 0 : index
    %c2_319 = arith.constant 2 : index
    %c80_320 = arith.constant 80 : index
    %259 = vector.load %arg4[%c0_317, %c0_318, %c2_319, %c80_320] : memref<1x8x4x128xf32, #tpu.memory_space<vmem>>, vector<1x8x1x16xf32>
    %260 = vector.shape_cast %259 : vector<1x8x1x16xf32> to vector<8x16xf32>
    %261 = vector.shape_cast %258 : vector<8x16xf32> to vector<1x8x1x16xf32>
    tpu.vector_store %arg4[%c0_317, %c0_318, %c2_319, %c80_320], %261 {strides = array<i32>} : memref<1x8x4x128xf32, #tpu.memory_space<vmem>>, vector<1x8x1x16xf32>,
    %c0_321 = arith.constant 0 : index
    %c6_322 = arith.constant 6 : index
    %c32_323 = arith.constant 32 : index
    %262 = vector.load %arg7[%c0_321, %c6_322, %c32_323] : memref<8x8x64xf32, #tpu.memory_space<vmem>>, vector<8x1x16xf32>
    %263 = vector.shape_cast %262 : vector<8x1x16xf32> to vector<8x16xf32>
    %c0_324 = arith.constant 0 : index
    %c0_325 = arith.constant 0 : index
    %c2_326 = arith.constant 2 : index
    %c96_327 = arith.constant 96 : index
    %264 = vector.load %arg4[%c0_324, %c0_325, %c2_326, %c96_327] : memref<1x8x4x128xf32, #tpu.memory_space<vmem>>, vector<1x8x1x16xf32>
    %265 = vector.shape_cast %264 : vector<1x8x1x16xf32> to vector<8x16xf32>
    %266 = vector.shape_cast %263 : vector<8x16xf32> to vector<1x8x1x16xf32>
    tpu.vector_store %arg4[%c0_324, %c0_325, %c2_326, %c96_327], %266 {strides = array<i32>} : memref<1x8x4x128xf32, #tpu.memory_space<vmem>>, vector<1x8x1x16xf32>,
    %c0_328 = arith.constant 0 : index
    %c7_329 = arith.constant 7 : index
    %c32_330 = arith.constant 32 : index
    %267 = vector.load %arg7[%c0_328, %c7_329, %c32_330] : memref<8x8x64xf32, #tpu.memory_space<vmem>>, vector<8x1x16xf32>
    %268 = vector.shape_cast %267 : vector<8x1x16xf32> to vector<8x16xf32>
    %c0_331 = arith.constant 0 : index
    %c0_332 = arith.constant 0 : index
    %c2_333 = arith.constant 2 : index
    %c112_334 = arith.constant 112 : index
    %269 = vector.load %arg4[%c0_331, %c0_332, %c2_333, %c112_334] : memref<1x8x4x128xf32, #tpu.memory_space<vmem>>, vector<1x8x1x16xf32>
    %270 = vector.shape_cast %269 : vector<1x8x1x16xf32> to vector<8x16xf32>
    %271 = vector.shape_cast %268 : vector<8x16xf32> to vector<1x8x1x16xf32>
    tpu.vector_store %arg4[%c0_331, %c0_332, %c2_333, %c112_334], %271 {strides = array<i32>} : memref<1x8x4x128xf32, #tpu.memory_space<vmem>>, vector<1x8x1x16xf32>,
    %c0_335 = arith.constant 0 : index
    %c0_336 = arith.constant 0 : index
    %c48_337 = arith.constant 48 : index
    %272 = vector.load %arg7[%c0_335, %c0_336, %c48_337] : memref<8x8x64xf32, #tpu.memory_space<vmem>>, vector<8x1x16xf32>
    %273 = vector.shape_cast %272 : vector<8x1x16xf32> to vector<8x16xf32>
    %c0_338 = arith.constant 0 : index
    %c0_339 = arith.constant 0 : index
    %c3_340 = arith.constant 3 : index
    %c0_341 = arith.constant 0 : index
    %274 = vector.load %arg4[%c0_338, %c0_339, %c3_340, %c0_341] : memref<1x8x4x128xf32, #tpu.memory_space<vmem>>, vector<1x8x1x16xf32>
    %275 = vector.shape_cast %274 : vector<1x8x1x16xf32> to vector<8x16xf32>
    %276 = vector.shape_cast %273 : vector<8x16xf32> to vector<1x8x1x16xf32>
    tpu.vector_store %arg4[%c0_338, %c0_339, %c3_340, %c0_341], %276 {strides = array<i32>} : memref<1x8x4x128xf32, #tpu.memory_space<vmem>>, vector<1x8x1x16xf32>,
    %c0_342 = arith.constant 0 : index
    %c1_343 = arith.constant 1 : index
    %c48_344 = arith.constant 48 : index
    %277 = vector.load %arg7[%c0_342, %c1_343, %c48_344] : memref<8x8x64xf32, #tpu.memory_space<vmem>>, vector<8x1x16xf32>
    %278 = vector.shape_cast %277 : vector<8x1x16xf32> to vector<8x16xf32>
    %c0_345 = arith.constant 0 : index
    %c0_346 = arith.constant 0 : index
    %c3_347 = arith.constant 3 : index
    %c16_348 = arith.constant 16 : index
    %279 = vector.load %arg4[%c0_345, %c0_346, %c3_347, %c16_348] : memref<1x8x4x128xf32, #tpu.memory_space<vmem>>, vector<1x8x1x16xf32>
    %280 = vector.shape_cast %279 : vector<1x8x1x16xf32> to vector<8x16xf32>
    %281 = vector.shape_cast %278 : vector<8x16xf32> to vector<1x8x1x16xf32>
    tpu.vector_store %arg4[%c0_345, %c0_346, %c3_347, %c16_348], %281 {strides = array<i32>} : memref<1x8x4x128xf32, #tpu.memory_space<vmem>>, vector<1x8x1x16xf32>,
    %c0_349 = arith.constant 0 : index
    %c2_350 = arith.constant 2 : index
    %c48_351 = arith.constant 48 : index
    %282 = vector.load %arg7[%c0_349, %c2_350, %c48_351] : memref<8x8x64xf32, #tpu.memory_space<vmem>>, vector<8x1x16xf32>
    %283 = vector.shape_cast %282 : vector<8x1x16xf32> to vector<8x16xf32>
    %c0_352 = arith.constant 0 : index
    %c0_353 = arith.constant 0 : index
    %c3_354 = arith.constant 3 : index
    %c32_355 = arith.constant 32 : index
    %284 = vector.load %arg4[%c0_352, %c0_353, %c3_354, %c32_355] : memref<1x8x4x128xf32, #tpu.memory_space<vmem>>, vector<1x8x1x16xf32>
    %285 = vector.shape_cast %284 : vector<1x8x1x16xf32> to vector<8x16xf32>
    %286 = vector.shape_cast %283 : vector<8x16xf32> to vector<1x8x1x16xf32>
    tpu.vector_store %arg4[%c0_352, %c0_353, %c3_354, %c32_355], %286 {strides = array<i32>} : memref<1x8x4x128xf32, #tpu.memory_space<vmem>>, vector<1x8x1x16xf32>,
    %c0_356 = arith.constant 0 : index
    %c3_357 = arith.constant 3 : index
    %c48_358 = arith.constant 48 : index
    %287 = vector.load %arg7[%c0_356, %c3_357, %c48_358] : memref<8x8x64xf32, #tpu.memory_space<vmem>>, vector<8x1x16xf32>
    %288 = vector.shape_cast %287 : vector<8x1x16xf32> to vector<8x16xf32>
    %c0_359 = arith.constant 0 : index
    %c0_360 = arith.constant 0 : index
    %c3_361 = arith.constant 3 : index
    %c48_362 = arith.constant 48 : index
    %289 = vector.load %arg4[%c0_359, %c0_360, %c3_361, %c48_362] : memref<1x8x4x128xf32, #tpu.memory_space<vmem>>, vector<1x8x1x16xf32>
    %290 = vector.shape_cast %289 : vector<1x8x1x16xf32> to vector<8x16xf32>
    %291 = vector.shape_cast %288 : vector<8x16xf32> to vector<1x8x1x16xf32>
    tpu.vector_store %arg4[%c0_359, %c0_360, %c3_361, %c48_362], %291 {strides = array<i32>} : memref<1x8x4x128xf32, #tpu.memory_space<vmem>>, vector<1x8x1x16xf32>,
    %c0_363 = arith.constant 0 : index
    %c4_364 = arith.constant 4 : index
    %c48_365 = arith.constant 48 : index
    %292 = vector.load %arg7[%c0_363, %c4_364, %c48_365] : memref<8x8x64xf32, #tpu.memory_space<vmem>>, vector<8x1x16xf32>
    %293 = vector.shape_cast %292 : vector<8x1x16xf32> to vector<8x16xf32>
    %c0_366 = arith.constant 0 : index
    %c0_367 = arith.constant 0 : index
    %c3_368 = arith.constant 3 : index
    %c64_369 = arith.constant 64 : index
    %294 = vector.load %arg4[%c0_366, %c0_367, %c3_368, %c64_369] : memref<1x8x4x128xf32, #tpu.memory_space<vmem>>, vector<1x8x1x16xf32>
    %295 = vector.shape_cast %294 : vector<1x8x1x16xf32> to vector<8x16xf32>
    %296 = vector.shape_cast %293 : vector<8x16xf32> to vector<1x8x1x16xf32>
    tpu.vector_store %arg4[%c0_366, %c0_367, %c3_368, %c64_369], %296 {strides = array<i32>} : memref<1x8x4x128xf32, #tpu.memory_space<vmem>>, vector<1x8x1x16xf32>,
    %c0_370 = arith.constant 0 : index
    %c5_371 = arith.constant 5 : index
    %c48_372 = arith.constant 48 : index
    %297 = vector.load %arg7[%c0_370, %c5_371, %c48_372] : memref<8x8x64xf32, #tpu.memory_space<vmem>>, vector<8x1x16xf32>
    %298 = vector.shape_cast %297 : vector<8x1x16xf32> to vector<8x16xf32>
    %c0_373 = arith.constant 0 : index
    %c0_374 = arith.constant 0 : index
    %c3_375 = arith.constant 3 : index
    %c80_376 = arith.constant 80 : index
    %299 = vector.load %arg4[%c0_373, %c0_374, %c3_375, %c80_376] : memref<1x8x4x128xf32, #tpu.memory_space<vmem>>, vector<1x8x1x16xf32>
    %300 = vector.shape_cast %299 : vector<1x8x1x16xf32> to vector<8x16xf32>
    %301 = vector.shape_cast %298 : vector<8x16xf32> to vector<1x8x1x16xf32>
    tpu.vector_store %arg4[%c0_373, %c0_374, %c3_375, %c80_376], %301 {strides = array<i32>} : memref<1x8x4x128xf32, #tpu.memory_space<vmem>>, vector<1x8x1x16xf32>,
    %c0_377 = arith.constant 0 : index
    %c6_378 = arith.constant 6 : index
    %c48_379 = arith.constant 48 : index
    %302 = vector.load %arg7[%c0_377, %c6_378, %c48_379] : memref<8x8x64xf32, #tpu.memory_space<vmem>>, vector<8x1x16xf32>
    %303 = vector.shape_cast %302 : vector<8x1x16xf32> to vector<8x16xf32>
    %c0_380 = arith.constant 0 : index
    %c0_381 = arith.constant 0 : index
    %c3_382 = arith.constant 3 : index
    %c96_383 = arith.constant 96 : index
    %304 = vector.load %arg4[%c0_380, %c0_381, %c3_382, %c96_383] : memref<1x8x4x128xf32, #tpu.memory_space<vmem>>, vector<1x8x1x16xf32>
    %305 = vector.shape_cast %304 : vector<1x8x1x16xf32> to vector<8x16xf32>
    %306 = vector.shape_cast %303 : vector<8x16xf32> to vector<1x8x1x16xf32>
    tpu.vector_store %arg4[%c0_380, %c0_381, %c3_382, %c96_383], %306 {strides = array<i32>} : memref<1x8x4x128xf32, #tpu.memory_space<vmem>>, vector<1x8x1x16xf32>,
    %c0_384 = arith.constant 0 : index
    %c7_385 = arith.constant 7 : index
    %c48_386 = arith.constant 48 : index
    %307 = vector.load %arg7[%c0_384, %c7_385, %c48_386] : memref<8x8x64xf32, #tpu.memory_space<vmem>>, vector<8x1x16xf32>
    %308 = vector.shape_cast %307 : vector<8x1x16xf32> to vector<8x16xf32>
    %c0_387 = arith.constant 0 : index
    %c0_388 = arith.constant 0 : index
    %c3_389 = arith.constant 3 : index
    %c112_390 = arith.constant 112 : index
    %309 = vector.load %arg4[%c0_387, %c0_388, %c3_389, %c112_390] : memref<1x8x4x128xf32, #tpu.memory_space<vmem>>, vector<1x8x1x16xf32>
    %310 = vector.shape_cast %309 : vector<1x8x1x16xf32> to vector<8x16xf32>
    %311 = vector.shape_cast %308 : vector<8x16xf32> to vector<1x8x1x16xf32>
    tpu.vector_store %arg4[%c0_387, %c0_388, %c3_389, %c112_390], %311 {strides = array<i32>} : memref<1x8x4x128xf32, #tpu.memory_space<vmem>>, vector<1x8x1x16xf32>,
    return
  }
  func.func @transform_0(%arg0: i32) -> (i32, i32, i32) {
    %c0_i32 = arith.constant 0 : i32
    %c0_i32_0 = arith.constant 0 : i32
    %c0_i32_1 = arith.constant 0 : i32
    return %arg0, %c0_i32, %c0_i32_0 : i32, i32, i32
  }
  func.func @transform_1(%arg0: i32) -> (i32, i32) {
    %c0_i32 = arith.constant 0 : i32
    %c0_i32_0 = arith.constant 0 : i32
    %c0_i32_1 = arith.constant 0 : i32
    return %c0_i32, %c0_i32_0 : i32, i32
  }
  func.func @transform_2(%arg0: i32) -> (i32, i32) {
    %c0_i32 = arith.constant 0 : i32
    %c0_i32_0 = arith.constant 0 : i32
    %c0_i32_1 = arith.constant 0 : i32
    return %c0_i32, %c0_i32_0 : i32, i32
  }
  func.func @transform_3(%arg0: i32) -> (i32, i32, i32, i32) {
    %c0_i32 = arith.constant 0 : i32
    %c0_i32_0 = arith.constant 0 : i32
    %c0_i32_1 = arith.constant 0 : i32
    %c0_i32_2 = arith.constant 0 : i32
    return %arg0, %c0_i32, %c0_i32_0, %c0_i32_1 : i32, i32, i32, i32
  }
}

</mosaic_0001>

<bundles_post_ra>
// kernel: mha_forward.1
= control target key start
LH: loop header
LB: loop body
LE: loop exit
PB: predicated region body
PF: predicated region fallthrough
CT: control target
= control target key end

     0   :  { %s13952_s12 = smov 0   ;;  %s17785_s0 = inlined_call_operand.vmem [shape: bf16[2,32,128], index: 0, kind: input, shape index: {}]   ;;  %s17786_s1 = inlined_call_operand.vmem [shape: bf16[96,32], index: 1, kind: input, shape index: {}]   ;;  %s17787_s2 = inlined_call_operand.vmem [shape: f32[96,1], index: 2, kind: input, shape index: {}]   ;;  %s17788_s3 = inlined_call_operand.vmem [shape: f32[2,8,4,128], index: 3, kind: output, shape index: {}]  }
   0x1 LB: > { %s13665_s13 = sadd.s32 4294967295, %s13919_s12   ;;  %p13669_p0 = scmp.ge.s32.totalorder %s13919_s12, 1  ;;  %s13919_s12 = sphi %s13952_s12, %s13_s12  }
   0x2   : > { %p137_p1 = scmp.lt.s32.totalorder %s13919_s12, 3 }
   0x4   : > { %p138_p2 = pnand %p13669_p0, %p137_p1 }
   0x6   : > { %141 = sbr.rel (%p138_p2) target bundleno = 2911 (0xb5f), region = 32 }
   0xd   : > { %p161_p3 = scmp.lt.s32.totalorder %s13665_s13, 1  ;;  %v13875_v0 = vld [vmem:[%s17786_s1] sm:$0xff]   ;;  %vm302_vm0 = vcmask 261120   ;;  %v13921_v1 = vmov 0   ;;  %v190_v4 = vld [vmem:[%s17787_s2 + $0x10] sm:$0xff]  ;;  %v191_v5 = vld [vmem:[%s17787_s2 + $0x18] sm:$0xff]  ;;  %v424_v23 = vlaneseq }
   0xe   : > { %13760 = vmatprep.mubr.msk.bf16.mxu0 %vm302_vm0, %v13875_v0  ;;  %13872 = vset.pattern.permute.xlu1 %v13921_v1  ;;  %v188_v6 = vld [vmem:[%s17787_s2] sm:$0xff]  ;;  %v13876_v7 = vld [vmem:[%s17786_s1 + $0x8] sm:$0xff]   ;;  %v13877_v9 = vld [vmem:[%s17786_s1 + $0x10] sm:$0xff]   ;;  %v13922_v21 = vmov 1966171168   ;;  %vm591_vm1 = vcmask 122880  }
   0xf   : > { %s17826_s13 = smov (!%p161_p3, %s13665_s13), 1  ;;  %13871 = vset.pattern.permute.xlu0 %v13921_v1  ;;  %212 = vperm.xlu1 %13872, %v190_v4   ;;  %v189_v8 = vld [vmem:[%s17787_s2 + $0x8] sm:$0xff]  ;;  %v192_v11 = vld [vmem:[%s17787_s2 + $0x20] sm:$0xff]  ;;  %v195_v12 = vld [vmem:[%s17787_s2 + $0x38] sm:$0xff]  ;;  %v422_v22 = vunpack.c.l.s4 %v13922_v21  ;;  %v425_v25 = vshrl.u32 %v424_v23, 7  ;;  %s13923_s29 = smov 112  }
  0x10   : > { %s13714_s16 = sshll.u32 %s17826_s13, 4  ;;  %202 = vperm.xlu0 %13871, %v188_v6   ;;  %v193_v10 = vld [vmem:[%s17787_s2 + $0x28] sm:$0xff]  ;;  %v13878_v13 = vld [vmem:[%s17786_s1 + $0x18] sm:$0xff]   ;;  %v194_v14 = vld [vmem:[%s17787_s2 + $0x30] sm:$0xff]  ;;  %s13924_s30 = smov 96   ;;  %vm3352_vm2 = vcmask 254080  }
  0x11   : > { %s165_s19 = scalar_lea.vmem %s17785_s0, %s13714_s16  ;;  %v13879_v15 = vld [vmem:[%s17786_s1 + $0x20] sm:$0xff]   ;;  %v197_v16 = vld [vmem:[%s17787_s2 + $0x48] sm:$0xff]  ;;  %v199_v18 = vld [vmem:[%s17787_s2 + $0x58] sm:$0xff]  ;;  %v423_v24 = vunpack.c.0.s8 %v422_v22  ;;  %v14031_v39 = vsub.s32 0, %v425_v25  ;;  %s13925_s4 = smov 80   ;;  %vm5969_vm3 = vcmask 385280  }
  0x12   : > { %v13873_v2 = vld [vmem:[%s165_s19] sm:$0xff]   ;;  %v13874_v3 = vld [vmem:[%s165_s19 + $0x8] sm:$0xff]   ;;  %v198_v20 = vld [vmem:[%s17787_s2 + $0x50] sm:$0xff]  ;;  %s13926_s5 = smov 64   ;;  %s13927_s6 = smov 48   ;;  %vm8586_vm4 = vcmask 516480  }
  0x13   : > { %13756 = vmatprep.subr.bf16.mxu0 %v13873_v2  ;;  %217 = vperm.xlu1 %13872, %v191_v5   ;;  %v196_v17 = vld [vmem:[%s17787_s2 + $0x40] sm:$0xff]  ;;  %v13880_v19 = vld [vmem:[%s17786_s1 + $0x28] sm:$0xff]   ;;  %v14026_v27 = vsub.s32 %v423_v24, %v425_v25  ;;  %s13928_s7 = smov 32   ;;  %s13929_s8 = smov 16   ;;  %vm13931_vm5 = vmmov 0   ;;  %vm10908_vm6 = vcmask 523264  }
  0x14   : > { %13757 = vmatpush3.bf16.msra.mxu0 %v13873_v2  ;;  %207 = vperm.xlu0 %13871, %v189_v8   ;;  %vm11517_vm7 = vcmask 64512   ;;  %s13715_s9 = sshll.u32 %s17826_s13, 5  ;;  %vm12398_vm8 = vcmask 647680   ;;  %vm12447_vm9 = vcmask 778880   ;;  %vm12496_vm10 = vcmask 910080  }
  0x15   : > { %13758 = vmatprep.subr.bf16.mxu0 %v13874_v3  ;;  %s17037_s14 = scalar_lea.vmem %s17788_s3, %s13715_s9  ;;  %vm12545_vm11 = vcmask 1041280  }
  0x17   : > { %227 = vperm.xlu1 %13872, %v193_v10  }
  0x18   : > { %13759 = vmatpush3.bf16.msra.mxu0 %v13874_v3  ;;  %222 = vperm.xlu0 %13871, %v192_v11  }
  0x1b   : > { %13761 = vmatmul.mubr.msk.bf16.vlgmr.msra.gmra.mrb[0].mxu0 %vm302_vm0, %v13876_v7  ;;  %237 = vperm.xlu1 %13872, %v195_v12  }
  0x1c   : > { %13764 = vmatprep.mubr.msk.bf16.mxu0 %vm302_vm0, %v13877_v9  ;;  %232 = vperm.xlu0 %13871, %v194_v14  }
  0x1f   : > { %247 = vperm.xlu1 %13872, %v197_v16  }
  0x20   : > { %242 = vperm.xlu0 %13871, %v196_v17  }
  0x23   : > { %13765 = vmatmul.mubr.msk.bf16.gmra.mrb[4].mxu0 %vm302_vm0, %v13878_v13  ;;  %257 = vperm.xlu1 %13872, %v199_v18  }
  0x24   : > { %13768 = vmatprep.mubr.msk.bf16.mxu0 %vm302_vm0, %v13879_v15  ;;  %252 = vperm.xlu0 %13871, %v198_v20  }
  0x2b   : > { %13769 = vmatmul.mubr.msk.bf16.gmra.mrb[8].mxu0 %vm302_vm0, %v13880_v19 }
  0x8e   : > { %v213_v26 = vpop.permute.xlu1 %212 }
  0x8f   : > { %v203_v28 = vpop.permute.xlu0 %202 }
  0x92   : > { %v218_v32 = vpop.permute.xlu1 %217 }
  0x93   : > { %v208_v45 = vpop.permute.xlu0 %207 }
  0x97   : > { %v223_v11 = vpop.permute.xlu0 %222 }
  0xee   : > { %v13762_v29 = vpop.f32.mrb[0].mxu0 }
  0xef   : > { %v364_v30 = vadd.f32 %v13762_v29, %v213_v26  ;;  %v355_v31 = vpop.f32.mrb[1].mxu0 }
  0xf0   : > { %v356_v33 = vadd.f32 %v355_v31, %v203_v28  ;;  %v13763_v34 = vpop.f32.mrb[2].mxu0 }
  0xf1   : > { %v518_v35 = vcombine.high %v364_v30, %v364_v30  ;;  %v525_v36 = vrot.slane %v364_v30, %v14026_v27  ;;  %v14029_v37 = vadd.f32 %v13763_v34, %v218_v32  ;;  %v358_v38 = vpop.f32.mrb[3].mxu0 }
  0xf2   : > { %v420_v40 = vcombine.high %v356_v33, %v356_v33  ;;  %v427_v41 = vrot.slane %v356_v33, %v14026_v27  ;;  %v359_v6 = vadd.f32 %v358_v38, %v208_v45  ;;  %v233_v33 = vpop.permute.xlu0 %232 }
  0xf3   : > { %v532_v42 = vrot.slane %v518_v35, %v14026_v27  ;;  %v533_v43 = vcombine.high %v525_v36, %v525_v36  ;;  %v541_v44 = vrot.slane %v525_v36, %v14026_v27  ;;  %v14042_v49 = vrot.slane %v14029_v37, %v14026_v27 }
  0xf4   : > { %v434_v46 = vrot.slane %v420_v40, %v14026_v27  ;;  %v435_v47 = vcombine.high %v427_v41, %v427_v41  ;;  %v14038_v48 = vrot.slane %v427_v41, %v14026_v27  ;;  %v3037_v5 = vcombine.high %v14029_v37, %v14029_v37  ;;  %v228_v41 = vpop.permute.xlu1 %227 }
  0xf5   : > { %v534_v50 = vcombine.high %v532_v42, %v532_v42  ;;  %v14045_v51 = vrot.slane %v532_v42, %v14026_v27  ;;  %v555_v52 = vrot.slane %v533_v43, %v14026_v27  ;;  %v14048_v53 = vcombine.high %v541_v44, %v541_v44  ;;  %608 = vst.msk [vmem:[#allocation3 + $0x80] sm:$0x1] %vm591_vm1, %v541_v44 }
  0xf6   : > { %v14052_v54 = vrot.slane %v541_v44, %v14031_v39  ;;  %v436_v55 = vcombine.high %v434_v46, %v434_v46  ;;  %v450_v56 = vrot.slane %v434_v46, %v14026_v27  ;;  %v14056_v57 = vrot.slane %v435_v47, %v14026_v27  ;;  %v14058_v58 = vpop.f32.mrb[4].mxu0  ;;  %592 = vst.msk [vmem:[#allocation3] sm:$0x1] %vm591_vm1, %v14038_v48 }
  0xf7   : > { %v14063_v59 = vrot.slane %v534_v50, %v14026_v27  ;;  %v564_v60 = vcombine.high %v14045_v51, %v14045_v51  ;;  %v14067_v61 = vcombine.high %v555_v52, %v555_v52  ;;  %v14070_v62 = vrot.slane %v555_v52, %v14031_v39  ;;  %v14072_v63 = vpop.f32.mrb[5].mxu0  ;;  %609 = vst.msk [vmem:[#allocation3 + $0x88] sm:$0x1] %vm591_vm1, %v555_v52 }
  0xf8   : > { %610 = vst.msk [vmem:[#allocation3 + $0x90] sm:$0x1] %vm591_vm1, %v14048_v53  ;;  %612 = vst.msk [vmem:[#allocation3 + $0xa0] sm:$0x1] %vm591_vm1, %v14045_v51  ;;  %v464_v0 = vrot.slane %v436_v55, %v14026_v27  ;;  %v465_v1 = vcombine.high %v14038_v48, %v14038_v48  ;;  %897 = vrot.lane.b32.xlu0 %v14052_v54, %s13923_s29  ;;  %v14084_v2 = vpop.f32.mrb[6].mxu0  ;;  %v466_v8 = vcombine.high %v450_v56, %v450_v56 }
  0xf9   : > { %593 = vst.msk [vmem:[#allocation3 + $0x8] sm:$0x1] %vm591_vm1, %v14056_v57  ;;  %596 = vst.msk [vmem:[#allocation3 + $0x20] sm:$0x1] %vm591_vm1, %v450_v56  ;;  %v566_v3 = vcombine.high %v14063_v59, %v14063_v59  ;;  %v14092_v4 = vrot.slane %v564_v60, %v14031_v39  ;;  %899 = vrot.lane.b32.xlu1 %v14070_v62, %s13923_s29  ;;  %v14098_v7 = vpop.f32.mrb[7].mxu0  ;;  %v467_v9 = vcombine.high %v14056_v57, %v14056_v57 }
  0xfa   : > { %611 = vst.msk [vmem:[#allocation3 + $0x98] sm:$0x1] %vm591_vm1, %v14067_v61  ;;  %613 = vst.msk [vmem:[#allocation3 + $0xa8] sm:$0x1] %vm591_vm1, %v14063_v59  ;;  %v468_v10 = vcombine.high %v464_v0, %v464_v0  ;;  %v14113_v13 = vrot.slane %v465_v1, %v14031_v39  ;;  %v14116_v14 = vrot.slane %v450_v56, %v14031_v39 }
  0xfb   : > { %614 = vst.msk [vmem:[#allocation3 + $0xb0] sm:$0x1] %vm591_vm1, %v564_v60  ;;  %594 = vst.msk [vmem:[#allocation3 + $0x10] sm:$0x1] %vm591_vm1, %v465_v1  ;;  %v14110_v12 = vrot.slane %v566_v3, %v14031_v39  ;;  %v14120_v15 = vrot.slane %v467_v9, %v14031_v39  ;;  %v14123_v16 = vrot.slane %v464_v0, %v14031_v39 }
  0xfc   : > { %597 = vst.msk [vmem:[#allocation3 + $0x28] sm:$0x1] %vm591_vm1, %v464_v0  ;;  %615 = vst.msk [vmem:[#allocation3 + $0xb8] sm:$0x1] %vm591_vm1, %v566_v3  ;;  %v14126_v17 = vrot.slane %v466_v8, %v14031_v39  ;;  %v14129_v18 = vrot.slane %v468_v10, %v14031_v39  ;;  %1242 = vrot.lane.b32.xlu0 %v14052_v54, %s13924_s30  ;;  %v3051_v19 = vrot.slane %v3037_v5, %v14026_v27 }
  0xfd   : > { %595 = vst.msk [vmem:[#allocation3 + $0x18] sm:$0x1] %vm591_vm1, %v467_v9  ;;  %598 = vst.msk [vmem:[#allocation3 + $0x30] sm:$0x1] %vm591_vm1, %v466_v8  ;;  %v3052_v20 = vcombine.high %v14042_v49, %v14042_v49  ;;  %v14141_v21 = vrot.slane %v14042_v49, %v14026_v27  ;;  %v469_v22 = vcombine.high %v359_v6, %v359_v6  ;;  %1244 = vrot.lane.b32.xlu1 %v14070_v62, %s13924_s30  ;;  %v238_v9 = vpop.permute.xlu1 %237 }
  0xfe   : > { %599 = vst.msk [vmem:[#allocation3 + $0x38] sm:$0x1] %vm591_vm1, %v468_v10  ;;  %v476_v23 = vrot.slane %v359_v6, %v14026_v27  ;;  %v14146_v24 = vpop.f32.mrb[8].mxu0  ;;  %v3053_v25 = vcombine.high %v3051_v19, %v3051_v19  ;;  %v14149_v26 = vrot.slane %v3051_v19, %v14026_v27  ;;  %v380_v36 = vadd.f32 %v14058_v58, %v233_v33 }
  0xff   : > { %v14152_v28 = vrot.slane %v3052_v20, %v14026_v27  ;;  %v14154_v29 = vpop.f32.mrb[9].mxu0  ;;  %v483_v30 = vrot.slane %v469_v22, %v14026_v27  ;;  %v14174_v42 = vrot.slane %v14038_v48, %v14031_v39  ;;  %v372_v43 = vadd.f32 %v14072_v63, %v223_v11 }
 0x100   : > { %v484_v31 = vcombine.high %v476_v23, %v476_v23  ;;  %v492_v32 = vrot.slane %v476_v23, %v14026_v27  ;;  %1587 = vrot.lane.b32.xlu0 %v14052_v54, %s13925_s4  ;;  %v14160_v34 = vpop.f32.mrb[10].mxu0  ;;  %v14163_v35 = vrot.slane %v3053_v25, %v14026_v27  ;;  %v14184_v49 = vrot.slane %v14056_v57, %v14031_v39 }
 0x101   : > { %1589 = vrot.lane.b32.xlu1 %v14070_v62, %s13925_s4  ;;  %v14168_v37 = vpop.f32.mrb[11].mxu0  ;;  %v485_v38 = vcombine.high %v483_v30, %v483_v30  ;;  %v499_v40 = vrot.slane %v483_v30, %v14026_v27  ;;  %v5654_v52 = vcombine.high %v380_v36, %v380_v36  ;;  %v5661_v0 = vrot.slane %v380_v36, %v14026_v27 }
 0x102   : > { %600 = vst.msk [vmem:[#allocation3 + $0x40] sm:$0x1] %vm591_vm1, %v492_v32  ;;  %v506_v44 = vrot.slane %v484_v31, %v14026_v27  ;;  %v514_v46 = vcombine.high %v492_v32, %v492_v32  ;;  %v14187_v48 = vrot.slane %v492_v32, %v14031_v39  ;;  %v3086_v6 = vcombine.high %v372_v43, %v372_v43  ;;  %v243_v31 = vpop.permute.xlu0 %242 }
 0x103   : > { %v513_v45 = vrot.slane %v485_v38, %v14026_v27  ;;  %v515_v47 = vcombine.high %v499_v40, %v499_v40  ;;  %604 = vst.msk [vmem:[#allocation3 + $0x60] sm:$0x1] %vm591_vm1, %v499_v40  ;;  %v14190_v50 = vrot.slane %v499_v40, %v14031_v39  ;;  %v5668_v1 = vrot.slane %v5654_v52, %v14026_v27 }
 0x104   : > { %1932 = vrot.lane.b32.xlu0 %v14052_v54, %s13926_s5  ;;  %v516_v55 = vcombine.high %v506_v44, %v506_v44  ;;  %v14195_v58 = vrot.slane %v506_v44, %v14031_v39  ;;  %v14198_v60 = vrot.slane %v514_v46, %v14031_v39  ;;  %601 = vst.msk [vmem:[#allocation3 + $0x48] sm:$0x1] %vm591_vm1, %v506_v44  ;;  %602 = vst.msk [vmem:[#allocation3 + $0x50] sm:$0x1] %vm591_vm1, %v514_v46 }
 0x105   : > { %1934 = vrot.lane.b32.xlu1 %v14070_v62, %s13926_s5  ;;  %v517_v56 = vcombine.high %v513_v45, %v513_v45  ;;  %605 = vst.msk [vmem:[#allocation3 + $0x68] sm:$0x1] %vm591_vm1, %v513_v45  ;;  %606 = vst.msk [vmem:[#allocation3 + $0x70] sm:$0x1] %vm591_vm1, %v515_v47  ;;  %v14205_v57 = vrot.slane %v513_v45, %v14031_v39  ;;  %v14208_v63 = vrot.slane %v515_v47, %v14031_v39 }
 0x106   : > { %v14213_v3 = vrot.slane %v516_v55, %v14031_v39  ;;  %v3093_v8 = vrot.slane %v372_v43, %v14026_v27  ;;  %603 = vst.msk [vmem:[#allocation3 + $0x58] sm:$0x1] %vm591_vm1, %v516_v55  ;;  %v5669_v10 = vcombine.high %v5661_v0, %v5661_v0  ;;  %v5670_v11 = vcombine.high %v5668_v1, %v5668_v1  ;;  %v253_v44 = vpop.permute.xlu0 %252 }
 0x107   : > { %v14216_v5 = vrot.slane %v517_v56, %v14031_v39  ;;  %607 = vst.msk [vmem:[#allocation3 + $0x78] sm:$0x1] %vm591_vm1, %v517_v56  ;;  %v14224_v19 = vrot.slane %v5661_v0, %v14026_v27  ;;  %v14227_v20 = vrot.slane %v5668_v1, %v14026_v27  ;;  %v3100_v22 = vrot.slane %v3086_v6, %v14026_v27  ;;  %v248_v6 = vpop.permute.xlu1 %247 }
 0x108   : > { %865 = vrot.lane.b32.xlu0 %v14174_v42, %s13923_s29  ;;  %v3101_v23 = vcombine.high %v3093_v8, %v3093_v8  ;;  %v14233_v25 = vrot.slane %v3093_v8, %v14026_v27  ;;  %v383_v30 = vadd.f32 %v14084_v2, %v238_v9  ;;  %v14237_v32 = vrot.slane %v5669_v10, %v14026_v27 }
 0x109   : > { %867 = vrot.lane.b32.xlu1 %v14184_v49, %s13923_s29  ;;  %v14240_v33 = vrot.slane %v5670_v11, %v14026_v27  ;;  %v3102_v36 = vcombine.high %v3100_v22, %v3100_v22  ;;  %v14243_v38 = vrot.slane %v3100_v22, %v14026_v27  ;;  %v375_v47 = vadd.f32 %v14098_v7, %v228_v41 }
 0x10a   : > { %v14250_v40 = vrot.slane %v3101_v23, %v14026_v27  ;;  %v5703_v43 = vcombine.high %v383_v30, %v383_v30  ;;  %v5710_v45 = vrot.slane %v383_v30, %v14026_v27  ;;  %v396_v52 = vadd.f32 %v14146_v24, %v253_v44 }
 0x10b   : > { %v14253_v2 = vrot.slane %v3102_v36, %v14026_v27  ;;  %v3135_v8 = vcombine.high %v375_v47, %v375_v47  ;;  %v3142_v9 = vrot.slane %v375_v47, %v14026_v27  ;;  %v14291_v36 = vrot.slane %v14048_v53, %v14031_v39 }
 0x10c   : > { %1210 = vrot.lane.b32.xlu0 %v14174_v42, %s13924_s30  ;;  %v5717_v46 = vrot.slane %v5703_v43, %v14026_v27  ;;  %v5718_v55 = vcombine.high %v5710_v45, %v5710_v45  ;;  %v14264_v0 = vrot.slane %v5710_v45, %v14026_v27  ;;  %v8327_v10 = vrot.slane %v396_v52, %v14026_v27  ;;  %v258_v45 = vpop.permute.xlu1 %257 }
 0x10d   : > { %1212 = vrot.lane.b32.xlu1 %v14184_v49, %s13924_s30  ;;  %v3149_v41 = vrot.slane %v3135_v8, %v14026_v27  ;;  %v3150_v11 = vcombine.high %v3142_v9, %v3142_v9  ;;  %v8320_v22 = vcombine.high %v396_v52, %v396_v52  ;;  %v14285_v30 = vrot.slane %v3142_v9, %v14026_v27 }
 0x10e   : > { %v5719_v56 = vcombine.high %v5717_v46, %v5717_v46  ;;  %v14267_v1 = vrot.slane %v5717_v46, %v14026_v27  ;;  %v14276_v7 = vrot.slane %v5718_v55, %v14026_v27  ;;  %v14301_v46 = vrot.slane %v14067_v61, %v14031_v39 }
 0x10f   : > { %v3151_v23 = vcombine.high %v3149_v41, %v3149_v41  ;;  %v14294_v43 = vrot.slane %v3149_v41, %v14026_v27  ;;  %v14297_v44 = vrot.slane %v3150_v11, %v14026_v27  ;;  %v8334_v52 = vrot.slane %v8320_v22, %v14026_v27 }
 0x110   : > { %1555 = vrot.lane.b32.xlu0 %v14174_v42, %s13925_s4  ;;  %v14279_v24 = vrot.slane %v5719_v56, %v14026_v27  ;;  %v388_v55 = vadd.f32 %v14154_v29, %v243_v31  ;;  %v399_v53 = vadd.f32 %v14160_v34, %v258_v45  ;;  %v8335_v56 = vcombine.high %v8327_v10, %v8327_v10 }
 0x111   : > { %1557 = vrot.lane.b32.xlu1 %v14184_v49, %s13925_s4  ;;  %v14304_v47 = vrot.slane %v3151_v23, %v14026_v27  ;;  %v14315_v61 = vrot.slane %v14045_v51, %v14031_v39  ;;  %v14318_v8 = vrot.slane %v8327_v10, %v14026_v27  ;;  %v14322_v9 = vrot.slane %v14063_v59, %v14031_v39 }
 0x112   : > { %v14325_v29 = vrot.slane %v8334_v52, %v14026_v27  ;;  %v14328_v34 = vrot.slane %v8335_v56, %v14026_v27  ;;  %v5752_v31 = vcombine.high %v388_v55, %v388_v55  ;;  %v5759_v41 = vrot.slane %v388_v55, %v14026_v27 }
 0x113   : > { %17801 = vst [vmem:[#allocation5_spill] sm:$0xff] %v14318_v8  ;;  %v8369_v11 = vcombine.high %v399_v53, %v399_v53  ;;  %v8376_v51 = vrot.slane %v399_v53, %v14026_v27  ;;  %v391_v59 = vadd.f32 %v14168_v37, %v248_v6 }
 0x114   : > { %1900 = vrot.lane.b32.xlu0 %v14174_v42, %s13926_s5  ;;  %17802 = vst [vmem:[#allocation6_spill] sm:$0xff] %v14325_v29  ;;  %17803 = vst [vmem:[#allocation7_spill] sm:$0xff] %v14328_v34  ;;  %v5766_v10 = vrot.slane %v5752_v31, %v14026_v27  ;;  %v5767_v22 = vcombine.high %v5759_v41, %v5759_v41  ;;  %v14339_v23 = vrot.slane %v5759_v41, %v14026_v27 }
 0x115   : > { %1902 = vrot.lane.b32.xlu1 %v14184_v49, %s13926_s5  ;;  %v8383_v45 = vrot.slane %v8369_v11, %v14026_v27  ;;  %v8384_v55 = vcombine.high %v8376_v51, %v8376_v51  ;;  %v14346_v29 = vrot.slane %v8376_v51, %v14026_v27  ;;  %v8271_v41 = vcombine.high %v391_v59, %v391_v59 }
 0x116   : > { %v5768_v56 = vcombine.high %v5766_v10, %v5766_v10  ;;  %v14343_v53 = vrot.slane %v5766_v10, %v14026_v27  ;;  %v14349_v31 = vrot.slane %v5767_v22, %v14026_v27  ;;  %v8336_v11 = vcombine.high %v8334_v52, %v8334_v52 }
 0x117   : > { %17804 = vst [vmem:[#allocation8_spill] sm:$0xff] %v14346_v29  ;;  %v14357_v6 = vrot.slane %v8383_v45, %v14026_v27  ;;  %v14362_v51 = vrot.slane %v8384_v55, %v14026_v27  ;;  %v8278_v10 = vrot.slane %v391_v59, %v14026_v27  ;;  %v8285_v22 = vrot.slane %v8271_v41, %v14026_v27 }
 0x118   : > { %2245 = vrot.lane.b32.xlu0 %v14174_v42, %s13927_s6  ;;  %v14354_v37 = vrot.slane %v5768_v56, %v14026_v27  ;;  %v14374_v29 = vrot.slane %v8336_v11, %v14026_v27  ;;  %v8385_v59 = vcombine.high %v8383_v45, %v8383_v45 }
 0x119   : > { %2247 = vrot.lane.b32.xlu1 %v14184_v49, %s13927_s6  ;;  %17805 = vst [vmem:[#allocation9_spill] sm:$0xff] %v14357_v6  ;;  %17806 = vst [vmem:[#allocation10_spill] sm:$0xff] %v14362_v51  ;;  %v8286_v56 = vcombine.high %v8278_v10, %v8278_v10  ;;  %v14371_v6 = vrot.slane %v8278_v10, %v14026_v27  ;;  %v8287_v52 = vcombine.high %v8285_v22, %v8285_v22 }
 0x11a   : > { %17808 = vst [vmem:[#allocation12_spill] sm:$0xff] %v14374_v29  ;;  %v14377_v55 = vrot.slane %v8285_v22, %v14026_v27  ;;  %v14392_v11 = vrot.slane %v8385_v59, %v14026_v27 }
 0x11b   : > { %17807 = vst [vmem:[#allocation11_spill] sm:$0xff] %v14371_v6  ;;  %v14380_v51 = vrot.slane %v8286_v56, %v14026_v27  ;;  %v14387_v41 = vrot.slane %v8287_v52, %v14026_v27 }
 0x11c   : > { %901 = vrot.lane.b32.xlu0 %v14291_v36, %s13923_s29  ;;  %17809 = vst [vmem:[#allocation13_spill] sm:$0xff] %v14377_v55  ;;  %17812 = vst [vmem:[#allocation16_spill] sm:$0xff] %v14392_v11 }
 0x11d   : > { %903 = vrot.lane.b32.xlu1 %v14301_v46, %s13923_s29  ;;  %17810 = vst [vmem:[#allocation14_spill] sm:$0xff] %v14380_v51  ;;  %17811 = vst [vmem:[#allocation15_spill] sm:$0xff] %v14387_v41  ;;  %v14748_v41 = vcombine.high %v14250_v40, %v14250_v40 }
 0x120   : > { %905 = vrot.lane.b32.xlu0 %v14315_v61, %s13923_s29 }
 0x121   : > { %907 = vrot.lane.b32.xlu1 %v14322_v9, %s13923_s29 }
 0x124   : > { %1246 = vrot.lane.b32.xlu0 %v14291_v36, %s13924_s30 }
 0x125   : > { %1248 = vrot.lane.b32.xlu1 %v14301_v46, %s13924_s30 }
 0x128   : > { %1250 = vrot.lane.b32.xlu0 %v14315_v61, %s13924_s30 }
 0x129   : > { %1252 = vrot.lane.b32.xlu1 %v14322_v9, %s13924_s30 }
 0x12c   : > { %1591 = vrot.lane.b32.xlu0 %v14291_v36, %s13925_s4 }
 0x12d   : > { %1593 = vrot.lane.b32.xlu1 %v14301_v46, %s13925_s4 }
 0x130   : > { %1595 = vrot.lane.b32.xlu0 %v14315_v61, %s13925_s4 }
 0x131   : > { %1597 = vrot.lane.b32.xlu1 %v14322_v9, %s13925_s4 }
 0x134   : > { %1936 = vrot.lane.b32.xlu0 %v14291_v36, %s13926_s5 }
 0x135   : > { %1938 = vrot.lane.b32.xlu1 %v14301_v46, %s13926_s5 }
 0x138   : > { %1940 = vrot.lane.b32.xlu0 %v14315_v61, %s13926_s5 }
 0x139   : > { %1942 = vrot.lane.b32.xlu1 %v14322_v9, %s13926_s5 }
 0x13c   : > { %869 = vrot.lane.b32.xlu0 %v14113_v13, %s13923_s29 }
 0x13d   : > { %871 = vrot.lane.b32.xlu1 %v14120_v15, %s13923_s29 }
 0x140   : > { %873 = vrot.lane.b32.xlu0 %v14116_v14, %s13923_s29 }
 0x141   : > { %875 = vrot.lane.b32.xlu1 %v14123_v16, %s13923_s29 }
 0x144   : > { %881 = vrot.lane.b32.xlu0 %v14187_v48, %s13923_s29 }
 0x145   : > { %883 = vrot.lane.b32.xlu1 %v14195_v58, %s13923_s29 }
 0x148   : > { %1214 = vrot.lane.b32.xlu0 %v14113_v13, %s13924_s30 }
 0x149   : > { %1216 = vrot.lane.b32.xlu1 %v14120_v15, %s13924_s30 }
 0x14c   : > { %1218 = vrot.lane.b32.xlu0 %v14116_v14, %s13924_s30 }
 0x14d   : > { %1220 = vrot.lane.b32.xlu1 %v14123_v16, %s13924_s30 }
 0x150   : > { %1226 = vrot.lane.b32.xlu0 %v14187_v48, %s13924_s30 }
 0x151   : > { %1228 = vrot.lane.b32.xlu1 %v14195_v58, %s13924_s30 }
 0x154   : > { %1559 = vrot.lane.b32.xlu0 %v14113_v13, %s13925_s4 }
 0x155   : > { %1561 = vrot.lane.b32.xlu1 %v14120_v15, %s13925_s4 }
 0x158   : > { %1563 = vrot.lane.b32.xlu0 %v14116_v14, %s13925_s4 }
 0x159   : > { %1565 = vrot.lane.b32.xlu1 %v14123_v16, %s13925_s4 }
 0x15c   : > { %1571 = vrot.lane.b32.xlu0 %v14187_v48, %s13925_s4 }
 0x15d   : > { %1573 = vrot.lane.b32.xlu1 %v14195_v58, %s13925_s4 }
 0x160   : > { %1904 = vrot.lane.b32.xlu0 %v14113_v13, %s13926_s5 }
 0x161   : > { %1906 = vrot.lane.b32.xlu1 %v14120_v15, %s13926_s5 }
 0x164   : > { %1908 = vrot.lane.b32.xlu0 %v14116_v14, %s13926_s5 }
 0x165   : > { %1910 = vrot.lane.b32.xlu1 %v14123_v16, %s13926_s5 }
 0x168   : > { %1916 = vrot.lane.b32.xlu0 %v14187_v48, %s13926_s5 }
 0x169   : > { %1918 = vrot.lane.b32.xlu1 %v14195_v58, %s13926_s5 }
 0x16a   : > { %v898_v27 = vpop.permute.xlu0 %897 }
 0x16b   : > { %953 = vst.msk [vmem:[#allocation3 + $0x81] sm:$0x1] %vm591_vm1, %v898_v27  ;;  %v900_v45 = vpop.permute.xlu1 %899 }
 0x16c   : > { %954 = vst.msk [vmem:[#allocation3 + $0x89] sm:$0x1] %vm591_vm1, %v900_v45  ;;  %2249 = vrot.lane.b32.xlu0 %v14113_v13, %s13927_s6 }
 0x16d   : > { %3570 = vst.msk [vmem:[#allocation3 + $0x81] sm:$0x1] %vm3352_vm2, %v14285_v30  ;;  %2251 = vrot.lane.b32.xlu1 %v14120_v15, %s13927_s6  ;;  %3571 = vst.msk [vmem:[#allocation3 + $0x89] sm:$0x1] %vm3352_vm2, %v14297_v44 }
 0x16e   : > { %v1243_v10 = vpop.permute.xlu0 %1242 }
 0x16f   : > { %1298 = vst.msk [vmem:[#allocation3 + $0x82] sm:$0x1] %vm591_vm1, %v1243_v10  ;;  %v1245_v22 = vpop.permute.xlu1 %1244 }
 0x170   : > { %1299 = vst.msk [vmem:[#allocation3 + $0x8a] sm:$0x1] %vm591_vm1, %v1245_v22  ;;  %2253 = vrot.lane.b32.xlu0 %v14116_v14, %s13927_s6 }
 0x171   : > { %2255 = vrot.lane.b32.xlu1 %v14123_v16, %s13927_s6 }
 0x172   : > { %v1588_v56 = vpop.permute.xlu0 %1587 }
 0x173   : > { %1643 = vst.msk [vmem:[#allocation3 + $0x83] sm:$0x1] %vm591_vm1, %v1588_v56  ;;  %v1590_v52 = vpop.permute.xlu1 %1589 }
 0x174   : > { %1644 = vst.msk [vmem:[#allocation3 + $0x8b] sm:$0x1] %vm591_vm1, %v1590_v52  ;;  %2261 = vrot.lane.b32.xlu0 %v14187_v48, %s13927_s6 }
 0x175   : > { %2263 = vrot.lane.b32.xlu1 %v14195_v58, %s13927_s6 }
 0x176   : > { %v1933_v59 = vpop.permute.xlu0 %1932 }
 0x177   : > { %1988 = vst.msk [vmem:[#allocation3 + $0x84] sm:$0x1] %vm591_vm1, %v1933_v59  ;;  %v1935_v27 = vpop.permute.xlu1 %1934 }
 0x178   : > { %1989 = vst.msk [vmem:[#allocation3 + $0x8c] sm:$0x1] %vm591_vm1, %v1935_v27  ;;  %909 = vrot.lane.b32.xlu0 %v14092_v4, %s13923_s29 }
 0x179   : > { %911 = vrot.lane.b32.xlu1 %v14110_v12, %s13923_s29 }
 0x17a   : > { %v866_v45 = vpop.permute.xlu0 %865 }
 0x17b   : > { %937 = vst.msk [vmem:[#allocation3 + $0x1] sm:$0x1] %vm591_vm1, %v866_v45  ;;  %v868_v10 = vpop.permute.xlu1 %867 }
 0x17c   : > { %938 = vst.msk [vmem:[#allocation3 + $0x9] sm:$0x1] %vm591_vm1, %v868_v10  ;;  %1254 = vrot.lane.b32.xlu0 %v14092_v4, %s13924_s30 }
 0x17d   : > { %3554 = vst.msk [vmem:[#allocation3 + $0x1] sm:$0x1] %vm3352_vm2, %v14141_v21  ;;  %1256 = vrot.lane.b32.xlu1 %v14110_v12, %s13924_s30  ;;  %3555 = vst.msk [vmem:[#allocation3 + $0x9] sm:$0x1] %vm3352_vm2, %v14152_v28 }
 0x17e   : > { %v1211_v22 = vpop.permute.xlu0 %1210 }
 0x17f   : > { %1282 = vst.msk [vmem:[#allocation3 + $0x2] sm:$0x1] %vm591_vm1, %v1211_v22  ;;  %v1213_v56 = vpop.permute.xlu1 %1212 }
 0x180   : > { %1283 = vst.msk [vmem:[#allocation3 + $0xa] sm:$0x1] %vm591_vm1, %v1213_v56  ;;  %1599 = vrot.lane.b32.xlu0 %v14092_v4, %s13925_s4  ;;  %v14516_v56 = vcombine.high %v14285_v30, %v14285_v30 }
 0x181   : > { %1601 = vrot.lane.b32.xlu1 %v14110_v12, %s13925_s4 }
 0x182   : > { %v1556_v52 = vpop.permute.xlu0 %1555 }
 0x183   : > { %1627 = vst.msk [vmem:[#allocation3 + $0x3] sm:$0x1] %vm591_vm1, %v1556_v52  ;;  %v1558_v59 = vpop.permute.xlu1 %1557 }
 0x184   : > { %1628 = vst.msk [vmem:[#allocation3 + $0xb] sm:$0x1] %vm591_vm1, %v1558_v59  ;;  %1944 = vrot.lane.b32.xlu0 %v14092_v4, %s13926_s5  ;;  %v14520_v59 = vcombine.high %v14297_v44, %v14297_v44 }
 0x185   : > { %1946 = vrot.lane.b32.xlu1 %v14110_v12, %s13926_s5 }
 0x186   : > { %v1901_v27 = vpop.permute.xlu0 %1900 }
 0x187   : > { %1972 = vst.msk [vmem:[#allocation3 + $0x4] sm:$0x1] %vm591_vm1, %v1901_v27  ;;  %v1903_v45 = vpop.permute.xlu1 %1902 }
 0x188   : > { %1973 = vst.msk [vmem:[#allocation3 + $0xc] sm:$0x1] %vm591_vm1, %v1903_v45  ;;  %877 = vrot.lane.b32.xlu0 %v14126_v17, %s13923_s29 }
 0x189   : > { %879 = vrot.lane.b32.xlu1 %v14129_v18, %s13923_s29 }
 0x18a   : > { %v2246_v10 = vpop.permute.xlu0 %2245 }
 0x18b   : > { %2317 = vst.msk [vmem:[#allocation3 + $0x5] sm:$0x1] %vm591_vm1, %v2246_v10  ;;  %v2248_v22 = vpop.permute.xlu1 %2247 }
 0x18c   : > { %2318 = vst.msk [vmem:[#allocation3 + $0xd] sm:$0x1] %vm591_vm1, %v2248_v22  ;;  %885 = vrot.lane.b32.xlu0 %v14198_v60, %s13923_s29 }
 0x18d   : > { %887 = vrot.lane.b32.xlu1 %v14213_v3, %s13923_s29 }
 0x18e   : > { %v902_v52 = vpop.permute.xlu0 %901 }
 0x18f   : > { %955 = vst.msk [vmem:[#allocation3 + $0x91] sm:$0x1] %vm591_vm1, %v902_v52  ;;  %v904_v27 = vpop.permute.xlu1 %903 }
 0x190   : > { %956 = vst.msk [vmem:[#allocation3 + $0x99] sm:$0x1] %vm591_vm1, %v904_v27  ;;  %889 = vrot.lane.b32.xlu0 %v14190_v50, %s13923_s29 }
 0x191   : > { %3572 = vst.msk [vmem:[#allocation3 + $0x91] sm:$0x1] %vm3352_vm2, %v14516_v56  ;;  %891 = vrot.lane.b32.xlu1 %v14205_v57, %s13923_s29  ;;  %3573 = vst.msk [vmem:[#allocation3 + $0x99] sm:$0x1] %vm3352_vm2, %v14520_v59 }
 0x192   : > { %v906_v45 = vpop.permute.xlu0 %905 }
 0x193   : > { %957 = vst.msk [vmem:[#allocation3 + $0xa1] sm:$0x1] %vm591_vm1, %v906_v45  ;;  %v908_v10 = vpop.permute.xlu1 %907 }
 0x194   : > { %958 = vst.msk [vmem:[#allocation3 + $0xa9] sm:$0x1] %vm591_vm1, %v908_v10  ;;  %1222 = vrot.lane.b32.xlu0 %v14126_v17, %s13924_s30 }
 0x195   : > { %3574 = vst.msk [vmem:[#allocation3 + $0xa1] sm:$0x1] %vm3352_vm2, %v14294_v43  ;;  %1224 = vrot.lane.b32.xlu1 %v14129_v18, %s13924_s30  ;;  %3575 = vst.msk [vmem:[#allocation3 + $0xa9] sm:$0x1] %vm3352_vm2, %v14304_v47 }
 0x196   : > { %v1247_v22 = vpop.permute.xlu0 %1246 }
 0x197   : > { %1300 = vst.msk [vmem:[#allocation3 + $0x92] sm:$0x1] %vm591_vm1, %v1247_v22  ;;  %v1249_v52 = vpop.permute.xlu1 %1248 }
 0x198   : > { %1301 = vst.msk [vmem:[#allocation3 + $0x9a] sm:$0x1] %vm591_vm1, %v1249_v52  ;;  %1230 = vrot.lane.b32.xlu0 %v14198_v60, %s13924_s30 }
 0x199   : > { %1232 = vrot.lane.b32.xlu1 %v14213_v3, %s13924_s30 }
 0x19a   : > { %v1251_v27 = vpop.permute.xlu0 %1250 }
 0x19b   : > { %1302 = vst.msk [vmem:[#allocation3 + $0xa2] sm:$0x1] %vm591_vm1, %v1251_v27  ;;  %v1253_v45 = vpop.permute.xlu1 %1252 }
 0x19c   : > { %1303 = vst.msk [vmem:[#allocation3 + $0xaa] sm:$0x1] %vm591_vm1, %v1253_v45  ;;  %1234 = vrot.lane.b32.xlu0 %v14190_v50, %s13924_s30 }
 0x19d   : > { %1236 = vrot.lane.b32.xlu1 %v14205_v57, %s13924_s30 }
 0x19e   : > { %v1592_v10 = vpop.permute.xlu0 %1591 }
 0x19f   : > { %1645 = vst.msk [vmem:[#allocation3 + $0x93] sm:$0x1] %vm591_vm1, %v1592_v10  ;;  %v1594_v22 = vpop.permute.xlu1 %1593 }
 0x1a0   : > { %1646 = vst.msk [vmem:[#allocation3 + $0x9b] sm:$0x1] %vm591_vm1, %v1594_v22  ;;  %1567 = vrot.lane.b32.xlu0 %v14126_v17, %s13925_s4 }
 0x1a1   : > { %1569 = vrot.lane.b32.xlu1 %v14129_v18, %s13925_s4 }
 0x1a2   : > { %v1596_v52 = vpop.permute.xlu0 %1595 }
 0x1a3   : > { %1647 = vst.msk [vmem:[#allocation3 + $0xa3] sm:$0x1] %vm591_vm1, %v1596_v52  ;;  %v1598_v27 = vpop.permute.xlu1 %1597 }
 0x1a4   : > { %1648 = vst.msk [vmem:[#allocation3 + $0xab] sm:$0x1] %vm591_vm1, %v1598_v27  ;;  %1575 = vrot.lane.b32.xlu0 %v14198_v60, %s13925_s4  ;;  %v14580_v27 = vcombine.high %v14141_v21, %v14141_v21 }
 0x1a5   : > { %1577 = vrot.lane.b32.xlu1 %v14213_v3, %s13925_s4 }
 0x1a6   : > { %v1937_v45 = vpop.permute.xlu0 %1936 }
 0x1a7   : > { %1990 = vst.msk [vmem:[#allocation3 + $0x94] sm:$0x1] %vm591_vm1, %v1937_v45  ;;  %v1939_v10 = vpop.permute.xlu1 %1938 }
 0x1a8   : > { %1991 = vst.msk [vmem:[#allocation3 + $0x9c] sm:$0x1] %vm591_vm1, %v1939_v10  ;;  %1579 = vrot.lane.b32.xlu0 %v14190_v50, %s13925_s4  ;;  %v14584_v10 = vcombine.high %v14152_v28, %v14152_v28 }
 0x1a9   : > { %1581 = vrot.lane.b32.xlu1 %v14205_v57, %s13925_s4 }
 0x1aa   : > { %v1941_v22 = vpop.permute.xlu0 %1940 }
 0x1ab   : > { %1992 = vst.msk [vmem:[#allocation3 + $0xa4] sm:$0x1] %vm591_vm1, %v1941_v22  ;;  %v1943_v52 = vpop.permute.xlu1 %1942 }
 0x1ac   : > { %1993 = vst.msk [vmem:[#allocation3 + $0xac] sm:$0x1] %vm591_vm1, %v1943_v52  ;;  %1912 = vrot.lane.b32.xlu0 %v14126_v17, %s13926_s5 }
 0x1ad   : > { %1914 = vrot.lane.b32.xlu1 %v14129_v18, %s13926_s5 }
 0x1ae   : > { %v870_v45 = vpop.permute.xlu0 %869 }
 0x1af   : > { %939 = vst.msk [vmem:[#allocation3 + $0x11] sm:$0x1] %vm591_vm1, %v870_v45  ;;  %v872_v22 = vpop.permute.xlu1 %871 }
 0x1b0   : > { %940 = vst.msk [vmem:[#allocation3 + $0x19] sm:$0x1] %vm591_vm1, %v872_v22  ;;  %1920 = vrot.lane.b32.xlu0 %v14198_v60, %s13926_s5 }
 0x1b1   : > { %3556 = vst.msk [vmem:[#allocation3 + $0x11] sm:$0x1] %vm3352_vm2, %v14580_v27  ;;  %1922 = vrot.lane.b32.xlu1 %v14213_v3, %s13926_s5  ;;  %3557 = vst.msk [vmem:[#allocation3 + $0x19] sm:$0x1] %vm3352_vm2, %v14584_v10 }
 0x1b2   : > { %v874_v52 = vpop.permute.xlu0 %873 }
 0x1b3   : > { %941 = vst.msk [vmem:[#allocation3 + $0x21] sm:$0x1] %vm591_vm1, %v874_v52  ;;  %v876_v11 = vpop.permute.xlu1 %875 }
 0x1b4   : > { %1924 = vrot.lane.b32.xlu0 %v14190_v50, %s13926_s5  ;;  %942 = vst.msk [vmem:[#allocation3 + $0x29] sm:$0x1] %vm591_vm1, %v876_v11 }
 0x1b5   : > { %3558 = vst.msk [vmem:[#allocation3 + $0x21] sm:$0x1] %vm3352_vm2, %v14149_v26  ;;  %1926 = vrot.lane.b32.xlu1 %v14205_v57, %s13926_s5  ;;  %3559 = vst.msk [vmem:[#allocation3 + $0x29] sm:$0x1] %vm3352_vm2, %v14163_v35 }
 0x1b6   : > { %v882_v45 = vpop.permute.xlu0 %881 }
 0x1b7   : > { %945 = vst.msk [vmem:[#allocation3 + $0x41] sm:$0x1] %vm591_vm1, %v882_v45  ;;  %v884_v22 = vpop.permute.xlu1 %883 }
 0x1b8   : > { %2257 = vrot.lane.b32.xlu0 %v14126_v17, %s13927_s6  ;;  %946 = vst.msk [vmem:[#allocation3 + $0x49] sm:$0x1] %vm591_vm1, %v884_v22 }
 0x1b9   : > { %3562 = vst.msk [vmem:[#allocation3 + $0x41] sm:$0x1] %vm3352_vm2, %v14233_v25  ;;  %2259 = vrot.lane.b32.xlu1 %v14129_v18, %s13927_s6  ;;  %3563 = vst.msk [vmem:[#allocation3 + $0x49] sm:$0x1] %vm3352_vm2, %v14250_v40 }
 0x1ba   : > { %v1215_v11 = vpop.permute.xlu0 %1214 }
 0x1bb   : > { %1284 = vst.msk [vmem:[#allocation3 + $0x12] sm:$0x1] %vm591_vm1, %v1215_v11  ;;  %v1217_v52 = vpop.permute.xlu1 %1216 }
 0x1bc   : > { %2265 = vrot.lane.b32.xlu0 %v14198_v60, %s13927_s6  ;;  %1285 = vst.msk [vmem:[#allocation3 + $0x1a] sm:$0x1] %vm591_vm1, %v1217_v52 }
 0x1bd   : > { %2267 = vrot.lane.b32.xlu1 %v14213_v3, %s13927_s6 }
 0x1be   : > { %v1219_v45 = vpop.permute.xlu0 %1218 }
 0x1bf   : > { %1286 = vst.msk [vmem:[#allocation3 + $0x22] sm:$0x1] %vm591_vm1, %v1219_v45  ;;  %v1221_v22 = vpop.permute.xlu1 %1220 }
 0x1c0   : > { %2269 = vrot.lane.b32.xlu0 %v14190_v50, %s13927_s6  ;;  %1287 = vst.msk [vmem:[#allocation3 + $0x2a] sm:$0x1] %vm591_vm1, %v1221_v22 }
 0x1c1   : > { %2271 = vrot.lane.b32.xlu1 %v14205_v57, %s13927_s6 }
 0x1c2   : > { %v1227_v11 = vpop.permute.xlu0 %1226 }
 0x1c3   : > { %1290 = vst.msk [vmem:[#allocation3 + $0x42] sm:$0x1] %vm591_vm1, %v1227_v11  ;;  %v1229_v29 = vpop.permute.xlu1 %1228 }
 0x1c4   : > { %893 = vrot.lane.b32.xlu0 %v14208_v63, %s13923_s29  ;;  %1291 = vst.msk [vmem:[#allocation3 + $0x4a] sm:$0x1] %vm591_vm1, %v1229_v29 }
 0x1c5   : > { %895 = vrot.lane.b32.xlu1 %v14216_v5, %s13923_s29 }
 0x1c6   : > { %v1560_v52 = vpop.permute.xlu0 %1559 }
 0x1c7   : > { %1629 = vst.msk [vmem:[#allocation3 + $0x13] sm:$0x1] %vm591_vm1, %v1560_v52  ;;  %v1562_v45 = vpop.permute.xlu1 %1561 }
 0x1c8   : > { %1238 = vrot.lane.b32.xlu0 %v14208_v63, %s13924_s30  ;;  %1630 = vst.msk [vmem:[#allocation3 + $0x1b] sm:$0x1] %vm591_vm1, %v1562_v45 }
 0x1c9   : > { %1240 = vrot.lane.b32.xlu1 %v14216_v5, %s13924_s30 }
 0x1ca   : > { %v1564_v22 = vpop.permute.xlu0 %1563 }
 0x1cb   : > { %1631 = vst.msk [vmem:[#allocation3 + $0x23] sm:$0x1] %vm591_vm1, %v1564_v22  ;;  %v1566_v11 = vpop.permute.xlu1 %1565 }
 0x1cc   : > { %1583 = vrot.lane.b32.xlu0 %v14208_v63, %s13925_s4  ;;  %1632 = vst.msk [vmem:[#allocation3 + $0x2b] sm:$0x1] %vm591_vm1, %v1566_v11 }
 0x1cd   : > { %1585 = vrot.lane.b32.xlu1 %v14216_v5, %s13925_s4 }
 0x1ce   : > { %v1572_v29 = vpop.permute.xlu0 %1571 }
 0x1cf   : > { %1635 = vst.msk [vmem:[#allocation3 + $0x43] sm:$0x1] %vm591_vm1, %v1572_v29  ;;  %v1574_v52 = vpop.permute.xlu1 %1573 }
 0x1d0   : > { %1928 = vrot.lane.b32.xlu0 %v14208_v63, %s13926_s5  ;;  %1636 = vst.msk [vmem:[#allocation3 + $0x4b] sm:$0x1] %vm591_vm1, %v1574_v52 }
 0x1d1   : > { %1930 = vrot.lane.b32.xlu1 %v14216_v5, %s13926_s5 }
 0x1d2   : > { %v1905_v45 = vpop.permute.xlu0 %1904 }
 0x1d3   : > { %1974 = vst.msk [vmem:[#allocation3 + $0x14] sm:$0x1] %vm591_vm1, %v1905_v45  ;;  %v1907_v22 = vpop.permute.xlu1 %1906 }
 0x1d4   : > { %2273 = vrot.lane.b32.xlu0 %v14208_v63, %s13927_s6  ;;  %1975 = vst.msk [vmem:[#allocation3 + $0x1c] sm:$0x1] %vm591_vm1, %v1907_v22 }
 0x1d5   : > { %2275 = vrot.lane.b32.xlu1 %v14216_v5, %s13927_s6 }
 0x1d6   : > { %v1909_v11 = vpop.permute.xlu0 %1908 }
 0x1d7   : > { %1976 = vst.msk [vmem:[#allocation3 + $0x24] sm:$0x1] %vm591_vm1, %v1909_v11  ;;  %v1911_v29 = vpop.permute.xlu1 %1910 }
 0x1d8   : > { %2277 = vrot.lane.b32.xlu0 %v14052_v54, %s13927_s6  ;;  %1977 = vst.msk [vmem:[#allocation3 + $0x2c] sm:$0x1] %vm591_vm1, %v1911_v29 }
 0x1d9   : > { %2279 = vrot.lane.b32.xlu1 %v14070_v62, %s13927_s6 }
 0x1da   : > { %v1917_v52 = vpop.permute.xlu0 %1916 }
 0x1db   : > { %1980 = vst.msk [vmem:[#allocation3 + $0x44] sm:$0x1] %vm591_vm1, %v1917_v52  ;;  %v1919_v45 = vpop.permute.xlu1 %1918 }
 0x1dc   : > { %2281 = vrot.lane.b32.xlu0 %v14291_v36, %s13927_s6  ;;  %1981 = vst.msk [vmem:[#allocation3 + $0x4c] sm:$0x1] %vm591_vm1, %v1919_v45 }
 0x1dd   : > { %2283 = vrot.lane.b32.xlu1 %v14301_v46, %s13927_s6 }
 0x1de   : > { %v2250_v22 = vpop.permute.xlu0 %2249 }
 0x1df   : > { %2319 = vst.msk [vmem:[#allocation3 + $0x15] sm:$0x1] %vm591_vm1, %v2250_v22  ;;  %v2252_v11 = vpop.permute.xlu1 %2251 }
 0x1e0   : > { %2285 = vrot.lane.b32.xlu0 %v14315_v61, %s13927_s6  ;;  %2320 = vst.msk [vmem:[#allocation3 + $0x1d] sm:$0x1] %vm591_vm1, %v2252_v11  ;;  %v14690_v11 = vcombine.high %v14294_v43, %v14294_v43 }
 0x1e1   : > { %2287 = vrot.lane.b32.xlu1 %v14322_v9, %s13927_s6 }
 0x1e2   : > { %v2254_v29 = vpop.permute.xlu0 %2253 }
 0x1e3   : > { %2321 = vst.msk [vmem:[#allocation3 + $0x25] sm:$0x1] %vm591_vm1, %v2254_v29  ;;  %v2256_v52 = vpop.permute.xlu1 %2255 }
 0x1e4   : > { %2289 = vrot.lane.b32.xlu0 %v14092_v4, %s13927_s6  ;;  %2322 = vst.msk [vmem:[#allocation3 + $0x2d] sm:$0x1] %vm591_vm1, %v2256_v52  ;;  %v14694_v52 = vcombine.high %v14304_v47, %v14304_v47 }
 0x1e5   : > { %2291 = vrot.lane.b32.xlu1 %v14110_v12, %s13927_s6 }
 0x1e6   : > { %v2262_v45 = vpop.permute.xlu0 %2261 }
 0x1e7   : > { %2325 = vst.msk [vmem:[#allocation3 + $0x45] sm:$0x1] %vm591_vm1, %v2262_v45  ;;  %v2264_v22 = vpop.permute.xlu1 %2263 }
 0x1e8   : > { %2590 = vrot.lane.b32.xlu0 %v14174_v42, %s13928_s7  ;;  %2326 = vst.msk [vmem:[#allocation3 + $0x4d] sm:$0x1] %vm591_vm1, %v2264_v22 }
 0x1e9   : > { %2592 = vrot.lane.b32.xlu1 %v14184_v49, %s13928_s7 }
 0x1ea   : > { %v910_v29 = vpop.permute.xlu0 %909 }
 0x1eb   : > { %959 = vst.msk [vmem:[#allocation3 + $0xb1] sm:$0x1] %vm591_vm1, %v910_v29  ;;  %v912_v45 = vpop.permute.xlu1 %911 }
 0x1ec   : > { %2594 = vrot.lane.b32.xlu0 %v14113_v13, %s13928_s7  ;;  %960 = vst.msk [vmem:[#allocation3 + $0xb9] sm:$0x1] %vm591_vm1, %v912_v45 }
 0x1ed   : > { %3576 = vst.msk [vmem:[#allocation3 + $0xb1] sm:$0x1] %vm3352_vm2, %v14690_v11  ;;  %2596 = vrot.lane.b32.xlu1 %v14120_v15, %s13928_s7  ;;  %3577 = vst.msk [vmem:[#allocation3 + $0xb9] sm:$0x1] %vm3352_vm2, %v14694_v52 }
 0x1ee   : > { %v1255_v22 = vpop.permute.xlu0 %1254 }
 0x1ef   : > { %1304 = vst.msk [vmem:[#allocation3 + $0xb2] sm:$0x1] %vm591_vm1, %v1255_v22  ;;  %v1257_v34 = vpop.permute.xlu1 %1256 }
 0x1f0   : > { %2598 = vrot.lane.b32.xlu0 %v14116_v14, %s13928_s7  ;;  %1305 = vst.msk [vmem:[#allocation3 + $0xba] sm:$0x1] %vm591_vm1, %v1257_v34  ;;  %v14726_v34 = vcombine.high %v14149_v26, %v14149_v26 }
 0x1f1   : > { %2600 = vrot.lane.b32.xlu1 %v14123_v16, %s13928_s7 }
 0x1f2   : > { %v1600_v29 = vpop.permute.xlu0 %1599 }
 0x1f3   : > { %1649 = vst.msk [vmem:[#allocation3 + $0xb3] sm:$0x1] %vm591_vm1, %v1600_v29  ;;  %v1602_v45 = vpop.permute.xlu1 %1601 }
 0x1f4   : > { %2602 = vrot.lane.b32.xlu0 %v14126_v17, %s13928_s7  ;;  %1650 = vst.msk [vmem:[#allocation3 + $0xbb] sm:$0x1] %vm591_vm1, %v1602_v45  ;;  %v14730_v45 = vcombine.high %v14163_v35, %v14163_v35 }
 0x1f5   : > { %2604 = vrot.lane.b32.xlu1 %v14129_v18, %s13928_s7 }
 0x1f6   : > { %v1945_v22 = vpop.permute.xlu0 %1944 }
 0x1f7   : > { %1994 = vst.msk [vmem:[#allocation3 + $0xb4] sm:$0x1] %vm591_vm1, %v1945_v22  ;;  %v1947_v8 = vpop.permute.xlu1 %1946 }
 0x1f8   : > { %2606 = vrot.lane.b32.xlu0 %v14187_v48, %s13928_s7  ;;  %1995 = vst.msk [vmem:[#allocation3 + $0xbc] sm:$0x1] %vm591_vm1, %v1947_v8  ;;  %v14744_v8 = vcombine.high %v14233_v25, %v14233_v25 }
 0x1f9   : > { %2608 = vrot.lane.b32.xlu1 %v14195_v58, %s13928_s7 }
 0x1fa   : > { %v878_v29 = vpop.permute.xlu0 %877 }
 0x1fb   : > { %943 = vst.msk [vmem:[#allocation3 + $0x31] sm:$0x1] %vm591_vm1, %v878_v29  ;;  %v880_v22 = vpop.permute.xlu1 %879 }
 0x1fc   : > { %2610 = vrot.lane.b32.xlu0 %v14198_v60, %s13928_s7  ;;  %944 = vst.msk [vmem:[#allocation3 + $0x39] sm:$0x1] %vm591_vm1, %v880_v22 }
 0x1fd   : > { %3560 = vst.msk [vmem:[#allocation3 + $0x31] sm:$0x1] %vm3352_vm2, %v14726_v34  ;;  %2612 = vrot.lane.b32.xlu1 %v14213_v3, %s13928_s7  ;;  %3561 = vst.msk [vmem:[#allocation3 + $0x39] sm:$0x1] %vm3352_vm2, %v14730_v45 }
 0x1fe   : > { %v886_v29 = vpop.permute.xlu0 %885 }
 0x1ff   : > { %947 = vst.msk [vmem:[#allocation3 + $0x51] sm:$0x1] %vm591_vm1, %v886_v29  ;;  %v888_v22 = vpop.permute.xlu1 %887 }
 0x200   : > { %2614 = vrot.lane.b32.xlu0 %v14190_v50, %s13928_s7  ;;  %948 = vst.msk [vmem:[#allocation3 + $0x59] sm:$0x1] %vm591_vm1, %v888_v22 }
 0x201   : > { %3564 = vst.msk [vmem:[#allocation3 + $0x51] sm:$0x1] %vm3352_vm2, %v14744_v8  ;;  %2616 = vrot.lane.b32.xlu1 %v14205_v57, %s13928_s7  ;;  %3565 = vst.msk [vmem:[#allocation3 + $0x59] sm:$0x1] %vm3352_vm2, %v14748_v41 }
 0x202   : > { %v890_v55 = vpop.permute.xlu0 %889 }
 0x203   : > { %949 = vst.msk [vmem:[#allocation3 + $0x61] sm:$0x1] %vm591_vm1, %v890_v55  ;;  %v892_v51 = vpop.permute.xlu1 %891 }
 0x204   : > { %2618 = vrot.lane.b32.xlu0 %v14208_v63, %s13928_s7  ;;  %950 = vst.msk [vmem:[#allocation3 + $0x69] sm:$0x1] %vm591_vm1, %v892_v51 }
 0x205   : > { %3566 = vst.msk [vmem:[#allocation3 + $0x61] sm:$0x1] %vm3352_vm2, %v14243_v38  ;;  %2620 = vrot.lane.b32.xlu1 %v14216_v5, %s13928_s7  ;;  %3567 = vst.msk [vmem:[#allocation3 + $0x69] sm:$0x1] %vm3352_vm2, %v14253_v2 }
 0x206   : > { %v1223_v29 = vpop.permute.xlu0 %1222 }
 0x207   : > { %1288 = vst.msk [vmem:[#allocation3 + $0x32] sm:$0x1] %vm591_vm1, %v1223_v29  ;;  %v1225_v22 = vpop.permute.xlu1 %1224 }
 0x208   : > { %2622 = vrot.lane.b32.xlu0 %v14052_v54, %s13928_s7  ;;  %1289 = vst.msk [vmem:[#allocation3 + $0x3a] sm:$0x1] %vm591_vm1, %v1225_v22 }
 0x209   : > { %2624 = vrot.lane.b32.xlu1 %v14070_v62, %s13928_s7 }
 0x20a   : > { %v1231_v51 = vpop.permute.xlu0 %1230 }
 0x20b   : > { %1292 = vst.msk [vmem:[#allocation3 + $0x52] sm:$0x1] %vm591_vm1, %v1231_v51  ;;  %v1233_v55 = vpop.permute.xlu1 %1232 }
 0x20c   : > { %2626 = vrot.lane.b32.xlu0 %v14291_v36, %s13928_s7  ;;  %1293 = vst.msk [vmem:[#allocation3 + $0x5a] sm:$0x1] %vm591_vm1, %v1233_v55 }
 0x20d   : > { %2628 = vrot.lane.b32.xlu1 %v14301_v46, %s13928_s7 }
 0x20e   : > { %v1235_v29 = vpop.permute.xlu0 %1234 }
 0x20f   : > { %1294 = vst.msk [vmem:[#allocation3 + $0x62] sm:$0x1] %vm591_vm1, %v1235_v29  ;;  %v1237_v6 = vpop.permute.xlu1 %1236 }
 0x210   : > { %2630 = vrot.lane.b32.xlu0 %v14315_v61, %s13928_s7  ;;  %1295 = vst.msk [vmem:[#allocation3 + $0x6a] sm:$0x1] %vm591_vm1, %v1237_v6 }
 0x211   : > { %2632 = vrot.lane.b32.xlu1 %v14322_v9, %s13928_s7 }
 0x212   : > { %v1568_v22 = vpop.permute.xlu0 %1567 }
 0x213   : > { %1633 = vst.msk [vmem:[#allocation3 + $0x33] sm:$0x1] %vm591_vm1, %v1568_v22  ;;  %v1570_v51 = vpop.permute.xlu1 %1569 }
 0x214   : > { %2634 = vrot.lane.b32.xlu0 %v14092_v4, %s13928_s7  ;;  %1634 = vst.msk [vmem:[#allocation3 + $0x3b] sm:$0x1] %vm591_vm1, %v1570_v51 }
 0x215   : > { %2636 = vrot.lane.b32.xlu1 %v14110_v12, %s13928_s7 }
 0x216   : > { %v1576_v55 = vpop.permute.xlu0 %1575 }
 0x217   : > { %1637 = vst.msk [vmem:[#allocation3 + $0x53] sm:$0x1] %vm591_vm1, %v1576_v55  ;;  %v1578_v29 = vpop.permute.xlu1 %1577 }
 0x218   : > { %2935 = vrot.lane.b32.xlu0 %v14174_v42, %s13929_s8  ;;  %1638 = vst.msk [vmem:[#allocation3 + $0x5b] sm:$0x1] %vm591_vm1, %v1578_v29 }
 0x219   : > { %2937 = vrot.lane.b32.xlu1 %v14184_v49, %s13929_s8 }
 0x21a   : > { %v1580_v6 = vpop.permute.xlu0 %1579 }
 0x21b   : > { %1639 = vst.msk [vmem:[#allocation3 + $0x63] sm:$0x1] %vm591_vm1, %v1580_v6  ;;  %v1582_v22 = vpop.permute.xlu1 %1581 }
 0x21c   : > { %2939 = vrot.lane.b32.xlu0 %v14113_v13, %s13929_s8  ;;  %1640 = vst.msk [vmem:[#allocation3 + $0x6b] sm:$0x1] %vm591_vm1, %v1582_v22 }
 0x21d   : > { %2941 = vrot.lane.b32.xlu1 %v14120_v15, %s13929_s8 }
 0x21e   : > { %v1913_v51 = vpop.permute.xlu0 %1912 }
 0x21f   : > { %1978 = vst.msk [vmem:[#allocation3 + $0x34] sm:$0x1] %vm591_vm1, %v1913_v51  ;;  %v1915_v42 = vpop.permute.xlu1 %1914 }
 0x220   : > { %2943 = vrot.lane.b32.xlu0 %v14116_v14, %s13929_s8  ;;  %1979 = vst.msk [vmem:[#allocation3 + $0x3c] sm:$0x1] %vm591_vm1, %v1915_v42 }
 0x221   : > { %2945 = vrot.lane.b32.xlu1 %v14123_v16, %s13929_s8 }
 0x222   : > { %v1921_v49 = vpop.permute.xlu0 %1920 }
 0x223   : > { %1982 = vst.msk [vmem:[#allocation3 + $0x54] sm:$0x1] %vm591_vm1, %v1921_v49  ;;  %v1923_v13 = vpop.permute.xlu1 %1922 }
 0x224   : > { %2947 = vrot.lane.b32.xlu0 %v14126_v17, %s13929_s8  ;;  %1983 = vst.msk [vmem:[#allocation3 + $0x5c] sm:$0x1] %vm591_vm1, %v1923_v13 }
 0x225   : > { %2949 = vrot.lane.b32.xlu1 %v14129_v18, %s13929_s8 }
 0x226   : > { %v1925_v15 = vpop.permute.xlu0 %1924 }
 0x227   : > { %1984 = vst.msk [vmem:[#allocation3 + $0x64] sm:$0x1] %vm591_vm1, %v1925_v15  ;;  %v1927_v14 = vpop.permute.xlu1 %1926 }
 0x228   : > { %2951 = vrot.lane.b32.xlu0 %v14187_v48, %s13929_s8  ;;  %1985 = vst.msk [vmem:[#allocation3 + $0x6c] sm:$0x1] %vm591_vm1, %v1927_v14 }
 0x229   : > { %2953 = vrot.lane.b32.xlu1 %v14195_v58, %s13929_s8 }
 0x22a   : > { %v2258_v16 = vpop.permute.xlu0 %2257 }
 0x22b   : > { %2323 = vst.msk [vmem:[#allocation3 + $0x35] sm:$0x1] %vm591_vm1, %v2258_v16  ;;  %v2260_v17 = vpop.permute.xlu1 %2259 }
 0x22c   : > { %2955 = vrot.lane.b32.xlu0 %v14198_v60, %s13929_s8  ;;  %2324 = vst.msk [vmem:[#allocation3 + $0x3d] sm:$0x1] %vm591_vm1, %v2260_v17 }
 0x22d   : > { %2957 = vrot.lane.b32.xlu1 %v14213_v3, %s13929_s8 }
 0x22e   : > { %v2266_v18 = vpop.permute.xlu0 %2265 }
 0x22f   : > { %2327 = vst.msk [vmem:[#allocation3 + $0x55] sm:$0x1] %vm591_vm1, %v2266_v18  ;;  %v2268_v48 = vpop.permute.xlu1 %2267 }
 0x230   : > { %2959 = vrot.lane.b32.xlu0 %v14190_v50, %s13929_s8  ;;  %2328 = vst.msk [vmem:[#allocation3 + $0x5d] sm:$0x1] %vm591_vm1, %v2268_v48  ;;  %v14844_v50 = vcombine.high %v14243_v38, %v14243_v38 }
 0x231   : > { %2961 = vrot.lane.b32.xlu1 %v14205_v57, %s13929_s8  ;;  %v14848_v57 = vcombine.high %v14253_v2, %v14253_v2 }
 0x232   : > { %v2270_v58 = vpop.permute.xlu0 %2269 }
 0x233   : > { %2329 = vst.msk [vmem:[#allocation3 + $0x65] sm:$0x1] %vm591_vm1, %v2270_v58  ;;  %v2272_v60 = vpop.permute.xlu1 %2271 }
 0x234   : > { %2963 = vrot.lane.b32.xlu0 %v14208_v63, %s13929_s8  ;;  %2330 = vst.msk [vmem:[#allocation3 + $0x6d] sm:$0x1] %vm591_vm1, %v2272_v60  ;;  %v14992_v60 = vrot.slane %v14285_v30, %v14031_v39  ;;  %v15006_v30 = vrot.slane %v14516_v56, %v14031_v39  ;;  %v15020_v56 = vrot.slane %v14294_v43, %v14031_v39 }
 0x235   : > { %2965 = vrot.lane.b32.xlu1 %v14216_v5, %s13929_s8  ;;  %v15034_v43 = vrot.slane %v14690_v11, %v14031_v39 }
 0x236   : > { %v894_v3 = vpop.permute.xlu0 %893 }
 0x237   : > { %951 = vst.msk [vmem:[#allocation3 + $0x71] sm:$0x1] %vm591_vm1, %v894_v3  ;;  %v896_v55 = vpop.permute.xlu1 %895  ;;  %v14996_v3 = vrot.slane %v14297_v44, %v14031_v39  ;;  %v15010_v44 = vrot.slane %v14520_v59, %v14031_v39  ;;  %v15024_v59 = vrot.slane %v14304_v47, %v14031_v39  ;;  %v15038_v47 = vrot.slane %v14694_v52, %v14031_v39 }
 0x238   : > { %2967 = vrot.lane.b32.xlu0 %v14052_v54, %s13929_s8  ;;  %952 = vst.msk [vmem:[#allocation3 + $0x79] sm:$0x1] %vm591_vm1, %v896_v55 }
 0x239   : > { %3568 = vst.msk [vmem:[#allocation3 + $0x71] sm:$0x1] %vm3352_vm2, %v14844_v50  ;;  %2969 = vrot.lane.b32.xlu1 %v14070_v62, %s13929_s8  ;;  %3569 = vst.msk [vmem:[#allocation3 + $0x79] sm:$0x1] %vm3352_vm2, %v14848_v57 }
 0x23a   : > { %v1239_v63 = vpop.permute.xlu0 %1238 }
 0x23b   : > { %1296 = vst.msk [vmem:[#allocation3 + $0x72] sm:$0x1] %vm591_vm1, %v1239_v63  ;;  %v1241_v5 = vpop.permute.xlu1 %1240 }
 0x23c   : > { %2971 = vrot.lane.b32.xlu0 %v14291_v36, %s13929_s8  ;;  %1297 = vst.msk [vmem:[#allocation3 + $0x7a] sm:$0x1] %vm591_vm1, %v1241_v5 }
 0x23d   : > { %2973 = vrot.lane.b32.xlu1 %v14301_v46, %s13929_s8  ;;  %v14880_v46 = vrot.slane %v14141_v21, %v14031_v39  ;;  %v14898_v21 = vrot.slane %v14584_v10, %v14031_v39  ;;  %v14912_v10 = vrot.slane %v14163_v35, %v14031_v39  ;;  %v14926_v35 = vrot.slane %v14730_v45, %v14031_v39 }
 0x23e   : > { %v1584_v54 = vpop.permute.xlu0 %1583  ;;  %v14940_v45 = vrot.slane %v14250_v40, %v14031_v39  ;;  %v14954_v40 = vrot.slane %v14748_v41, %v14031_v39  ;;  %v14968_v41 = vrot.slane %v14253_v2, %v14031_v39  ;;  %v14982_v2 = vrot.slane %v14848_v57, %v14031_v39 }
 0x23f   : > { %1641 = vst.msk [vmem:[#allocation3 + $0x73] sm:$0x1] %vm591_vm1, %v1584_v54  ;;  %v1586_v29 = vpop.permute.xlu1 %1585 }
 0x240   : > { %2975 = vrot.lane.b32.xlu0 %v14315_v61, %s13929_s8  ;;  %1642 = vst.msk [vmem:[#allocation3 + $0x7b] sm:$0x1] %vm591_vm1, %v1586_v29 }
 0x241   : > { %2977 = vrot.lane.b32.xlu1 %v14322_v9, %s13929_s8  ;;  %v14884_v9 = vrot.slane %v14152_v28, %v14031_v39 }
 0x242   : > { %v1929_v62 = vpop.permute.xlu0 %1928 }
 0x243   : > { %1986 = vst.msk [vmem:[#allocation3 + $0x74] sm:$0x1] %vm591_vm1, %v1929_v62  ;;  %v1931_v36 = vpop.permute.xlu1 %1930 }
 0x244   : > { %2979 = vrot.lane.b32.xlu0 %v14092_v4, %s13929_s8  ;;  %1987 = vst.msk [vmem:[#allocation3 + $0x7c] sm:$0x1] %vm591_vm1, %v1931_v36  ;;  %v14894_v4 = vrot.slane %v14580_v27, %v14031_v39  ;;  %v14908_v27 = vrot.slane %v14149_v26, %v14031_v39  ;;  %v14922_v26 = vrot.slane %v14726_v34, %v14031_v39 }
 0x245   : > { %2981 = vrot.lane.b32.xlu1 %v14110_v12, %s13929_s8  ;;  %v14936_v34 = vrot.slane %v14233_v25, %v14031_v39  ;;  %v14950_v25 = vrot.slane %v14744_v8, %v14031_v39  ;;  %v14964_v8 = vrot.slane %v14243_v38, %v14031_v39  ;;  %v14978_v38 = vrot.slane %v14844_v50, %v14031_v39 }
 0x246   : > { %v2274_v61 = vpop.permute.xlu0 %2273 }
 0x247   : > { %2331 = vst.msk [vmem:[#allocation3 + $0x75] sm:$0x1] %vm591_vm1, %v2274_v61  ;;  %v2276_v6 = vpop.permute.xlu1 %2275 }
 0x248   : > { %3280 = vrot.lane.b32.xlu0 %v14880_v46, %s13929_s8  ;;  %2332 = vst.msk [vmem:[#allocation3 + $0x7d] sm:$0x1] %vm591_vm1, %v2276_v6 }
 0x249   : > { %3282 = vrot.lane.b32.xlu1 %v14884_v9, %s13929_s8 }
 0x24a   : > { %v2278_v12 = vpop.permute.xlu0 %2277 }
 0x24b   : > { %2333 = vst.msk [vmem:[#allocation3 + $0x85] sm:$0x1] %vm591_vm1, %v2278_v12  ;;  %v2280_v28 = vpop.permute.xlu1 %2279 }
 0x24c   : > { %3284 = vrot.lane.b32.xlu0 %v14894_v4, %s13929_s8  ;;  %2334 = vst.msk [vmem:[#allocation3 + $0x8d] sm:$0x1] %vm591_vm1, %v2280_v28 }
 0x24d   : > { %3286 = vrot.lane.b32.xlu1 %v14898_v21, %s13929_s8 }
 0x24e   : > { %v2282_v22 = vpop.permute.xlu0 %2281 }
 0x24f   : > { %2335 = vst.msk [vmem:[#allocation3 + $0x95] sm:$0x1] %vm591_vm1, %v2282_v22  ;;  %v2284_v51 = vpop.permute.xlu1 %2283 }
 0x250   : > { %3288 = vrot.lane.b32.xlu0 %v14908_v27, %s13929_s8  ;;  %2336 = vst.msk [vmem:[#allocation3 + $0x9d] sm:$0x1] %vm591_vm1, %v2284_v51 }
 0x251   : > { %3290 = vrot.lane.b32.xlu1 %v14912_v10, %s13929_s8 }
 0x252   : > { %v2286_v42 = vpop.permute.xlu0 %2285 }
 0x253   : > { %2337 = vst.msk [vmem:[#allocation3 + $0xa5] sm:$0x1] %vm591_vm1, %v2286_v42  ;;  %v2288_v49 = vpop.permute.xlu1 %2287 }
 0x254   : > { %3292 = vrot.lane.b32.xlu0 %v14922_v26, %s13929_s8  ;;  %2338 = vst.msk [vmem:[#allocation3 + $0xad] sm:$0x1] %vm591_vm1, %v2288_v49 }
 0x255   : > { %3294 = vrot.lane.b32.xlu1 %v14926_v35, %s13929_s8 }
 0x256   : > { %v2290_v13 = vpop.permute.xlu0 %2289 }
 0x257   : > { %2339 = vst.msk [vmem:[#allocation3 + $0xb5] sm:$0x1] %vm591_vm1, %v2290_v13  ;;  %v2292_v15 = vpop.permute.xlu1 %2291 }
 0x258   : > { %3296 = vrot.lane.b32.xlu0 %v14936_v34, %s13929_s8  ;;  %2340 = vst.msk [vmem:[#allocation3 + $0xbd] sm:$0x1] %vm591_vm1, %v2292_v15 }
 0x259   : > { %3298 = vrot.lane.b32.xlu1 %v14940_v45, %s13929_s8 }
 0x25a   : > { %v2591_v14 = vpop.permute.xlu0 %2590 }
 0x25b   : > { %2662 = vst.msk [vmem:[#allocation3 + $0x6] sm:$0x1] %vm591_vm1, %v2591_v14  ;;  %v2593_v16 = vpop.permute.xlu1 %2592 }
 0x25c   : > { %3300 = vrot.lane.b32.xlu0 %v14950_v25, %s13929_s8  ;;  %2663 = vst.msk [vmem:[#allocation3 + $0xe] sm:$0x1] %vm591_vm1, %v2593_v16 }
 0x25d   : > { %3302 = vrot.lane.b32.xlu1 %v14954_v40, %s13929_s8 }
 0x25e   : > { %v2595_v17 = vpop.permute.xlu0 %2594 }
 0x25f   : > { %2664 = vst.msk [vmem:[#allocation3 + $0x16] sm:$0x1] %vm591_vm1, %v2595_v17  ;;  %v2597_v18 = vpop.permute.xlu1 %2596 }
 0x260   : > { %3304 = vrot.lane.b32.xlu0 %v14964_v8, %s13929_s8  ;;  %2665 = vst.msk [vmem:[#allocation3 + $0x1e] sm:$0x1] %vm591_vm1, %v2597_v18 }
 0x261   : > { %3306 = vrot.lane.b32.xlu1 %v14968_v41, %s13929_s8 }
 0x262   : > { %v2599_v48 = vpop.permute.xlu0 %2598 }
 0x263   : > { %2666 = vst.msk [vmem:[#allocation3 + $0x26] sm:$0x1] %vm591_vm1, %v2599_v48  ;;  %v2601_v58 = vpop.permute.xlu1 %2600 }
 0x264   : > { %3308 = vrot.lane.b32.xlu0 %v14978_v38, %s13929_s8  ;;  %2667 = vst.msk [vmem:[#allocation3 + $0x2e] sm:$0x1] %vm591_vm1, %v2601_v58 }
 0x265   : > { %3310 = vrot.lane.b32.xlu1 %v14982_v2, %s13929_s8 }
 0x266   : > { %v2603_v50 = vpop.permute.xlu0 %2602 }
 0x267   : > { %2668 = vst.msk [vmem:[#allocation3 + $0x36] sm:$0x1] %vm591_vm1, %v2603_v50  ;;  %v2605_v57 = vpop.permute.xlu1 %2604 }
 0x268   : > { %3312 = vrot.lane.b32.xlu0 %v14992_v60, %s13929_s8  ;;  %2669 = vst.msk [vmem:[#allocation3 + $0x3e] sm:$0x1] %vm591_vm1, %v2605_v57 }
 0x269   : > { %3314 = vrot.lane.b32.xlu1 %v14996_v3, %s13929_s8 }
 0x26a   : > { %v2607_v55 = vpop.permute.xlu0 %2606 }
 0x26b   : > { %2670 = vst.msk [vmem:[#allocation3 + $0x46] sm:$0x1] %vm591_vm1, %v2607_v55  ;;  %v2609_v63 = vpop.permute.xlu1 %2608 }
 0x26c   : > { %3316 = vrot.lane.b32.xlu0 %v15006_v30, %s13929_s8  ;;  %2671 = vst.msk [vmem:[#allocation3 + $0x4e] sm:$0x1] %vm591_vm1, %v2609_v63 }
 0x26d   : > { %3318 = vrot.lane.b32.xlu1 %v15010_v44, %s13929_s8 }
 0x26e   : > { %v2611_v5 = vpop.permute.xlu0 %2610 }
 0x26f   : > { %2672 = vst.msk [vmem:[#allocation3 + $0x56] sm:$0x1] %vm591_vm1, %v2611_v5  ;;  %v2613_v54 = vpop.permute.xlu1 %2612 }
 0x270   : > { %3320 = vrot.lane.b32.xlu0 %v15020_v56, %s13929_s8  ;;  %2673 = vst.msk [vmem:[#allocation3 + $0x5e] sm:$0x1] %vm591_vm1, %v2613_v54 }
 0x271   : > { %3322 = vrot.lane.b32.xlu1 %v15024_v59, %s13929_s8 }
 0x272   : > { %v2615_v29 = vpop.permute.xlu0 %2614 }
 0x273   : > { %2674 = vst.msk [vmem:[#allocation3 + $0x66] sm:$0x1] %vm591_vm1, %v2615_v29  ;;  %v2617_v62 = vpop.permute.xlu1 %2616 }
 0x274   : > { %3324 = vrot.lane.b32.xlu0 %v15034_v43, %s13929_s8  ;;  %2675 = vst.msk [vmem:[#allocation3 + $0x6e] sm:$0x1] %vm591_vm1, %v2617_v62 }
 0x275   : > { %3326 = vrot.lane.b32.xlu1 %v15038_v47, %s13929_s8 }
 0x276   : > { %v2619_v36 = vpop.permute.xlu0 %2618 }
 0x277   : > { %2676 = vst.msk [vmem:[#allocation3 + $0x76] sm:$0x1] %vm591_vm1, %v2619_v36  ;;  %v2621_v11 = vpop.permute.xlu1 %2620 }
 0x278   : > { %3827 = vrot.lane.b32.xlu0 %v14880_v46, %s13923_s29  ;;  %2677 = vst.msk [vmem:[#allocation3 + $0x7e] sm:$0x1] %vm591_vm1, %v2621_v11 }
 0x279   : > { %3829 = vrot.lane.b32.xlu1 %v14884_v9, %s13923_s29 }
 0x27a   : > { %v2623_v52 = vpop.permute.xlu0 %2622 }
 0x27b   : > { %2678 = vst.msk [vmem:[#allocation3 + $0x86] sm:$0x1] %vm591_vm1, %v2623_v52  ;;  %v2625_v61 = vpop.permute.xlu1 %2624 }
 0x27c   : > { %3831 = vrot.lane.b32.xlu0 %v14894_v4, %s13923_s29  ;;  %2679 = vst.msk [vmem:[#allocation3 + $0x8e] sm:$0x1] %vm591_vm1, %v2625_v61 }
 0x27d   : > { %3833 = vrot.lane.b32.xlu1 %v14898_v21, %s13923_s29 }
 0x27e   : > { %v2627_v6 = vpop.permute.xlu0 %2626 }
 0x27f   : > { %2680 = vst.msk [vmem:[#allocation3 + $0x96] sm:$0x1] %vm591_vm1, %v2627_v6  ;;  %v2629_v12 = vpop.permute.xlu1 %2628 }
 0x280   : > { %3835 = vrot.lane.b32.xlu0 %v14908_v27, %s13923_s29  ;;  %2681 = vst.msk [vmem:[#allocation3 + $0x9e] sm:$0x1] %vm591_vm1, %v2629_v12 }
 0x281   : > { %3837 = vrot.lane.b32.xlu1 %v14912_v10, %s13923_s29 }
 0x282   : > { %v2631_v28 = vpop.permute.xlu0 %2630 }
 0x283   : > { %2682 = vst.msk [vmem:[#allocation3 + $0xa6] sm:$0x1] %vm591_vm1, %v2631_v28  ;;  %v2633_v22 = vpop.permute.xlu1 %2632 }
 0x284   : > { %3839 = vrot.lane.b32.xlu0 %v14922_v26, %s13923_s29  ;;  %2683 = vst.msk [vmem:[#allocation3 + $0xae] sm:$0x1] %vm591_vm1, %v2633_v22 }
 0x285   : > { %3841 = vrot.lane.b32.xlu1 %v14926_v35, %s13923_s29 }
 0x286   : > { %v2635_v51 = vpop.permute.xlu0 %2634 }
 0x287   : > { %2684 = vst.msk [vmem:[#allocation3 + $0xb6] sm:$0x1] %vm591_vm1, %v2635_v51  ;;  %v2637_v42 = vpop.permute.xlu1 %2636 }
 0x288   : > { %3843 = vrot.lane.b32.xlu0 %v14936_v34, %s13923_s29  ;;  %2685 = vst.msk [vmem:[#allocation3 + $0xbe] sm:$0x1] %vm591_vm1, %v2637_v42 }
 0x289   : > { %3845 = vrot.lane.b32.xlu1 %v14940_v45, %s13923_s29 }
 0x28a   : > { %v2936_v49 = vpop.permute.xlu0 %2935 }
 0x28b   : > { %3007 = vst.msk [vmem:[#allocation3 + $0x7] sm:$0x1] %vm591_vm1, %v2936_v49  ;;  %v2938_v13 = vpop.permute.xlu1 %2937 }
 0x28c   : > { %3847 = vrot.lane.b32.xlu0 %v14950_v25, %s13923_s29  ;;  %3008 = vst.msk [vmem:[#allocation3 + $0xf] sm:$0x1] %vm591_vm1, %v2938_v13 }
 0x28d   : > { %3849 = vrot.lane.b32.xlu1 %v14954_v40, %s13923_s29 }
 0x28e   : > { %v2940_v15 = vpop.permute.xlu0 %2939 }
 0x28f   : > { %3009 = vst.msk [vmem:[#allocation3 + $0x17] sm:$0x1] %vm591_vm1, %v2940_v15  ;;  %v2942_v14 = vpop.permute.xlu1 %2941 }
 0x290   : > { %3851 = vrot.lane.b32.xlu0 %v14964_v8, %s13923_s29  ;;  %3010 = vst.msk [vmem:[#allocation3 + $0x1f] sm:$0x1] %vm591_vm1, %v2942_v14 }
 0x291   : > { %3853 = vrot.lane.b32.xlu1 %v14968_v41, %s13923_s29 }
 0x292   : > { %v2944_v16 = vpop.permute.xlu0 %2943 }
 0x293   : > { %3011 = vst.msk [vmem:[#allocation3 + $0x27] sm:$0x1] %vm591_vm1, %v2944_v16  ;;  %v2946_v17 = vpop.permute.xlu1 %2945 }
 0x294   : > { %3855 = vrot.lane.b32.xlu0 %v14978_v38, %s13923_s29  ;;  %3012 = vst.msk [vmem:[#allocation3 + $0x2f] sm:$0x1] %vm591_vm1, %v2946_v17 }
 0x295   : > { %3857 = vrot.lane.b32.xlu1 %v14982_v2, %s13923_s29 }
 0x296   : > { %v2948_v18 = vpop.permute.xlu0 %2947 }
 0x297   : > { %3013 = vst.msk [vmem:[#allocation3 + $0x37] sm:$0x1] %vm591_vm1, %v2948_v18  ;;  %v2950_v48 = vpop.permute.xlu1 %2949 }
 0x298   : > { %3859 = vrot.lane.b32.xlu0 %v14992_v60, %s13923_s29  ;;  %3014 = vst.msk [vmem:[#allocation3 + $0x3f] sm:$0x1] %vm591_vm1, %v2950_v48 }
 0x299   : > { %3861 = vrot.lane.b32.xlu1 %v14996_v3, %s13923_s29 }
 0x29a   : > { %v2952_v58 = vpop.permute.xlu0 %2951 }
 0x29b   : > { %3015 = vst.msk [vmem:[#allocation3 + $0x47] sm:$0x1] %vm591_vm1, %v2952_v58  ;;  %v2954_v50 = vpop.permute.xlu1 %2953 }
 0x29c   : > { %3863 = vrot.lane.b32.xlu0 %v15006_v30, %s13923_s29  ;;  %3016 = vst.msk [vmem:[#allocation3 + $0x4f] sm:$0x1] %vm591_vm1, %v2954_v50 }
 0x29d   : > { %3865 = vrot.lane.b32.xlu1 %v15010_v44, %s13923_s29 }
 0x29e   : > { %v2956_v57 = vpop.permute.xlu0 %2955 }
 0x29f   : > { %3017 = vst.msk [vmem:[#allocation3 + $0x57] sm:$0x1] %vm591_vm1, %v2956_v57  ;;  %v2958_v55 = vpop.permute.xlu1 %2957 }
 0x2a0   : > { %3867 = vrot.lane.b32.xlu0 %v15020_v56, %s13923_s29  ;;  %3018 = vst.msk [vmem:[#allocation3 + $0x5f] sm:$0x1] %vm591_vm1, %v2958_v55 }
 0x2a1   : > { %3869 = vrot.lane.b32.xlu1 %v15024_v59, %s13923_s29 }
 0x2a2   : > { %v2960_v63 = vpop.permute.xlu0 %2959 }
 0x2a3   : > { %3019 = vst.msk [vmem:[#allocation3 + $0x67] sm:$0x1] %vm591_vm1, %v2960_v63  ;;  %v2962_v5 = vpop.permute.xlu1 %2961 }
 0x2a4   : > { %3871 = vrot.lane.b32.xlu0 %v15034_v43, %s13923_s29  ;;  %3020 = vst.msk [vmem:[#allocation3 + $0x6f] sm:$0x1] %vm591_vm1, %v2962_v5 }
 0x2a5   : > { %3873 = vrot.lane.b32.xlu1 %v15038_v47, %s13923_s29 }
 0x2a6   : > { %v2964_v54 = vpop.permute.xlu0 %2963 }
 0x2a7   : > { %3021 = vst.msk [vmem:[#allocation3 + $0x77] sm:$0x1] %vm591_vm1, %v2964_v54  ;;  %v2966_v29 = vpop.permute.xlu1 %2965 }
 0x2a8   : > { %4172 = vrot.lane.b32.xlu0 %v14880_v46, %s13924_s30  ;;  %3022 = vst.msk [vmem:[#allocation3 + $0x7f] sm:$0x1] %vm591_vm1, %v2966_v29 }
 0x2a9   : > { %4174 = vrot.lane.b32.xlu1 %v14884_v9, %s13924_s30 }
 0x2aa   : > { %v2968_v62 = vpop.permute.xlu0 %2967 }
 0x2ab   : > { %3023 = vst.msk [vmem:[#allocation3 + $0x87] sm:$0x1] %vm591_vm1, %v2968_v62  ;;  %v2970_v36 = vpop.permute.xlu1 %2969 }
 0x2ac   : > { %4176 = vrot.lane.b32.xlu0 %v14894_v4, %s13924_s30  ;;  %3024 = vst.msk [vmem:[#allocation3 + $0x8f] sm:$0x1] %vm591_vm1, %v2970_v36 }
 0x2ad   : > { %4178 = vrot.lane.b32.xlu1 %v14898_v21, %s13924_s30 }
 0x2ae   : > { %v2972_v11 = vpop.permute.xlu0 %2971 }
 0x2af   : > { %3025 = vst.msk [vmem:[#allocation3 + $0x97] sm:$0x1] %vm591_vm1, %v2972_v11  ;;  %v2974_v52 = vpop.permute.xlu1 %2973 }
 0x2b0   : > { %4180 = vrot.lane.b32.xlu0 %v14908_v27, %s13924_s30  ;;  %3026 = vst.msk [vmem:[#allocation3 + $0x9f] sm:$0x1] %vm591_vm1, %v2974_v52 }
 0x2b1   : > { %4182 = vrot.lane.b32.xlu1 %v14912_v10, %s13924_s30 }
 0x2b2   : > { %v2976_v61 = vpop.permute.xlu0 %2975 }
 0x2b3   : > { %3027 = vst.msk [vmem:[#allocation3 + $0xa7] sm:$0x1] %vm591_vm1, %v2976_v61  ;;  %v2978_v6 = vpop.permute.xlu1 %2977 }
 0x2b4   : > { %4184 = vrot.lane.b32.xlu0 %v14922_v26, %s13924_s30  ;;  %3028 = vst.msk [vmem:[#allocation3 + $0xaf] sm:$0x1] %vm591_vm1, %v2978_v6 }
 0x2b5   : > { %4186 = vrot.lane.b32.xlu1 %v14926_v35, %s13924_s30 }
 0x2b6   : > { %v2980_v12 = vpop.permute.xlu0 %2979 }
 0x2b7   : > { %3029 = vst.msk [vmem:[#allocation3 + $0xb7] sm:$0x1] %vm591_vm1, %v2980_v12  ;;  %v2982_v28 = vpop.permute.xlu1 %2981 }
 0x2b8   : > { %4188 = vrot.lane.b32.xlu0 %v14936_v34, %s13924_s30  ;;  %3030 = vst.msk [vmem:[#allocation3 + $0xbf] sm:$0x1] %vm591_vm1, %v2982_v28  ;;  %v15232_v28 = vcombine.high %v14224_v19, %v14224_v19 }
 0x2b9   : > { %4190 = vrot.lane.b32.xlu1 %v14940_v45, %s13924_s30 }
 0x2ba   : > { %v3281_v22 = vpop.permute.xlu0 %3280 }
 0x2bb   : > { %3353 = vst.msk [vmem:[#allocation3] sm:$0x1] %vm3352_vm2, %v3281_v22  ;;  %v3283_v51 = vpop.permute.xlu1 %3282 }
 0x2bc   : > { %4192 = vrot.lane.b32.xlu0 %v14950_v25, %s13924_s30  ;;  %3354 = vst.msk [vmem:[#allocation3 + $0x8] sm:$0x1] %vm3352_vm2, %v3283_v51  ;;  %v15236_v51 = vcombine.high %v14237_v32, %v14237_v32 }
 0x2bd   : > { %4194 = vrot.lane.b32.xlu1 %v14954_v40, %s13924_s30 }
 0x2be   : > { %v3285_v42 = vpop.permute.xlu0 %3284 }
 0x2bf   : > { %3355 = vst.msk [vmem:[#allocation3 + $0x10] sm:$0x1] %vm3352_vm2, %v3285_v42  ;;  %v3287_v49 = vpop.permute.xlu1 %3286 }
 0x2c0   : > { %4196 = vrot.lane.b32.xlu0 %v14964_v8, %s13924_s30  ;;  %3356 = vst.msk [vmem:[#allocation3 + $0x18] sm:$0x1] %vm3352_vm2, %v3287_v49 }
 0x2c1   : > { %4198 = vrot.lane.b32.xlu1 %v14968_v41, %s13924_s30 }
 0x2c2   : > { %v3289_v13 = vpop.permute.xlu0 %3288 }
 0x2c3   : > { %3357 = vst.msk [vmem:[#allocation3 + $0x20] sm:$0x1] %vm3352_vm2, %v3289_v13  ;;  %v3291_v15 = vpop.permute.xlu1 %3290 }
 0x2c4   : > { %4200 = vrot.lane.b32.xlu0 %v14978_v38, %s13924_s30  ;;  %3358 = vst.msk [vmem:[#allocation3 + $0x28] sm:$0x1] %vm3352_vm2, %v3291_v15  ;;  %v15260_v15 = vcombine.high %v14227_v20, %v14227_v20 }
 0x2c5   : > { %4202 = vrot.lane.b32.xlu1 %v14982_v2, %s13924_s30 }
 0x2c6   : > { %v3293_v14 = vpop.permute.xlu0 %3292 }
 0x2c7   : > { %3359 = vst.msk [vmem:[#allocation3 + $0x30] sm:$0x1] %vm3352_vm2, %v3293_v14  ;;  %v3295_v16 = vpop.permute.xlu1 %3294 }
 0x2c8   : > { %4204 = vrot.lane.b32.xlu0 %v14992_v60, %s13924_s30  ;;  %3360 = vst.msk [vmem:[#allocation3 + $0x38] sm:$0x1] %vm3352_vm2, %v3295_v16  ;;  %v15264_v16 = vcombine.high %v14240_v33, %v14240_v33 }
 0x2c9   : > { %4206 = vrot.lane.b32.xlu1 %v14996_v3, %s13924_s30 }
 0x2ca   : > { %v3297_v17 = vpop.permute.xlu0 %3296 }
 0x2cb   : > { %3361 = vst.msk [vmem:[#allocation3 + $0x40] sm:$0x1] %vm3352_vm2, %v3297_v17  ;;  %v3299_v18 = vpop.permute.xlu1 %3298 }
 0x2cc   : > { %4208 = vrot.lane.b32.xlu0 %v15006_v30, %s13924_s30  ;;  %3362 = vst.msk [vmem:[#allocation3 + $0x48] sm:$0x1] %vm3352_vm2, %v3299_v18 }
 0x2cd   : > { %4210 = vrot.lane.b32.xlu1 %v15010_v44, %s13924_s30 }
 0x2ce   : > { %v3301_v48 = vpop.permute.xlu0 %3300 }
 0x2cf   : > { %3363 = vst.msk [vmem:[#allocation3 + $0x50] sm:$0x1] %vm3352_vm2, %v3301_v48  ;;  %v3303_v58 = vpop.permute.xlu1 %3302 }
 0x2d0   : > { %4212 = vrot.lane.b32.xlu0 %v15020_v56, %s13924_s30  ;;  %3364 = vst.msk [vmem:[#allocation3 + $0x58] sm:$0x1] %vm3352_vm2, %v3303_v58  ;;  %v15288_v58 = vcombine.high %v14264_v0, %v14264_v0 }
 0x2d1   : > { %4214 = vrot.lane.b32.xlu1 %v15024_v59, %s13924_s30 }
 0x2d2   : > { %v3305_v50 = vpop.permute.xlu0 %3304 }
 0x2d3   : > { %3365 = vst.msk [vmem:[#allocation3 + $0x60] sm:$0x1] %vm3352_vm2, %v3305_v50  ;;  %v3307_v57 = vpop.permute.xlu1 %3306 }
 0x2d4   : > { %4216 = vrot.lane.b32.xlu0 %v15034_v43, %s13924_s30  ;;  %3366 = vst.msk [vmem:[#allocation3 + $0x68] sm:$0x1] %vm3352_vm2, %v3307_v57  ;;  %v15292_v57 = vcombine.high %v14276_v7, %v14276_v7 }
 0x2d5   : > { %4218 = vrot.lane.b32.xlu1 %v15038_v47, %s13924_s30 }
 0x2d6   : > { %v3309_v55 = vpop.permute.xlu0 %3308 }
 0x2d7   : > { %3367 = vst.msk [vmem:[#allocation3 + $0x70] sm:$0x1] %vm3352_vm2, %v3309_v55  ;;  %v3311_v63 = vpop.permute.xlu1 %3310 }
 0x2d8   : > { %4517 = vrot.lane.b32.xlu0 %v14880_v46, %s13925_s4  ;;  %3368 = vst.msk [vmem:[#allocation3 + $0x78] sm:$0x1] %vm3352_vm2, %v3311_v63 }
 0x2d9   : > { %4519 = vrot.lane.b32.xlu1 %v14884_v9, %s13925_s4 }
 0x2da   : > { %v3313_v5 = vpop.permute.xlu0 %3312 }
 0x2db   : > { %3369 = vst.msk [vmem:[#allocation3 + $0x80] sm:$0x1] %vm3352_vm2, %v3313_v5  ;;  %v3315_v54 = vpop.permute.xlu1 %3314 }
 0x2dc   : > { %4521 = vrot.lane.b32.xlu0 %v14894_v4, %s13925_s4  ;;  %3370 = vst.msk [vmem:[#allocation3 + $0x88] sm:$0x1] %vm3352_vm2, %v3315_v54  ;;  %v15316_v54 = vcombine.high %v14267_v1, %v14267_v1 }
 0x2dd   : > { %4523 = vrot.lane.b32.xlu1 %v14898_v21, %s13925_s4 }
 0x2de   : > { %v3317_v29 = vpop.permute.xlu0 %3316 }
 0x2df   : > { %3371 = vst.msk [vmem:[#allocation3 + $0x90] sm:$0x1] %vm3352_vm2, %v3317_v29  ;;  %v3319_v62 = vpop.permute.xlu1 %3318 }
 0x2e0   : > { %4525 = vrot.lane.b32.xlu0 %v14908_v27, %s13925_s4  ;;  %3372 = vst.msk [vmem:[#allocation3 + $0x98] sm:$0x1] %vm3352_vm2, %v3319_v62  ;;  %v15320_v62 = vcombine.high %v14279_v24, %v14279_v24 }
 0x2e1   : > { %4527 = vrot.lane.b32.xlu1 %v14912_v10, %s13925_s4 }
 0x2e2   : > { %v3321_v36 = vpop.permute.xlu0 %3320 }
 0x2e3   : > { %3373 = vst.msk [vmem:[#allocation3 + $0xa0] sm:$0x1] %vm3352_vm2, %v3321_v36  ;;  %v3323_v11 = vpop.permute.xlu1 %3322 }
 0x2e4   : > { %4529 = vrot.lane.b32.xlu0 %v14922_v26, %s13925_s4  ;;  %3374 = vst.msk [vmem:[#allocation3 + $0xa8] sm:$0x1] %vm3352_vm2, %v3323_v11 }
 0x2e5   : > { %4531 = vrot.lane.b32.xlu1 %v14926_v35, %s13925_s4 }
 0x2e6   : > { %v3325_v52 = vpop.permute.xlu0 %3324 }
 0x2e7   : > { %3375 = vst.msk [vmem:[#allocation3 + $0xb0] sm:$0x1] %vm3352_vm2, %v3325_v52  ;;  %v3327_v61 = vpop.permute.xlu1 %3326 }
 0x2e8   : > { %4533 = vrot.lane.b32.xlu0 %v14936_v34, %s13925_s4  ;;  %3376 = vst.msk [vmem:[#allocation3 + $0xb8] sm:$0x1] %vm3352_vm2, %v3327_v61  ;;  %v15344_v61 = vcombine.high %v14339_v23, %v14339_v23 }
 0x2e9   : > { %4535 = vrot.lane.b32.xlu1 %v14940_v45, %s13925_s4 }
 0x2ea   : > { %v3828_v6 = vpop.permute.xlu0 %3827 }
 0x2eb   : > { %3899 = vst.msk [vmem:[#allocation3 + $0x2] sm:$0x1] %vm3352_vm2, %v3828_v6  ;;  %v3830_v12 = vpop.permute.xlu1 %3829 }
 0x2ec   : > { %4537 = vrot.lane.b32.xlu0 %v14950_v25, %s13925_s4  ;;  %3900 = vst.msk [vmem:[#allocation3 + $0xa] sm:$0x1] %vm3352_vm2, %v3830_v12  ;;  %v15348_v12 = vcombine.high %v14349_v31, %v14349_v31 }
 0x2ed   : > { %6516 = vst.msk [vmem:[#allocation3 + $0x2] sm:$0x1] %vm5969_vm3, %v14224_v19  ;;  %4539 = vrot.lane.b32.xlu1 %v14954_v40, %s13925_s4  ;;  %6517 = vst.msk [vmem:[#allocation3 + $0xa] sm:$0x1] %vm5969_vm3, %v14237_v32 }
 0x2ee   : > { %v3832_v22 = vpop.permute.xlu0 %3831 }
 0x2ef   : > { %3901 = vst.msk [vmem:[#allocation3 + $0x12] sm:$0x1] %vm3352_vm2, %v3832_v22  ;;  %v3834_v42 = vpop.permute.xlu1 %3833 }
 0x2f0   : > { %4541 = vrot.lane.b32.xlu0 %v14964_v8, %s13925_s4  ;;  %3902 = vst.msk [vmem:[#allocation3 + $0x1a] sm:$0x1] %vm3352_vm2, %v3834_v42 }
 0x2f1   : > { %6518 = vst.msk [vmem:[#allocation3 + $0x12] sm:$0x1] %vm5969_vm3, %v15232_v28  ;;  %4543 = vrot.lane.b32.xlu1 %v14968_v41, %s13925_s4  ;;  %6519 = vst.msk [vmem:[#allocation3 + $0x1a] sm:$0x1] %vm5969_vm3, %v15236_v51 }
 0x2f2   : > { %v3836_v49 = vpop.permute.xlu0 %3835 }
 0x2f3   : > { %3903 = vst.msk [vmem:[#allocation3 + $0x22] sm:$0x1] %vm3352_vm2, %v3836_v49  ;;  %v3838_v13 = vpop.permute.xlu1 %3837 }
 0x2f4   : > { %4545 = vrot.lane.b32.xlu0 %v14978_v38, %s13925_s4  ;;  %3904 = vst.msk [vmem:[#allocation3 + $0x2a] sm:$0x1] %vm3352_vm2, %v3838_v13  ;;  %v15372_v13 = vcombine.high %v14343_v53, %v14343_v53 }
 0x2f5   : > { %6520 = vst.msk [vmem:[#allocation3 + $0x22] sm:$0x1] %vm5969_vm3, %v14227_v20  ;;  %4547 = vrot.lane.b32.xlu1 %v14982_v2, %s13925_s4  ;;  %6521 = vst.msk [vmem:[#allocation3 + $0x2a] sm:$0x1] %vm5969_vm3, %v14240_v33 }
 0x2f6   : > { %v3840_v14 = vpop.permute.xlu0 %3839 }
 0x2f7   : > { %3905 = vst.msk [vmem:[#allocation3 + $0x32] sm:$0x1] %vm3352_vm2, %v3840_v14  ;;  %v3842_v17 = vpop.permute.xlu1 %3841 }
 0x2f8   : > { %4549 = vrot.lane.b32.xlu0 %v14992_v60, %s13925_s4  ;;  %3906 = vst.msk [vmem:[#allocation3 + $0x3a] sm:$0x1] %vm3352_vm2, %v3842_v17  ;;  %v15376_v17 = vcombine.high %v14354_v37, %v14354_v37 }
 0x2f9   : > { %6522 = vst.msk [vmem:[#allocation3 + $0x32] sm:$0x1] %vm5969_vm3, %v15260_v15  ;;  %4551 = vrot.lane.b32.xlu1 %v14996_v3, %s13925_s4  ;;  %6523 = vst.msk [vmem:[#allocation3 + $0x3a] sm:$0x1] %vm5969_vm3, %v15264_v16 }
 0x2fa   : > { %v3844_v18 = vpop.permute.xlu0 %3843 }
 0x2fb   : > { %3907 = vst.msk [vmem:[#allocation3 + $0x42] sm:$0x1] %vm3352_vm2, %v3844_v18  ;;  %v3846_v48 = vpop.permute.xlu1 %3845 }
 0x2fc   : > { %4553 = vrot.lane.b32.xlu0 %v15006_v30, %s13925_s4  ;;  %3908 = vst.msk [vmem:[#allocation3 + $0x4a] sm:$0x1] %vm3352_vm2, %v3846_v48 }
 0x2fd   : > { %6524 = vst.msk [vmem:[#allocation3 + $0x42] sm:$0x1] %vm5969_vm3, %v14264_v0  ;;  %4555 = vrot.lane.b32.xlu1 %v15010_v44, %s13925_s4  ;;  %6525 = vst.msk [vmem:[#allocation3 + $0x4a] sm:$0x1] %vm5969_vm3, %v14276_v7 }
 0x2fe   : > { %v3848_v50 = vpop.permute.xlu0 %3847 }
 0x2ff   : > { %3909 = vst.msk [vmem:[#allocation3 + $0x52] sm:$0x1] %vm3352_vm2, %v3848_v50  ;;  %v3850_v55 = vpop.permute.xlu1 %3849 }
 0x300   : > { %4557 = vrot.lane.b32.xlu0 %v15020_v56, %s13925_s4  ;;  %3910 = vst.msk [vmem:[#allocation3 + $0x5a] sm:$0x1] %vm3352_vm2, %v3850_v55 }
 0x301   : > { %6526 = vst.msk [vmem:[#allocation3 + $0x52] sm:$0x1] %vm5969_vm3, %v15288_v58  ;;  %4559 = vrot.lane.b32.xlu1 %v15024_v59, %s13925_s4  ;;  %6527 = vst.msk [vmem:[#allocation3 + $0x5a] sm:$0x1] %vm5969_vm3, %v15292_v57 }
 0x302   : > { %v3852_v63 = vpop.permute.xlu0 %3851 }
 0x303   : > { %3911 = vst.msk [vmem:[#allocation3 + $0x62] sm:$0x1] %vm3352_vm2, %v3852_v63  ;;  %v3854_v5 = vpop.permute.xlu1 %3853 }
 0x304   : > { %4561 = vrot.lane.b32.xlu0 %v15034_v43, %s13925_s4  ;;  %3912 = vst.msk [vmem:[#allocation3 + $0x6a] sm:$0x1] %vm3352_vm2, %v3854_v5 }
 0x305   : > { %6528 = vst.msk [vmem:[#allocation3 + $0x62] sm:$0x1] %vm5969_vm3, %v14267_v1  ;;  %4563 = vrot.lane.b32.xlu1 %v15038_v47, %s13925_s4  ;;  %6529 = vst.msk [vmem:[#allocation3 + $0x6a] sm:$0x1] %vm5969_vm3, %v14279_v24 }
 0x306   : > { %v3856_v29 = vpop.permute.xlu0 %3855 }
 0x307   : > { %3913 = vst.msk [vmem:[#allocation3 + $0x72] sm:$0x1] %vm3352_vm2, %v3856_v29  ;;  %v3858_v36 = vpop.permute.xlu1 %3857 }
 0x308   : > { %4862 = vrot.lane.b32.xlu0 %v14880_v46, %s13926_s5  ;;  %3914 = vst.msk [vmem:[#allocation3 + $0x7a] sm:$0x1] %vm3352_vm2, %v3858_v36 }
 0x309   : > { %6530 = vst.msk [vmem:[#allocation3 + $0x72] sm:$0x1] %vm5969_vm3, %v15316_v54  ;;  %4864 = vrot.lane.b32.xlu1 %v14884_v9, %s13926_s5  ;;  %6531 = vst.msk [vmem:[#allocation3 + $0x7a] sm:$0x1] %vm5969_vm3, %v15320_v62 }
 0x30a   : > { %v3860_v11 = vpop.permute.xlu0 %3859 }
 0x30b   : > { %3915 = vst.msk [vmem:[#allocation3 + $0x82] sm:$0x1] %vm3352_vm2, %v3860_v11  ;;  %v3862_v52 = vpop.permute.xlu1 %3861 }
 0x30c   : > { %4866 = vrot.lane.b32.xlu0 %v14894_v4, %s13926_s5  ;;  %3916 = vst.msk [vmem:[#allocation3 + $0x8a] sm:$0x1] %vm3352_vm2, %v3862_v52 }
 0x30d   : > { %6532 = vst.msk [vmem:[#allocation3 + $0x82] sm:$0x1] %vm5969_vm3, %v14339_v23  ;;  %4868 = vrot.lane.b32.xlu1 %v14898_v21, %s13926_s5  ;;  %6533 = vst.msk [vmem:[#allocation3 + $0x8a] sm:$0x1] %vm5969_vm3, %v14349_v31 }
 0x30e   : > { %v3864_v6 = vpop.permute.xlu0 %3863 }
 0x30f   : > { %3917 = vst.msk [vmem:[#allocation3 + $0x92] sm:$0x1] %vm3352_vm2, %v3864_v6  ;;  %v3866_v22 = vpop.permute.xlu1 %3865 }
 0x310   : > { %4870 = vrot.lane.b32.xlu0 %v14908_v27, %s13926_s5  ;;  %3918 = vst.msk [vmem:[#allocation3 + $0x9a] sm:$0x1] %vm3352_vm2, %v3866_v22 }
 0x311   : > { %6534 = vst.msk [vmem:[#allocation3 + $0x92] sm:$0x1] %vm5969_vm3, %v15344_v61  ;;  %4872 = vrot.lane.b32.xlu1 %v14912_v10, %s13926_s5  ;;  %6535 = vst.msk [vmem:[#allocation3 + $0x9a] sm:$0x1] %vm5969_vm3, %v15348_v12 }
 0x312   : > { %v3868_v42 = vpop.permute.xlu0 %3867 }
 0x313   : > { %3919 = vst.msk [vmem:[#allocation3 + $0xa2] sm:$0x1] %vm3352_vm2, %v3868_v42  ;;  %v3870_v49 = vpop.permute.xlu1 %3869 }
 0x314   : > { %4874 = vrot.lane.b32.xlu0 %v14922_v26, %s13926_s5  ;;  %3920 = vst.msk [vmem:[#allocation3 + $0xaa] sm:$0x1] %vm3352_vm2, %v3870_v49 }
 0x315   : > { %6536 = vst.msk [vmem:[#allocation3 + $0xa2] sm:$0x1] %vm5969_vm3, %v14343_v53  ;;  %4876 = vrot.lane.b32.xlu1 %v14926_v35, %s13926_s5  ;;  %6537 = vst.msk [vmem:[#allocation3 + $0xaa] sm:$0x1] %vm5969_vm3, %v14354_v37 }
 0x316   : > { %v3872_v14 = vpop.permute.xlu0 %3871 }
 0x317   : > { %3921 = vst.msk [vmem:[#allocation3 + $0xb2] sm:$0x1] %vm3352_vm2, %v3872_v14  ;;  %v3874_v18 = vpop.permute.xlu1 %3873 }
 0x318   : > { %4878 = vrot.lane.b32.xlu0 %v14936_v34, %s13926_s5  ;;  %3922 = vst.msk [vmem:[#allocation3 + $0xba] sm:$0x1] %vm3352_vm2, %v3874_v18 }
 0x319   : > { %6538 = vst.msk [vmem:[#allocation3 + $0xb2] sm:$0x1] %vm5969_vm3, %v15372_v13  ;;  %4880 = vrot.lane.b32.xlu1 %v14940_v45, %s13926_s5  ;;  %6539 = vst.msk [vmem:[#allocation3 + $0xba] sm:$0x1] %vm5969_vm3, %v15376_v17 }
 0x31a   : > { %v4173_v48 = vpop.permute.xlu0 %4172 }
 0x31b   : > { %4244 = vst.msk [vmem:[#allocation3 + $0x3] sm:$0x1] %vm3352_vm2, %v4173_v48  ;;  %v4175_v50 = vpop.permute.xlu1 %4174 }
 0x31c   : > { %4882 = vrot.lane.b32.xlu0 %v14950_v25, %s13926_s5  ;;  %4245 = vst.msk [vmem:[#allocation3 + $0xb] sm:$0x1] %vm3352_vm2, %v4175_v50 }
 0x31d   : > { %4884 = vrot.lane.b32.xlu1 %v14954_v40, %s13926_s5 }
 0x31e   : > { %v4177_v55 = vpop.permute.xlu0 %4176 }
 0x31f   : > { %4246 = vst.msk [vmem:[#allocation3 + $0x13] sm:$0x1] %vm3352_vm2, %v4177_v55  ;;  %v4179_v63 = vpop.permute.xlu1 %4178 }
 0x320   : > { %4886 = vrot.lane.b32.xlu0 %v14964_v8, %s13926_s5  ;;  %4247 = vst.msk [vmem:[#allocation3 + $0x1b] sm:$0x1] %vm3352_vm2, %v4179_v63 }
 0x321   : > { %4888 = vrot.lane.b32.xlu1 %v14968_v41, %s13926_s5 }
 0x322   : > { %v4181_v5 = vpop.permute.xlu0 %4180 }
 0x323   : > { %4248 = vst.msk [vmem:[#allocation3 + $0x23] sm:$0x1] %vm3352_vm2, %v4181_v5  ;;  %v4183_v29 = vpop.permute.xlu1 %4182 }
 0x324   : > { %4890 = vrot.lane.b32.xlu0 %v14978_v38, %s13926_s5  ;;  %4249 = vst.msk [vmem:[#allocation3 + $0x2b] sm:$0x1] %vm3352_vm2, %v4183_v29 }
 0x325   : > { %4892 = vrot.lane.b32.xlu1 %v14982_v2, %s13926_s5 }
 0x326   : > { %v4185_v36 = vpop.permute.xlu0 %4184 }
 0x327   : > { %4250 = vst.msk [vmem:[#allocation3 + $0x33] sm:$0x1] %vm3352_vm2, %v4185_v36  ;;  %v4187_v11 = vpop.permute.xlu1 %4186 }
 0x328   : > { %4894 = vrot.lane.b32.xlu0 %v14992_v60, %s13926_s5  ;;  %4251 = vst.msk [vmem:[#allocation3 + $0x3b] sm:$0x1] %vm3352_vm2, %v4187_v11 }
 0x329   : > { %4896 = vrot.lane.b32.xlu1 %v14996_v3, %s13926_s5 }
 0x32a   : > { %v4189_v52 = vpop.permute.xlu0 %4188 }
 0x32b   : > { %4252 = vst.msk [vmem:[#allocation3 + $0x43] sm:$0x1] %vm3352_vm2, %v4189_v52  ;;  %v4191_v6 = vpop.permute.xlu1 %4190 }
 0x32c   : > { %4898 = vrot.lane.b32.xlu0 %v15006_v30, %s13926_s5  ;;  %4253 = vst.msk [vmem:[#allocation3 + $0x4b] sm:$0x1] %vm3352_vm2, %v4191_v6 }
 0x32d   : > { %4900 = vrot.lane.b32.xlu1 %v15010_v44, %s13926_s5 }
 0x32e   : > { %v4193_v22 = vpop.permute.xlu0 %4192 }
 0x32f   : > { %4254 = vst.msk [vmem:[#allocation3 + $0x53] sm:$0x1] %vm3352_vm2, %v4193_v22  ;;  %v4195_v42 = vpop.permute.xlu1 %4194 }
 0x330   : > { %4902 = vrot.lane.b32.xlu0 %v15020_v56, %s13926_s5  ;;  %4255 = vst.msk [vmem:[#allocation3 + $0x5b] sm:$0x1] %vm3352_vm2, %v4195_v42 }
 0x331   : > { %4904 = vrot.lane.b32.xlu1 %v15024_v59, %s13926_s5 }
 0x332   : > { %v4197_v49 = vpop.permute.xlu0 %4196 }
 0x333   : > { %4256 = vst.msk [vmem:[#allocation3 + $0x63] sm:$0x1] %vm3352_vm2, %v4197_v49  ;;  %v4199_v14 = vpop.permute.xlu1 %4198 }
 0x334   : > { %4906 = vrot.lane.b32.xlu0 %v15034_v43, %s13926_s5  ;;  %4257 = vst.msk [vmem:[#allocation3 + $0x6b] sm:$0x1] %vm3352_vm2, %v4199_v14 }
 0x335   : > { %4908 = vrot.lane.b32.xlu1 %v15038_v47, %s13926_s5 }
 0x336   : > { %v4201_v18 = vpop.permute.xlu0 %4200 }
 0x337   : > { %4258 = vst.msk [vmem:[#allocation3 + $0x73] sm:$0x1] %vm3352_vm2, %v4201_v18  ;;  %v4203_v48 = vpop.permute.xlu1 %4202 }
 0x338   : > { %5207 = vrot.lane.b32.xlu0 %v14880_v46, %s13927_s6  ;;  %4259 = vst.msk [vmem:[#allocation3 + $0x7b] sm:$0x1] %vm3352_vm2, %v4203_v48 }
 0x339   : > { %5209 = vrot.lane.b32.xlu1 %v14884_v9, %s13927_s6 }
 0x33a   : > { %v4205_v50 = vpop.permute.xlu0 %4204 }
 0x33b   : > { %4260 = vst.msk [vmem:[#allocation3 + $0x83] sm:$0x1] %vm3352_vm2, %v4205_v50  ;;  %v4207_v55 = vpop.permute.xlu1 %4206 }
 0x33c   : > { %5211 = vrot.lane.b32.xlu0 %v14894_v4, %s13927_s6  ;;  %4261 = vst.msk [vmem:[#allocation3 + $0x8b] sm:$0x1] %vm3352_vm2, %v4207_v55 }
 0x33d   : > { %5213 = vrot.lane.b32.xlu1 %v14898_v21, %s13927_s6 }
 0x33e   : > { %v4209_v63 = vpop.permute.xlu0 %4208 }
 0x33f   : > { %4262 = vst.msk [vmem:[#allocation3 + $0x93] sm:$0x1] %vm3352_vm2, %v4209_v63  ;;  %v4211_v5 = vpop.permute.xlu1 %4210 }
 0x340   : > { %5215 = vrot.lane.b32.xlu0 %v14908_v27, %s13927_s6  ;;  %4263 = vst.msk [vmem:[#allocation3 + $0x9b] sm:$0x1] %vm3352_vm2, %v4211_v5 }
 0x341   : > { %5217 = vrot.lane.b32.xlu1 %v14912_v10, %s13927_s6 }
 0x342   : > { %v4213_v29 = vpop.permute.xlu0 %4212 }
 0x343   : > { %4264 = vst.msk [vmem:[#allocation3 + $0xa3] sm:$0x1] %vm3352_vm2, %v4213_v29  ;;  %v4215_v36 = vpop.permute.xlu1 %4214 }
 0x344   : > { %5219 = vrot.lane.b32.xlu0 %v14922_v26, %s13927_s6  ;;  %4265 = vst.msk [vmem:[#allocation3 + $0xab] sm:$0x1] %vm3352_vm2, %v4215_v36 }
 0x345   : > { %5221 = vrot.lane.b32.xlu1 %v14926_v35, %s13927_s6 }
 0x346   : > { %v4217_v11 = vpop.permute.xlu0 %4216 }
 0x347   : > { %4266 = vst.msk [vmem:[#allocation3 + $0xb3] sm:$0x1] %vm3352_vm2, %v4217_v11  ;;  %v4219_v52 = vpop.permute.xlu1 %4218 }
 0x348   : > { %5223 = vrot.lane.b32.xlu0 %v14936_v34, %s13927_s6  ;;  %4267 = vst.msk [vmem:[#allocation3 + $0xbb] sm:$0x1] %vm3352_vm2, %v4219_v52 }
 0x349   : > { %5225 = vrot.lane.b32.xlu1 %v14940_v45, %s13927_s6 }
 0x34a   : > { %v4518_v6 = vpop.permute.xlu0 %4517 }
 0x34b   : > { %4589 = vst.msk [vmem:[#allocation3 + $0x4] sm:$0x1] %vm3352_vm2, %v4518_v6  ;;  %v4520_v22 = vpop.permute.xlu1 %4519 }
 0x34c   : > { %5227 = vrot.lane.b32.xlu0 %v14950_v25, %s13927_s6  ;;  %4590 = vst.msk [vmem:[#allocation3 + $0xc] sm:$0x1] %vm3352_vm2, %v4520_v22 }
 0x34d   : > { %5229 = vrot.lane.b32.xlu1 %v14954_v40, %s13927_s6 }
 0x34e   : > { %v4522_v42 = vpop.permute.xlu0 %4521 }
 0x34f   : > { %4591 = vst.msk [vmem:[#allocation3 + $0x14] sm:$0x1] %vm3352_vm2, %v4522_v42  ;;  %v4524_v49 = vpop.permute.xlu1 %4523 }
 0x350   : > { %5231 = vrot.lane.b32.xlu0 %v14964_v8, %s13927_s6  ;;  %4592 = vst.msk [vmem:[#allocation3 + $0x1c] sm:$0x1] %vm3352_vm2, %v4524_v49 }
 0x351   : > { %5233 = vrot.lane.b32.xlu1 %v14968_v41, %s13927_s6 }
 0x352   : > { %v4526_v14 = vpop.permute.xlu0 %4525 }
 0x353   : > { %4593 = vst.msk [vmem:[#allocation3 + $0x24] sm:$0x1] %vm3352_vm2, %v4526_v14  ;;  %v4528_v18 = vpop.permute.xlu1 %4527 }
 0x354   : > { %5235 = vrot.lane.b32.xlu0 %v14978_v38, %s13927_s6  ;;  %4594 = vst.msk [vmem:[#allocation3 + $0x2c] sm:$0x1] %vm3352_vm2, %v4528_v18 }
 0x355   : > { %5237 = vrot.lane.b32.xlu1 %v14982_v2, %s13927_s6 }
 0x356   : > { %v4530_v48 = vpop.permute.xlu0 %4529 }
 0x357   : > { %4595 = vst.msk [vmem:[#allocation3 + $0x34] sm:$0x1] %vm3352_vm2, %v4530_v48  ;;  %v4532_v50 = vpop.permute.xlu1 %4531 }
 0x358   : > { %5239 = vrot.lane.b32.xlu0 %v14992_v60, %s13927_s6  ;;  %4596 = vst.msk [vmem:[#allocation3 + $0x3c] sm:$0x1] %vm3352_vm2, %v4532_v50 }
 0x359   : > { %5241 = vrot.lane.b32.xlu1 %v14996_v3, %s13927_s6 }
 0x35a   : > { %v4534_v55 = vpop.permute.xlu0 %4533 }
 0x35b   : > { %4597 = vst.msk [vmem:[#allocation3 + $0x44] sm:$0x1] %vm3352_vm2, %v4534_v55  ;;  %v4536_v63 = vpop.permute.xlu1 %4535 }
 0x35c   : > { %5243 = vrot.lane.b32.xlu0 %v15006_v30, %s13927_s6  ;;  %4598 = vst.msk [vmem:[#allocation3 + $0x4c] sm:$0x1] %vm3352_vm2, %v4536_v63 }
 0x35d   : > { %5245 = vrot.lane.b32.xlu1 %v15010_v44, %s13927_s6 }
 0x35e   : > { %v4538_v5 = vpop.permute.xlu0 %4537 }
 0x35f   : > { %4599 = vst.msk [vmem:[#allocation3 + $0x54] sm:$0x1] %vm3352_vm2, %v4538_v5  ;;  %v4540_v29 = vpop.permute.xlu1 %4539 }
 0x360   : > { %5247 = vrot.lane.b32.xlu0 %v15020_v56, %s13927_s6  ;;  %4600 = vst.msk [vmem:[#allocation3 + $0x5c] sm:$0x1] %vm3352_vm2, %v4540_v29 }
 0x361   : > { %5249 = vrot.lane.b32.xlu1 %v15024_v59, %s13927_s6 }
 0x362   : > { %v4542_v36 = vpop.permute.xlu0 %4541 }
 0x363   : > { %4601 = vst.msk [vmem:[#allocation3 + $0x64] sm:$0x1] %vm3352_vm2, %v4542_v36  ;;  %v4544_v11 = vpop.permute.xlu1 %4543 }
 0x364   : > { %5251 = vrot.lane.b32.xlu0 %v15034_v43, %s13927_s6  ;;  %4602 = vst.msk [vmem:[#allocation3 + $0x6c] sm:$0x1] %vm3352_vm2, %v4544_v11 }
 0x365   : > { %5253 = vrot.lane.b32.xlu1 %v15038_v47, %s13927_s6 }
 0x366   : > { %v4546_v52 = vpop.permute.xlu0 %4545 }
 0x367   : > { %4603 = vst.msk [vmem:[#allocation3 + $0x74] sm:$0x1] %vm3352_vm2, %v4546_v52  ;;  %v4548_v6 = vpop.permute.xlu1 %4547 }
 0x368   : > { %5552 = vrot.lane.b32.xlu0 %v14880_v46, %s13928_s7  ;;  %4604 = vst.msk [vmem:[#allocation3 + $0x7c] sm:$0x1] %vm3352_vm2, %v4548_v6 }
 0x369   : > { %5554 = vrot.lane.b32.xlu1 %v14884_v9, %s13928_s7 }
 0x36a   : > { %v4550_v22 = vpop.permute.xlu0 %4549 }
 0x36b   : > { %4605 = vst.msk [vmem:[#allocation3 + $0x84] sm:$0x1] %vm3352_vm2, %v4550_v22  ;;  %v4552_v42 = vpop.permute.xlu1 %4551 }
 0x36c   : > { %5556 = vrot.lane.b32.xlu0 %v14894_v4, %s13928_s7  ;;  %4606 = vst.msk [vmem:[#allocation3 + $0x8c] sm:$0x1] %vm3352_vm2, %v4552_v42 }
 0x36d   : > { %5558 = vrot.lane.b32.xlu1 %v14898_v21, %s13928_s7 }
 0x36e   : > { %v4554_v49 = vpop.permute.xlu0 %4553 }
 0x36f   : > { %4607 = vst.msk [vmem:[#allocation3 + $0x94] sm:$0x1] %vm3352_vm2, %v4554_v49  ;;  %v4556_v46 = vpop.permute.xlu1 %4555 }
 0x370   : > { %5560 = vrot.lane.b32.xlu0 %v14908_v27, %s13928_s7  ;;  %4608 = vst.msk [vmem:[#allocation3 + $0x9c] sm:$0x1] %vm3352_vm2, %v4556_v46 }
 0x371   : > { %5562 = vrot.lane.b32.xlu1 %v14912_v10, %s13928_s7 }
 0x372   : > { %v4558_v9 = vpop.permute.xlu0 %4557 }
 0x373   : > { %4609 = vst.msk [vmem:[#allocation3 + $0xa4] sm:$0x1] %vm3352_vm2, %v4558_v9  ;;  %v4560_v4 = vpop.permute.xlu1 %4559 }
 0x374   : > { %5564 = vrot.lane.b32.xlu0 %v14922_v26, %s13928_s7  ;;  %4610 = vst.msk [vmem:[#allocation3 + $0xac] sm:$0x1] %vm3352_vm2, %v4560_v4 }
 0x375   : > { %5566 = vrot.lane.b32.xlu1 %v14926_v35, %s13928_s7 }
 0x376   : > { %v4562_v21 = vpop.permute.xlu0 %4561 }
 0x377   : > { %4611 = vst.msk [vmem:[#allocation3 + $0xb4] sm:$0x1] %vm3352_vm2, %v4562_v21  ;;  %v4564_v27 = vpop.permute.xlu1 %4563 }
 0x378   : > { %5568 = vrot.lane.b32.xlu0 %v14936_v34, %s13928_s7  ;;  %4612 = vst.msk [vmem:[#allocation3 + $0xbc] sm:$0x1] %vm3352_vm2, %v4564_v27 }
 0x379   : > { %5570 = vrot.lane.b32.xlu1 %v14940_v45, %s13928_s7 }
 0x37a   : > { %v4863_v10 = vpop.permute.xlu0 %4862 }
 0x37b   : > { %4934 = vst.msk [vmem:[#allocation3 + $0x5] sm:$0x1] %vm3352_vm2, %v4863_v10  ;;  %v4865_v26 = vpop.permute.xlu1 %4864 }
 0x37c   : > { %5572 = vrot.lane.b32.xlu0 %v14950_v25, %s13928_s7  ;;  %4935 = vst.msk [vmem:[#allocation3 + $0xd] sm:$0x1] %vm3352_vm2, %v4865_v26 }
 0x37d   : > { %5574 = vrot.lane.b32.xlu1 %v14954_v40, %s13928_s7 }
 0x37e   : > { %v4867_v35 = vpop.permute.xlu0 %4866 }
 0x37f   : > { %4936 = vst.msk [vmem:[#allocation3 + $0x15] sm:$0x1] %vm3352_vm2, %v4867_v35  ;;  %v4869_v34 = vpop.permute.xlu1 %4868 }
 0x380   : > { %5576 = vrot.lane.b32.xlu0 %v14964_v8, %s13928_s7  ;;  %4937 = vst.msk [vmem:[#allocation3 + $0x1d] sm:$0x1] %vm3352_vm2, %v4869_v34 }
 0x381   : > { %5578 = vrot.lane.b32.xlu1 %v14968_v41, %s13928_s7 }
 0x382   : > { %v4871_v45 = vpop.permute.xlu0 %4870 }
 0x383   : > { %4938 = vst.msk [vmem:[#allocation3 + $0x25] sm:$0x1] %vm3352_vm2, %v4871_v45  ;;  %v4873_v25 = vpop.permute.xlu1 %4872 }
 0x384   : > { %5580 = vrot.lane.b32.xlu0 %v14978_v38, %s13928_s7  ;;  %4939 = vst.msk [vmem:[#allocation3 + $0x2d] sm:$0x1] %vm3352_vm2, %v4873_v25 }
 0x385   : > { %5582 = vrot.lane.b32.xlu1 %v14982_v2, %s13928_s7 }
 0x386   : > { %v4875_v40 = vpop.permute.xlu0 %4874 }
 0x387   : > { %4940 = vst.msk [vmem:[#allocation3 + $0x35] sm:$0x1] %vm3352_vm2, %v4875_v40  ;;  %v4877_v8 = vpop.permute.xlu1 %4876 }
 0x388   : > { %5584 = vrot.lane.b32.xlu0 %v14992_v60, %s13928_s7  ;;  %4941 = vst.msk [vmem:[#allocation3 + $0x3d] sm:$0x1] %vm3352_vm2, %v4877_v8 }
 0x389   : > { %5586 = vrot.lane.b32.xlu1 %v14996_v3, %s13928_s7 }
 0x38a   : > { %v4879_v41 = vpop.permute.xlu0 %4878 }
 0x38b   : > { %4942 = vst.msk [vmem:[#allocation3 + $0x45] sm:$0x1] %vm3352_vm2, %v4879_v41  ;;  %v4881_v38 = vpop.permute.xlu1 %4880 }
 0x38c   : > { %5588 = vrot.lane.b32.xlu0 %v15006_v30, %s13928_s7  ;;  %4943 = vst.msk [vmem:[#allocation3 + $0x4d] sm:$0x1] %vm3352_vm2, %v4881_v38 }
 0x38d   : > { %5590 = vrot.lane.b32.xlu1 %v15010_v44, %s13928_s7  ;;  %v15576_v44 = vrot.slane %v14224_v19, %v14031_v39  ;;  %v15590_v19 = vrot.slane %v15232_v28, %v14031_v39  ;;  %v15604_v28 = vrot.slane %v14227_v20, %v14031_v39  ;;  %v15618_v20 = vrot.slane %v15260_v15, %v14031_v39 }
 0x38e   : > { %v4883_v2 = vpop.permute.xlu0 %4882  ;;  %v15632_v15 = vrot.slane %v14264_v0, %v14031_v39  ;;  %v15646_v0 = vrot.slane %v15288_v58, %v14031_v39  ;;  %v15660_v58 = vrot.slane %v14267_v1, %v14031_v39  ;;  %v15674_v1 = vrot.slane %v15316_v54, %v14031_v39 }
 0x38f   : > { %4944 = vst.msk [vmem:[#allocation3 + $0x55] sm:$0x1] %vm3352_vm2, %v4883_v2  ;;  %v4885_v60 = vpop.permute.xlu1 %4884  ;;  %v15688_v54 = vrot.slane %v14339_v23, %v14031_v39  ;;  %v15702_v23 = vrot.slane %v15344_v61, %v14031_v39  ;;  %v15716_v61 = vrot.slane %v14343_v53, %v14031_v39  ;;  %v15730_v53 = vrot.slane %v15372_v13, %v14031_v39 }
 0x390   : > { %5592 = vrot.lane.b32.xlu0 %v15020_v56, %s13928_s7  ;;  %4945 = vst.msk [vmem:[#allocation3 + $0x5d] sm:$0x1] %vm3352_vm2, %v4885_v60 }
 0x391   : > { %5594 = vrot.lane.b32.xlu1 %v15024_v59, %s13928_s7  ;;  %v15580_v59 = vrot.slane %v14237_v32, %v14031_v39  ;;  %v15594_v32 = vrot.slane %v15236_v51, %v14031_v39  ;;  %v15608_v51 = vrot.slane %v14240_v33, %v14031_v39  ;;  %v15622_v33 = vrot.slane %v15264_v16, %v14031_v39 }
 0x392   : > { %v4887_v3 = vpop.permute.xlu0 %4886  ;;  %v15636_v16 = vrot.slane %v14276_v7, %v14031_v39  ;;  %v15650_v7 = vrot.slane %v15292_v57, %v14031_v39  ;;  %v15664_v57 = vrot.slane %v14279_v24, %v14031_v39  ;;  %v15678_v24 = vrot.slane %v15320_v62, %v14031_v39 }
 0x393   : > { %4946 = vst.msk [vmem:[#allocation3 + $0x65] sm:$0x1] %vm3352_vm2, %v4887_v3  ;;  %v4889_v30 = vpop.permute.xlu1 %4888  ;;  %v15692_v62 = vrot.slane %v14349_v31, %v14031_v39  ;;  %v15706_v31 = vrot.slane %v15348_v12, %v14031_v39  ;;  %v15720_v12 = vrot.slane %v14354_v37, %v14031_v39  ;;  %v15734_v37 = vrot.slane %v15376_v17, %v14031_v39 }
 0x394   : > { %5596 = vrot.lane.b32.xlu0 %v15034_v43, %s13928_s7  ;;  %4947 = vst.msk [vmem:[#allocation3 + $0x6d] sm:$0x1] %vm3352_vm2, %v4889_v30 }
 0x395   : > { %5598 = vrot.lane.b32.xlu1 %v15038_v47, %s13928_s7 }
 0x396   : > { %v4891_v56 = vpop.permute.xlu0 %4890 }
 0x397   : > { %4948 = vst.msk [vmem:[#allocation3 + $0x75] sm:$0x1] %vm3352_vm2, %v4891_v56  ;;  %v4893_v14 = vpop.permute.xlu1 %4892 }
 0x398   : > { %5897 = vrot.lane.b32.xlu0 %v15576_v44, %s13928_s7  ;;  %4949 = vst.msk [vmem:[#allocation3 + $0x7d] sm:$0x1] %vm3352_vm2, %v4893_v14 }
 0x399   : > { %5899 = vrot.lane.b32.xlu1 %v15580_v59, %s13928_s7 }
 0x39a   : > { %v4895_v43 = vpop.permute.xlu0 %4894 }
 0x39b   : > { %4950 = vst.msk [vmem:[#allocation3 + $0x85] sm:$0x1] %vm3352_vm2, %v4895_v43  ;;  %v4897_v47 = vpop.permute.xlu1 %4896 }
 0x39c   : > { %5901 = vrot.lane.b32.xlu0 %v15590_v19, %s13928_s7  ;;  %4951 = vst.msk [vmem:[#allocation3 + $0x8d] sm:$0x1] %vm3352_vm2, %v4897_v47 }
 0x39d   : > { %5903 = vrot.lane.b32.xlu1 %v15594_v32, %s13928_s7 }
 0x39e   : > { %v4899_v18 = vpop.permute.xlu0 %4898 }
 0x39f   : > { %4952 = vst.msk [vmem:[#allocation3 + $0x95] sm:$0x1] %vm3352_vm2, %v4899_v18  ;;  %v4901_v48 = vpop.permute.xlu1 %4900 }
 0x3a0   : > { %5905 = vrot.lane.b32.xlu0 %v15604_v28, %s13928_s7  ;;  %4953 = vst.msk [vmem:[#allocation3 + $0x9d] sm:$0x1] %vm3352_vm2, %v4901_v48 }
 0x3a1   : > { %5907 = vrot.lane.b32.xlu1 %v15608_v51, %s13928_s7 }
 0x3a2   : > { %v4903_v50 = vpop.permute.xlu0 %4902 }
 0x3a3   : > { %4954 = vst.msk [vmem:[#allocation3 + $0xa5] sm:$0x1] %vm3352_vm2, %v4903_v50  ;;  %v4905_v55 = vpop.permute.xlu1 %4904 }
 0x3a4   : > { %5909 = vrot.lane.b32.xlu0 %v15618_v20, %s13928_s7  ;;  %4955 = vst.msk [vmem:[#allocation3 + $0xad] sm:$0x1] %vm3352_vm2, %v4905_v55 }
 0x3a5   : > { %5911 = vrot.lane.b32.xlu1 %v15622_v33, %s13928_s7 }
 0x3a6   : > { %v4907_v63 = vpop.permute.xlu0 %4906 }
 0x3a7   : > { %4956 = vst.msk [vmem:[#allocation3 + $0xb5] sm:$0x1] %vm3352_vm2, %v4907_v63  ;;  %v4909_v5 = vpop.permute.xlu1 %4908 }
 0x3a8   : > { %5913 = vrot.lane.b32.xlu0 %v15632_v15, %s13928_s7  ;;  %4957 = vst.msk [vmem:[#allocation3 + $0xbd] sm:$0x1] %vm3352_vm2, %v4909_v5 }
 0x3a9   : > { %5915 = vrot.lane.b32.xlu1 %v15636_v16, %s13928_s7 }
 0x3aa   : > { %v5208_v29 = vpop.permute.xlu0 %5207 }
 0x3ab   : > { %5279 = vst.msk [vmem:[#allocation3 + $0x6] sm:$0x1] %vm3352_vm2, %v5208_v29  ;;  %v5210_v36 = vpop.permute.xlu1 %5209 }
 0x3ac   : > { %5917 = vrot.lane.b32.xlu0 %v15646_v0, %s13928_s7  ;;  %5280 = vst.msk [vmem:[#allocation3 + $0xe] sm:$0x1] %vm3352_vm2, %v5210_v36 }
 0x3ad   : > { %5919 = vrot.lane.b32.xlu1 %v15650_v7, %s13928_s7 }
 0x3ae   : > { %v5212_v11 = vpop.permute.xlu0 %5211 }
 0x3af   : > { %5281 = vst.msk [vmem:[#allocation3 + $0x16] sm:$0x1] %vm3352_vm2, %v5212_v11  ;;  %v5214_v52 = vpop.permute.xlu1 %5213 }
 0x3b0   : > { %5921 = vrot.lane.b32.xlu0 %v15660_v58, %s13928_s7  ;;  %5282 = vst.msk [vmem:[#allocation3 + $0x1e] sm:$0x1] %vm3352_vm2, %v5214_v52 }
 0x3b1   : > { %5923 = vrot.lane.b32.xlu1 %v15664_v57, %s13928_s7 }
 0x3b2   : > { %v5216_v6 = vpop.permute.xlu0 %5215 }
 0x3b3   : > { %5283 = vst.msk [vmem:[#allocation3 + $0x26] sm:$0x1] %vm3352_vm2, %v5216_v6  ;;  %v5218_v22 = vpop.permute.xlu1 %5217 }
 0x3b4   : > { %5925 = vrot.lane.b32.xlu0 %v15674_v1, %s13928_s7  ;;  %5284 = vst.msk [vmem:[#allocation3 + $0x2e] sm:$0x1] %vm3352_vm2, %v5218_v22 }
 0x3b5   : > { %5927 = vrot.lane.b32.xlu1 %v15678_v24, %s13928_s7 }
 0x3b6   : > { %v5220_v42 = vpop.permute.xlu0 %5219 }
 0x3b7   : > { %5285 = vst.msk [vmem:[#allocation3 + $0x36] sm:$0x1] %vm3352_vm2, %v5220_v42  ;;  %v5222_v49 = vpop.permute.xlu1 %5221 }
 0x3b8   : > { %5929 = vrot.lane.b32.xlu0 %v15688_v54, %s13928_s7  ;;  %5286 = vst.msk [vmem:[#allocation3 + $0x3e] sm:$0x1] %vm3352_vm2, %v5222_v49 }
 0x3b9   : > { %5931 = vrot.lane.b32.xlu1 %v15692_v62, %s13928_s7 }
 0x3ba   : > { %v5224_v46 = vpop.permute.xlu0 %5223 }
 0x3bb   : > { %5287 = vst.msk [vmem:[#allocation3 + $0x46] sm:$0x1] %vm3352_vm2, %v5224_v46  ;;  %v5226_v9 = vpop.permute.xlu1 %5225 }
 0x3bc   : > { %5933 = vrot.lane.b32.xlu0 %v15702_v23, %s13928_s7  ;;  %5288 = vst.msk [vmem:[#allocation3 + $0x4e] sm:$0x1] %vm3352_vm2, %v5226_v9 }
 0x3bd   : > { %5935 = vrot.lane.b32.xlu1 %v15706_v31, %s13928_s7 }
 0x3be   : > { %v5228_v4 = vpop.permute.xlu0 %5227 }
 0x3bf   : > { %5289 = vst.msk [vmem:[#allocation3 + $0x56] sm:$0x1] %vm3352_vm2, %v5228_v4  ;;  %v5230_v21 = vpop.permute.xlu1 %5229 }
 0x3c0   : > { %5937 = vrot.lane.b32.xlu0 %v15716_v61, %s13928_s7  ;;  %5290 = vst.msk [vmem:[#allocation3 + $0x5e] sm:$0x1] %vm3352_vm2, %v5230_v21 }
 0x3c1   : > { %5939 = vrot.lane.b32.xlu1 %v15720_v12, %s13928_s7 }
 0x3c2   : > { %v5232_v27 = vpop.permute.xlu0 %5231 }
 0x3c3   : > { %5291 = vst.msk [vmem:[#allocation3 + $0x66] sm:$0x1] %vm3352_vm2, %v5232_v27  ;;  %v5234_v10 = vpop.permute.xlu1 %5233 }
 0x3c4   : > { %5941 = vrot.lane.b32.xlu0 %v15730_v53, %s13928_s7  ;;  %5292 = vst.msk [vmem:[#allocation3 + $0x6e] sm:$0x1] %vm3352_vm2, %v5234_v10 }
 0x3c5   : > { %5943 = vrot.lane.b32.xlu1 %v15734_v37, %s13928_s7 }
 0x3c6   : > { %v5236_v26 = vpop.permute.xlu0 %5235 }
 0x3c7   : > { %5293 = vst.msk [vmem:[#allocation3 + $0x76] sm:$0x1] %vm3352_vm2, %v5236_v26  ;;  %v5238_v13 = vpop.permute.xlu1 %5237 }
 0x3c8   : > { %6243 = vrot.lane.b32.xlu0 %v15576_v44, %s13929_s8  ;;  %5294 = vst.msk [vmem:[#allocation3 + $0x7e] sm:$0x1] %vm3352_vm2, %v5238_v13 }
 0x3c9   : > { %6245 = vrot.lane.b32.xlu1 %v15580_v59, %s13929_s8 }
 0x3ca   : > { %v5240_v17 = vpop.permute.xlu0 %5239 }
 0x3cb   : > { %5295 = vst.msk [vmem:[#allocation3 + $0x86] sm:$0x1] %vm3352_vm2, %v5240_v17  ;;  %v5242_v35 = vpop.permute.xlu1 %5241 }
 0x3cc   : > { %6247 = vrot.lane.b32.xlu0 %v15590_v19, %s13929_s8  ;;  %5296 = vst.msk [vmem:[#allocation3 + $0x8e] sm:$0x1] %vm3352_vm2, %v5242_v35 }
 0x3cd   : > { %6249 = vrot.lane.b32.xlu1 %v15594_v32, %s13929_s8 }
 0x3ce   : > { %v5244_v34 = vpop.permute.xlu0 %5243 }
 0x3cf   : > { %5297 = vst.msk [vmem:[#allocation3 + $0x96] sm:$0x1] %vm3352_vm2, %v5244_v34  ;;  %v5246_v45 = vpop.permute.xlu1 %5245 }
 0x3d0   : > { %6251 = vrot.lane.b32.xlu0 %v15604_v28, %s13929_s8  ;;  %5298 = vst.msk [vmem:[#allocation3 + $0x9e] sm:$0x1] %vm3352_vm2, %v5246_v45 }
 0x3d1   : > { %6253 = vrot.lane.b32.xlu1 %v15608_v51, %s13929_s8 }
 0x3d2   : > { %v5248_v25 = vpop.permute.xlu0 %5247 }
 0x3d3   : > { %5299 = vst.msk [vmem:[#allocation3 + $0xa6] sm:$0x1] %vm3352_vm2, %v5248_v25  ;;  %v5250_v40 = vpop.permute.xlu1 %5249 }
 0x3d4   : > { %6255 = vrot.lane.b32.xlu0 %v15618_v20, %s13929_s8  ;;  %5300 = vst.msk [vmem:[#allocation3 + $0xae] sm:$0x1] %vm3352_vm2, %v5250_v40 }
 0x3d5   : > { %6257 = vrot.lane.b32.xlu1 %v15622_v33, %s13929_s8 }
 0x3d6   : > { %v5252_v8 = vpop.permute.xlu0 %5251 }
 0x3d7   : > { %5301 = vst.msk [vmem:[#allocation3 + $0xb6] sm:$0x1] %vm3352_vm2, %v5252_v8  ;;  %v5254_v41 = vpop.permute.xlu1 %5253 }
 0x3d8   : > { %6259 = vrot.lane.b32.xlu0 %v15632_v15, %s13929_s8  ;;  %5302 = vst.msk [vmem:[#allocation3 + $0xbe] sm:$0x1] %vm3352_vm2, %v5254_v41 }
 0x3d9   : > { %6261 = vrot.lane.b32.xlu1 %v15636_v16, %s13929_s8 }
 0x3da   : > { %v5553_v38 = vpop.permute.xlu0 %5552 }
 0x3db   : > { %5624 = vst.msk [vmem:[#allocation3 + $0x7] sm:$0x1] %vm3352_vm2, %v5553_v38  ;;  %v5555_v2 = vpop.permute.xlu1 %5554 }
 0x3dc   : > { %6263 = vrot.lane.b32.xlu0 %v15646_v0, %s13929_s8  ;;  %5625 = vst.msk [vmem:[#allocation3 + $0xf] sm:$0x1] %vm3352_vm2, %v5555_v2 }
 0x3dd   : > { %6265 = vrot.lane.b32.xlu1 %v15650_v7, %s13929_s8 }
 0x3de   : > { %v5557_v60 = vpop.permute.xlu0 %5556 }
 0x3df   : > { %5626 = vst.msk [vmem:[#allocation3 + $0x17] sm:$0x1] %vm3352_vm2, %v5557_v60  ;;  %v5559_v3 = vpop.permute.xlu1 %5558 }
 0x3e0   : > { %6267 = vrot.lane.b32.xlu0 %v15660_v58, %s13929_s8  ;;  %5627 = vst.msk [vmem:[#allocation3 + $0x1f] sm:$0x1] %vm3352_vm2, %v5559_v3 }
 0x3e1   : > { %6269 = vrot.lane.b32.xlu1 %v15664_v57, %s13929_s8 }
 0x3e2   : > { %v5561_v30 = vpop.permute.xlu0 %5560 }
 0x3e3   : > { %5628 = vst.msk [vmem:[#allocation3 + $0x27] sm:$0x1] %vm3352_vm2, %v5561_v30  ;;  %v5563_v56 = vpop.permute.xlu1 %5562 }
 0x3e4   : > { %6271 = vrot.lane.b32.xlu0 %v15674_v1, %s13929_s8  ;;  %5629 = vst.msk [vmem:[#allocation3 + $0x2f] sm:$0x1] %vm3352_vm2, %v5563_v56 }
 0x3e5   : > { %6273 = vrot.lane.b32.xlu1 %v15678_v24, %s13929_s8 }
 0x3e6   : > { %v5565_v14 = vpop.permute.xlu0 %5564 }
 0x3e7   : > { %5630 = vst.msk [vmem:[#allocation3 + $0x37] sm:$0x1] %vm3352_vm2, %v5565_v14  ;;  %v5567_v43 = vpop.permute.xlu1 %5566 }
 0x3e8   : > { %6275 = vrot.lane.b32.xlu0 %v15688_v54, %s13929_s8  ;;  %5631 = vst.msk [vmem:[#allocation3 + $0x3f] sm:$0x1] %vm3352_vm2, %v5567_v43 }
 0x3e9   : > { %6277 = vrot.lane.b32.xlu1 %v15692_v62, %s13929_s8 }
 0x3ea   : > { %v5569_v47 = vpop.permute.xlu0 %5568 }
 0x3eb   : > { %5632 = vst.msk [vmem:[#allocation3 + $0x47] sm:$0x1] %vm3352_vm2, %v5569_v47  ;;  %v5571_v18 = vpop.permute.xlu1 %5570 }
 0x3ec   : > { %6279 = vrot.lane.b32.xlu0 %v15702_v23, %s13929_s8  ;;  %5633 = vst.msk [vmem:[#allocation3 + $0x4f] sm:$0x1] %vm3352_vm2, %v5571_v18 }
 0x3ed   : > { %6281 = vrot.lane.b32.xlu1 %v15706_v31, %s13929_s8 }
 0x3ee   : > { %v5573_v48 = vpop.permute.xlu0 %5572 }
 0x3ef   : > { %5634 = vst.msk [vmem:[#allocation3 + $0x57] sm:$0x1] %vm3352_vm2, %v5573_v48  ;;  %v5575_v50 = vpop.permute.xlu1 %5574 }
 0x3f0   : > { %6283 = vrot.lane.b32.xlu0 %v15716_v61, %s13929_s8  ;;  %5635 = vst.msk [vmem:[#allocation3 + $0x5f] sm:$0x1] %vm3352_vm2, %v5575_v50 }
 0x3f1   : > { %6285 = vrot.lane.b32.xlu1 %v15720_v12, %s13929_s8 }
 0x3f2   : > { %v5577_v55 = vpop.permute.xlu0 %5576 }
 0x3f3   : > { %5636 = vst.msk [vmem:[#allocation3 + $0x67] sm:$0x1] %vm3352_vm2, %v5577_v55  ;;  %v5579_v63 = vpop.permute.xlu1 %5578 }
 0x3f4   : > { %6287 = vrot.lane.b32.xlu0 %v15730_v53, %s13929_s8  ;;  %5637 = vst.msk [vmem:[#allocation3 + $0x6f] sm:$0x1] %vm3352_vm2, %v5579_v63 }
 0x3f5   : > { %6289 = vrot.lane.b32.xlu1 %v15734_v37, %s13929_s8 }
 0x3f6   : > { %v5581_v5 = vpop.permute.xlu0 %5580 }
 0x3f7   : > { %5638 = vst.msk [vmem:[#allocation3 + $0x77] sm:$0x1] %vm3352_vm2, %v5581_v5  ;;  %v5583_v29 = vpop.permute.xlu1 %5582 }
 0x3f8   : > { %6789 = vrot.lane.b32.xlu0 %v15576_v44, %s13923_s29  ;;  %5639 = vst.msk [vmem:[#allocation3 + $0x7f] sm:$0x1] %vm3352_vm2, %v5583_v29 }
 0x3f9   : > { %6791 = vrot.lane.b32.xlu1 %v15580_v59, %s13923_s29 }
 0x3fa   : > { %v5585_v36 = vpop.permute.xlu0 %5584 }
 0x3fb   : > { %5640 = vst.msk [vmem:[#allocation3 + $0x87] sm:$0x1] %vm3352_vm2, %v5585_v36  ;;  %v5587_v11 = vpop.permute.xlu1 %5586 }
 0x3fc   : > { %6793 = vrot.lane.b32.xlu0 %v15590_v19, %s13923_s29  ;;  %5641 = vst.msk [vmem:[#allocation3 + $0x8f] sm:$0x1] %vm3352_vm2, %v5587_v11 }
 0x3fd   : > { %6795 = vrot.lane.b32.xlu1 %v15594_v32, %s13923_s29 }
 0x3fe   : > { %v5589_v52 = vpop.permute.xlu0 %5588 }
 0x3ff   : > { %5642 = vst.msk [vmem:[#allocation3 + $0x97] sm:$0x1] %vm3352_vm2, %v5589_v52  ;;  %v5591_v6 = vpop.permute.xlu1 %5590 }
 0x400   : > { %6797 = vrot.lane.b32.xlu0 %v15604_v28, %s13923_s29  ;;  %5643 = vst.msk [vmem:[#allocation3 + $0x9f] sm:$0x1] %vm3352_vm2, %v5591_v6 }
 0x401   : > { %6799 = vrot.lane.b32.xlu1 %v15608_v51, %s13923_s29 }
 0x402   : > { %v5593_v22 = vpop.permute.xlu0 %5592 }
 0x403   : > { %5644 = vst.msk [vmem:[#allocation3 + $0xa7] sm:$0x1] %vm3352_vm2, %v5593_v22  ;;  %v5595_v42 = vpop.permute.xlu1 %5594 }
 0x404   : > { %6801 = vrot.lane.b32.xlu0 %v15618_v20, %s13923_s29  ;;  %5645 = vst.msk [vmem:[#allocation3 + $0xaf] sm:$0x1] %vm3352_vm2, %v5595_v42 }
 0x405   : > { %6803 = vrot.lane.b32.xlu1 %v15622_v33, %s13923_s29 }
 0x406   : > { %v5597_v49 = vpop.permute.xlu0 %5596 }
 0x407   : > { %5646 = vst.msk [vmem:[#allocation3 + $0xb7] sm:$0x1] %vm3352_vm2, %v5597_v49  ;;  %v5599_v46 = vpop.permute.xlu1 %5598 }
 0x408   : > { %6805 = vrot.lane.b32.xlu0 %v15632_v15, %s13923_s29  ;;  %5647 = vst.msk [vmem:[#allocation3 + $0xbf] sm:$0x1] %vm3352_vm2, %v5599_v46 }
 0x409   : > { %6807 = vrot.lane.b32.xlu1 %v15636_v16, %s13923_s29 }
 0x40a   : > { %v5898_v9 = vpop.permute.xlu0 %5897 }
 0x40b   : > { %5970 = vst.msk [vmem:[#allocation3] sm:$0x1] %vm5969_vm3, %v5898_v9  ;;  %v5900_v4 = vpop.permute.xlu1 %5899 }
 0x40c   : > { %6809 = vrot.lane.b32.xlu0 %v15646_v0, %s13923_s29  ;;  %5971 = vst.msk [vmem:[#allocation3 + $0x8] sm:$0x1] %vm5969_vm3, %v5900_v4 }
 0x40d   : > { %6811 = vrot.lane.b32.xlu1 %v15650_v7, %s13923_s29 }
 0x40e   : > { %v5902_v21 = vpop.permute.xlu0 %5901 }
 0x40f   : > { %5972 = vst.msk [vmem:[#allocation3 + $0x10] sm:$0x1] %vm5969_vm3, %v5902_v21  ;;  %v5904_v27 = vpop.permute.xlu1 %5903 }
 0x410   : > { %6813 = vrot.lane.b32.xlu0 %v15660_v58, %s13923_s29  ;;  %5973 = vst.msk [vmem:[#allocation3 + $0x18] sm:$0x1] %vm5969_vm3, %v5904_v27 }
 0x411   : > { %6815 = vrot.lane.b32.xlu1 %v15664_v57, %s13923_s29 }
 0x412   : > { %v5906_v10 = vpop.permute.xlu0 %5905 }
 0x413   : > { %5974 = vst.msk [vmem:[#allocation3 + $0x20] sm:$0x1] %vm5969_vm3, %v5906_v10  ;;  %v5908_v26 = vpop.permute.xlu1 %5907 }
 0x414   : > { %6817 = vrot.lane.b32.xlu0 %v15674_v1, %s13923_s29  ;;  %5975 = vst.msk [vmem:[#allocation3 + $0x28] sm:$0x1] %vm5969_vm3, %v5908_v26 }
 0x415   : > { %6819 = vrot.lane.b32.xlu1 %v15678_v24, %s13923_s29 }
 0x416   : > { %v5910_v13 = vpop.permute.xlu0 %5909 }
 0x417   : > { %5976 = vst.msk [vmem:[#allocation3 + $0x30] sm:$0x1] %vm5969_vm3, %v5910_v13  ;;  %v5912_v17 = vpop.permute.xlu1 %5911 }
 0x418   : > { %6821 = vrot.lane.b32.xlu0 %v15688_v54, %s13923_s29  ;;  %5977 = vst.msk [vmem:[#allocation3 + $0x38] sm:$0x1] %vm5969_vm3, %v5912_v17 }
 0x419   : > { %6823 = vrot.lane.b32.xlu1 %v15692_v62, %s13923_s29 }
 0x41a   : > { %v5914_v35 = vpop.permute.xlu0 %5913 }
 0x41b   : > { %5978 = vst.msk [vmem:[#allocation3 + $0x40] sm:$0x1] %vm5969_vm3, %v5914_v35  ;;  %v5916_v34 = vpop.permute.xlu1 %5915 }
 0x41c   : > { %6825 = vrot.lane.b32.xlu0 %v15702_v23, %s13923_s29  ;;  %5979 = vst.msk [vmem:[#allocation3 + $0x48] sm:$0x1] %vm5969_vm3, %v5916_v34 }
 0x41d   : > { %6827 = vrot.lane.b32.xlu1 %v15706_v31, %s13923_s29 }
 0x41e   : > { %v5918_v45 = vpop.permute.xlu0 %5917 }
 0x41f   : > { %5980 = vst.msk [vmem:[#allocation3 + $0x50] sm:$0x1] %vm5969_vm3, %v5918_v45  ;;  %v5920_v25 = vpop.permute.xlu1 %5919 }
 0x420   : > { %6829 = vrot.lane.b32.xlu0 %v15716_v61, %s13923_s29  ;;  %5981 = vst.msk [vmem:[#allocation3 + $0x58] sm:$0x1] %vm5969_vm3, %v5920_v25  ;;  %v17813_v25 = vld [vmem:[#allocation11_spill] sm:$0xff] }
 0x421   : > { %6831 = vrot.lane.b32.xlu1 %v15720_v12, %s13923_s29 }
 0x422   : > { %v5922_v40 = vpop.permute.xlu0 %5921 }
 0x423   : > { %5982 = vst.msk [vmem:[#allocation3 + $0x60] sm:$0x1] %vm5969_vm3, %v5922_v40  ;;  %v5924_v8 = vpop.permute.xlu1 %5923  ;;  %v17814_v40 = vld [vmem:[#allocation14_spill] sm:$0xff] }
 0x424   : > { %6833 = vrot.lane.b32.xlu0 %v15730_v53, %s13923_s29  ;;  %5983 = vst.msk [vmem:[#allocation3 + $0x68] sm:$0x1] %vm5969_vm3, %v5924_v8  ;;  %v16000_v8 = vcombine.high %v17813_v25, %v17813_v25 }
 0x425   : > { %6835 = vrot.lane.b32.xlu1 %v15734_v37, %s13923_s29 }
 0x426   : > { %v5926_v41 = vpop.permute.xlu0 %5925 }
 0x427   : > { %5984 = vst.msk [vmem:[#allocation3 + $0x70] sm:$0x1] %vm5969_vm3, %v5926_v41  ;;  %v5928_v38 = vpop.permute.xlu1 %5927 }
 0x428   : > { %7134 = vrot.lane.b32.xlu0 %v15576_v44, %s13924_s30  ;;  %5985 = vst.msk [vmem:[#allocation3 + $0x78] sm:$0x1] %vm5969_vm3, %v5928_v38  ;;  %v16005_v38 = vcombine.high %v17814_v40, %v17814_v40 }
 0x429   : > { %7136 = vrot.lane.b32.xlu1 %v15580_v59, %s13924_s30 }
 0x42a   : > { %v5930_v2 = vpop.permute.xlu0 %5929 }
 0x42b   : > { %5986 = vst.msk [vmem:[#allocation3 + $0x80] sm:$0x1] %vm5969_vm3, %v5930_v2  ;;  %v5932_v60 = vpop.permute.xlu1 %5931 }
 0x42c   : > { %7138 = vrot.lane.b32.xlu0 %v15590_v19, %s13924_s30  ;;  %5987 = vst.msk [vmem:[#allocation3 + $0x88] sm:$0x1] %vm5969_vm3, %v5932_v60 }
 0x42d   : > { %7140 = vrot.lane.b32.xlu1 %v15594_v32, %s13924_s30 }
 0x42e   : > { %v5934_v3 = vpop.permute.xlu0 %5933 }
 0x42f   : > { %5988 = vst.msk [vmem:[#allocation3 + $0x90] sm:$0x1] %vm5969_vm3, %v5934_v3  ;;  %v5936_v30 = vpop.permute.xlu1 %5935 }
 0x430   : > { %7142 = vrot.lane.b32.xlu0 %v15604_v28, %s13924_s30  ;;  %5989 = vst.msk [vmem:[#allocation3 + $0x98] sm:$0x1] %vm5969_vm3, %v5936_v30  ;;  %v17815_v30 = vld [vmem:[#allocation13_spill] sm:$0xff] }
 0x431   : > { %7144 = vrot.lane.b32.xlu1 %v15608_v51, %s13924_s30 }
 0x432   : > { %v5938_v56 = vpop.permute.xlu0 %5937 }
 0x433   : > { %5990 = vst.msk [vmem:[#allocation3 + $0xa0] sm:$0x1] %vm5969_vm3, %v5938_v56  ;;  %v5940_v14 = vpop.permute.xlu1 %5939  ;;  %v17816_v56 = vld [vmem:[#allocation15_spill] sm:$0xff] }
 0x434   : > { %7146 = vrot.lane.b32.xlu0 %v15618_v20, %s13924_s30  ;;  %5991 = vst.msk [vmem:[#allocation3 + $0xa8] sm:$0x1] %vm5969_vm3, %v5940_v14  ;;  %v16028_v14 = vcombine.high %v17815_v30, %v17815_v30 }
 0x435   : > { %7148 = vrot.lane.b32.xlu1 %v15622_v33, %s13924_s30 }
 0x436   : > { %v5942_v43 = vpop.permute.xlu0 %5941 }
 0x437   : > { %5992 = vst.msk [vmem:[#allocation3 + $0xb0] sm:$0x1] %vm5969_vm3, %v5942_v43  ;;  %v5944_v47 = vpop.permute.xlu1 %5943 }
 0x438   : > { %7150 = vrot.lane.b32.xlu0 %v15632_v15, %s13924_s30  ;;  %5993 = vst.msk [vmem:[#allocation3 + $0xb8] sm:$0x1] %vm5969_vm3, %v5944_v47  ;;  %v16033_v47 = vcombine.high %v17816_v56, %v17816_v56 }
 0x439   : > { %7152 = vrot.lane.b32.xlu1 %v15636_v16, %s13924_s30 }
 0x43a   : > { %v6244_v18 = vpop.permute.xlu0 %6243 }
 0x43b   : > { %6315 = vst.msk [vmem:[#allocation3 + $0x1] sm:$0x1] %vm5969_vm3, %v6244_v18  ;;  %v6246_v48 = vpop.permute.xlu1 %6245 }
 0x43c   : > { %7154 = vrot.lane.b32.xlu0 %v15646_v0, %s13924_s30  ;;  %6316 = vst.msk [vmem:[#allocation3 + $0x9] sm:$0x1] %vm5969_vm3, %v6246_v48 }
 0x43d   : > { %7156 = vrot.lane.b32.xlu1 %v15650_v7, %s13924_s30 }
 0x43e   : > { %v6248_v50 = vpop.permute.xlu0 %6247 }
 0x43f   : > { %6317 = vst.msk [vmem:[#allocation3 + $0x11] sm:$0x1] %vm5969_vm3, %v6248_v50  ;;  %v6250_v55 = vpop.permute.xlu1 %6249 }
 0x440   : > { %7158 = vrot.lane.b32.xlu0 %v15660_v58, %s13924_s30  ;;  %6318 = vst.msk [vmem:[#allocation3 + $0x19] sm:$0x1] %vm5969_vm3, %v6250_v55  ;;  %v17817_v55 = vld [vmem:[#allocation5_spill] sm:$0xff] }
 0x441   : > { %7160 = vrot.lane.b32.xlu1 %v15664_v57, %s13924_s30 }
 0x442   : > { %v6252_v63 = vpop.permute.xlu0 %6251 }
 0x443   : > { %6319 = vst.msk [vmem:[#allocation3 + $0x21] sm:$0x1] %vm5969_vm3, %v6252_v63  ;;  %v6254_v5 = vpop.permute.xlu1 %6253  ;;  %v17818_v63 = vld [vmem:[#allocation7_spill] sm:$0xff] }
 0x444   : > { %7162 = vrot.lane.b32.xlu0 %v15674_v1, %s13924_s30  ;;  %6320 = vst.msk [vmem:[#allocation3 + $0x29] sm:$0x1] %vm5969_vm3, %v6254_v5  ;;  %v16056_v5 = vcombine.high %v17817_v55, %v17817_v55 }
 0x445   : > { %7164 = vrot.lane.b32.xlu1 %v15678_v24, %s13924_s30 }
 0x446   : > { %v6256_v29 = vpop.permute.xlu0 %6255 }
 0x447   : > { %6321 = vst.msk [vmem:[#allocation3 + $0x31] sm:$0x1] %vm5969_vm3, %v6256_v29  ;;  %v6258_v36 = vpop.permute.xlu1 %6257 }
 0x448   : > { %7166 = vrot.lane.b32.xlu0 %v15688_v54, %s13924_s30  ;;  %6322 = vst.msk [vmem:[#allocation3 + $0x39] sm:$0x1] %vm5969_vm3, %v6258_v36  ;;  %v16061_v36 = vcombine.high %v17818_v63, %v17818_v63 }
 0x449   : > { %7168 = vrot.lane.b32.xlu1 %v15692_v62, %s13924_s30 }
 0x44a   : > { %v6260_v11 = vpop.permute.xlu0 %6259 }
 0x44b   : > { %6323 = vst.msk [vmem:[#allocation3 + $0x41] sm:$0x1] %vm5969_vm3, %v6260_v11  ;;  %v6262_v52 = vpop.permute.xlu1 %6261 }
 0x44c   : > { %7170 = vrot.lane.b32.xlu0 %v15702_v23, %s13924_s30  ;;  %6324 = vst.msk [vmem:[#allocation3 + $0x49] sm:$0x1] %vm5969_vm3, %v6262_v52 }
 0x44d   : > { %7172 = vrot.lane.b32.xlu1 %v15706_v31, %s13924_s30 }
 0x44e   : > { %v6264_v6 = vpop.permute.xlu0 %6263 }
 0x44f   : > { %6325 = vst.msk [vmem:[#allocation3 + $0x51] sm:$0x1] %vm5969_vm3, %v6264_v6  ;;  %v6266_v22 = vpop.permute.xlu1 %6265 }
 0x450   : > { %7174 = vrot.lane.b32.xlu0 %v15716_v61, %s13924_s30  ;;  %6326 = vst.msk [vmem:[#allocation3 + $0x59] sm:$0x1] %vm5969_vm3, %v6266_v22  ;;  %v17819_v22 = vld [vmem:[#allocation6_spill] sm:$0xff] }
 0x451   : > { %7176 = vrot.lane.b32.xlu1 %v15720_v12, %s13924_s30 }
 0x452   : > { %v6268_v42 = vpop.permute.xlu0 %6267 }
 0x453   : > { %6327 = vst.msk [vmem:[#allocation3 + $0x61] sm:$0x1] %vm5969_vm3, %v6268_v42  ;;  %v6270_v49 = vpop.permute.xlu1 %6269  ;;  %v17820_v42 = vld [vmem:[#allocation12_spill] sm:$0xff] }
 0x454   : > { %7178 = vrot.lane.b32.xlu0 %v15730_v53, %s13924_s30  ;;  %6328 = vst.msk [vmem:[#allocation3 + $0x69] sm:$0x1] %vm5969_vm3, %v6270_v49  ;;  %v16084_v49 = vcombine.high %v17819_v22, %v17819_v22 }
 0x455   : > { %7180 = vrot.lane.b32.xlu1 %v15734_v37, %s13924_s30 }
 0x456   : > { %v6272_v46 = vpop.permute.xlu0 %6271 }
 0x457   : > { %6329 = vst.msk [vmem:[#allocation3 + $0x71] sm:$0x1] %vm5969_vm3, %v6272_v46  ;;  %v6274_v9 = vpop.permute.xlu1 %6273 }
 0x458   : > { %7479 = vrot.lane.b32.xlu0 %v15576_v44, %s13925_s4  ;;  %6330 = vst.msk [vmem:[#allocation3 + $0x79] sm:$0x1] %vm5969_vm3, %v6274_v9  ;;  %v16089_v9 = vcombine.high %v17820_v42, %v17820_v42 }
 0x459   : > { %7481 = vrot.lane.b32.xlu1 %v15580_v59, %s13925_s4 }
 0x45a   : > { %v6276_v4 = vpop.permute.xlu0 %6275 }
 0x45b   : > { %6331 = vst.msk [vmem:[#allocation3 + $0x81] sm:$0x1] %vm5969_vm3, %v6276_v4  ;;  %v6278_v21 = vpop.permute.xlu1 %6277 }
 0x45c   : > { %7483 = vrot.lane.b32.xlu0 %v15590_v19, %s13925_s4  ;;  %6332 = vst.msk [vmem:[#allocation3 + $0x89] sm:$0x1] %vm5969_vm3, %v6278_v21 }
 0x45d   : > { %7485 = vrot.lane.b32.xlu1 %v15594_v32, %s13925_s4 }
 0x45e   : > { %v6280_v27 = vpop.permute.xlu0 %6279 }
 0x45f   : > { %6333 = vst.msk [vmem:[#allocation3 + $0x91] sm:$0x1] %vm5969_vm3, %v6280_v27  ;;  %v6282_v10 = vpop.permute.xlu1 %6281 }
 0x460   : > { %7487 = vrot.lane.b32.xlu0 %v15604_v28, %s13925_s4  ;;  %6334 = vst.msk [vmem:[#allocation3 + $0x99] sm:$0x1] %vm5969_vm3, %v6282_v10  ;;  %v17821_v10 = vld [vmem:[#allocation8_spill] sm:$0xff] }
 0x461   : > { %7489 = vrot.lane.b32.xlu1 %v15608_v51, %s13925_s4 }
 0x462   : > { %v6284_v26 = vpop.permute.xlu0 %6283 }
 0x463   : > { %6335 = vst.msk [vmem:[#allocation3 + $0xa1] sm:$0x1] %vm5969_vm3, %v6284_v26  ;;  %v6286_v13 = vpop.permute.xlu1 %6285  ;;  %v17822_v26 = vld [vmem:[#allocation10_spill] sm:$0xff] }
 0x464   : > { %7491 = vrot.lane.b32.xlu0 %v15618_v20, %s13925_s4  ;;  %6336 = vst.msk [vmem:[#allocation3 + $0xa9] sm:$0x1] %vm5969_vm3, %v6286_v13  ;;  %v16112_v13 = vcombine.high %v17821_v10, %v17821_v10 }
 0x465   : > { %7493 = vrot.lane.b32.xlu1 %v15622_v33, %s13925_s4 }
 0x466   : > { %v6288_v17 = vpop.permute.xlu0 %6287 }
 0x467   : > { %6337 = vst.msk [vmem:[#allocation3 + $0xb1] sm:$0x1] %vm5969_vm3, %v6288_v17  ;;  %v6290_v35 = vpop.permute.xlu1 %6289 }
 0x468   : > { %7495 = vrot.lane.b32.xlu0 %v15632_v15, %s13925_s4  ;;  %6338 = vst.msk [vmem:[#allocation3 + $0xb9] sm:$0x1] %vm5969_vm3, %v6290_v35  ;;  %v16117_v35 = vcombine.high %v17822_v26, %v17822_v26 }
 0x469   : > { %7497 = vrot.lane.b32.xlu1 %v15636_v16, %s13925_s4 }
 0x46a   : > { %v6790_v34 = vpop.permute.xlu0 %6789 }
 0x46b   : > { %6861 = vst.msk [vmem:[#allocation3 + $0x3] sm:$0x1] %vm5969_vm3, %v6790_v34  ;;  %v6792_v45 = vpop.permute.xlu1 %6791 }
 0x46c   : > { %9478 = vst.msk [vmem:[#allocation3 + $0x3] sm:$0x1] %vm8586_vm4, %v17813_v25  ;;  %7499 = vrot.lane.b32.xlu0 %v15646_v0, %s13925_s4 }
 0x46d   : > { %6862 = vst.msk [vmem:[#allocation3 + $0xb] sm:$0x1] %vm5969_vm3, %v6792_v45  ;;  %7501 = vrot.lane.b32.xlu1 %v15650_v7, %s13925_s4 }
 0x46e   : > { %9479 = vst.msk [vmem:[#allocation3 + $0xb] sm:$0x1] %vm8586_vm4, %v17814_v40  ;;  %v6794_v41 = vpop.permute.xlu0 %6793 }
 0x46f   : > { %6863 = vst.msk [vmem:[#allocation3 + $0x13] sm:$0x1] %vm5969_vm3, %v6794_v41  ;;  %v6796_v2 = vpop.permute.xlu1 %6795 }
 0x470   : > { %9480 = vst.msk [vmem:[#allocation3 + $0x13] sm:$0x1] %vm8586_vm4, %v16000_v8  ;;  %7503 = vrot.lane.b32.xlu0 %v15660_v58, %s13925_s4 }
 0x471   : > { %6864 = vst.msk [vmem:[#allocation3 + $0x1b] sm:$0x1] %vm5969_vm3, %v6796_v2  ;;  %7505 = vrot.lane.b32.xlu1 %v15664_v57, %s13925_s4  ;;  %v17823_v2 = vld [vmem:[#allocation9_spill] sm:$0xff] }
 0x472   : > { %9481 = vst.msk [vmem:[#allocation3 + $0x1b] sm:$0x1] %vm8586_vm4, %v16005_v38  ;;  %v6798_v60 = vpop.permute.xlu0 %6797 }
 0x473   : > { %6865 = vst.msk [vmem:[#allocation3 + $0x23] sm:$0x1] %vm5969_vm3, %v6798_v60  ;;  %v6800_v3 = vpop.permute.xlu1 %6799  ;;  %v17824_v60 = vld [vmem:[#allocation16_spill] sm:$0xff] }
 0x474   : > { %9482 = vst.msk [vmem:[#allocation3 + $0x23] sm:$0x1] %vm8586_vm4, %v17815_v30  ;;  %7507 = vrot.lane.b32.xlu0 %v15674_v1, %s13925_s4 }
 0x475   : > { %6866 = vst.msk [vmem:[#allocation3 + $0x2b] sm:$0x1] %vm5969_vm3, %v6800_v3  ;;  %7509 = vrot.lane.b32.xlu1 %v15678_v24, %s13925_s4  ;;  %v16140_v3 = vcombine.high %v17823_v2, %v17823_v2 }
 0x476   : > { %9483 = vst.msk [vmem:[#allocation3 + $0x2b] sm:$0x1] %vm8586_vm4, %v17816_v56  ;;  %v6802_v43 = vpop.permute.xlu0 %6801 }
 0x477   : > { %6867 = vst.msk [vmem:[#allocation3 + $0x33] sm:$0x1] %vm5969_vm3, %v6802_v43  ;;  %v6804_v18 = vpop.permute.xlu1 %6803 }
 0x478   : > { %9484 = vst.msk [vmem:[#allocation3 + $0x33] sm:$0x1] %vm8586_vm4, %v16028_v14  ;;  %7511 = vrot.lane.b32.xlu0 %v15688_v54, %s13925_s4 }
 0x479   : > { %6868 = vst.msk [vmem:[#allocation3 + $0x3b] sm:$0x1] %vm5969_vm3, %v6804_v18  ;;  %7513 = vrot.lane.b32.xlu1 %v15692_v62, %s13925_s4  ;;  %v16145_v18 = vcombine.high %v17824_v60, %v17824_v60 }
 0x47a   : > { %9485 = vst.msk [vmem:[#allocation3 + $0x3b] sm:$0x1] %vm8586_vm4, %v16033_v47  ;;  %v6806_v48 = vpop.permute.xlu0 %6805 }
 0x47b   : > { %6869 = vst.msk [vmem:[#allocation3 + $0x43] sm:$0x1] %vm5969_vm3, %v6806_v48  ;;  %v6808_v50 = vpop.permute.xlu1 %6807 }
 0x47c   : > { %9486 = vst.msk [vmem:[#allocation3 + $0x43] sm:$0x1] %vm8586_vm4, %v17817_v55  ;;  %7515 = vrot.lane.b32.xlu0 %v15702_v23, %s13925_s4 }
 0x47d   : > { %6870 = vst.msk [vmem:[#allocation3 + $0x4b] sm:$0x1] %vm5969_vm3, %v6808_v50  ;;  %7517 = vrot.lane.b32.xlu1 %v15706_v31, %s13925_s4 }
 0x47e   : > { %9487 = vst.msk [vmem:[#allocation3 + $0x4b] sm:$0x1] %vm8586_vm4, %v17818_v63  ;;  %v6810_v29 = vpop.permute.xlu0 %6809 }
 0x47f   : > { %6871 = vst.msk [vmem:[#allocation3 + $0x53] sm:$0x1] %vm5969_vm3, %v6810_v29  ;;  %v6812_v11 = vpop.permute.xlu1 %6811 }
 0x480   : > { %9488 = vst.msk [vmem:[#allocation3 + $0x53] sm:$0x1] %vm8586_vm4, %v16056_v5  ;;  %7519 = vrot.lane.b32.xlu0 %v15716_v61, %s13925_s4 }
 0x481   : > { %6872 = vst.msk [vmem:[#allocation3 + $0x5b] sm:$0x1] %vm5969_vm3, %v6812_v11  ;;  %7521 = vrot.lane.b32.xlu1 %v15720_v12, %s13925_s4 }
 0x482   : > { %9489 = vst.msk [vmem:[#allocation3 + $0x5b] sm:$0x1] %vm8586_vm4, %v16061_v36  ;;  %v6814_v52 = vpop.permute.xlu0 %6813 }
 0x483   : > { %6873 = vst.msk [vmem:[#allocation3 + $0x63] sm:$0x1] %vm5969_vm3, %v6814_v52  ;;  %v6816_v6 = vpop.permute.xlu1 %6815 }
 0x484   : > { %9490 = vst.msk [vmem:[#allocation3 + $0x63] sm:$0x1] %vm8586_vm4, %v17819_v22  ;;  %7523 = vrot.lane.b32.xlu0 %v15730_v53, %s13925_s4 }
 0x485   : > { %6874 = vst.msk [vmem:[#allocation3 + $0x6b] sm:$0x1] %vm5969_vm3, %v6816_v6  ;;  %7525 = vrot.lane.b32.xlu1 %v15734_v37, %s13925_s4 }
 0x486   : > { %9491 = vst.msk [vmem:[#allocation3 + $0x6b] sm:$0x1] %vm8586_vm4, %v17820_v42  ;;  %v6818_v46 = vpop.permute.xlu0 %6817 }
 0x487   : > { %6875 = vst.msk [vmem:[#allocation3 + $0x73] sm:$0x1] %vm5969_vm3, %v6818_v46  ;;  %v6820_v4 = vpop.permute.xlu1 %6819 }
 0x488   : > { %9492 = vst.msk [vmem:[#allocation3 + $0x73] sm:$0x1] %vm8586_vm4, %v16084_v49  ;;  %7824 = vrot.lane.b32.xlu0 %v15576_v44, %s13926_s5 }
 0x489   : > { %6876 = vst.msk [vmem:[#allocation3 + $0x7b] sm:$0x1] %vm5969_vm3, %v6820_v4  ;;  %7826 = vrot.lane.b32.xlu1 %v15580_v59, %s13926_s5 }
 0x48a   : > { %9493 = vst.msk [vmem:[#allocation3 + $0x7b] sm:$0x1] %vm8586_vm4, %v16089_v9  ;;  %v6822_v21 = vpop.permute.xlu0 %6821 }
 0x48b   : > { %6877 = vst.msk [vmem:[#allocation3 + $0x83] sm:$0x1] %vm5969_vm3, %v6822_v21  ;;  %v6824_v27 = vpop.permute.xlu1 %6823 }
 0x48c   : > { %9494 = vst.msk [vmem:[#allocation3 + $0x83] sm:$0x1] %vm8586_vm4, %v17821_v10  ;;  %7828 = vrot.lane.b32.xlu0 %v15590_v19, %s13926_s5 }
 0x48d   : > { %6878 = vst.msk [vmem:[#allocation3 + $0x8b] sm:$0x1] %vm5969_vm3, %v6824_v27  ;;  %7830 = vrot.lane.b32.xlu1 %v15594_v32, %s13926_s5 }
 0x48e   : > { %9495 = vst.msk [vmem:[#allocation3 + $0x8b] sm:$0x1] %vm8586_vm4, %v17822_v26  ;;  %v6826_v17 = vpop.permute.xlu0 %6825 }
 0x48f   : > { %6879 = vst.msk [vmem:[#allocation3 + $0x93] sm:$0x1] %vm5969_vm3, %v6826_v17  ;;  %v6828_v34 = vpop.permute.xlu1 %6827 }
 0x490   : > { %9496 = vst.msk [vmem:[#allocation3 + $0x93] sm:$0x1] %vm8586_vm4, %v16112_v13  ;;  %7832 = vrot.lane.b32.xlu0 %v15604_v28, %s13926_s5 }
 0x491   : > { %6880 = vst.msk [vmem:[#allocation3 + $0x9b] sm:$0x1] %vm5969_vm3, %v6828_v34  ;;  %7834 = vrot.lane.b32.xlu1 %v15608_v51, %s13926_s5 }
 0x492   : > { %9497 = vst.msk [vmem:[#allocation3 + $0x9b] sm:$0x1] %vm8586_vm4, %v16117_v35  ;;  %v6830_v45 = vpop.permute.xlu0 %6829 }
 0x493   : > { %6881 = vst.msk [vmem:[#allocation3 + $0xa3] sm:$0x1] %vm5969_vm3, %v6830_v45  ;;  %v6832_v41 = vpop.permute.xlu1 %6831 }
 0x494   : > { %9498 = vst.msk [vmem:[#allocation3 + $0xa3] sm:$0x1] %vm8586_vm4, %v17823_v2  ;;  %7836 = vrot.lane.b32.xlu0 %v15618_v20, %s13926_s5 }
 0x495   : > { %6882 = vst.msk [vmem:[#allocation3 + $0xab] sm:$0x1] %vm5969_vm3, %v6832_v41  ;;  %7838 = vrot.lane.b32.xlu1 %v15622_v33, %s13926_s5 }
 0x496   : > { %9499 = vst.msk [vmem:[#allocation3 + $0xab] sm:$0x1] %vm8586_vm4, %v17824_v60  ;;  %v6834_v43 = vpop.permute.xlu0 %6833 }
 0x497   : > { %6883 = vst.msk [vmem:[#allocation3 + $0xb3] sm:$0x1] %vm5969_vm3, %v6834_v43  ;;  %v6836_v48 = vpop.permute.xlu1 %6835 }
 0x498   : > { %9500 = vst.msk [vmem:[#allocation3 + $0xb3] sm:$0x1] %vm8586_vm4, %v16140_v3  ;;  %7840 = vrot.lane.b32.xlu0 %v15632_v15, %s13926_s5 }
 0x499   : > { %6884 = vst.msk [vmem:[#allocation3 + $0xbb] sm:$0x1] %vm5969_vm3, %v6836_v48  ;;  %7842 = vrot.lane.b32.xlu1 %v15636_v16, %s13926_s5 }
 0x49a   : > { %9501 = vst.msk [vmem:[#allocation3 + $0xbb] sm:$0x1] %vm8586_vm4, %v16145_v18  ;;  %v7135_v50 = vpop.permute.xlu0 %7134 }
 0x49b   : > { %7206 = vst.msk [vmem:[#allocation3 + $0x4] sm:$0x1] %vm5969_vm3, %v7135_v50  ;;  %v7137_v29 = vpop.permute.xlu1 %7136 }
 0x49c   : > { %7844 = vrot.lane.b32.xlu0 %v15646_v0, %s13926_s5  ;;  %7207 = vst.msk [vmem:[#allocation3 + $0xc] sm:$0x1] %vm5969_vm3, %v7137_v29 }
 0x49d   : > { %7846 = vrot.lane.b32.xlu1 %v15650_v7, %s13926_s5 }
 0x49e   : > { %v7139_v11 = vpop.permute.xlu0 %7138 }
 0x49f   : > { %7208 = vst.msk [vmem:[#allocation3 + $0x14] sm:$0x1] %vm5969_vm3, %v7139_v11  ;;  %v7141_v52 = vpop.permute.xlu1 %7140 }
 0x4a0   : > { %7848 = vrot.lane.b32.xlu0 %v15660_v58, %s13926_s5  ;;  %7209 = vst.msk [vmem:[#allocation3 + $0x1c] sm:$0x1] %vm5969_vm3, %v7141_v52 }
 0x4a1   : > { %7850 = vrot.lane.b32.xlu1 %v15664_v57, %s13926_s5 }
 0x4a2   : > { %v7143_v6 = vpop.permute.xlu0 %7142 }
 0x4a3   : > { %7210 = vst.msk [vmem:[#allocation3 + $0x24] sm:$0x1] %vm5969_vm3, %v7143_v6  ;;  %v7145_v46 = vpop.permute.xlu1 %7144 }
 0x4a4   : > { %7852 = vrot.lane.b32.xlu0 %v15674_v1, %s13926_s5  ;;  %7211 = vst.msk [vmem:[#allocation3 + $0x2c] sm:$0x1] %vm5969_vm3, %v7145_v46 }
 0x4a5   : > { %7854 = vrot.lane.b32.xlu1 %v15678_v24, %s13926_s5 }
 0x4a6   : > { %v7147_v4 = vpop.permute.xlu0 %7146 }
 0x4a7   : > { %7212 = vst.msk [vmem:[#allocation3 + $0x34] sm:$0x1] %vm5969_vm3, %v7147_v4  ;;  %v7149_v21 = vpop.permute.xlu1 %7148 }
 0x4a8   : > { %7856 = vrot.lane.b32.xlu0 %v15688_v54, %s13926_s5  ;;  %7213 = vst.msk [vmem:[#allocation3 + $0x3c] sm:$0x1] %vm5969_vm3, %v7149_v21 }
 0x4a9   : > { %7858 = vrot.lane.b32.xlu1 %v15692_v62, %s13926_s5 }
 0x4aa   : > { %v7151_v27 = vpop.permute.xlu0 %7150 }
 0x4ab   : > { %7214 = vst.msk [vmem:[#allocation3 + $0x44] sm:$0x1] %vm5969_vm3, %v7151_v27  ;;  %v7153_v17 = vpop.permute.xlu1 %7152 }
 0x4ac   : > { %7860 = vrot.lane.b32.xlu0 %v15702_v23, %s13926_s5  ;;  %7215 = vst.msk [vmem:[#allocation3 + $0x4c] sm:$0x1] %vm5969_vm3, %v7153_v17 }
 0x4ad   : > { %7862 = vrot.lane.b32.xlu1 %v15706_v31, %s13926_s5 }
 0x4ae   : > { %v7155_v34 = vpop.permute.xlu0 %7154 }
 0x4af   : > { %7216 = vst.msk [vmem:[#allocation3 + $0x54] sm:$0x1] %vm5969_vm3, %v7155_v34  ;;  %v7157_v45 = vpop.permute.xlu1 %7156 }
 0x4b0   : > { %7864 = vrot.lane.b32.xlu0 %v15716_v61, %s13926_s5  ;;  %7217 = vst.msk [vmem:[#allocation3 + $0x5c] sm:$0x1] %vm5969_vm3, %v7157_v45 }
 0x4b1   : > { %7866 = vrot.lane.b32.xlu1 %v15720_v12, %s13926_s5 }
 0x4b2   : > { %v7159_v41 = vpop.permute.xlu0 %7158 }
 0x4b3   : > { %7218 = vst.msk [vmem:[#allocation3 + $0x64] sm:$0x1] %vm5969_vm3, %v7159_v41  ;;  %v7161_v43 = vpop.permute.xlu1 %7160 }
 0x4b4   : > { %7868 = vrot.lane.b32.xlu0 %v15730_v53, %s13926_s5  ;;  %7219 = vst.msk [vmem:[#allocation3 + $0x6c] sm:$0x1] %vm5969_vm3, %v7161_v43 }
 0x4b5   : > { %7870 = vrot.lane.b32.xlu1 %v15734_v37, %s13926_s5 }
 0x4b6   : > { %v7163_v48 = vpop.permute.xlu0 %7162 }
 0x4b7   : > { %7220 = vst.msk [vmem:[#allocation3 + $0x74] sm:$0x1] %vm5969_vm3, %v7163_v48  ;;  %v7165_v50 = vpop.permute.xlu1 %7164 }
 0x4b8   : > { %8169 = vrot.lane.b32.xlu0 %v15576_v44, %s13927_s6  ;;  %7221 = vst.msk [vmem:[#allocation3 + $0x7c] sm:$0x1] %vm5969_vm3, %v7165_v50 }
 0x4b9   : > { %8171 = vrot.lane.b32.xlu1 %v15580_v59, %s13927_s6 }
 0x4ba   : > { %v7167_v29 = vpop.permute.xlu0 %7166 }
 0x4bb   : > { %7222 = vst.msk [vmem:[#allocation3 + $0x84] sm:$0x1] %vm5969_vm3, %v7167_v29  ;;  %v7169_v11 = vpop.permute.xlu1 %7168 }
 0x4bc   : > { %8173 = vrot.lane.b32.xlu0 %v15590_v19, %s13927_s6  ;;  %7223 = vst.msk [vmem:[#allocation3 + $0x8c] sm:$0x1] %vm5969_vm3, %v7169_v11 }
 0x4bd   : > { %8175 = vrot.lane.b32.xlu1 %v15594_v32, %s13927_s6 }
 0x4be   : > { %v7171_v52 = vpop.permute.xlu0 %7170 }
 0x4bf   : > { %7224 = vst.msk [vmem:[#allocation3 + $0x94] sm:$0x1] %vm5969_vm3, %v7171_v52  ;;  %v7173_v44 = vpop.permute.xlu1 %7172 }
 0x4c0   : > { %8177 = vrot.lane.b32.xlu0 %v15604_v28, %s13927_s6  ;;  %7225 = vst.msk [vmem:[#allocation3 + $0x9c] sm:$0x1] %vm5969_vm3, %v7173_v44 }
 0x4c1   : > { %8179 = vrot.lane.b32.xlu1 %v15608_v51, %s13927_s6 }
 0x4c2   : > { %v7175_v59 = vpop.permute.xlu0 %7174 }
 0x4c3   : > { %7226 = vst.msk [vmem:[#allocation3 + $0xa4] sm:$0x1] %vm5969_vm3, %v7175_v59  ;;  %v7177_v19 = vpop.permute.xlu1 %7176 }
 0x4c4   : > { %8181 = vrot.lane.b32.xlu0 %v15618_v20, %s13927_s6  ;;  %7227 = vst.msk [vmem:[#allocation3 + $0xac] sm:$0x1] %vm5969_vm3, %v7177_v19 }
 0x4c5   : > { %8183 = vrot.lane.b32.xlu1 %v15622_v33, %s13927_s6 }
 0x4c6   : > { %v7179_v32 = vpop.permute.xlu0 %7178 }
 0x4c7   : > { %7228 = vst.msk [vmem:[#allocation3 + $0xb4] sm:$0x1] %vm5969_vm3, %v7179_v32  ;;  %v7181_v28 = vpop.permute.xlu1 %7180 }
 0x4c8   : > { %8185 = vrot.lane.b32.xlu0 %v15632_v15, %s13927_s6  ;;  %7229 = vst.msk [vmem:[#allocation3 + $0xbc] sm:$0x1] %vm5969_vm3, %v7181_v28 }
 0x4c9   : > { %8187 = vrot.lane.b32.xlu1 %v15636_v16, %s13927_s6 }
 0x4ca   : > { %v7480_v51 = vpop.permute.xlu0 %7479 }
 0x4cb   : > { %7551 = vst.msk [vmem:[#allocation3 + $0x5] sm:$0x1] %vm5969_vm3, %v7480_v51  ;;  %v7482_v20 = vpop.permute.xlu1 %7481 }
 0x4cc   : > { %8189 = vrot.lane.b32.xlu0 %v15646_v0, %s13927_s6  ;;  %7552 = vst.msk [vmem:[#allocation3 + $0xd] sm:$0x1] %vm5969_vm3, %v7482_v20 }
 0x4cd   : > { %8191 = vrot.lane.b32.xlu1 %v15650_v7, %s13927_s6 }
 0x4ce   : > { %v7484_v33 = vpop.permute.xlu0 %7483 }
 0x4cf   : > { %7553 = vst.msk [vmem:[#allocation3 + $0x15] sm:$0x1] %vm5969_vm3, %v7484_v33  ;;  %v7486_v15 = vpop.permute.xlu1 %7485 }
 0x4d0   : > { %8193 = vrot.lane.b32.xlu0 %v15660_v58, %s13927_s6  ;;  %7554 = vst.msk [vmem:[#allocation3 + $0x1d] sm:$0x1] %vm5969_vm3, %v7486_v15 }
 0x4d1   : > { %8195 = vrot.lane.b32.xlu1 %v15664_v57, %s13927_s6 }
 0x4d2   : > { %v7488_v16 = vpop.permute.xlu0 %7487 }
 0x4d3   : > { %7555 = vst.msk [vmem:[#allocation3 + $0x25] sm:$0x1] %vm5969_vm3, %v7488_v16  ;;  %v7490_v0 = vpop.permute.xlu1 %7489 }
 0x4d4   : > { %8197 = vrot.lane.b32.xlu0 %v15674_v1, %s13927_s6  ;;  %7556 = vst.msk [vmem:[#allocation3 + $0x2d] sm:$0x1] %vm5969_vm3, %v7490_v0 }
 0x4d5   : > { %8199 = vrot.lane.b32.xlu1 %v15678_v24, %s13927_s6 }
 0x4d6   : > { %v7492_v7 = vpop.permute.xlu0 %7491 }
 0x4d7   : > { %7557 = vst.msk [vmem:[#allocation3 + $0x35] sm:$0x1] %vm5969_vm3, %v7492_v7  ;;  %v7494_v58 = vpop.permute.xlu1 %7493 }
 0x4d8   : > { %8201 = vrot.lane.b32.xlu0 %v15688_v54, %s13927_s6  ;;  %7558 = vst.msk [vmem:[#allocation3 + $0x3d] sm:$0x1] %vm5969_vm3, %v7494_v58 }
 0x4d9   : > { %8203 = vrot.lane.b32.xlu1 %v15692_v62, %s13927_s6 }
 0x4da   : > { %v7496_v57 = vpop.permute.xlu0 %7495 }
 0x4db   : > { %7559 = vst.msk [vmem:[#allocation3 + $0x45] sm:$0x1] %vm5969_vm3, %v7496_v57  ;;  %v7498_v1 = vpop.permute.xlu1 %7497 }
 0x4dc   : > { %8205 = vrot.lane.b32.xlu0 %v15702_v23, %s13927_s6  ;;  %7560 = vst.msk [vmem:[#allocation3 + $0x4d] sm:$0x1] %vm5969_vm3, %v7498_v1 }
 0x4dd   : > { %8207 = vrot.lane.b32.xlu1 %v15706_v31, %s13927_s6  ;;  %v16272_v31 = vrot.slane %v17813_v25, %v14031_v39  ;;  %v16290_v25 = vrot.slane %v16005_v38, %v14031_v39  ;;  %v16304_v38 = vrot.slane %v17816_v56, %v14031_v39  ;;  %v16318_v56 = vrot.slane %v16033_v47, %v14031_v39 }
 0x4de   : > { %v7500_v24 = vpop.permute.xlu0 %7499  ;;  %v16332_v47 = vrot.slane %v17818_v63, %v14031_v39  ;;  %v16346_v63 = vrot.slane %v16061_v36, %v14031_v39  ;;  %v16360_v36 = vrot.slane %v17820_v42, %v14031_v39  ;;  %v16374_v42 = vrot.slane %v16089_v9, %v14031_v39 }
 0x4df   : > { %7561 = vst.msk [vmem:[#allocation3 + $0x55] sm:$0x1] %vm5969_vm3, %v7500_v24  ;;  %v7502_v54 = vpop.permute.xlu1 %7501  ;;  %v16388_v9 = vrot.slane %v17822_v26, %v14031_v39  ;;  %v16402_v26 = vrot.slane %v16117_v35, %v14031_v39  ;;  %v16416_v35 = vrot.slane %v17824_v60, %v14031_v39  ;;  %v16430_v60 = vrot.slane %v16145_v18, %v14031_v39 }
 0x4e0   : > { %8209 = vrot.lane.b32.xlu0 %v15716_v61, %s13927_s6  ;;  %7562 = vst.msk [vmem:[#allocation3 + $0x5d] sm:$0x1] %vm5969_vm3, %v7502_v54 }
 0x4e1   : > { %8211 = vrot.lane.b32.xlu1 %v15720_v12, %s13927_s6  ;;  %v16276_v12 = vrot.slane %v17814_v40, %v14031_v39 }
 0x4e2   : > { %v7504_v62 = vpop.permute.xlu0 %7503 }
 0x4e3   : > { %7563 = vst.msk [vmem:[#allocation3 + $0x65] sm:$0x1] %vm5969_vm3, %v7504_v62  ;;  %v7506_v23 = vpop.permute.xlu1 %7505 }
 0x4e4   : > { %8213 = vrot.lane.b32.xlu0 %v15730_v53, %s13927_s6  ;;  %7564 = vst.msk [vmem:[#allocation3 + $0x6d] sm:$0x1] %vm5969_vm3, %v7506_v23  ;;  %v16286_v53 = vrot.slane %v16000_v8, %v14031_v39  ;;  %v16300_v8 = vrot.slane %v17815_v30, %v14031_v39  ;;  %v16314_v30 = vrot.slane %v16028_v14, %v14031_v39 }
 0x4e5   : > { %8215 = vrot.lane.b32.xlu1 %v15734_v37, %s13927_s6  ;;  %v16328_v14 = vrot.slane %v17817_v55, %v14031_v39  ;;  %v16342_v55 = vrot.slane %v16056_v5, %v14031_v39  ;;  %v16356_v5 = vrot.slane %v17819_v22, %v14031_v39  ;;  %v16370_v22 = vrot.slane %v16084_v49, %v14031_v39 }
 0x4e6   : > { %v7508_v61 = vpop.permute.xlu0 %7507  ;;  %v16384_v49 = vrot.slane %v17821_v10, %v14031_v39  ;;  %v16398_v10 = vrot.slane %v16112_v13, %v14031_v39  ;;  %v16412_v13 = vrot.slane %v17823_v2, %v14031_v39  ;;  %v16426_v2 = vrot.slane %v16140_v3, %v14031_v39 }
 0x4e7   : > { %7565 = vst.msk [vmem:[#allocation3 + $0x75] sm:$0x1] %vm5969_vm3, %v7508_v61  ;;  %v7510_v6 = vpop.permute.xlu1 %7509  ;;  %v13930_v61 = vmov 0.0  }
 0x4e8   : > { %8514 = vrot.lane.b32.xlu0 %v16272_v31, %s13927_s6  ;;  %7566 = vst.msk [vmem:[#allocation3 + $0x7d] sm:$0x1] %vm5969_vm3, %v7510_v6  ;;  %13772 = vmatprep.subr.mxu1 %v13930_v61 }
 0x4e9   : > { %8516 = vrot.lane.b32.xlu1 %v16276_v12, %s13927_s6  ;;  %13807 = vmatprep.subr.mxu0 %v13930_v61 }
 0x4ea   : > { %v7512_v37 = vpop.permute.xlu0 %7511  ;;  %13774 = vmatprep.mubr.msk.f32.mxu1 %vm13931_vm5, %v13930_v61  ;;  %13809 = vmatprep.mubr.msk.f32.mxu0 %vm13931_vm5, %v13930_v61 }
 0x4eb   : > { %7567 = vst.msk [vmem:[#allocation3 + $0x85] sm:$0x1] %vm5969_vm3, %v7512_v37  ;;  %v7514_v40 = vpop.permute.xlu1 %7513 }
 0x4ec   : > { %8518 = vrot.lane.b32.xlu0 %v16286_v53, %s13927_s6  ;;  %7568 = vst.msk [vmem:[#allocation3 + $0x8d] sm:$0x1] %vm5969_vm3, %v7514_v40 }
 0x4ed   : > { %8520 = vrot.lane.b32.xlu1 %v16290_v25, %s13927_s6 }
 0x4ee   : > { %v7516_v46 = vpop.permute.xlu0 %7515 }
 0x4ef   : > { %7569 = vst.msk [vmem:[#allocation3 + $0x95] sm:$0x1] %vm5969_vm3, %v7516_v46  ;;  %v7518_v4 = vpop.permute.xlu1 %7517 }
 0x4f0   : > { %8522 = vrot.lane.b32.xlu0 %v16300_v8, %s13927_s6  ;;  %7570 = vst.msk [vmem:[#allocation3 + $0x9d] sm:$0x1] %vm5969_vm3, %v7518_v4 }
 0x4f1   : > { %8524 = vrot.lane.b32.xlu1 %v16304_v38, %s13927_s6 }
 0x4f2   : > { %v7520_v21 = vpop.permute.xlu0 %7519 }
 0x4f3   : > { %7571 = vst.msk [vmem:[#allocation3 + $0xa5] sm:$0x1] %vm5969_vm3, %v7520_v21  ;;  %v7522_v27 = vpop.permute.xlu1 %7521 }
 0x4f4   : > { %8526 = vrot.lane.b32.xlu0 %v16314_v30, %s13927_s6  ;;  %7572 = vst.msk [vmem:[#allocation3 + $0xad] sm:$0x1] %vm5969_vm3, %v7522_v27 }
 0x4f5   : > { %8528 = vrot.lane.b32.xlu1 %v16318_v56, %s13927_s6 }
 0x4f6   : > { %v7524_v17 = vpop.permute.xlu0 %7523 }
 0x4f7   : > { %7573 = vst.msk [vmem:[#allocation3 + $0xb5] sm:$0x1] %vm5969_vm3, %v7524_v17  ;;  %v7526_v34 = vpop.permute.xlu1 %7525 }
 0x4f8   : > { %8530 = vrot.lane.b32.xlu0 %v16328_v14, %s13927_s6  ;;  %7574 = vst.msk [vmem:[#allocation3 + $0xbd] sm:$0x1] %vm5969_vm3, %v7526_v34 }
 0x4f9   : > { %8532 = vrot.lane.b32.xlu1 %v16332_v47, %s13927_s6 }
 0x4fa   : > { %v7825_v45 = vpop.permute.xlu0 %7824 }
 0x4fb   : > { %7896 = vst.msk [vmem:[#allocation3 + $0x6] sm:$0x1] %vm5969_vm3, %v7825_v45  ;;  %v7827_v41 = vpop.permute.xlu1 %7826 }
 0x4fc   : > { %8534 = vrot.lane.b32.xlu0 %v16342_v55, %s13927_s6  ;;  %7897 = vst.msk [vmem:[#allocation3 + $0xe] sm:$0x1] %vm5969_vm3, %v7827_v41 }
 0x4fd   : > { %8536 = vrot.lane.b32.xlu1 %v16346_v63, %s13927_s6 }
 0x4fe   : > { %v7829_v43 = vpop.permute.xlu0 %7828 }
 0x4ff   : > { %7898 = vst.msk [vmem:[#allocation3 + $0x16] sm:$0x1] %vm5969_vm3, %v7829_v43  ;;  %v7831_v48 = vpop.permute.xlu1 %7830 }
 0x500   : > { %8538 = vrot.lane.b32.xlu0 %v16356_v5, %s13927_s6  ;;  %7899 = vst.msk [vmem:[#allocation3 + $0x1e] sm:$0x1] %vm5969_vm3, %v7831_v48 }
 0x501   : > { %8540 = vrot.lane.b32.xlu1 %v16360_v36, %s13927_s6 }
 0x502   : > { %v7833_v50 = vpop.permute.xlu0 %7832 }
 0x503   : > { %7900 = vst.msk [vmem:[#allocation3 + $0x26] sm:$0x1] %vm5969_vm3, %v7833_v50  ;;  %v7835_v29 = vpop.permute.xlu1 %7834 }
 0x504   : > { %8542 = vrot.lane.b32.xlu0 %v16370_v22, %s13927_s6  ;;  %7901 = vst.msk [vmem:[#allocation3 + $0x2e] sm:$0x1] %vm5969_vm3, %v7835_v29 }
 0x505   : > { %8544 = vrot.lane.b32.xlu1 %v16374_v42, %s13927_s6 }
 0x506   : > { %v7837_v11 = vpop.permute.xlu0 %7836 }
 0x507   : > { %7902 = vst.msk [vmem:[#allocation3 + $0x36] sm:$0x1] %vm5969_vm3, %v7837_v11  ;;  %v7839_v52 = vpop.permute.xlu1 %7838 }
 0x508   : > { %8546 = vrot.lane.b32.xlu0 %v16384_v49, %s13927_s6  ;;  %7903 = vst.msk [vmem:[#allocation3 + $0x3e] sm:$0x1] %vm5969_vm3, %v7839_v52 }
 0x509   : > { %8548 = vrot.lane.b32.xlu1 %v16388_v9, %s13927_s6 }
 0x50a   : > { %v7841_v44 = vpop.permute.xlu0 %7840 }
 0x50b   : > { %7904 = vst.msk [vmem:[#allocation3 + $0x46] sm:$0x1] %vm5969_vm3, %v7841_v44  ;;  %v7843_v59 = vpop.permute.xlu1 %7842 }
 0x50c   : > { %8550 = vrot.lane.b32.xlu0 %v16398_v10, %s13927_s6  ;;  %7905 = vst.msk [vmem:[#allocation3 + $0x4e] sm:$0x1] %vm5969_vm3, %v7843_v59 }
 0x50d   : > { %8552 = vrot.lane.b32.xlu1 %v16402_v26, %s13927_s6 }
 0x50e   : > { %v7845_v19 = vpop.permute.xlu0 %7844 }
 0x50f   : > { %7906 = vst.msk [vmem:[#allocation3 + $0x56] sm:$0x1] %vm5969_vm3, %v7845_v19  ;;  %v7847_v32 = vpop.permute.xlu1 %7846 }
 0x510   : > { %8554 = vrot.lane.b32.xlu0 %v16412_v13, %s13927_s6  ;;  %7907 = vst.msk [vmem:[#allocation3 + $0x5e] sm:$0x1] %vm5969_vm3, %v7847_v32 }
 0x511   : > { %8556 = vrot.lane.b32.xlu1 %v16416_v35, %s13927_s6 }
 0x512   : > { %v7849_v28 = vpop.permute.xlu0 %7848 }
 0x513   : > { %7908 = vst.msk [vmem:[#allocation3 + $0x66] sm:$0x1] %vm5969_vm3, %v7849_v28  ;;  %v7851_v51 = vpop.permute.xlu1 %7850 }
 0x514   : > { %8558 = vrot.lane.b32.xlu0 %v16426_v2, %s13927_s6  ;;  %7909 = vst.msk [vmem:[#allocation3 + $0x6e] sm:$0x1] %vm5969_vm3, %v7851_v51 }
 0x515   : > { %8560 = vrot.lane.b32.xlu1 %v16430_v60, %s13927_s6 }
 0x516   : > { %v7853_v20 = vpop.permute.xlu0 %7852 }
 0x517   : > { %7910 = vst.msk [vmem:[#allocation3 + $0x76] sm:$0x1] %vm5969_vm3, %v7853_v20  ;;  %v7855_v3 = vpop.permute.xlu1 %7854 }
 0x518   : > { %8860 = vrot.lane.b32.xlu0 %v16272_v31, %s13928_s7  ;;  %7911 = vst.msk [vmem:[#allocation3 + $0x7e] sm:$0x1] %vm5969_vm3, %v7855_v3 }
 0x519   : > { %8862 = vrot.lane.b32.xlu1 %v16276_v12, %s13928_s7 }
 0x51a   : > { %v7857_v39 = vpop.permute.xlu0 %7856 }
 0x51b   : > { %7912 = vst.msk [vmem:[#allocation3 + $0x86] sm:$0x1] %vm5969_vm3, %v7857_v39  ;;  %v7859_v18 = vpop.permute.xlu1 %7858 }
 0x51c   : > { %8864 = vrot.lane.b32.xlu0 %v16286_v53, %s13928_s7  ;;  %7913 = vst.msk [vmem:[#allocation3 + $0x8e] sm:$0x1] %vm5969_vm3, %v7859_v18 }
 0x51d   : > { %8866 = vrot.lane.b32.xlu1 %v16290_v25, %s13928_s7 }
 0x51e   : > { %v7861_v33 = vpop.permute.xlu0 %7860 }
 0x51f   : > { %7914 = vst.msk [vmem:[#allocation3 + $0x96] sm:$0x1] %vm5969_vm3, %v7861_v33  ;;  %v7863_v15 = vpop.permute.xlu1 %7862 }
 0x520   : > { %8868 = vrot.lane.b32.xlu0 %v16300_v8, %s13928_s7  ;;  %7915 = vst.msk [vmem:[#allocation3 + $0x9e] sm:$0x1] %vm5969_vm3, %v7863_v15 }
 0x521   : > { %8870 = vrot.lane.b32.xlu1 %v16304_v38, %s13928_s7 }
 0x522   : > { %v7865_v16 = vpop.permute.xlu0 %7864 }
 0x523   : > { %7916 = vst.msk [vmem:[#allocation3 + $0xa6] sm:$0x1] %vm5969_vm3, %v7865_v16  ;;  %v7867_v0 = vpop.permute.xlu1 %7866 }
 0x524   : > { %8872 = vrot.lane.b32.xlu0 %v16314_v30, %s13928_s7  ;;  %7917 = vst.msk [vmem:[#allocation3 + $0xae] sm:$0x1] %vm5969_vm3, %v7867_v0 }
 0x525   : > { %8874 = vrot.lane.b32.xlu1 %v16318_v56, %s13928_s7 }
 0x526   : > { %v7869_v7 = vpop.permute.xlu0 %7868 }
 0x527   : > { %7918 = vst.msk [vmem:[#allocation3 + $0xb6] sm:$0x1] %vm5969_vm3, %v7869_v7  ;;  %v7871_v58 = vpop.permute.xlu1 %7870 }
 0x528   : > { %8876 = vrot.lane.b32.xlu0 %v16328_v14, %s13928_s7  ;;  %7919 = vst.msk [vmem:[#allocation3 + $0xbe] sm:$0x1] %vm5969_vm3, %v7871_v58 }
 0x529   : > { %8878 = vrot.lane.b32.xlu1 %v16332_v47, %s13928_s7 }
 0x52a   : > { %v8170_v57 = vpop.permute.xlu0 %8169 }
 0x52b   : > { %8241 = vst.msk [vmem:[#allocation3 + $0x7] sm:$0x1] %vm5969_vm3, %v8170_v57  ;;  %v8172_v1 = vpop.permute.xlu1 %8171 }
 0x52c   : > { %8880 = vrot.lane.b32.xlu0 %v16342_v55, %s13928_s7  ;;  %8242 = vst.msk [vmem:[#allocation3 + $0xf] sm:$0x1] %vm5969_vm3, %v8172_v1 }
 0x52d   : > { %8882 = vrot.lane.b32.xlu1 %v16346_v63, %s13928_s7 }
 0x52e   : > { %v8174_v24 = vpop.permute.xlu0 %8173 }
 0x52f   : > { %8243 = vst.msk [vmem:[#allocation3 + $0x17] sm:$0x1] %vm5969_vm3, %v8174_v24  ;;  %v8176_v54 = vpop.permute.xlu1 %8175 }
 0x530   : > { %8884 = vrot.lane.b32.xlu0 %v16356_v5, %s13928_s7  ;;  %8244 = vst.msk [vmem:[#allocation3 + $0x1f] sm:$0x1] %vm5969_vm3, %v8176_v54 }
 0x531   : > { %8886 = vrot.lane.b32.xlu1 %v16360_v36, %s13928_s7 }
 0x532   : > { %v8178_v62 = vpop.permute.xlu0 %8177 }
 0x533   : > { %8245 = vst.msk [vmem:[#allocation3 + $0x27] sm:$0x1] %vm5969_vm3, %v8178_v62  ;;  %v8180_v23 = vpop.permute.xlu1 %8179 }
 0x534   : > { %9221 = vrot.lane.b32.xlu0 %v16328_v14, %s13929_s8  ;;  %8246 = vst.msk [vmem:[#allocation3 + $0x2f] sm:$0x1] %vm5969_vm3, %v8180_v23 }
 0x535   : > { %9767 = vrot.lane.b32.xlu1 %v16328_v14, %s13923_s29 }
 0x536   : > { %v8182_v6 = vpop.permute.xlu0 %8181 }
 0x537   : > { %8247 = vst.msk [vmem:[#allocation3 + $0x37] sm:$0x1] %vm5969_vm3, %v8182_v6  ;;  %v8184_v37 = vpop.permute.xlu1 %8183 }
 0x538   : > { %10112 = vrot.lane.b32.xlu0 %v16328_v14, %s13924_s30  ;;  %8248 = vst.msk [vmem:[#allocation3 + $0x3f] sm:$0x1] %vm5969_vm3, %v8184_v37 }
 0x539   : > { %10457 = vrot.lane.b32.xlu1 %v16328_v14, %s13925_s4 }
 0x53a   : > { %v8186_v40 = vpop.permute.xlu0 %8185 }
 0x53b   : > { %8249 = vst.msk [vmem:[#allocation3 + $0x47] sm:$0x1] %vm5969_vm3, %v8186_v40  ;;  %v8188_v46 = vpop.permute.xlu1 %8187 }
 0x53c   : > { %10802 = vrot.lane.b32.xlu0 %v16328_v14, %s13926_s5  ;;  %8250 = vst.msk [vmem:[#allocation3 + $0x4f] sm:$0x1] %vm5969_vm3, %v8188_v46 }
 0x53d   : > { %9205 = vrot.lane.b32.xlu1 %v16272_v31, %s13929_s8 }
 0x53e   : > { %v8190_v4 = vpop.permute.xlu0 %8189 }
 0x53f   : > { %8251 = vst.msk [vmem:[#allocation3 + $0x57] sm:$0x1] %vm5969_vm3, %v8190_v4  ;;  %v8192_v21 = vpop.permute.xlu1 %8191 }
 0x540   : > { %9751 = vrot.lane.b32.xlu0 %v16272_v31, %s13923_s29  ;;  %8252 = vst.msk [vmem:[#allocation3 + $0x5f] sm:$0x1] %vm5969_vm3, %v8192_v21 }
 0x541   : > { %10096 = vrot.lane.b32.xlu1 %v16272_v31, %s13924_s30 }
 0x542   : > { %v8194_v27 = vpop.permute.xlu0 %8193 }
 0x543   : > { %8253 = vst.msk [vmem:[#allocation3 + $0x67] sm:$0x1] %vm5969_vm3, %v8194_v27  ;;  %v8196_v14 = vpop.permute.xlu1 %8195 }
 0x544   : > { %10441 = vrot.lane.b32.xlu0 %v16272_v31, %s13925_s4  ;;  %8254 = vst.msk [vmem:[#allocation3 + $0x6f] sm:$0x1] %vm5969_vm3, %v8196_v14 }
 0x545   : > { %10786 = vrot.lane.b32.xlu1 %v16272_v31, %s13926_s5 }
 0x546   : > { %v8198_v17 = vpop.permute.xlu0 %8197 }
 0x547   : > { %8255 = vst.msk [vmem:[#allocation3 + $0x77] sm:$0x1] %vm5969_vm3, %v8198_v17  ;;  %v8200_v34 = vpop.permute.xlu1 %8199 }
 0x548   : > { %9223 = vrot.lane.b32.xlu0 %v16332_v47, %s13929_s8  ;;  %8256 = vst.msk [vmem:[#allocation3 + $0x7f] sm:$0x1] %vm5969_vm3, %v8200_v34 }
 0x549   : > { %9769 = vrot.lane.b32.xlu1 %v16332_v47, %s13923_s29 }
 0x54a   : > { %v8202_v45 = vpop.permute.xlu0 %8201 }
 0x54b   : > { %8257 = vst.msk [vmem:[#allocation3 + $0x87] sm:$0x1] %vm5969_vm3, %v8202_v45  ;;  %v8204_v41 = vpop.permute.xlu1 %8203 }
 0x54c   : > { %10114 = vrot.lane.b32.xlu0 %v16332_v47, %s13924_s30  ;;  %8258 = vst.msk [vmem:[#allocation3 + $0x8f] sm:$0x1] %vm5969_vm3, %v8204_v41 }
 0x54d   : > { %10459 = vrot.lane.b32.xlu1 %v16332_v47, %s13925_s4 }
 0x54e   : > { %v8206_v31 = vpop.permute.xlu0 %8205 }
 0x54f   : > { %8259 = vst.msk [vmem:[#allocation3 + $0x97] sm:$0x1] %vm5969_vm3, %v8206_v31  ;;  %v8208_v43 = vpop.permute.xlu1 %8207 }
 0x550   : > { %10804 = vrot.lane.b32.xlu0 %v16332_v47, %s13926_s5  ;;  %8260 = vst.msk [vmem:[#allocation3 + $0x9f] sm:$0x1] %vm5969_vm3, %v8208_v43 }
 0x551   : > { %9207 = vrot.lane.b32.xlu1 %v16276_v12, %s13929_s8 }
 0x552   : > { %v8210_v48 = vpop.permute.xlu0 %8209 }
 0x553   : > { %8261 = vst.msk [vmem:[#allocation3 + $0xa7] sm:$0x1] %vm5969_vm3, %v8210_v48  ;;  %v8212_v50 = vpop.permute.xlu1 %8211 }
 0x554   : > { %9753 = vrot.lane.b32.xlu0 %v16276_v12, %s13923_s29  ;;  %8262 = vst.msk [vmem:[#allocation3 + $0xaf] sm:$0x1] %vm5969_vm3, %v8212_v50 }
 0x555   : > { %10098 = vrot.lane.b32.xlu1 %v16276_v12, %s13924_s30 }
 0x556   : > { %v8214_v29 = vpop.permute.xlu0 %8213 }
 0x557   : > { %8263 = vst.msk [vmem:[#allocation3 + $0xb7] sm:$0x1] %vm5969_vm3, %v8214_v29  ;;  %v8216_v47 = vpop.permute.xlu1 %8215 }
 0x558   : > { %10443 = vrot.lane.b32.xlu0 %v16276_v12, %s13925_s4  ;;  %8264 = vst.msk [vmem:[#allocation3 + $0xbf] sm:$0x1] %vm5969_vm3, %v8216_v47 }
 0x559   : > { %10788 = vrot.lane.b32.xlu1 %v16276_v12, %s13926_s5 }
 0x55a   : > { %v8515_v11 = vpop.permute.xlu0 %8514 }
 0x55b   : > { %8587 = vst.msk [vmem:[#allocation3] sm:$0x1] %vm8586_vm4, %v8515_v11  ;;  %v8517_v52 = vpop.permute.xlu1 %8516 }
 0x55c   : > { %9225 = vrot.lane.b32.xlu0 %v16342_v55, %s13929_s8  ;;  %8588 = vst.msk [vmem:[#allocation3 + $0x8] sm:$0x1] %vm8586_vm4, %v8517_v52 }
 0x55d   : > { %9771 = vrot.lane.b32.xlu1 %v16342_v55, %s13923_s29 }
 0x55e   : > { %v8519_v44 = vpop.permute.xlu0 %8518 }
 0x55f   : > { %8589 = vst.msk [vmem:[#allocation3 + $0x10] sm:$0x1] %vm8586_vm4, %v8519_v44  ;;  %v8521_v59 = vpop.permute.xlu1 %8520 }
 0x560   : > { %10116 = vrot.lane.b32.xlu0 %v16342_v55, %s13924_s30  ;;  %8590 = vst.msk [vmem:[#allocation3 + $0x18] sm:$0x1] %vm8586_vm4, %v8521_v59 }
 0x561   : > { %10461 = vrot.lane.b32.xlu1 %v16342_v55, %s13925_s4 }
 0x562   : > { %v8523_v12 = vpop.permute.xlu0 %8522 }
 0x563   : > { %8591 = vst.msk [vmem:[#allocation3 + $0x20] sm:$0x1] %vm8586_vm4, %v8523_v12  ;;  %v8525_v19 = vpop.permute.xlu1 %8524 }
 0x564   : > { %10806 = vrot.lane.b32.xlu0 %v16342_v55, %s13926_s5  ;;  %8592 = vst.msk [vmem:[#allocation3 + $0x28] sm:$0x1] %vm8586_vm4, %v8525_v19 }
 0x565   : > { %9209 = vrot.lane.b32.xlu1 %v16286_v53, %s13929_s8 }
 0x566   : > { %v8527_v32 = vpop.permute.xlu0 %8526 }
 0x567   : > { %8593 = vst.msk [vmem:[#allocation3 + $0x30] sm:$0x1] %vm8586_vm4, %v8527_v32  ;;  %v8529_v28 = vpop.permute.xlu1 %8528 }
 0x568   : > { %9755 = vrot.lane.b32.xlu0 %v16286_v53, %s13923_s29  ;;  %8594 = vst.msk [vmem:[#allocation3 + $0x38] sm:$0x1] %vm8586_vm4, %v8529_v28 }
 0x569   : > { %10100 = vrot.lane.b32.xlu1 %v16286_v53, %s13924_s30 }
 0x56a   : > { %v8531_v51 = vpop.permute.xlu0 %8530 }
 0x56b   : > { %8595 = vst.msk [vmem:[#allocation3 + $0x40] sm:$0x1] %vm8586_vm4, %v8531_v51  ;;  %v8533_v55 = vpop.permute.xlu1 %8532 }
 0x56c   : > { %10445 = vrot.lane.b32.xlu0 %v16286_v53, %s13925_s4  ;;  %8596 = vst.msk [vmem:[#allocation3 + $0x48] sm:$0x1] %vm8586_vm4, %v8533_v55 }
 0x56d   : > { %10790 = vrot.lane.b32.xlu1 %v16286_v53, %s13926_s5 }
 0x56e   : > { %v8535_v20 = vpop.permute.xlu0 %8534 }
 0x56f   : > { %8597 = vst.msk [vmem:[#allocation3 + $0x50] sm:$0x1] %vm8586_vm4, %v8535_v20  ;;  %v8537_v3 = vpop.permute.xlu1 %8536 }
 0x570   : > { %9227 = vrot.lane.b32.xlu0 %v16346_v63, %s13929_s8  ;;  %8598 = vst.msk [vmem:[#allocation3 + $0x58] sm:$0x1] %vm8586_vm4, %v8537_v3 }
 0x571   : > { %9773 = vrot.lane.b32.xlu1 %v16346_v63, %s13923_s29 }
 0x572   : > { %v8539_v39 = vpop.permute.xlu0 %8538 }
 0x573   : > { %8599 = vst.msk [vmem:[#allocation3 + $0x60] sm:$0x1] %vm8586_vm4, %v8539_v39  ;;  %v8541_v18 = vpop.permute.xlu1 %8540 }
 0x574   : > { %10118 = vrot.lane.b32.xlu0 %v16346_v63, %s13924_s30  ;;  %8600 = vst.msk [vmem:[#allocation3 + $0x68] sm:$0x1] %vm8586_vm4, %v8541_v18 }
 0x575   : > { %10463 = vrot.lane.b32.xlu1 %v16346_v63, %s13925_s4 }
 0x576   : > { %v8543_v53 = vpop.permute.xlu0 %8542 }
 0x577   : > { %8601 = vst.msk [vmem:[#allocation3 + $0x70] sm:$0x1] %vm8586_vm4, %v8543_v53  ;;  %v8545_v33 = vpop.permute.xlu1 %8544 }
 0x578   : > { %10808 = vrot.lane.b32.xlu0 %v16346_v63, %s13926_s5  ;;  %8602 = vst.msk [vmem:[#allocation3 + $0x78] sm:$0x1] %vm8586_vm4, %v8545_v33 }
 0x579   : > { %9211 = vrot.lane.b32.xlu1 %v16290_v25, %s13929_s8 }
 0x57a   : > { %v8547_v15 = vpop.permute.xlu0 %8546 }
 0x57b   : > { %8603 = vst.msk [vmem:[#allocation3 + $0x80] sm:$0x1] %vm8586_vm4, %v8547_v15  ;;  %v8549_v16 = vpop.permute.xlu1 %8548 }
 0x57c   : > { %9757 = vrot.lane.b32.xlu0 %v16290_v25, %s13923_s29  ;;  %8604 = vst.msk [vmem:[#allocation3 + $0x88] sm:$0x1] %vm8586_vm4, %v8549_v16 }
 0x57d   : > { %10102 = vrot.lane.b32.xlu1 %v16290_v25, %s13924_s30 }
 0x57e   : > { %v8551_v0 = vpop.permute.xlu0 %8550 }
 0x57f   : > { %8605 = vst.msk [vmem:[#allocation3 + $0x90] sm:$0x1] %vm8586_vm4, %v8551_v0  ;;  %v8553_v63 = vpop.permute.xlu1 %8552 }
 0x580   : > { %10447 = vrot.lane.b32.xlu0 %v16290_v25, %s13925_s4  ;;  %8606 = vst.msk [vmem:[#allocation3 + $0x98] sm:$0x1] %vm8586_vm4, %v8553_v63 }
 0x581   : > { %10792 = vrot.lane.b32.xlu1 %v16290_v25, %s13926_s5 }
 0x582   : > { %v8555_v7 = vpop.permute.xlu0 %8554 }
 0x583   : > { %8607 = vst.msk [vmem:[#allocation3 + $0xa0] sm:$0x1] %vm8586_vm4, %v8555_v7  ;;  %v8557_v58 = vpop.permute.xlu1 %8556 }
 0x584   : > { %9229 = vrot.lane.b32.xlu0 %v16356_v5, %s13929_s8  ;;  %8608 = vst.msk [vmem:[#allocation3 + $0xa8] sm:$0x1] %vm8586_vm4, %v8557_v58 }
 0x585   : > { %9775 = vrot.lane.b32.xlu1 %v16356_v5, %s13923_s29 }
 0x586   : > { %v8559_v57 = vpop.permute.xlu0 %8558 }
 0x587   : > { %8609 = vst.msk [vmem:[#allocation3 + $0xb0] sm:$0x1] %vm8586_vm4, %v8559_v57  ;;  %v8561_v1 = vpop.permute.xlu1 %8560 }
 0x588   : > { %10120 = vrot.lane.b32.xlu0 %v16356_v5, %s13924_s30  ;;  %8610 = vst.msk [vmem:[#allocation3 + $0xb8] sm:$0x1] %vm8586_vm4, %v8561_v1 }
 0x589   : > { %10465 = vrot.lane.b32.xlu1 %v16356_v5, %s13925_s4 }
 0x58a   : > { %v8861_v25 = vpop.permute.xlu0 %8860 }
 0x58b   : > { %8932 = vst.msk [vmem:[#allocation3 + $0x1] sm:$0x1] %vm8586_vm4, %v8861_v25  ;;  %v8863_v24 = vpop.permute.xlu1 %8862 }
 0x58c   : > { %10810 = vrot.lane.b32.xlu0 %v16356_v5, %s13926_s5  ;;  %8933 = vst.msk [vmem:[#allocation3 + $0x9] sm:$0x1] %vm8586_vm4, %v8863_v24 }
 0x58d   : > { %9213 = vrot.lane.b32.xlu1 %v16300_v8, %s13929_s8 }
 0x58e   : > { %v8865_v54 = vpop.permute.xlu0 %8864 }
 0x58f   : > { %8934 = vst.msk [vmem:[#allocation3 + $0x11] sm:$0x1] %vm8586_vm4, %v8865_v54  ;;  %v8867_v62 = vpop.permute.xlu1 %8866 }
 0x590   : > { %9759 = vrot.lane.b32.xlu0 %v16300_v8, %s13923_s29  ;;  %8935 = vst.msk [vmem:[#allocation3 + $0x19] sm:$0x1] %vm8586_vm4, %v8867_v62 }
 0x591   : > { %10104 = vrot.lane.b32.xlu1 %v16300_v8, %s13924_s30 }
 0x592   : > { %v8869_v23 = vpop.permute.xlu0 %8868 }
 0x593   : > { %8936 = vst.msk [vmem:[#allocation3 + $0x21] sm:$0x1] %vm8586_vm4, %v8869_v23  ;;  %v8871_v5 = vpop.permute.xlu1 %8870 }
 0x594   : > { %10449 = vrot.lane.b32.xlu0 %v16300_v8, %s13925_s4  ;;  %8937 = vst.msk [vmem:[#allocation3 + $0x29] sm:$0x1] %vm8586_vm4, %v8871_v5 }
 0x595   : > { %10794 = vrot.lane.b32.xlu1 %v16300_v8, %s13926_s5 }
 0x596   : > { %v8873_v6 = vpop.permute.xlu0 %8872 }
 0x597   : > { %8938 = vst.msk [vmem:[#allocation3 + $0x31] sm:$0x1] %vm8586_vm4, %v8873_v6  ;;  %v8875_v37 = vpop.permute.xlu1 %8874 }
 0x598   : > { %9231 = vrot.lane.b32.xlu0 %v16360_v36, %s13929_s8  ;;  %8939 = vst.msk [vmem:[#allocation3 + $0x39] sm:$0x1] %vm8586_vm4, %v8875_v37 }
 0x599   : > { %9777 = vrot.lane.b32.xlu1 %v16360_v36, %s13923_s29 }
 0x59a   : > { %v8877_v40 = vpop.permute.xlu0 %8876 }
 0x59b   : > { %8940 = vst.msk [vmem:[#allocation3 + $0x41] sm:$0x1] %vm8586_vm4, %v8877_v40  ;;  %v8879_v46 = vpop.permute.xlu1 %8878 }
 0x59c   : > { %10122 = vrot.lane.b32.xlu0 %v16360_v36, %s13924_s30  ;;  %8941 = vst.msk [vmem:[#allocation3 + $0x49] sm:$0x1] %vm8586_vm4, %v8879_v46 }
 0x59d   : > { %10467 = vrot.lane.b32.xlu1 %v16360_v36, %s13925_s4 }
 0x59e   : > { %v8881_v8 = vpop.permute.xlu0 %8880 }
 0x59f   : > { %8942 = vst.msk [vmem:[#allocation3 + $0x51] sm:$0x1] %vm8586_vm4, %v8881_v8  ;;  %v8883_v4 = vpop.permute.xlu1 %8882 }
 0x5a0   : > { %10812 = vrot.lane.b32.xlu0 %v16360_v36, %s13926_s5  ;;  %8943 = vst.msk [vmem:[#allocation3 + $0x59] sm:$0x1] %vm8586_vm4, %v8883_v4 }
 0x5a1   : > { %9215 = vrot.lane.b32.xlu1 %v16304_v38, %s13929_s8 }
 0x5a2   : > { %v8885_v21 = vpop.permute.xlu0 %8884 }
 0x5a3   : > { %8944 = vst.msk [vmem:[#allocation3 + $0x61] sm:$0x1] %vm8586_vm4, %v8885_v21  ;;  %v8887_v27 = vpop.permute.xlu1 %8886 }
 0x5a4   : > { %9761 = vrot.lane.b32.xlu0 %v16304_v38, %s13923_s29  ;;  %8945 = vst.msk [vmem:[#allocation3 + $0x69] sm:$0x1] %vm8586_vm4, %v8887_v27 }
 0x5a5   : > { %10106 = vrot.lane.b32.xlu1 %v16304_v38, %s13924_s30 }
 0x5a6   : > { %v9222_v14 = vpop.permute.xlu0 %9221 }
 0x5a7   : > { %9285 = vst.msk [vmem:[#allocation3 + $0x42] sm:$0x1] %vm8586_vm4, %v9222_v14  ;;  %v9768_v36 = vpop.permute.xlu1 %9767 }
 0x5a8   : > { %10451 = vrot.lane.b32.xlu0 %v16304_v38, %s13925_s4  ;;  %9831 = vst.msk [vmem:[#allocation3 + $0x44] sm:$0x1] %vm8586_vm4, %v9768_v36 }
 0x5a9   : > { %10796 = vrot.lane.b32.xlu1 %v16304_v38, %s13926_s5 }
 0x5aa   : > { %v10113_v17 = vpop.permute.xlu0 %10112 }
 0x5ab   : > { %10176 = vst.msk [vmem:[#allocation3 + $0x45] sm:$0x1] %vm8586_vm4, %v10113_v17  ;;  %v10458_v34 = vpop.permute.xlu1 %10457 }
 0x5ac   : > { %8888 = vrot.lane.b32.xlu0 %v16370_v22, %s13928_s7  ;;  %10521 = vst.msk [vmem:[#allocation3 + $0x46] sm:$0x1] %vm8586_vm4, %v10458_v34 }
 0x5ad   : > { %8890 = vrot.lane.b32.xlu1 %v16374_v42, %s13928_s7 }
 0x5ae   : > { %v10803_v45 = vpop.permute.xlu0 %10802 }
 0x5af   : > { %10866 = vst.msk [vmem:[#allocation3 + $0x47] sm:$0x1] %vm8586_vm4, %v10803_v45  ;;  %v9206_v41 = vpop.permute.xlu1 %9205 }
 0x5b0   : > { %9233 = vrot.lane.b32.xlu0 %v16370_v22, %s13929_s8  ;;  %9277 = vst.msk [vmem:[#allocation3 + $0x2] sm:$0x1] %vm8586_vm4, %v9206_v41 }
 0x5b1   : > { %9235 = vrot.lane.b32.xlu1 %v16374_v42, %s13929_s8 }
 0x5b2   : > { %v9752_v38 = vpop.permute.xlu0 %9751 }
 0x5b3   : > { %9823 = vst.msk [vmem:[#allocation3 + $0x4] sm:$0x1] %vm8586_vm4, %v9752_v38  ;;  %v10097_v31 = vpop.permute.xlu1 %10096 }
 0x5b4   : > { %9779 = vrot.lane.b32.xlu0 %v16370_v22, %s13923_s29  ;;  %10168 = vst.msk [vmem:[#allocation3 + $0x5] sm:$0x1] %vm8586_vm4, %v10097_v31 }
 0x5b5   : > { %9781 = vrot.lane.b32.xlu1 %v16374_v42, %s13923_s29 }
 0x5b6   : > { %v10442_v43 = vpop.permute.xlu0 %10441  ;;  %v10891_v48 = vld [vmem:[#allocation3 + $0x40] sm:$0xff] }
 0x5b7   : > { %10513 = vst.msk [vmem:[#allocation3 + $0x6] sm:$0x1] %vm8586_vm4, %v10442_v43  ;;  %13773 = vmatpush3.xpose.msk.msra.mxu1 %vm10908_vm6, %v10891_v48  ;;  %v10787_v50 = vpop.permute.xlu1 %10786 }
 0x5b8   : > { %10124 = vrot.lane.b32.xlu0 %v16370_v22, %s13924_s30  ;;  %10858 = vst.msk [vmem:[#allocation3 + $0x7] sm:$0x1] %vm8586_vm4, %v10787_v50  ;;  %13777 = vmatprep.subr.mxu1 %v13930_v61 }
 0x5b9   : > { %10126 = vrot.lane.b32.xlu1 %v16374_v42, %s13924_s30 }
 0x5ba   : > { %v9224_v29 = vpop.permute.xlu0 %9223 }
 0x5bb   : > { %9286 = vst.msk [vmem:[#allocation3 + $0x4a] sm:$0x1] %vm8586_vm4, %v9224_v29  ;;  %v9770_v47 = vpop.permute.xlu1 %9769 }
 0x5bc   : > { %10469 = vrot.lane.b32.xlu0 %v16370_v22, %s13925_s4  ;;  %9832 = vst.msk [vmem:[#allocation3 + $0x4c] sm:$0x1] %vm8586_vm4, %v9770_v47 }
 0x5bd   : > { %10471 = vrot.lane.b32.xlu1 %v16374_v42, %s13925_s4 }
 0x5be   : > { %v10115_v11 = vpop.permute.xlu0 %10114 }
 0x5bf   : > { %10177 = vst.msk [vmem:[#allocation3 + $0x4d] sm:$0x1] %vm8586_vm4, %v10115_v11  ;;  %v10460_v52 = vpop.permute.xlu1 %10459  ;;  %v10882_v44 = vld [vmem:[#allocation3] sm:$0xff] }
 0x5c0   : > { %10814 = vrot.lane.b32.xlu0 %v16370_v22, %s13926_s5  ;;  %10522 = vst.msk [vmem:[#allocation3 + $0x4e] sm:$0x1] %vm8586_vm4, %v10460_v52  ;;  %13775 = vmatmul.mubr.msk.f32.vlgmr.msra.gmra.mrb[0].mxu1 %vm10908_vm6, %v10882_v44 }
 0x5c1   : > { %10816 = vrot.lane.b32.xlu1 %v16374_v42, %s13926_s5  ;;  %13779 = vmatprep.mubr.msk.f32.mxu1 %vm13931_vm5, %v13930_v61 }
 0x5c2   : > { %v10805_v59 = vpop.permute.xlu0 %10804 }
 0x5c3   : > { %10867 = vst.msk [vmem:[#allocation3 + $0x4f] sm:$0x1] %vm8586_vm4, %v10805_v59  ;;  %v9208_v12 = vpop.permute.xlu1 %9207 }
 0x5c4   : > { %9217 = vrot.lane.b32.xlu0 %v16314_v30, %s13929_s8  ;;  %9278 = vst.msk [vmem:[#allocation3 + $0xa] sm:$0x1] %vm8586_vm4, %v9208_v12 }
 0x5c5   : > { %9219 = vrot.lane.b32.xlu1 %v16318_v56, %s13929_s8 }
 0x5c6   : > { %v9754_v22 = vpop.permute.xlu0 %9753 }
 0x5c7   : > { %9824 = vst.msk [vmem:[#allocation3 + $0xc] sm:$0x1] %vm8586_vm4, %v9754_v22  ;;  %v10099_v19 = vpop.permute.xlu1 %10098 }
 0x5c8   : > { %9763 = vrot.lane.b32.xlu0 %v16314_v30, %s13923_s29  ;;  %10169 = vst.msk [vmem:[#allocation3 + $0xd] sm:$0x1] %vm8586_vm4, %v10099_v19 }
 0x5c9   : > { %9765 = vrot.lane.b32.xlu1 %v16318_v56, %s13923_s29 }
 0x5ca   : > { %v10444_v42 = vpop.permute.xlu0 %10443  ;;  %v10892_v32 = vld [vmem:[#allocation3 + $0x48] sm:$0xff] }
 0x5cb   : > { %10514 = vst.msk [vmem:[#allocation3 + $0xe] sm:$0x1] %vm8586_vm4, %v10444_v42  ;;  %13778 = vmatpush3.xpose.msk.msra.mxu1 %vm10908_vm6, %v10892_v32  ;;  %v10789_v28 = vpop.permute.xlu1 %10788 }
 0x5cc   : > { %10108 = vrot.lane.b32.xlu0 %v16314_v30, %s13924_s30  ;;  %10859 = vst.msk [vmem:[#allocation3 + $0xf] sm:$0x1] %vm8586_vm4, %v10789_v28  ;;  %13782 = vmatprep.subr.mxu1 %v13930_v61 }
 0x5cd   : > { %10110 = vrot.lane.b32.xlu1 %v16318_v56, %s13924_s30 }
 0x5ce   : > { %v9226_v51 = vpop.permute.xlu0 %9225 }
 0x5cf   : > { %9287 = vst.msk [vmem:[#allocation3 + $0x52] sm:$0x1] %vm8586_vm4, %v9226_v51  ;;  %v9772_v55 = vpop.permute.xlu1 %9771 }
 0x5d0   : > { %10453 = vrot.lane.b32.xlu0 %v16314_v30, %s13925_s4  ;;  %9833 = vst.msk [vmem:[#allocation3 + $0x54] sm:$0x1] %vm8586_vm4, %v9772_v55 }
 0x5d1   : > { %10455 = vrot.lane.b32.xlu1 %v16318_v56, %s13925_s4 }
 0x5d2   : > { %v10117_v20 = vpop.permute.xlu0 %10116 }
 0x5d3   : > { %10178 = vst.msk [vmem:[#allocation3 + $0x55] sm:$0x1] %vm8586_vm4, %v10117_v20  ;;  %v10462_v3 = vpop.permute.xlu1 %10461  ;;  %v10883_v39 = vld [vmem:[#allocation3 + $0x8] sm:$0xff] }
 0x5d4   : > { %10798 = vrot.lane.b32.xlu0 %v16314_v30, %s13926_s5  ;;  %10523 = vst.msk [vmem:[#allocation3 + $0x56] sm:$0x1] %vm8586_vm4, %v10462_v3  ;;  %13780 = vmatmul.mubr.msk.f32.vlgmr.msra.gmra.mrb[2].mxu1 %vm10908_vm6, %v10883_v39 }
 0x5d5   : > { %10800 = vrot.lane.b32.xlu1 %v16318_v56, %s13926_s5  ;;  %13784 = vmatprep.mubr.msk.f32.mxu1 %vm13931_vm5, %v13930_v61 }
 0x5d6   : > { %v10807_v18 = vpop.permute.xlu0 %10806 }
 0x5d7   : > { %10868 = vst.msk [vmem:[#allocation3 + $0x57] sm:$0x1] %vm8586_vm4, %v10807_v18  ;;  %v9210_v53 = vpop.permute.xlu1 %9209 }
 0x5d8   : > { %8892 = vrot.lane.b32.xlu0 %v16384_v49, %s13928_s7  ;;  %9279 = vst.msk [vmem:[#allocation3 + $0x12] sm:$0x1] %vm8586_vm4, %v9210_v53 }
 0x5d9   : > { %8894 = vrot.lane.b32.xlu1 %v16388_v9, %s13928_s7 }
 0x5da   : > { %v9756_v30 = vpop.permute.xlu0 %9755 }
 0x5db   : > { %9825 = vst.msk [vmem:[#allocation3 + $0x14] sm:$0x1] %vm8586_vm4, %v9756_v30  ;;  %v10101_v33 = vpop.permute.xlu1 %10100 }
 0x5dc   : > { %8896 = vrot.lane.b32.xlu0 %v16398_v10, %s13928_s7  ;;  %10170 = vst.msk [vmem:[#allocation3 + $0x15] sm:$0x1] %vm8586_vm4, %v10101_v33 }
 0x5dd   : > { %8898 = vrot.lane.b32.xlu1 %v16402_v26, %s13928_s7 }
 0x5de   : > { %v10446_v56 = vpop.permute.xlu0 %10445  ;;  %v10893_v15 = vld [vmem:[#allocation3 + $0x50] sm:$0xff] }
 0x5df   : > { %10515 = vst.msk [vmem:[#allocation3 + $0x16] sm:$0x1] %vm8586_vm4, %v10446_v56  ;;  %13783 = vmatpush3.xpose.msk.msra.mxu1 %vm10908_vm6, %v10893_v15  ;;  %v10791_v16 = vpop.permute.xlu1 %10790 }
 0x5e0   : > { %8900 = vrot.lane.b32.xlu0 %v16412_v13, %s13928_s7  ;;  %10860 = vst.msk [vmem:[#allocation3 + $0x17] sm:$0x1] %vm8586_vm4, %v10791_v16  ;;  %13787 = vmatprep.subr.mxu1 %v13930_v61 }
 0x5e1   : > { %8902 = vrot.lane.b32.xlu1 %v16416_v35, %s13928_s7 }
 0x5e2   : > { %v9228_v0 = vpop.permute.xlu0 %9227 }
 0x5e3   : > { %9288 = vst.msk [vmem:[#allocation3 + $0x5a] sm:$0x1] %vm8586_vm4, %v9228_v0  ;;  %v9774_v63 = vpop.permute.xlu1 %9773 }
 0x5e4   : > { %8904 = vrot.lane.b32.xlu0 %v16426_v2, %s13928_s7  ;;  %9834 = vst.msk [vmem:[#allocation3 + $0x5c] sm:$0x1] %vm8586_vm4, %v9774_v63 }
 0x5e5   : > { %8906 = vrot.lane.b32.xlu1 %v16430_v60, %s13928_s7 }
 0x5e6   : > { %v10119_v7 = vpop.permute.xlu0 %10118 }
 0x5e7   : > { %10179 = vst.msk [vmem:[#allocation3 + $0x5d] sm:$0x1] %vm8586_vm4, %v10119_v7  ;;  %v10464_v58 = vpop.permute.xlu1 %10463  ;;  %v10884_v57 = vld [vmem:[#allocation3 + $0x10] sm:$0xff] }
 0x5e8   : > { %9237 = vrot.lane.b32.xlu0 %v16384_v49, %s13929_s8  ;;  %10524 = vst.msk [vmem:[#allocation3 + $0x5e] sm:$0x1] %vm8586_vm4, %v10464_v58  ;;  %13785 = vmatmul.mubr.msk.f32.vlgmr.msra.gmra.mrb[4].mxu1 %vm10908_vm6, %v10884_v57 }
 0x5e9   : > { %9239 = vrot.lane.b32.xlu1 %v16388_v9, %s13929_s8  ;;  %13789 = vmatprep.mubr.msk.f32.mxu1 %vm13931_vm5, %v13930_v61 }
 0x5ea   : > { %v10809_v1 = vpop.permute.xlu0 %10808 }
 0x5eb   : > { %10869 = vst.msk [vmem:[#allocation3 + $0x5f] sm:$0x1] %vm8586_vm4, %v10809_v1  ;;  %v9212_v25 = vpop.permute.xlu1 %9211 }
 0x5ec   : > { %9241 = vrot.lane.b32.xlu0 %v16398_v10, %s13929_s8  ;;  %9280 = vst.msk [vmem:[#allocation3 + $0x1a] sm:$0x1] %vm8586_vm4, %v9212_v25 }
 0x5ed   : > { %9243 = vrot.lane.b32.xlu1 %v16402_v26, %s13929_s8 }
 0x5ee   : > { %v9758_v24 = vpop.permute.xlu0 %9757 }
 0x5ef   : > { %9826 = vst.msk [vmem:[#allocation3 + $0x1c] sm:$0x1] %vm8586_vm4, %v9758_v24  ;;  %v10103_v54 = vpop.permute.xlu1 %10102 }
 0x5f0   : > { %9245 = vrot.lane.b32.xlu0 %v16412_v13, %s13929_s8  ;;  %10171 = vst.msk [vmem:[#allocation3 + $0x1d] sm:$0x1] %vm8586_vm4, %v10103_v54 }
 0x5f1   : > { %9247 = vrot.lane.b32.xlu1 %v16416_v35, %s13929_s8 }
 0x5f2   : > { %v10448_v62 = vpop.permute.xlu0 %10447  ;;  %v10894_v23 = vld [vmem:[#allocation3 + $0x58] sm:$0xff] }
 0x5f3   : > { %10516 = vst.msk [vmem:[#allocation3 + $0x1e] sm:$0x1] %vm8586_vm4, %v10448_v62  ;;  %13788 = vmatpush3.xpose.msk.msra.mxu1 %vm10908_vm6, %v10894_v23  ;;  %v10793_v5 = vpop.permute.xlu1 %10792 }
 0x5f4   : > { %9249 = vrot.lane.b32.xlu0 %v16426_v2, %s13929_s8  ;;  %10861 = vst.msk [vmem:[#allocation3 + $0x1f] sm:$0x1] %vm8586_vm4, %v10793_v5  ;;  %13792 = vmatprep.subr.mxu1 %v13930_v61 }
 0x5f5   : > { %9251 = vrot.lane.b32.xlu1 %v16430_v60, %s13929_s8 }
 0x5f6   : > { %v9230_v6 = vpop.permute.xlu0 %9229 }
 0x5f7   : > { %9289 = vst.msk [vmem:[#allocation3 + $0x62] sm:$0x1] %vm8586_vm4, %v9230_v6  ;;  %v9776_v37 = vpop.permute.xlu1 %9775 }
 0x5f8   : > { %9783 = vrot.lane.b32.xlu0 %v16384_v49, %s13923_s29  ;;  %9835 = vst.msk [vmem:[#allocation3 + $0x64] sm:$0x1] %vm8586_vm4, %v9776_v37 }
 0x5f9   : > { %9785 = vrot.lane.b32.xlu1 %v16388_v9, %s13923_s29 }
 0x5fa   : > { %v10121_v40 = vpop.permute.xlu0 %10120 }
 0x5fb   : > { %10180 = vst.msk [vmem:[#allocation3 + $0x65] sm:$0x1] %vm8586_vm4, %v10121_v40  ;;  %v10466_v46 = vpop.permute.xlu1 %10465  ;;  %v10885_v8 = vld [vmem:[#allocation3 + $0x18] sm:$0xff] }
 0x5fc   : > { %9787 = vrot.lane.b32.xlu0 %v16398_v10, %s13923_s29  ;;  %10525 = vst.msk [vmem:[#allocation3 + $0x66] sm:$0x1] %vm8586_vm4, %v10466_v46  ;;  %13790 = vmatmul.mubr.msk.f32.vlgmr.msra.gmra.mrb[6].mxu1 %vm10908_vm6, %v10885_v8 }
 0x5fd   : > { %9789 = vrot.lane.b32.xlu1 %v16402_v26, %s13923_s29  ;;  %13794 = vmatprep.mubr.msk.f32.mxu1 %vm13931_vm5, %v13930_v61 }
 0x5fe   : > { %v10811_v4 = vpop.permute.xlu0 %10810 }
 0x5ff   : > { %10870 = vst.msk [vmem:[#allocation3 + $0x67] sm:$0x1] %vm8586_vm4, %v10811_v4  ;;  %v9214_v21 = vpop.permute.xlu1 %9213 }
 0x600   : > { %9791 = vrot.lane.b32.xlu0 %v16412_v13, %s13923_s29  ;;  %9281 = vst.msk [vmem:[#allocation3 + $0x22] sm:$0x1] %vm8586_vm4, %v9214_v21 }
 0x601   : > { %9793 = vrot.lane.b32.xlu1 %v16416_v35, %s13923_s29 }
 0x602   : > { %v9760_v27 = vpop.permute.xlu0 %9759 }
 0x603   : > { %9827 = vst.msk [vmem:[#allocation3 + $0x24] sm:$0x1] %vm8586_vm4, %v9760_v27  ;;  %v10105_v14 = vpop.permute.xlu1 %10104 }
 0x604   : > { %9795 = vrot.lane.b32.xlu0 %v16426_v2, %s13923_s29  ;;  %10172 = vst.msk [vmem:[#allocation3 + $0x25] sm:$0x1] %vm8586_vm4, %v10105_v14 }
 0x605   : > { %9797 = vrot.lane.b32.xlu1 %v16430_v60, %s13923_s29 }
 0x606   : > { %v10450_v36 = vpop.permute.xlu0 %10449  ;;  %v10895_v17 = vld [vmem:[#allocation3 + $0x60] sm:$0xff] }
 0x607   : > { %10517 = vst.msk [vmem:[#allocation3 + $0x26] sm:$0x1] %vm8586_vm4, %v10450_v36  ;;  %13793 = vmatpush3.xpose.msk.msra.mxu1 %vm10908_vm6, %v10895_v17  ;;  %v10795_v34 = vpop.permute.xlu1 %10794 }
 0x608   : > { %10128 = vrot.lane.b32.xlu0 %v16384_v49, %s13924_s30  ;;  %10862 = vst.msk [vmem:[#allocation3 + $0x27] sm:$0x1] %vm8586_vm4, %v10795_v34  ;;  %13797 = vmatprep.subr.mxu1 %v13930_v61 }
 0x609   : > { %10130 = vrot.lane.b32.xlu1 %v16388_v9, %s13924_s30 }
 0x60a   : > { %v9232_v45 = vpop.permute.xlu0 %9231 }
 0x60b   : > { %9290 = vst.msk [vmem:[#allocation3 + $0x6a] sm:$0x1] %vm8586_vm4, %v9232_v45  ;;  %v9778_v41 = vpop.permute.xlu1 %9777 }
 0x60c   : > { %10132 = vrot.lane.b32.xlu0 %v16398_v10, %s13924_s30  ;;  %9836 = vst.msk [vmem:[#allocation3 + $0x6c] sm:$0x1] %vm8586_vm4, %v9778_v41 }
 0x60d   : > { %10134 = vrot.lane.b32.xlu1 %v16402_v26, %s13924_s30 }
 0x60e   : > { %v10123_v38 = vpop.permute.xlu0 %10122 }
 0x60f   : > { %10181 = vst.msk [vmem:[#allocation3 + $0x6d] sm:$0x1] %vm8586_vm4, %v10123_v38  ;;  %v10468_v31 = vpop.permute.xlu1 %10467  ;;  %v10886_v43 = vld [vmem:[#allocation3 + $0x20] sm:$0xff] }
 0x610   : > { %10136 = vrot.lane.b32.xlu0 %v16412_v13, %s13924_s30  ;;  %10526 = vst.msk [vmem:[#allocation3 + $0x6e] sm:$0x1] %vm8586_vm4, %v10468_v31  ;;  %13795 = vmatmul.mubr.msk.f32.vlgmr.msra.gmra.mrb[8].mxu1 %vm10908_vm6, %v10886_v43 }
 0x611   : > { %10138 = vrot.lane.b32.xlu1 %v16416_v35, %s13924_s30  ;;  %13799 = vmatprep.mubr.msk.f32.mxu1 %vm13931_vm5, %v13930_v61 }
 0x612   : > { %v10813_v48 = vpop.permute.xlu0 %10812 }
 0x613   : > { %10871 = vst.msk [vmem:[#allocation3 + $0x6f] sm:$0x1] %vm8586_vm4, %v10813_v48  ;;  %v9216_v50 = vpop.permute.xlu1 %9215 }
 0x614   : > { %10140 = vrot.lane.b32.xlu0 %v16426_v2, %s13924_s30  ;;  %9282 = vst.msk [vmem:[#allocation3 + $0x2a] sm:$0x1] %vm8586_vm4, %v9216_v50 }
 0x615   : > { %10142 = vrot.lane.b32.xlu1 %v16430_v60, %s13924_s30 }
 0x616   : > { %v9762_v29 = vpop.permute.xlu0 %9761 }
 0x617   : > { %9828 = vst.msk [vmem:[#allocation3 + $0x2c] sm:$0x1] %vm8586_vm4, %v9762_v29  ;;  %v10107_v47 = vpop.permute.xlu1 %10106 }
 0x618   : > { %10473 = vrot.lane.b32.xlu0 %v16384_v49, %s13925_s4  ;;  %10173 = vst.msk [vmem:[#allocation3 + $0x2d] sm:$0x1] %vm8586_vm4, %v10107_v47 }
 0x619   : > { %10475 = vrot.lane.b32.xlu1 %v16388_v9, %s13925_s4 }
 0x61a   : > { %v10452_v11 = vpop.permute.xlu0 %10451  ;;  %v10896_v52 = vld [vmem:[#allocation3 + $0x68] sm:$0xff] }
 0x61b   : > { %10518 = vst.msk [vmem:[#allocation3 + $0x2e] sm:$0x1] %vm8586_vm4, %v10452_v11  ;;  %13798 = vmatpush3.xpose.msk.msra.mxu1 %vm10908_vm6, %v10896_v52  ;;  %v10797_v44 = vpop.permute.xlu1 %10796 }
 0x61c   : > { %10477 = vrot.lane.b32.xlu0 %v16398_v10, %s13925_s4  ;;  %10863 = vst.msk [vmem:[#allocation3 + $0x2f] sm:$0x1] %vm8586_vm4, %v10797_v44  ;;  %13802 = vmatprep.subr.mxu1 %v13930_v61 }
 0x61d   : > { %10479 = vrot.lane.b32.xlu1 %v16402_v26, %s13925_s4 }
 0x61e   : > { %v8889_v59 = vpop.permute.xlu0 %8888 }
 0x61f   : > { %8946 = vst.msk [vmem:[#allocation3 + $0x71] sm:$0x1] %vm8586_vm4, %v8889_v59  ;;  %v8891_v12 = vpop.permute.xlu1 %8890 }
 0x620   : > { %10481 = vrot.lane.b32.xlu0 %v16412_v13, %s13925_s4  ;;  %8947 = vst.msk [vmem:[#allocation3 + $0x79] sm:$0x1] %vm8586_vm4, %v8891_v12 }
 0x621   : > { %10483 = vrot.lane.b32.xlu1 %v16416_v35, %s13925_s4 }
 0x622   : > { %v9234_v22 = vpop.permute.xlu0 %9233 }
 0x623   : > { %9291 = vst.msk [vmem:[#allocation3 + $0x72] sm:$0x1] %vm8586_vm4, %v9234_v22  ;;  %v9236_v19 = vpop.permute.xlu1 %9235  ;;  %v10887_v42 = vld [vmem:[#allocation3 + $0x28] sm:$0xff] }
 0x624   : > { %10485 = vrot.lane.b32.xlu0 %v16426_v2, %s13925_s4  ;;  %9292 = vst.msk [vmem:[#allocation3 + $0x7a] sm:$0x1] %vm8586_vm4, %v9236_v19  ;;  %13800 = vmatmul.mubr.msk.f32.vlgmr.msra.gmra.mrb[10].mxu1 %vm10908_vm6, %v10887_v42 }
 0x625   : > { %10487 = vrot.lane.b32.xlu1 %v16430_v60, %s13925_s4  ;;  %13804 = vmatprep.mubr.msk.f32.mxu1 %vm13931_vm5, %v13930_v61 }
 0x626   : > { %v9780_v32 = vpop.permute.xlu0 %9779 }
 0x627   : > { %9837 = vst.msk [vmem:[#allocation3 + $0x74] sm:$0x1] %vm8586_vm4, %v9780_v32  ;;  %v9782_v28 = vpop.permute.xlu1 %9781 }
 0x628   : > { %10818 = vrot.lane.b32.xlu0 %v16384_v49, %s13926_s5  ;;  %9838 = vst.msk [vmem:[#allocation3 + $0x7c] sm:$0x1] %vm8586_vm4, %v9782_v28 }
 0x629   : > { %10820 = vrot.lane.b32.xlu1 %v16388_v9, %s13926_s5 }
 0x62a   : > { %v10125_v51 = vpop.permute.xlu0 %10124 }
 0x62b   : > { %10182 = vst.msk [vmem:[#allocation3 + $0x75] sm:$0x1] %vm8586_vm4, %v10125_v51  ;;  %v10127_v55 = vpop.permute.xlu1 %10126 }
 0x62c   : > { %10822 = vrot.lane.b32.xlu0 %v16398_v10, %s13926_s5  ;;  %10183 = vst.msk [vmem:[#allocation3 + $0x7d] sm:$0x1] %vm8586_vm4, %v10127_v55 }
 0x62d   : > { %10824 = vrot.lane.b32.xlu1 %v16402_v26, %s13926_s5 }
 0x62e   : > { %v10470_v20 = vpop.permute.xlu0 %10469 }
 0x62f   : > { %10527 = vst.msk [vmem:[#allocation3 + $0x76] sm:$0x1] %vm8586_vm4, %v10470_v20  ;;  %v10472_v49 = vpop.permute.xlu1 %10471 }
 0x630   : > { %10826 = vrot.lane.b32.xlu0 %v16412_v13, %s13926_s5  ;;  %10528 = vst.msk [vmem:[#allocation3 + $0x7e] sm:$0x1] %vm8586_vm4, %v10472_v49 }
 0x631   : > { %10828 = vrot.lane.b32.xlu1 %v16416_v35, %s13926_s5 }
 0x632   : > { %v10815_v9 = vpop.permute.xlu0 %10814 }
 0x633   : > { %10872 = vst.msk [vmem:[#allocation3 + $0x77] sm:$0x1] %vm8586_vm4, %v10815_v9  ;;  %v10817_v10 = vpop.permute.xlu1 %10816 }
 0x634   : > { %10830 = vrot.lane.b32.xlu0 %v16426_v2, %s13926_s5  ;;  %10873 = vst.msk [vmem:[#allocation3 + $0x7f] sm:$0x1] %vm8586_vm4, %v10817_v10 }
 0x635   : > { %10832 = vrot.lane.b32.xlu1 %v16430_v60, %s13926_s5 }
 0x636   : > { %v9218_v26 = vpop.permute.xlu0 %9217 }
 0x637   : > { %9283 = vst.msk [vmem:[#allocation3 + $0x32] sm:$0x1] %vm8586_vm4, %v9218_v26  ;;  %v9220_v13 = vpop.permute.xlu1 %9219 }
 0x638   : > { %9284 = vst.msk [vmem:[#allocation3 + $0x3a] sm:$0x1] %vm8586_vm4, %v9220_v13 }
 0x63a   : > { %v9764_v3 = vpop.permute.xlu0 %9763  ;;  %v10897_v35 = vld [vmem:[#allocation3 + $0x70] sm:$0xff] }
 0x63b   : > { %9829 = vst.msk [vmem:[#allocation3 + $0x34] sm:$0x1] %vm8586_vm4, %v9764_v3  ;;  %13803 = vmatpush3.xpose.msk.msra.mxu1 %vm10908_vm6, %v10897_v35  ;;  %v9766_v39 = vpop.permute.xlu1 %9765  ;;  %v10898_v18 = vld [vmem:[#allocation3 + $0x78] sm:$0xff] }
 0x63c   : > { %9830 = vst.msk [vmem:[#allocation3 + $0x3c] sm:$0x1] %vm8586_vm4, %v9766_v39  ;;  %13808 = vmatpush3.xpose.msk.msra.mxu0 %vm10908_vm6, %v10898_v18  ;;  %13812 = vmatprep.subr.mxu1 %v13930_v61 }
 0x63d   : > { %13817 = vmatprep.subr.mxu0 %v13930_v61 }
 0x63e   : > { %v10109_v2 = vpop.permute.xlu0 %10108 }
 0x63f   : > { %10174 = vst.msk [vmem:[#allocation3 + $0x35] sm:$0x1] %vm8586_vm4, %v10109_v2  ;;  %v10111_v60 = vpop.permute.xlu1 %10110 }
 0x640   : > { %10175 = vst.msk [vmem:[#allocation3 + $0x3d] sm:$0x1] %vm8586_vm4, %v10111_v60 }
 0x642   : > { %v10454_v53 = vpop.permute.xlu0 %10453 }
 0x643   : > { %10519 = vst.msk [vmem:[#allocation3 + $0x36] sm:$0x1] %vm8586_vm4, %v10454_v53  ;;  %v10456_v30 = vpop.permute.xlu1 %10455 }
 0x644   : > { %10520 = vst.msk [vmem:[#allocation3 + $0x3e] sm:$0x1] %vm8586_vm4, %v10456_v30 }
 0x646   : > { %v10799_v33 = vpop.permute.xlu0 %10798 }
 0x647   : > { %10864 = vst.msk [vmem:[#allocation3 + $0x37] sm:$0x1] %vm8586_vm4, %v10799_v33  ;;  %v10801_v56 = vpop.permute.xlu1 %10800 }
 0x648   : > { %10865 = vst.msk [vmem:[#allocation3 + $0x3f] sm:$0x1] %vm8586_vm4, %v10801_v56 }
 0x64a   : > { %v8893_v15 = vpop.permute.xlu0 %8892 }
 0x64b   : > { %8948 = vst.msk [vmem:[#allocation3 + $0x81] sm:$0x1] %vm8586_vm4, %v8893_v15  ;;  %v8895_v16 = vpop.permute.xlu1 %8894 }
 0x64c   : > { %8949 = vst.msk [vmem:[#allocation3 + $0x89] sm:$0x1] %vm8586_vm4, %v8895_v16 }
 0x64e   : > { %v8897_v0 = vpop.permute.xlu0 %8896  ;;  %v10888_v63 = vld [vmem:[#allocation3 + $0x30] sm:$0xff] }
 0x64f   : > { %8950 = vst.msk [vmem:[#allocation3 + $0x91] sm:$0x1] %vm8586_vm4, %v8897_v0  ;;  %13805 = vmatmul.mubr.msk.f32.vlgmr.msra.gmra.mrb[12].mxu1 %vm10908_vm6, %v10888_v63  ;;  %v8899_v7 = vpop.permute.xlu1 %8898  ;;  %v10889_v58 = vld [vmem:[#allocation3 + $0x38] sm:$0xff] }
 0x650   : > { %8951 = vst.msk [vmem:[#allocation3 + $0x99] sm:$0x1] %vm8586_vm4, %v8899_v7  ;;  %13810 = vmatmul.mubr.msk.f32.vlgmr.msra.gmra.mrb[12].mxu0 %vm10908_vm6, %v10889_v58  ;;  %13814 = vmatprep.mubr.msk.f32.mxu1 %vm13931_vm5, %v13930_v61 }
 0x651   : > { %13819 = vmatprep.mubr.msk.f32.mxu0 %vm13931_vm5, %v13930_v61 }
 0x652   : > { %v8901_v57 = vpop.permute.xlu0 %8900 }
 0x653   : > { %8952 = vst.msk [vmem:[#allocation3 + $0xa1] sm:$0x1] %vm8586_vm4, %v8901_v57  ;;  %v8903_v1 = vpop.permute.xlu1 %8902 }
 0x654   : > { %8953 = vst.msk [vmem:[#allocation3 + $0xa9] sm:$0x1] %vm8586_vm4, %v8903_v1 }
 0x656   : > { %v8905_v25 = vpop.permute.xlu0 %8904 }
 0x657   : > { %8954 = vst.msk [vmem:[#allocation3 + $0xb1] sm:$0x1] %vm8586_vm4, %v8905_v25  ;;  %v8907_v24 = vpop.permute.xlu1 %8906 }
 0x658   : > { %8955 = vst.msk [vmem:[#allocation3 + $0xb9] sm:$0x1] %vm8586_vm4, %v8907_v24 }
 0x65a   : > { %v9238_v54 = vpop.permute.xlu0 %9237 }
 0x65b   : > { %9293 = vst.msk [vmem:[#allocation3 + $0x82] sm:$0x1] %vm8586_vm4, %v9238_v54  ;;  %v9240_v62 = vpop.permute.xlu1 %9239 }
 0x65c   : > { %9294 = vst.msk [vmem:[#allocation3 + $0x8a] sm:$0x1] %vm8586_vm4, %v9240_v62 }
 0x65e   : > { %v9242_v23 = vpop.permute.xlu0 %9241 }
 0x65f   : > { %9295 = vst.msk [vmem:[#allocation3 + $0x92] sm:$0x1] %vm8586_vm4, %v9242_v23  ;;  %v9244_v5 = vpop.permute.xlu1 %9243 }
 0x660   : > { %9296 = vst.msk [vmem:[#allocation3 + $0x9a] sm:$0x1] %vm8586_vm4, %v9244_v5 }
 0x662   : > { %v9246_v6 = vpop.permute.xlu0 %9245 }
 0x663   : > { %9297 = vst.msk [vmem:[#allocation3 + $0xa2] sm:$0x1] %vm8586_vm4, %v9246_v6  ;;  %v9248_v37 = vpop.permute.xlu1 %9247 }
 0x664   : > { %9298 = vst.msk [vmem:[#allocation3 + $0xaa] sm:$0x1] %vm8586_vm4, %v9248_v37 }
 0x666   : > { %v9250_v40 = vpop.permute.xlu0 %9249 }
 0x667   : > { %9299 = vst.msk [vmem:[#allocation3 + $0xb2] sm:$0x1] %vm8586_vm4, %v9250_v40  ;;  %v9252_v46 = vpop.permute.xlu1 %9251 }
 0x668   : > { %9300 = vst.msk [vmem:[#allocation3 + $0xba] sm:$0x1] %vm8586_vm4, %v9252_v46 }
 0x66a   : > { %v9784_v8 = vpop.permute.xlu0 %9783 }
 0x66b   : > { %9839 = vst.msk [vmem:[#allocation3 + $0x84] sm:$0x1] %vm8586_vm4, %v9784_v8  ;;  %v9786_v4 = vpop.permute.xlu1 %9785 }
 0x66c   : > { %9840 = vst.msk [vmem:[#allocation3 + $0x8c] sm:$0x1] %vm8586_vm4, %v9786_v4 }
 0x66e   : > { %v9788_v21 = vpop.permute.xlu0 %9787 }
 0x66f   : > { %9841 = vst.msk [vmem:[#allocation3 + $0x94] sm:$0x1] %vm8586_vm4, %v9788_v21  ;;  %v9790_v27 = vpop.permute.xlu1 %9789 }
 0x670   : > { %9842 = vst.msk [vmem:[#allocation3 + $0x9c] sm:$0x1] %vm8586_vm4, %v9790_v27 }
 0x672   : > { %v9792_v14 = vpop.permute.xlu0 %9791 }
 0x673   : > { %9843 = vst.msk [vmem:[#allocation3 + $0xa4] sm:$0x1] %vm8586_vm4, %v9792_v14  ;;  %v9794_v36 = vpop.permute.xlu1 %9793 }
 0x674   : > { %9844 = vst.msk [vmem:[#allocation3 + $0xac] sm:$0x1] %vm8586_vm4, %v9794_v36 }
 0x676   : > { %v9796_v17 = vpop.permute.xlu0 %9795 }
 0x677   : > { %9845 = vst.msk [vmem:[#allocation3 + $0xb4] sm:$0x1] %vm8586_vm4, %v9796_v17  ;;  %v9798_v34 = vpop.permute.xlu1 %9797 }
 0x678   : > { %9846 = vst.msk [vmem:[#allocation3 + $0xbc] sm:$0x1] %vm8586_vm4, %v9798_v34 }
 0x67a   : > { %v10129_v45 = vpop.permute.xlu0 %10128 }
 0x67b   : > { %10184 = vst.msk [vmem:[#allocation3 + $0x85] sm:$0x1] %vm8586_vm4, %v10129_v45  ;;  %v10131_v41 = vpop.permute.xlu1 %10130 }
 0x67c   : > { %10185 = vst.msk [vmem:[#allocation3 + $0x8d] sm:$0x1] %vm8586_vm4, %v10131_v41 }
 0x67e   : > { %v10133_v38 = vpop.permute.xlu0 %10132 }
 0x67f   : > { %10186 = vst.msk [vmem:[#allocation3 + $0x95] sm:$0x1] %vm8586_vm4, %v10133_v38  ;;  %v10135_v31 = vpop.permute.xlu1 %10134 }
 0x680   : > { %10187 = vst.msk [vmem:[#allocation3 + $0x9d] sm:$0x1] %vm8586_vm4, %v10135_v31 }
 0x682   : > { %v10137_v43 = vpop.permute.xlu0 %10136 }
 0x683   : > { %10188 = vst.msk [vmem:[#allocation3 + $0xa5] sm:$0x1] %vm8586_vm4, %v10137_v43  ;;  %v10139_v48 = vpop.permute.xlu1 %10138 }
 0x684   : > { %10189 = vst.msk [vmem:[#allocation3 + $0xad] sm:$0x1] %vm8586_vm4, %v10139_v48 }
 0x686   : > { %v10141_v50 = vpop.permute.xlu0 %10140 }
 0x687   : > { %10190 = vst.msk [vmem:[#allocation3 + $0xb5] sm:$0x1] %vm8586_vm4, %v10141_v50  ;;  %v10143_v29 = vpop.permute.xlu1 %10142 }
 0x688   : > { %10191 = vst.msk [vmem:[#allocation3 + $0xbd] sm:$0x1] %vm8586_vm4, %v10143_v29 }
 0x68a   : > { %v10474_v47 = vpop.permute.xlu0 %10473 }
 0x68b   : > { %10529 = vst.msk [vmem:[#allocation3 + $0x86] sm:$0x1] %vm8586_vm4, %v10474_v47  ;;  %v10476_v11 = vpop.permute.xlu1 %10475 }
 0x68c   : > { %10530 = vst.msk [vmem:[#allocation3 + $0x8e] sm:$0x1] %vm8586_vm4, %v10476_v11 }
 0x68e   : > { %v10478_v52 = vpop.permute.xlu0 %10477 }
 0x68f   : > { %10531 = vst.msk [vmem:[#allocation3 + $0x96] sm:$0x1] %vm8586_vm4, %v10478_v52  ;;  %v10480_v44 = vpop.permute.xlu1 %10479 }
 0x690   : > { %10532 = vst.msk [vmem:[#allocation3 + $0x9e] sm:$0x1] %vm8586_vm4, %v10480_v44 }
 0x692   : > { %v10482_v59 = vpop.permute.xlu0 %10481 }
 0x693   : > { %10533 = vst.msk [vmem:[#allocation3 + $0xa6] sm:$0x1] %vm8586_vm4, %v10482_v59  ;;  %v10981_v12 = vpop.f32.mrb[0].mxu1  ;;  %v10484_v22 = vpop.permute.xlu1 %10483 }
 0x694   : > { %10534 = vst.msk [vmem:[#allocation3 + $0xae] sm:$0x1] %vm8586_vm4, %v10484_v22  ;;  %v13776_v19 = vpop.f32.mrb[1].mxu1  ;;  %v11518_v42 = vsel %vm11517_vm7, %v10981_v12, -inf }
 0x695   : > { %11519 = vmax.xlane.f32.xlu0 %v11518_v42 }
 0x696   : > { %v10486_v32 = vpop.permute.xlu0 %10485 }
 0x697   : > { %10535 = vst.msk [vmem:[#allocation3 + $0xb6] sm:$0x1] %vm8586_vm4, %v10486_v32  ;;  %v10488_v28 = vpop.permute.xlu1 %10487 }
 0x698   : > { %10536 = vst.msk [vmem:[#allocation3 + $0xbe] sm:$0x1] %vm8586_vm4, %v10488_v28 }
 0x69a   : > { %v10819_v51 = vpop.permute.xlu0 %10818 }
 0x69b   : > { %10874 = vst.msk [vmem:[#allocation3 + $0x87] sm:$0x1] %vm8586_vm4, %v10819_v51  ;;  %v10821_v55 = vpop.permute.xlu1 %10820 }
 0x69c   : > { %10875 = vst.msk [vmem:[#allocation3 + $0x8f] sm:$0x1] %vm8586_vm4, %v10821_v55 }
 0x69e   : > { %v10823_v20 = vpop.permute.xlu0 %10822 }
 0x69f   : > { %10876 = vst.msk [vmem:[#allocation3 + $0x97] sm:$0x1] %vm8586_vm4, %v10823_v20  ;;  %v10825_v49 = vpop.permute.xlu1 %10824 }
 0x6a0   : > { %10877 = vst.msk [vmem:[#allocation3 + $0x9f] sm:$0x1] %vm8586_vm4, %v10825_v49 }
 0x6a2   : > { %v10827_v9 = vpop.permute.xlu0 %10826  ;;  %v10900_v10 = vld [vmem:[#allocation3 + $0x80] sm:$0xff] }
 0x6a3   : > { %10878 = vst.msk [vmem:[#allocation3 + $0xa7] sm:$0x1] %vm8586_vm4, %v10827_v9  ;;  %13813 = vmatpush3.msra.mxu1 %v10900_v10  ;;  %v10829_v26 = vpop.permute.xlu1 %10828  ;;  %v10901_v13 = vld [vmem:[#allocation3 + $0x88] sm:$0xff] }
 0x6a4   : > { %10879 = vst.msk [vmem:[#allocation3 + $0xaf] sm:$0x1] %vm8586_vm4, %v10829_v26  ;;  %13818 = vmatpush3.msra.mxu0 %v10901_v13  ;;  %13822 = vmatprep.subr.mxu1 %v13930_v61 }
 0x6a5   : > { %13827 = vmatprep.subr.mxu0 %v13930_v61 }
 0x6a6   : > { %v10831_v3 = vpop.permute.xlu0 %10830 }
 0x6a7   : > { %10880 = vst.msk [vmem:[#allocation3 + $0xb7] sm:$0x1] %vm8586_vm4, %v10831_v3  ;;  %v11057_v35 = vpop.f32.mrb[2].mxu1  ;;  %v10833_v39 = vpop.permute.xlu1 %10832 }
 0x6a8   : > { %10881 = vst.msk [vmem:[#allocation3 + $0xbf] sm:$0x1] %vm8586_vm4, %v10833_v39  ;;  %v13781_v18 = vpop.f32.mrb[3].mxu1  ;;  %v11521_v2 = vsel %vm11517_vm7, %v11057_v35, -inf }
 0x6a9   : > { %11522 = vmax.xlane.f32.xlu1 %v11521_v2  ;;  %v10902_v18 = vld [vmem:[#allocation3 + $0x90] sm:$0xff] }
 0x6bb   : > { %v11133_v60 = vpop.f32.mrb[4].mxu1 }
 0x6bc   : > { %v13786_v53 = vpop.f32.mrb[5].mxu1  ;;  %v11524_v30 = vsel %vm11517_vm7, %v11133_v60, -inf }
 0x6bd   : > { %11525 = vmax.xlane.f32.xlu0 %v11524_v30  ;;  %v10903_v30 = vld [vmem:[#allocation3 + $0x98] sm:$0xff] }
 0x6cf   : > { %v11209_v33 = vpop.f32.mrb[6].mxu1 }
 0x6d0   : > { %v13791_v56 = vpop.f32.mrb[7].mxu1  ;;  %v11527_v15 = vsel %vm11517_vm7, %v11209_v33, -inf }
 0x6d1   : > { %11528 = vmax.xlane.f32.xlu0 %v11527_v15 }
 0x6e3   : > { %v11285_v16 = vpop.f32.mrb[8].mxu1 }
 0x6e4   : > { %v13796_v0 = vpop.f32.mrb[9].mxu1  ;;  %v11530_v63 = vsel %vm11517_vm7, %v11285_v16, -inf }
 0x6e5   : > { %11531 = vmax.xlane.f32.xlu1 %v11530_v63 }
 0x6f7   : > { %v11361_v7 = vpop.f32.mrb[10].mxu1 }
 0x6f8   : > { %v13801_v58 = vpop.f32.mrb[11].mxu1  ;;  %v11533_v57 = vsel %vm11517_vm7, %v11361_v7, -inf }
 0x6f9   : > { %11534 = vmax.xlane.f32.xlu0 %v11533_v57  ;;  %v10905_v58 = vld [vmem:[#allocation3 + $0xa8] sm:$0xff] }
 0x722   : > { %v11437_v1 = vpop.f32.mrb[12].mxu1  ;;  %v11520_v25 = vpop.xlane.xlu0 %11519 }
 0x723   : > { %v11542_v24 = vsub.f32 %v10981_v12, %v11520_v25  ;;  %v13806_v54 = vpop.f32.mrb[13].mxu1  ;;  %v11536_v62 = vsel %vm11517_vm7, %v11437_v1, -inf  ;;  %v11513_v23 = vpop.f32.mrb[12].mxu0 }
 0x724   : > { %11537 = vmax.xlane.f32.xlu1 %v11536_v62  ;;  %v13811_v5 = vpop.f32.mrb[13].mxu0  ;;  %v11539_v6 = vsel %vm11517_vm7, %v11513_v23, -inf }
 0x725   : > { %v11550_v37 = vmul.f32 1.442695, %v11542_v24  ;;  %11540 = vmax.xlane.f32.xlu0 %v11539_v6  ;;  %v10906_v24 = vld [vmem:[#allocation3 + $0xb0] sm:$0xff]  ;;  %v10907_v5 = vld [vmem:[#allocation3 + $0xb8] sm:$0xff] }
 0x727   : > { %13881 = vpow2.f32 %v11550_v37 }
 0x731   : > { %v13882_v40 = vpop.eup %13881 }
 0x732   : > { %v11566_v46 = vsel %vm11517_vm7, %v13882_v40, 0.0 }
 0x733   : > { %11567 = vadd.xlane.f32.xlu1 %v11566_v46 }
 0x736   : > { %v11523_v8 = vpop.xlane.xlu1 %11522 }
 0x737   : > { %v11543_v4 = vsub.f32 %v11057_v35, %v11523_v8 }
 0x739   : > { %v11552_v21 = vmul.f32 1.442695, %v11543_v4 }
 0x73b   : > { %13883 = vpow2.f32 %v11552_v21 }
 0x745   : > { %v13884_v27 = vpop.eup %13883 }
 0x746   : > { %v11569_v14 = vsel %vm11517_vm7, %v13884_v27, 0.0 }
 0x747   : > { %11570 = vadd.xlane.f32.xlu0 %v11569_v14 }
 0x74a   : > { %v11526_v36 = vpop.xlane.xlu0 %11525 }
 0x74b   : > { %v11544_v17 = vsub.f32 %v11133_v60, %v11526_v36 }
 0x74d   : > { %v11554_v34 = vmul.f32 1.442695, %v11544_v17 }
 0x74f   : > { %13885 = vpow2.f32 %v11554_v34 }
 0x759   : > { %v13886_v45 = vpop.eup %13885 }
 0x75a   : > { %v11572_v41 = vsel %vm11517_vm7, %v13886_v45, 0.0 }
 0x75b   : > { %11573 = vadd.xlane.f32.xlu1 %v11572_v41 }
 0x75e   : > { %v11529_v38 = vpop.xlane.xlu0 %11528 }
 0x75f   : > { %v11545_v31 = vsub.f32 %v11209_v33, %v11529_v38 }
 0x761   : > { %v11556_v43 = vmul.f32 1.442695, %v11545_v31 }
 0x763   : > { %13887 = vpow2.f32 %v11556_v43 }
 0x76d   : > { %v13888_v48 = vpop.eup %13887 }
 0x76e   : > { %v11575_v50 = vsel %vm11517_vm7, %v13888_v48, 0.0 }
 0x76f   : > { %11576 = vadd.xlane.f32.xlu0 %v11575_v50 }
 0x772   : > { %v11532_v29 = vpop.xlane.xlu1 %11531 }
 0x773   : > { %v11546_v47 = vsub.f32 %v11285_v16, %v11532_v29  ;;  %v10904_v16 = vld [vmem:[#allocation3 + $0xa0] sm:$0xff] }
 0x775   : > { %v11558_v11 = vmul.f32 1.442695, %v11546_v47 }
 0x777   : > { %13889 = vpow2.f32 %v11558_v11 }
 0x781   : > { %v16988_v52 = vpop.eup %13889 }
 0x782   : > { %v11578_v44 = vsel %vm11517_vm7, %v16988_v52, 0.0 }
 0x783   : > { %11579 = vadd.xlane.f32.xlu1 %v11578_v44 }
 0x786   : > { %v11535_v59 = vpop.xlane.xlu0 %11534 }
 0x787   : > { %v11547_v12 = vsub.f32 %v11361_v7, %v11535_v59 }
 0x789   : > { %v11560_v22 = vmul.f32 1.442695, %v11547_v12 }
 0x78b   : > { %13891 = vpow2.f32 %v11560_v22 }
 0x795   : > { %v16992_v19 = vpop.eup %13891 }
 0x796   : > { %v11581_v42 = vsel %vm11517_vm7, %v16992_v19, 0.0 }
 0x797   : > { %11582 = vadd.xlane.f32.xlu0 %v11581_v42 }
 0x7b1   : > { %v11538_v32 = vpop.xlane.xlu1 %11537 }
 0x7b2   : > { %v11548_v28 = vsub.f32 %v11437_v1, %v11538_v32  ;;  %v11541_v51 = vpop.xlane.xlu0 %11540 }
 0x7b3   : > { %v11549_v55 = vsub.f32 %v11513_v23, %v11541_v51 }
 0x7b4   : > { %v11562_v20 = vmul.f32 1.442695, %v11548_v28 }
 0x7b5   : > { %v11564_v49 = vmul.f32 1.442695, %v11549_v55 }
 0x7b6   : > { %13893 = vpow2.f32 %v11562_v20 }
 0x7b7   : > { %13895 = vpow2.f32 %v11564_v49 }
 0x7c0   : > { %v16996_v9 = vpop.eup %13893  ;;  %v11568_v10 = vpop.xlane.xlu1 %11567 }
 0x7c1   : > { %v16998_v26 = vpop.eup %13895  ;;  %13897 = vrcp.f32 %v11568_v10  ;;  %v11584_v13 = vsel %vm11517_vm7, %v16996_v9, 0.0 }
 0x7c2   : > { %11585 = vadd.xlane.f32.xlu1 %v11584_v13  ;;  %v11587_v3 = vsel %vm11517_vm7, %v16998_v26, 0.0 }
 0x7c3   : > { %11588 = vadd.xlane.f32.xlu0 %v11587_v3 }
 0x7cb   : > { %v13898_v35 = vpop.eup %13897 }
 0x7cc   : > { %v11598_v39 = vmul.f32 %v13898_v35, %v13882_v40 }
 0x7ce   : > { %13815 = vmatmul.mubr.msk.f32.vlgmr.msra.gmra.mrb[14].mxu1 %vm11517_vm7, %v11598_v39 }
 0x7cf   : > { %13823 = vmatpush3.msra.mxu1 %v10902_v18  ;;  %13824 = vmatprep.mubr.msk.f32.mxu1 %vm13931_vm5, %v13930_v61 }
 0x7d0   : > { %13832 = vmatprep.subr.mxu1 %v13930_v61 }
 0x7d4   : > { %v11571_v2 = vpop.xlane.xlu0 %11570 }
 0x7d5   : > { %13899 = vrcp.f32 %v11571_v2 }
 0x7df   : > { %v13900_v60 = vpop.eup %13899 }
 0x7e0   : > { %v11599_v53 = vmul.f32 %v13900_v60, %v13884_v27 }
 0x7e2   : > { %13820 = vmatmul.mubr.msk.f32.vlgmr.msra.gmra.mrb[14].mxu0 %vm11517_vm7, %v11599_v53 }
 0x7e3   : > { %13828 = vmatpush3.msra.mxu0 %v10903_v30  ;;  %13829 = vmatprep.mubr.msk.f32.mxu0 %vm13931_vm5, %v13930_v61 }
 0x7e4   : > { %13837 = vmatprep.subr.mxu0 %v13930_v61 }
 0x7e8   : > { %v11574_v33 = vpop.xlane.xlu1 %11573 }
 0x7e9   : > { %13901 = vrcp.f32 %v11574_v33 }
 0x7f3   : > { %v13902_v56 = vpop.eup %13901 }
 0x7f4   : > { %v11600_v15 = vmul.f32 %v13902_v56, %v13886_v45 }
 0x7f6   : > { %13825 = vmatmul.mubr.msk.f32.vlgmr.msra.gmra.mrb[16].mxu1 %vm11517_vm7, %v11600_v15 }
 0x7f7   : > { %13833 = vmatpush3.msra.mxu1 %v10904_v16  ;;  %13834 = vmatprep.mubr.msk.f32.mxu1 %vm13931_vm5, %v13930_v61 }
 0x7f8   : > { %13842 = vmatprep.subr.mxu1 %v13930_v61 }
 0x7fc   : > { %v11577_v0 = vpop.xlane.xlu0 %11576 }
 0x7fd   : > { %13903 = vrcp.f32 %v11577_v0 }
 0x807   : > { %v13904_v63 = vpop.eup %13903 }
 0x808   : > { %v11601_v7 = vmul.f32 %v13904_v63, %v13888_v48 }
 0x80a   : > { %13830 = vmatmul.mubr.msk.f32.vlgmr.msra.gmra.mrb[16].mxu0 %vm11517_vm7, %v11601_v7 }
 0x80b   : > { %13838 = vmatpush3.msra.mxu0 %v10905_v58  ;;  %13839 = vmatprep.mubr.msk.f32.mxu0 %vm13931_vm5, %v13930_v61 }
 0x80c   : > { %13847 = vmatprep.subr.mxu0 %v13930_v61 }
 0x810   : > { %v11580_v57 = vpop.xlane.xlu1 %11579 }
 0x811   : > { %13905 = vrcp.f32 %v11580_v57 }
 0x81b   : > { %v13906_v1 = vpop.eup %13905 }
 0x81c   : > { %v11602_v25 = vmul.f32 %v13906_v1, %v16988_v52 }
 0x81e   : > { %13835 = vmatmul.mubr.msk.f32.vlgmr.msra.gmra.mrb[18].mxu1 %vm11517_vm7, %v11602_v25 }
 0x81f   : > { %13843 = vmatpush3.msra.mxu1 %v10906_v24  ;;  %13844 = vmatprep.mubr.msk.f32.mxu1 %vm13931_vm5, %v13930_v61 }
 0x824   : > { %v11583_v54 = vpop.xlane.xlu0 %11582 }
 0x825   : > { %13907 = vrcp.f32 %v11583_v54 }
 0x82f   : > { %v13908_v62 = vpop.eup %13907 }
 0x830   : > { %v11603_v23 = vmul.f32 %v13908_v62, %v16992_v19 }
 0x832   : > { %13840 = vmatmul.mubr.msk.f32.vlgmr.msra.gmra.mrb[18].mxu0 %vm11517_vm7, %v11603_v23 }
 0x833   : > { %13848 = vmatpush3.msra.mxu0 %v10907_v5  ;;  %13849 = vmatprep.mubr.msk.f32.mxu0 %vm13931_vm5, %v13930_v61 }
 0x84f   : > { %v11586_v6 = vpop.xlane.xlu1 %11585 }
 0x850   : > { %13909 = vrcp.f32 %v11586_v6  ;;  %v11589_v37 = vpop.xlane.xlu0 %11588 }
 0x851   : > { %13911 = vrcp.f32 %v11589_v37 }
 0x85a   : > { %v13910_v40 = vpop.eup %13909 }
 0x85b   : > { %v13912_v46 = vpop.eup %13911  ;;  %v11604_v8 = vmul.f32 %v13910_v40, %v16996_v9 }
 0x85c   : > { %v11605_v4 = vmul.f32 %v13912_v46, %v16998_v26 }
 0x85d   : > { %13845 = vmatmul.mubr.msk.f32.vlgmr.msra.gmra.mrb[20].mxu1 %vm11517_vm7, %v11604_v8 }
 0x85e   : > { %13850 = vmatmul.mubr.msk.f32.vlgmr.msra.gmra.mrb[20].mxu0 %vm11517_vm7, %v11605_v4 }
 0x8a1   : > { %v11675_v21 = vpop.f32.mrb[14].mxu1 }
 0x8a2   : > { %12190 = vst.msk [vmem:[#allocation4] sm:$0xff] %vm10908_vm6, %v11675_v21  ;;  %v13816_v27 = vpop.f32.mrb[15].mxu1 }
 0x8a9   : > { %v12214_v61 = vld [vmem:[#allocation4 + $0x1] sm:$0x1]  ;;  %v12198_v14 = vld [vmem:[#allocation4] sm:$0x1]  ;;  %v12262_v26 = vld [vmem:[#allocation4 + $0x2] sm:$0x1] }
 0x8aa   : > { %12230 = vrot.lane.b32.xlu1 %v12214_v61, %s13929_s8  ;;  %12206 = vst.msk [vmem:[%s17037_s14] sm:$0x1] %vm591_vm1, %v12198_v14  ;;  %v12310_v56 = vld [vmem:[#allocation4 + $0x3] sm:$0x1]  ;;  %v12358_v25 = vld [vmem:[#allocation4 + $0x4] sm:$0x1] }
 0x8ab   : > { %v12407_v40 = vld [vmem:[#allocation4 + $0x5] sm:$0x1] }
 0x8b5   : > { %v11748_v36 = vpop.f32.mrb[14].mxu0 }
 0x8b6   : > { %12191 = vst.msk [vmem:[#allocation4 + $0x8] sm:$0xff] %vm10908_vm6, %v11748_v36  ;;  %v13821_v17 = vpop.f32.mrb[15].mxu0 }
 0x8b7   : > { %v12456_v17 = vld [vmem:[#allocation4 + $0x6] sm:$0x1] }
 0x8bd   : > { %v12215_v34 = vld [vmem:[#allocation4 + $0x9] sm:$0x1]  ;;  %v12199_v45 = vld [vmem:[#allocation4 + $0x8] sm:$0x1]  ;;  %v12263_v13 = vld [vmem:[#allocation4 + $0xa] sm:$0x1] }
 0x8be   : > { %12232 = vrot.lane.b32.xlu0 %v12215_v34, %s13929_s8  ;;  %12207 = vst.msk [vmem:[%s17037_s14 + $0x4] sm:$0x1] %vm591_vm1, %v12199_v45  ;;  %v12311_v15 = vld [vmem:[#allocation4 + $0xb] sm:$0x1]  ;;  %v12359_v24 = vld [vmem:[#allocation4 + $0xc] sm:$0x1] }
 0x8bf   : > { %v12408_v8 = vld [vmem:[#allocation4 + $0xd] sm:$0x1]  ;;  %v12457_v34 = vld [vmem:[#allocation4 + $0xe] sm:$0x1] }
 0x8c9   : > { %v11821_v41 = vpop.f32.mrb[16].mxu1 }
 0x8ca   : > { %12192 = vst.msk [vmem:[#allocation4 + $0x10] sm:$0xff] %vm10908_vm6, %v11821_v41  ;;  %v13826_v38 = vpop.f32.mrb[17].mxu1 }
 0x8d1   : > { %v12216_v31 = vld [vmem:[#allocation4 + $0x11] sm:$0x1]  ;;  %v12200_v43 = vld [vmem:[#allocation4 + $0x10] sm:$0x1]  ;;  %v12264_v39 = vld [vmem:[#allocation4 + $0x12] sm:$0x1] }
 0x8d2   : > { %12234 = vrot.lane.b32.xlu1 %v12216_v31, %s13929_s8  ;;  %12208 = vst.msk [vmem:[%s17037_s14 + $0x8] sm:$0x1] %vm591_vm1, %v12200_v43  ;;  %v12312_v16 = vld [vmem:[#allocation4 + $0x13] sm:$0x1]  ;;  %v12360_v54 = vld [vmem:[#allocation4 + $0x14] sm:$0x1] }
 0x8d3   : > { %v12409_v4 = vld [vmem:[#allocation4 + $0x15] sm:$0x1]  ;;  %v12458_v45 = vld [vmem:[#allocation4 + $0x16] sm:$0x1] }
 0x8dd   : > { %v11894_v48 = vpop.f32.mrb[16].mxu0 }
 0x8de   : > { %12193 = vst.msk [vmem:[#allocation4 + $0x18] sm:$0xff] %vm10908_vm6, %v11894_v48  ;;  %v13831_v50 = vpop.f32.mrb[17].mxu0 }
 0x8e5   : > { %v12217_v29 = vld [vmem:[#allocation4 + $0x19] sm:$0x1]  ;;  %v12201_v47 = vld [vmem:[#allocation4 + $0x18] sm:$0x1]  ;;  %v12265_v18 = vld [vmem:[#allocation4 + $0x1a] sm:$0x1] }
 0x8e6   : > { %12236 = vrot.lane.b32.xlu1 %v12217_v29, %s13929_s8  ;;  %12209 = vst.msk [vmem:[%s17037_s14 + $0xc] sm:$0x1] %vm591_vm1, %v12201_v47  ;;  %v12313_v0 = vld [vmem:[#allocation4 + $0x1b] sm:$0x1]  ;;  %v12361_v62 = vld [vmem:[#allocation4 + $0x1c] sm:$0x1] }
 0x8e7   : > { %v12410_v21 = vld [vmem:[#allocation4 + $0x1d] sm:$0x1]  ;;  %v12459_v38 = vld [vmem:[#allocation4 + $0x1e] sm:$0x1]  ;;  %v12505_v29 = vld [vmem:[#allocation4 + $0x7] sm:$0x1] }
 0x8e8   : > { %v12506_v47 = vld [vmem:[#allocation4 + $0xf] sm:$0x1] }
 0x8f1   : > { %v11967_v11 = vpop.f32.mrb[18].mxu1 }
 0x8f2   : > { %12194 = vst.msk [vmem:[#allocation4 + $0x20] sm:$0xff] %vm10908_vm6, %v11967_v11  ;;  %v13836_v52 = vpop.f32.mrb[19].mxu1  ;;  %v12507_v11 = vld [vmem:[#allocation4 + $0x17] sm:$0x1] }
 0x8f3   : > { %v12508_v52 = vld [vmem:[#allocation4 + $0x1f] sm:$0x1] }
 0x8f9   : > { %v12218_v44 = vld [vmem:[#allocation4 + $0x21] sm:$0x1]  ;;  %v12202_v59 = vld [vmem:[#allocation4 + $0x20] sm:$0x1]  ;;  %v12266_v60 = vld [vmem:[#allocation4 + $0x22] sm:$0x1] }
 0x8fa   : > { %12238 = vrot.lane.b32.xlu0 %v12218_v44, %s13929_s8  ;;  %12210 = vst.msk [vmem:[%s17037_s14 + $0x10] sm:$0x1] %vm591_vm1, %v12202_v59  ;;  %v12314_v63 = vld [vmem:[#allocation4 + $0x23] sm:$0x1]  ;;  %v12362_v23 = vld [vmem:[#allocation4 + $0x24] sm:$0x1] }
 0x8fb   : > { %v12411_v27 = vld [vmem:[#allocation4 + $0x25] sm:$0x1]  ;;  %v12460_v31 = vld [vmem:[#allocation4 + $0x26] sm:$0x1]  ;;  %v12509_v44 = vld [vmem:[#allocation4 + $0x27] sm:$0x1] }
 0x905   : > { %v12040_v12 = vpop.f32.mrb[18].mxu0 }
 0x906   : > { %12195 = vst.msk [vmem:[#allocation4 + $0x28] sm:$0xff] %vm10908_vm6, %v12040_v12  ;;  %v13841_v22 = vpop.f32.mrb[19].mxu0 }
 0x90d   : > { %v12219_v19 = vld [vmem:[#allocation4 + $0x29] sm:$0x1]  ;;  %v12203_v42 = vld [vmem:[#allocation4 + $0x28] sm:$0x1]  ;;  %v12267_v53 = vld [vmem:[#allocation4 + $0x2a] sm:$0x1] }
 0x90e   : > { %12240 = vrot.lane.b32.xlu1 %v12219_v19, %s13929_s8  ;;  %12211 = vst.msk [vmem:[%s17037_s14 + $0x14] sm:$0x1] %vm591_vm1, %v12203_v42  ;;  %v12315_v7 = vld [vmem:[#allocation4 + $0x2b] sm:$0x1]  ;;  %v12363_v5 = vld [vmem:[#allocation4 + $0x2c] sm:$0x1] }
 0x90f   : > { %v12412_v61 = vld [vmem:[#allocation4 + $0x2d] sm:$0x1]  ;;  %v12461_v43 = vld [vmem:[#allocation4 + $0x2e] sm:$0x1]  ;;  %v12510_v59 = vld [vmem:[#allocation4 + $0x2f] sm:$0x1] }
 0x910   : > { %v12554_v19 = vld [vmem:[#allocation4] sm:$0x1]  ;;  %v12555_v42 = vld [vmem:[#allocation4 + $0x8] sm:$0x1] }
 0x91c   : > { %v12231_v32 = vpop.permute.xlu1 %12230 }
 0x91d   : > { %12254 = vst.msk [vmem:[%s17037_s14] sm:$0x1] %vm3352_vm2, %v12231_v32  ;;  %v12556_v32 = vld [vmem:[#allocation4 + $0x10] sm:$0x1] }
 0x930   : > { %v12113_v28 = vpop.f32.mrb[20].mxu1  ;;  %v12233_v51 = vpop.permute.xlu0 %12232 }
 0x931   : > { %12196 = vst.msk [vmem:[#allocation4 + $0x30] sm:$0xff] %vm10908_vm6, %v12113_v28  ;;  %v13846_v55 = vpop.f32.mrb[21].mxu1  ;;  %v12186_v20 = vpop.f32.mrb[20].mxu0  ;;  %v12557_v28 = vld [vmem:[#allocation4 + $0x18] sm:$0x1] }
 0x932   : > { %12255 = vst.msk [vmem:[%s17037_s14 + $0x4] sm:$0x1] %vm3352_vm2, %v12233_v51  ;;  %v13851_v49 = vpop.f32.mrb[21].mxu0  ;;  %v12558_v51 = vld [vmem:[#allocation4 + $0x20] sm:$0x1] }
 0x933   : > { %12197 = vst.msk [vmem:[#allocation4 + $0x38] sm:$0xff] %vm10908_vm6, %v12186_v20  ;;  %v12559_v55 = vld [vmem:[#allocation4 + $0x28] sm:$0x1] }
 0x938   : > { %v12220_v9 = vld [vmem:[#allocation4 + $0x31] sm:$0x1]  ;;  %v12204_v3 = vld [vmem:[#allocation4 + $0x30] sm:$0x1]  ;;  %v12268_v30 = vld [vmem:[#allocation4 + $0x32] sm:$0x1] }
 0x939   : > { %12242 = vrot.lane.b32.xlu0 %v12220_v9, %s13929_s8  ;;  %12212 = vst.msk [vmem:[%s17037_s14 + $0x18] sm:$0x1] %vm591_vm1, %v12204_v3  ;;  %v12316_v58 = vld [vmem:[#allocation4 + $0x33] sm:$0x1]  ;;  %v12364_v6 = vld [vmem:[#allocation4 + $0x34] sm:$0x1] }
 0x93a   : > { %v12221_v10 = vld [vmem:[#allocation4 + $0x39] sm:$0x1]  ;;  %v12205_v35 = vld [vmem:[#allocation4 + $0x38] sm:$0x1]  ;;  %v12269_v33 = vld [vmem:[#allocation4 + $0x3a] sm:$0x1] }
 0x93b   : > { %12244 = vrot.lane.b32.xlu1 %v12221_v10, %s13929_s8  ;;  %12213 = vst.msk [vmem:[%s17037_s14 + $0x1c] sm:$0x1] %vm591_vm1, %v12205_v35  ;;  %v12317_v1 = vld [vmem:[#allocation4 + $0x3b] sm:$0x1]  ;;  %v12365_v37 = vld [vmem:[#allocation4 + $0x3c] sm:$0x1] }
 0x93c   : > { %v12413_v14 = vld [vmem:[#allocation4 + $0x35] sm:$0x1]  ;;  %v12414_v36 = vld [vmem:[#allocation4 + $0x3d] sm:$0x1]  ;;  %v12462_v48 = vld [vmem:[#allocation4 + $0x36] sm:$0x1] }
 0x93d   : > { %12278 = vrot.lane.b32.xlu0 %v12262_v26, %s13928_s7  ;;  %v12463_v50 = vld [vmem:[#allocation4 + $0x3e] sm:$0x1]  ;;  %v12511_v12 = vld [vmem:[#allocation4 + $0x37] sm:$0x1]  ;;  %v12512_v22 = vld [vmem:[#allocation4 + $0x3f] sm:$0x1] }
 0x93e   : > { %v12560_v20 = vld [vmem:[#allocation4 + $0x30] sm:$0x1]  ;;  %v12561_v49 = vld [vmem:[#allocation4 + $0x38] sm:$0x1]  ;;  %v12618_v10 = vld [vmem:[#allocation4 + $0x2] sm:$0x1] }
 0x93f   : > { %12280 = vrot.lane.b32.xlu1 %v12263_v13, %s13928_s7  ;;  %v12619_v13 = vld [vmem:[#allocation4 + $0xa] sm:$0x1]  ;;  %v12620_v35 = vld [vmem:[#allocation4 + $0x12] sm:$0x1] }
 0x941   : > { %12282 = vrot.lane.b32.xlu0 %v12264_v39, %s13928_s7 }
 0x943   : > { %12284 = vrot.lane.b32.xlu1 %v12265_v18, %s13928_s7  ;;  %v12621_v18 = vld [vmem:[#allocation4 + $0x1a] sm:$0x1] }
 0x944   : > { %v12235_v2 = vpop.permute.xlu1 %12234 }
 0x945   : > { %12256 = vst.msk [vmem:[%s17037_s14 + $0x8] sm:$0x1] %vm3352_vm2, %v12235_v2  ;;  %12286 = vrot.lane.b32.xlu0 %v12266_v60, %s13928_s7  ;;  %v12622_v60 = vld [vmem:[#allocation4 + $0x22] sm:$0x1] }
 0x947   : > { %12288 = vrot.lane.b32.xlu1 %v12267_v53, %s13928_s7 }
 0x949   : > { %12290 = vrot.lane.b32.xlu0 %v12268_v30, %s13928_s7  ;;  %v12623_v30 = vld [vmem:[#allocation4 + $0x2a] sm:$0x1] }
 0x94b   : > { %12292 = vrot.lane.b32.xlu1 %v12269_v33, %s13928_s7 }
 0x94d   : > { %12326 = vrot.lane.b32.xlu0 %v12310_v56, %s13927_s6  ;;  %v12624_v56 = vld [vmem:[#allocation4 + $0x32] sm:$0x1] }
 0x94f   : > { %12328 = vrot.lane.b32.xlu1 %v12311_v15, %s13927_s6 }
 0x951   : > { %12330 = vrot.lane.b32.xlu0 %v12312_v16, %s13927_s6  ;;  %v12625_v16 = vld [vmem:[#allocation4 + $0x3a] sm:$0x1] }
 0x953   : > { %12332 = vrot.lane.b32.xlu1 %v12313_v0, %s13927_s6 }
 0x955   : > { %12334 = vrot.lane.b32.xlu0 %v12314_v63, %s13927_s6  ;;  %v12666_v63 = vld [vmem:[#allocation4 + $0x3] sm:$0x1] }
 0x957   : > { %12336 = vrot.lane.b32.xlu1 %v12315_v7, %s13927_s6 }
 0x958   : > { %v12237_v57 = vpop.permute.xlu1 %12236 }
 0x959   : > { %12338 = vrot.lane.b32.xlu0 %v12316_v58, %s13927_s6  ;;  %12257 = vst.msk [vmem:[%s17037_s14 + $0xc] sm:$0x1] %vm3352_vm2, %v12237_v57  ;;  %v12667_v58 = vld [vmem:[#allocation4 + $0xb] sm:$0x1] }
 0x95b   : > { %12340 = vrot.lane.b32.xlu1 %v12317_v1, %s13927_s6  ;;  %v12668_v1 = vld [vmem:[#allocation4 + $0x13] sm:$0x1] }
 0x95d   : > { %12374 = vrot.lane.b32.xlu0 %v12358_v25, %s13926_s5 }
 0x95f   : > { %12376 = vrot.lane.b32.xlu1 %v12359_v24, %s13926_s5  ;;  %v12669_v24 = vld [vmem:[#allocation4 + $0x1b] sm:$0x1] }
 0x961   : > { %12378 = vrot.lane.b32.xlu0 %v12360_v54, %s13926_s5 }
 0x963   : > { %12380 = vrot.lane.b32.xlu1 %v12361_v62, %s13926_s5  ;;  %v12670_v62 = vld [vmem:[#allocation4 + $0x23] sm:$0x1] }
 0x965   : > { %12382 = vrot.lane.b32.xlu0 %v12362_v23, %s13926_s5 }
 0x967   : > { %12384 = vrot.lane.b32.xlu1 %v12363_v5, %s13926_s5  ;;  %v12671_v5 = vld [vmem:[#allocation4 + $0x2b] sm:$0x1] }
 0x969   : > { %12386 = vrot.lane.b32.xlu0 %v12364_v6, %s13926_s5 }
 0x96b   : > { %12388 = vrot.lane.b32.xlu1 %v12365_v37, %s13926_s5  ;;  %v12672_v37 = vld [vmem:[#allocation4 + $0x33] sm:$0x1] }
 0x96c   : > { %v12239_v46 = vpop.permute.xlu0 %12238 }
 0x96d   : > { %12423 = vrot.lane.b32.xlu0 %v12407_v40, %s13925_s4  ;;  %12258 = vst.msk [vmem:[%s17037_s14 + $0x10] sm:$0x1] %vm3352_vm2, %v12239_v46  ;;  %v12673_v46 = vld [vmem:[#allocation4 + $0x3b] sm:$0x1] }
 0x96f   : > { %12425 = vrot.lane.b32.xlu1 %v12408_v8, %s13925_s4 }
 0x971   : > { %12427 = vrot.lane.b32.xlu0 %v12409_v4, %s13925_s4  ;;  %v12714_v4 = vld [vmem:[#allocation4 + $0x4] sm:$0x1] }
 0x973   : > { %12429 = vrot.lane.b32.xlu1 %v12410_v21, %s13925_s4 }
 0x975   : > { %12431 = vrot.lane.b32.xlu0 %v12411_v27, %s13925_s4  ;;  %v12715_v27 = vld [vmem:[#allocation4 + $0xc] sm:$0x1] }
 0x977   : > { %12433 = vrot.lane.b32.xlu1 %v12412_v61, %s13925_s4 }
 0x979   : > { %12435 = vrot.lane.b32.xlu0 %v12413_v14, %s13925_s4  ;;  %v12716_v14 = vld [vmem:[#allocation4 + $0x14] sm:$0x1] }
 0x97b   : > { %12437 = vrot.lane.b32.xlu1 %v12414_v36, %s13925_s4 }
 0x97d   : > { %12472 = vrot.lane.b32.xlu0 %v12456_v17, %s13924_s30  ;;  %v12717_v17 = vld [vmem:[#allocation4 + $0x1c] sm:$0x1] }
 0x97f   : > { %12474 = vrot.lane.b32.xlu1 %v12457_v34, %s13924_s30 }
 0x980   : > { %v12241_v41 = vpop.permute.xlu1 %12240 }
 0x981   : > { %12476 = vrot.lane.b32.xlu0 %v12458_v45, %s13924_s30  ;;  %12259 = vst.msk [vmem:[%s17037_s14 + $0x14] sm:$0x1] %vm3352_vm2, %v12241_v41  ;;  %v12718_v45 = vld [vmem:[#allocation4 + $0x24] sm:$0x1] }
 0x983   : > { %12478 = vrot.lane.b32.xlu1 %v12459_v38, %s13924_s30  ;;  %v12719_v38 = vld [vmem:[#allocation4 + $0x2c] sm:$0x1] }
 0x985   : > { %12480 = vrot.lane.b32.xlu0 %v12460_v31, %s13924_s30 }
 0x987   : > { %12482 = vrot.lane.b32.xlu1 %v12461_v43, %s13924_s30  ;;  %v12720_v43 = vld [vmem:[#allocation4 + $0x34] sm:$0x1] }
 0x989   : > { %12484 = vrot.lane.b32.xlu0 %v12462_v48, %s13924_s30 }
 0x98b   : > { %12486 = vrot.lane.b32.xlu1 %v12463_v50, %s13924_s30  ;;  %v12721_v50 = vld [vmem:[#allocation4 + $0x3c] sm:$0x1] }
 0x98d   : > { %12521 = vrot.lane.b32.xlu0 %v12505_v29, %s13923_s29 }
 0x98f   : > { %12523 = vrot.lane.b32.xlu1 %v12506_v47, %s13923_s29  ;;  %v12762_v47 = vld [vmem:[#allocation4 + $0x5] sm:$0x1] }
 0x991   : > { %12525 = vrot.lane.b32.xlu0 %v12507_v11, %s13923_s29 }
 0x993   : > { %12527 = vrot.lane.b32.xlu1 %v12508_v52, %s13923_s29  ;;  %v12763_v52 = vld [vmem:[#allocation4 + $0xd] sm:$0x1] }
 0x995   : > { %12529 = vrot.lane.b32.xlu0 %v12509_v44, %s13923_s29 }
 0x997   : > { %12531 = vrot.lane.b32.xlu1 %v12510_v59, %s13923_s29  ;;  %v12764_v59 = vld [vmem:[#allocation4 + $0x15] sm:$0x1] }
 0x999   : > { %12533 = vrot.lane.b32.xlu0 %v12511_v12, %s13923_s29 }
 0x99b   : > { %12535 = vrot.lane.b32.xlu1 %v12512_v22, %s13923_s29  ;;  %v12765_v22 = vld [vmem:[#allocation4 + $0x1d] sm:$0x1] }
 0x99d   : > { %12570 = vrot.lane.b32.xlu0 %v12554_v19, %s13923_s29 }
 0x99f   : > { %12572 = vrot.lane.b32.xlu1 %v12555_v42, %s13923_s29  ;;  %v12766_v42 = vld [vmem:[#allocation4 + $0x25] sm:$0x1] }
 0x9a1   : > { %12574 = vrot.lane.b32.xlu0 %v12556_v32, %s13923_s29 }
 0x9a3   : > { %12576 = vrot.lane.b32.xlu1 %v12557_v28, %s13923_s29  ;;  %v12767_v28 = vld [vmem:[#allocation4 + $0x2d] sm:$0x1] }
 0x9a5   : > { %12578 = vrot.lane.b32.xlu0 %v12558_v51, %s13923_s29 }
 0x9a7   : > { %12580 = vrot.lane.b32.xlu1 %v12559_v55, %s13923_s29  ;;  %v12768_v55 = vld [vmem:[#allocation4 + $0x35] sm:$0x1] }
 0x9a9   : > { %12582 = vrot.lane.b32.xlu0 %v12560_v20, %s13923_s29 }
 0x9ab   : > { %12584 = vrot.lane.b32.xlu1 %v12561_v49, %s13923_s29  ;;  %v12243_v9 = vpop.permute.xlu0 %12242  ;;  %v12769_v49 = vld [vmem:[#allocation4 + $0x3d] sm:$0x1] }
 0x9ac   : > { %12260 = vst.msk [vmem:[%s17037_s14 + $0x18] sm:$0x1] %vm3352_vm2, %v12243_v9 }
 0x9ad   : > { %v12245_v26 = vpop.permute.xlu1 %12244  ;;  %12634 = vrot.lane.b32.xlu0 %v12618_v10, %s13929_s8  ;;  %v12810_v10 = vld [vmem:[#allocation4 + $0x6] sm:$0x1] }
 0x9ae   : > { %12261 = vst.msk [vmem:[%s17037_s14 + $0x1c] sm:$0x1] %vm3352_vm2, %v12245_v26 }
 0x9af   : > { %12636 = vrot.lane.b32.xlu1 %v12619_v13, %s13929_s8  ;;  %v12279_v3 = vpop.permute.xlu0 %12278  ;;  %v12811_v13 = vld [vmem:[#allocation4 + $0xe] sm:$0x1] }
 0x9b0   : > { %12302 = vst.msk [vmem:[%s17037_s14] sm:$0x1] %vm5969_vm3, %v12279_v3 }
 0x9b1   : > { %v12281_v39 = vpop.permute.xlu1 %12280  ;;  %12638 = vrot.lane.b32.xlu0 %v12620_v35, %s13929_s8  ;;  %v12812_v35 = vld [vmem:[#allocation4 + $0x16] sm:$0x1] }
 0x9b2   : > { %12303 = vst.msk [vmem:[%s17037_s14 + $0x4] sm:$0x1] %vm5969_vm3, %v12281_v39 }
 0x9b3   : > { %12640 = vrot.lane.b32.xlu1 %v12621_v18, %s13929_s8  ;;  %v12283_v2 = vpop.permute.xlu0 %12282  ;;  %v12813_v18 = vld [vmem:[#allocation4 + $0x1e] sm:$0x1] }
 0x9b4   : > { %12304 = vst.msk [vmem:[%s17037_s14 + $0x8] sm:$0x1] %vm5969_vm3, %v12283_v2 }
 0x9b5   : > { %v12285_v53 = vpop.permute.xlu1 %12284  ;;  %12642 = vrot.lane.b32.xlu0 %v12622_v60, %s13929_s8  ;;  %v12814_v60 = vld [vmem:[#allocation4 + $0x26] sm:$0x1] }
 0x9b6   : > { %12305 = vst.msk [vmem:[%s17037_s14 + $0xc] sm:$0x1] %vm5969_vm3, %v12285_v53 }
 0x9b7   : > { %12644 = vrot.lane.b32.xlu1 %v12623_v30, %s13929_s8  ;;  %v12287_v33 = vpop.permute.xlu0 %12286  ;;  %v12815_v30 = vld [vmem:[#allocation4 + $0x2e] sm:$0x1] }
 0x9b8   : > { %12306 = vst.msk [vmem:[%s17037_s14 + $0x10] sm:$0x1] %vm5969_vm3, %v12287_v33 }
 0x9b9   : > { %v12289_v15 = vpop.permute.xlu1 %12288  ;;  %12646 = vrot.lane.b32.xlu0 %v12624_v56, %s13929_s8  ;;  %v12816_v56 = vld [vmem:[#allocation4 + $0x36] sm:$0x1] }
 0x9ba   : > { %12307 = vst.msk [vmem:[%s17037_s14 + $0x14] sm:$0x1] %vm5969_vm3, %v12289_v15 }
 0x9bb   : > { %12648 = vrot.lane.b32.xlu1 %v12625_v16, %s13929_s8  ;;  %v12291_v0 = vpop.permute.xlu0 %12290  ;;  %v12817_v16 = vld [vmem:[#allocation4 + $0x3e] sm:$0x1] }
 0x9bc   : > { %12308 = vst.msk [vmem:[%s17037_s14 + $0x18] sm:$0x1] %vm5969_vm3, %v12291_v0 }
 0x9bd   : > { %v12293_v7 = vpop.permute.xlu1 %12292  ;;  %12682 = vrot.lane.b32.xlu0 %v12666_v63, %s13928_s7  ;;  %v12858_v63 = vld [vmem:[#allocation4 + $0x7] sm:$0x1] }
 0x9be   : > { %12309 = vst.msk [vmem:[%s17037_s14 + $0x1c] sm:$0x1] %vm5969_vm3, %v12293_v7 }
 0x9bf   : > { %12684 = vrot.lane.b32.xlu1 %v12667_v58, %s13928_s7  ;;  %v12327_v57 = vpop.permute.xlu0 %12326  ;;  %v12859_v58 = vld [vmem:[#allocation4 + $0xf] sm:$0x1] }
 0x9c0   : > { %12350 = vst.msk [vmem:[%s17037_s14] sm:$0x1] %vm8586_vm4, %v12327_v57 }
 0x9c1   : > { %v12329_v25 = vpop.permute.xlu1 %12328  ;;  %12686 = vrot.lane.b32.xlu0 %v12668_v1, %s13928_s7  ;;  %v12860_v1 = vld [vmem:[#allocation4 + $0x17] sm:$0x1] }
 0x9c2   : > { %12351 = vst.msk [vmem:[%s17037_s14 + $0x4] sm:$0x1] %vm8586_vm4, %v12329_v25 }
 0x9c3   : > { %12688 = vrot.lane.b32.xlu1 %v12669_v24, %s13928_s7  ;;  %v12331_v54 = vpop.permute.xlu0 %12330  ;;  %v12861_v24 = vld [vmem:[#allocation4 + $0x1f] sm:$0x1] }
 0x9c4   : > { %12352 = vst.msk [vmem:[%s17037_s14 + $0x8] sm:$0x1] %vm8586_vm4, %v12331_v54 }
 0x9c5   : > { %v12333_v23 = vpop.permute.xlu1 %12332  ;;  %12690 = vrot.lane.b32.xlu0 %v12670_v62, %s13928_s7  ;;  %v12862_v62 = vld [vmem:[#allocation4 + $0x27] sm:$0x1] }
 0x9c6   : > { %12353 = vst.msk [vmem:[%s17037_s14 + $0xc] sm:$0x1] %vm8586_vm4, %v12333_v23 }
 0x9c7   : > { %12692 = vrot.lane.b32.xlu1 %v12671_v5, %s13928_s7  ;;  %v12335_v6 = vpop.permute.xlu0 %12334  ;;  %v12863_v5 = vld [vmem:[#allocation4 + $0x2f] sm:$0x1] }
 0x9c8   : > { %12354 = vst.msk [vmem:[%s17037_s14 + $0x10] sm:$0x1] %vm8586_vm4, %v12335_v6 }
 0x9c9   : > { %v12337_v40 = vpop.permute.xlu1 %12336  ;;  %12694 = vrot.lane.b32.xlu0 %v12672_v37, %s13928_s7  ;;  %v12864_v37 = vld [vmem:[#allocation4 + $0x37] sm:$0x1] }
 0x9ca   : > { %12355 = vst.msk [vmem:[%s17037_s14 + $0x14] sm:$0x1] %vm8586_vm4, %v12337_v40 }
 0x9cb   : > { %12696 = vrot.lane.b32.xlu1 %v12673_v46, %s13928_s7  ;;  %v12339_v8 = vpop.permute.xlu0 %12338  ;;  %v12865_v46 = vld [vmem:[#allocation4 + $0x3f] sm:$0x1] }
 0x9cc   : > { %12356 = vst.msk [vmem:[%s17037_s14 + $0x18] sm:$0x1] %vm8586_vm4, %v12339_v8 }
 0x9cd   : > { %v12341_v21 = vpop.permute.xlu1 %12340  ;;  %12730 = vrot.lane.b32.xlu0 %v12714_v4, %s13927_s6  ;;  %v12906_v4 = vld [vmem:[#allocation4] sm:$0x1] }
 0x9ce   : > { %12357 = vst.msk [vmem:[%s17037_s14 + $0x1c] sm:$0x1] %vm8586_vm4, %v12341_v21 }
 0x9cf   : > { %12732 = vrot.lane.b32.xlu1 %v12715_v27, %s13927_s6  ;;  %v12375_v61 = vpop.permute.xlu0 %12374  ;;  %v12907_v27 = vld [vmem:[#allocation4 + $0x8] sm:$0x1] }
 0x9d0   : > { %12399 = vst.msk [vmem:[%s17037_s14] sm:$0x1] %vm12398_vm8, %v12375_v61 }
 0x9d1   : > { %v12377_v36 = vpop.permute.xlu1 %12376  ;;  %12734 = vrot.lane.b32.xlu0 %v12716_v14, %s13927_s6  ;;  %v12602_v14 = vld [vmem:[#allocation4 + $0x1] sm:$0x1] }
 0x9d2   : > { %12400 = vst.msk [vmem:[%s17037_s14 + $0x4] sm:$0x1] %vm12398_vm8, %v12377_v36  ;;  %v12908_v36 = vld [vmem:[#allocation4 + $0x10] sm:$0x1] }
 0x9d3   : > { %12736 = vrot.lane.b32.xlu1 %v12717_v17, %s13927_s6  ;;  %v12379_v34 = vpop.permute.xlu0 %12378 }
 0x9d4   : > { %12401 = vst.msk [vmem:[%s17037_s14 + $0x8] sm:$0x1] %vm12398_vm8, %v12379_v34  ;;  %v12603_v34 = vld [vmem:[#allocation4 + $0x9] sm:$0x1] }
 0x9d5   : > { %v12381_v41 = vpop.permute.xlu1 %12380  ;;  %12738 = vrot.lane.b32.xlu0 %v12718_v45, %s13927_s6  ;;  %v12909_v45 = vld [vmem:[#allocation4 + $0x18] sm:$0x1] }
 0x9d6   : > { %12402 = vst.msk [vmem:[%s17037_s14 + $0xc] sm:$0x1] %vm12398_vm8, %v12381_v41 }
 0x9d7   : > { %12740 = vrot.lane.b32.xlu1 %v12719_v38, %s13927_s6  ;;  %v12383_v31 = vpop.permute.xlu0 %12382  ;;  %v12604_v38 = vld [vmem:[#allocation4 + $0x11] sm:$0x1] }
 0x9d8   : > { %12403 = vst.msk [vmem:[%s17037_s14 + $0x10] sm:$0x1] %vm12398_vm8, %v12383_v31  ;;  %v12910_v31 = vld [vmem:[#allocation4 + $0x20] sm:$0x1] }
 0x9d9   : > { %v12385_v48 = vpop.permute.xlu1 %12384  ;;  %12742 = vrot.lane.b32.xlu0 %v12720_v43, %s13927_s6 }
 0x9da   : > { %12404 = vst.msk [vmem:[%s17037_s14 + $0x14] sm:$0x1] %vm12398_vm8, %v12385_v48  ;;  %v12605_v48 = vld [vmem:[#allocation4 + $0x19] sm:$0x1] }
 0x9db   : > { %12744 = vrot.lane.b32.xlu1 %v12721_v50, %s13927_s6  ;;  %v12387_v29 = vpop.permute.xlu0 %12386  ;;  %v12911_v50 = vld [vmem:[#allocation4 + $0x28] sm:$0x1] }
 0x9dc   : > { %12405 = vst.msk [vmem:[%s17037_s14 + $0x18] sm:$0x1] %vm12398_vm8, %v12387_v29 }
 0x9dd   : > { %v12389_v11 = vpop.permute.xlu1 %12388  ;;  %12778 = vrot.lane.b32.xlu0 %v12762_v47, %s13926_s5  ;;  %v12606_v47 = vld [vmem:[#allocation4 + $0x21] sm:$0x1] }
 0x9de   : > { %12406 = vst.msk [vmem:[%s17037_s14 + $0x1c] sm:$0x1] %vm12398_vm8, %v12389_v11  ;;  %v12912_v11 = vld [vmem:[#allocation4 + $0x30] sm:$0x1] }
 0x9df   : > { %12780 = vrot.lane.b32.xlu1 %v12763_v52, %s13926_s5  ;;  %v12424_v44 = vpop.permute.xlu0 %12423 }
 0x9e0   : > { %12448 = vst.msk [vmem:[%s17037_s14] sm:$0x1] %vm12447_vm9, %v12424_v44  ;;  %v12607_v44 = vld [vmem:[#allocation4 + $0x29] sm:$0x1] }
 0x9e1   : > { %v12426_v12 = vpop.permute.xlu1 %12425  ;;  %12782 = vrot.lane.b32.xlu0 %v12764_v59, %s13926_s5  ;;  %v12913_v59 = vld [vmem:[#allocation4 + $0x38] sm:$0x1] }
 0x9e2   : > { %12449 = vst.msk [vmem:[%s17037_s14 + $0x4] sm:$0x1] %vm12447_vm9, %v12426_v12 }
 0x9e3   : > { %12784 = vrot.lane.b32.xlu1 %v12765_v22, %s13926_s5  ;;  %v12428_v19 = vpop.permute.xlu0 %12427  ;;  %v12608_v22 = vld [vmem:[#allocation4 + $0x31] sm:$0x1] }
 0x9e4   : > { %12450 = vst.msk [vmem:[%s17037_s14 + $0x8] sm:$0x1] %vm12447_vm9, %v12428_v19  ;;  %v12954_v19 = vld [vmem:[#allocation4 + $0x1] sm:$0x1] }
 0x9e5   : > { %v12430_v32 = vpop.permute.xlu1 %12429  ;;  %12786 = vrot.lane.b32.xlu0 %v12766_v42, %s13926_s5 }
 0x9e6   : > { %12451 = vst.msk [vmem:[%s17037_s14 + $0xc] sm:$0x1] %vm12447_vm9, %v12430_v32  ;;  %v12609_v32 = vld [vmem:[#allocation4 + $0x39] sm:$0x1] }
 0x9e7   : > { %12788 = vrot.lane.b32.xlu1 %v12767_v28, %s13926_s5  ;;  %v12432_v51 = vpop.permute.xlu0 %12431  ;;  %v12955_v28 = vld [vmem:[#allocation4 + $0x9] sm:$0x1] }
 0x9e8   : > { %12452 = vst.msk [vmem:[%s17037_s14 + $0x10] sm:$0x1] %vm12447_vm9, %v12432_v51 }
 0x9e9   : > { %v12434_v20 = vpop.permute.xlu1 %12433  ;;  %12790 = vrot.lane.b32.xlu0 %v12768_v55, %s13926_s5  ;;  %v12956_v55 = vld [vmem:[#allocation4 + $0x11] sm:$0x1] }
 0x9ea   : > { %12453 = vst.msk [vmem:[%s17037_s14 + $0x14] sm:$0x1] %vm12447_vm9, %v12434_v20 }
 0x9eb   : > { %12792 = vrot.lane.b32.xlu1 %v12769_v49, %s13926_s5  ;;  %v12436_v9 = vpop.permute.xlu0 %12435  ;;  %v12957_v49 = vld [vmem:[#allocation4 + $0x19] sm:$0x1] }
 0x9ec   : > { %12454 = vst.msk [vmem:[%s17037_s14 + $0x18] sm:$0x1] %vm12447_vm9, %v12436_v9 }
 0x9ed   : > { %v12438_v26 = vpop.permute.xlu1 %12437  ;;  %12826 = vrot.lane.b32.xlu0 %v12810_v10, %s13925_s4  ;;  %v12958_v10 = vld [vmem:[#allocation4 + $0x21] sm:$0x1] }
 0x9ee   : > { %12455 = vst.msk [vmem:[%s17037_s14 + $0x1c] sm:$0x1] %vm12447_vm9, %v12438_v26 }
 0x9ef   : > { %12828 = vrot.lane.b32.xlu1 %v12811_v13, %s13925_s4  ;;  %v12473_v3 = vpop.permute.xlu0 %12472  ;;  %v12959_v13 = vld [vmem:[#allocation4 + $0x29] sm:$0x1] }
 0x9f0   : > { %12497 = vst.msk [vmem:[%s17037_s14] sm:$0x1] %vm12496_vm10, %v12473_v3 }
 0x9f1   : > { %v12475_v39 = vpop.permute.xlu1 %12474  ;;  %12830 = vrot.lane.b32.xlu0 %v12812_v35, %s13925_s4  ;;  %v12960_v35 = vld [vmem:[#allocation4 + $0x31] sm:$0x1] }
 0x9f2   : > { %12498 = vst.msk [vmem:[%s17037_s14 + $0x4] sm:$0x1] %vm12496_vm10, %v12475_v39 }
 0x9f3   : > { %12832 = vrot.lane.b32.xlu1 %v12813_v18, %s13925_s4  ;;  %v12477_v2 = vpop.permute.xlu0 %12476  ;;  %v12961_v18 = vld [vmem:[#allocation4 + $0x39] sm:$0x1] }
 0x9f4   : > { %12499 = vst.msk [vmem:[%s17037_s14 + $0x8] sm:$0x1] %vm12496_vm10, %v12477_v2 }
 0x9f5   : > { %v12479_v53 = vpop.permute.xlu1 %12478  ;;  %12834 = vrot.lane.b32.xlu0 %v12814_v60, %s13925_s4  ;;  %v13018_v60 = vld [vmem:[#allocation4 + $0x3] sm:$0x1] }
 0x9f6   : > { %12500 = vst.msk [vmem:[%s17037_s14 + $0xc] sm:$0x1] %vm12496_vm10, %v12479_v53 }
 0x9f7   : > { %12836 = vrot.lane.b32.xlu1 %v12815_v30, %s13925_s4  ;;  %v12481_v33 = vpop.permute.xlu0 %12480  ;;  %v13019_v30 = vld [vmem:[#allocation4 + $0xb] sm:$0x1] }
 0x9f8   : > { %12501 = vst.msk [vmem:[%s17037_s14 + $0x10] sm:$0x1] %vm12496_vm10, %v12481_v33 }
 0x9f9   : > { %v12483_v15 = vpop.permute.xlu1 %12482  ;;  %12838 = vrot.lane.b32.xlu0 %v12816_v56, %s13925_s4  ;;  %v13020_v56 = vld [vmem:[#allocation4 + $0x13] sm:$0x1] }
 0x9fa   : > { %12502 = vst.msk [vmem:[%s17037_s14 + $0x14] sm:$0x1] %vm12496_vm10, %v12483_v15 }
 0x9fb   : > { %12840 = vrot.lane.b32.xlu1 %v12817_v16, %s13925_s4  ;;  %v12485_v0 = vpop.permute.xlu0 %12484  ;;  %v13021_v16 = vld [vmem:[#allocation4 + $0x1b] sm:$0x1] }
 0x9fc   : > { %12503 = vst.msk [vmem:[%s17037_s14 + $0x18] sm:$0x1] %vm12496_vm10, %v12485_v0 }
 0x9fd   : > { %v12487_v7 = vpop.permute.xlu1 %12486  ;;  %12874 = vrot.lane.b32.xlu0 %v12858_v63, %s13924_s30  ;;  %v13022_v63 = vld [vmem:[#allocation4 + $0x23] sm:$0x1] }
 0x9fe   : > { %12504 = vst.msk [vmem:[%s17037_s14 + $0x1c] sm:$0x1] %vm12496_vm10, %v12487_v7 }
 0x9ff   : > { %12876 = vrot.lane.b32.xlu1 %v12859_v58, %s13924_s30  ;;  %v12522_v57 = vpop.permute.xlu0 %12521  ;;  %v13023_v58 = vld [vmem:[#allocation4 + $0x2b] sm:$0x1] }
 0xa00   : > { %12546 = vst.msk [vmem:[%s17037_s14] sm:$0x1] %vm12545_vm11, %v12522_v57 }
 0xa01   : > { %v12524_v25 = vpop.permute.xlu1 %12523  ;;  %12878 = vrot.lane.b32.xlu0 %v12860_v1, %s13924_s30  ;;  %v13024_v1 = vld [vmem:[#allocation4 + $0x33] sm:$0x1] }
 0xa02   : > { %12547 = vst.msk [vmem:[%s17037_s14 + $0x4] sm:$0x1] %vm12545_vm11, %v12524_v25 }
 0xa03   : > { %12880 = vrot.lane.b32.xlu1 %v12861_v24, %s13924_s30  ;;  %v12526_v54 = vpop.permute.xlu0 %12525  ;;  %v13025_v24 = vld [vmem:[#allocation4 + $0x3b] sm:$0x1] }
 0xa04   : > { %12548 = vst.msk [vmem:[%s17037_s14 + $0x8] sm:$0x1] %vm12545_vm11, %v12526_v54 }
 0xa05   : > { %v12528_v23 = vpop.permute.xlu1 %12527  ;;  %12882 = vrot.lane.b32.xlu0 %v12862_v62, %s13924_s30  ;;  %v13066_v62 = vld [vmem:[#allocation4 + $0x4] sm:$0x1] }
 0xa06   : > { %12549 = vst.msk [vmem:[%s17037_s14 + $0xc] sm:$0x1] %vm12545_vm11, %v12528_v23 }
 0xa07   : > { %12884 = vrot.lane.b32.xlu1 %v12863_v5, %s13924_s30  ;;  %v12530_v6 = vpop.permute.xlu0 %12529  ;;  %v13067_v5 = vld [vmem:[#allocation4 + $0xc] sm:$0x1] }
 0xa08   : > { %12550 = vst.msk [vmem:[%s17037_s14 + $0x10] sm:$0x1] %vm12545_vm11, %v12530_v6 }
 0xa09   : > { %v12532_v40 = vpop.permute.xlu1 %12531  ;;  %12886 = vrot.lane.b32.xlu0 %v12864_v37, %s13924_s30  ;;  %v13068_v37 = vld [vmem:[#allocation4 + $0x14] sm:$0x1] }
 0xa0a   : > { %12551 = vst.msk [vmem:[%s17037_s14 + $0x14] sm:$0x1] %vm12545_vm11, %v12532_v40 }
 0xa0b   : > { %12888 = vrot.lane.b32.xlu1 %v12865_v46, %s13924_s30  ;;  %v12534_v8 = vpop.permute.xlu0 %12533  ;;  %v13069_v46 = vld [vmem:[#allocation4 + $0x1c] sm:$0x1] }
 0xa0c   : > { %12552 = vst.msk [vmem:[%s17037_s14 + $0x18] sm:$0x1] %vm12545_vm11, %v12534_v8 }
 0xa0d   : > { %v12536_v21 = vpop.permute.xlu1 %12535  ;;  %12922 = vrot.lane.b32.xlu0 %v12906_v4, %s13924_s30  ;;  %v13070_v4 = vld [vmem:[#allocation4 + $0x24] sm:$0x1] }
 0xa0e   : > { %12553 = vst.msk [vmem:[%s17037_s14 + $0x1c] sm:$0x1] %vm12545_vm11, %v12536_v21 }
 0xa0f   : > { %12924 = vrot.lane.b32.xlu1 %v12907_v27, %s13924_s30  ;;  %v12571_v61 = vpop.permute.xlu0 %12570  ;;  %v13071_v27 = vld [vmem:[#allocation4 + $0x2c] sm:$0x1] }
 0xa10   : > { %12594 = vst.msk [vmem:[%s17037_s14 + $0x1] sm:$0x1] %vm591_vm1, %v12571_v61 }
 0xa11   : > { %v12573_v17 = vpop.permute.xlu1 %12572  ;;  %12610 = vst.msk [vmem:[%s17037_s14 + $0x1] sm:$0x1] %vm3352_vm2, %v12602_v14  ;;  %12926 = vrot.lane.b32.xlu0 %v12908_v36, %s13924_s30  ;;  %v13072_v14 = vld [vmem:[#allocation4 + $0x34] sm:$0x1] }
 0xa12   : > { %12595 = vst.msk [vmem:[%s17037_s14 + $0x5] sm:$0x1] %vm591_vm1, %v12573_v17  ;;  %v13073_v17 = vld [vmem:[#allocation4 + $0x3c] sm:$0x1] }
 0xa13   : > { %12611 = vst.msk [vmem:[%s17037_s14 + $0x5] sm:$0x1] %vm3352_vm2, %v12603_v34  ;;  %12928 = vrot.lane.b32.xlu1 %v12909_v45, %s13924_s30  ;;  %v12575_v41 = vpop.permute.xlu0 %12574  ;;  %v13114_v45 = vld [vmem:[#allocation4 + $0x5] sm:$0x1] }
 0xa14   : > { %12596 = vst.msk [vmem:[%s17037_s14 + $0x9] sm:$0x1] %vm591_vm1, %v12575_v41 }
 0xa15   : > { %v12577_v43 = vpop.permute.xlu1 %12576  ;;  %12612 = vst.msk [vmem:[%s17037_s14 + $0x9] sm:$0x1] %vm3352_vm2, %v12604_v38  ;;  %12930 = vrot.lane.b32.xlu0 %v12910_v31, %s13924_s30  ;;  %v13115_v38 = vld [vmem:[#allocation4 + $0xd] sm:$0x1] }
 0xa16   : > { %12597 = vst.msk [vmem:[%s17037_s14 + $0xd] sm:$0x1] %vm591_vm1, %v12577_v43  ;;  %v13116_v43 = vld [vmem:[#allocation4 + $0x15] sm:$0x1] }
 0xa17   : > { %12613 = vst.msk [vmem:[%s17037_s14 + $0xd] sm:$0x1] %vm3352_vm2, %v12605_v48  ;;  %12932 = vrot.lane.b32.xlu1 %v12911_v50, %s13924_s30  ;;  %v12579_v29 = vpop.permute.xlu0 %12578  ;;  %v13117_v50 = vld [vmem:[#allocation4 + $0x1d] sm:$0x1] }
 0xa18   : > { %12598 = vst.msk [vmem:[%s17037_s14 + $0x11] sm:$0x1] %vm591_vm1, %v12579_v29 }
 0xa19   : > { %v12581_v52 = vpop.permute.xlu1 %12580  ;;  %12614 = vst.msk [vmem:[%s17037_s14 + $0x11] sm:$0x1] %vm3352_vm2, %v12606_v47  ;;  %12934 = vrot.lane.b32.xlu0 %v12912_v11, %s13924_s30  ;;  %v13118_v47 = vld [vmem:[#allocation4 + $0x25] sm:$0x1] }
 0xa1a   : > { %12599 = vst.msk [vmem:[%s17037_s14 + $0x15] sm:$0x1] %vm591_vm1, %v12581_v52  ;;  %v13119_v52 = vld [vmem:[#allocation4 + $0x2d] sm:$0x1] }
 0xa1b   : > { %12615 = vst.msk [vmem:[%s17037_s14 + $0x15] sm:$0x1] %vm3352_vm2, %v12607_v44  ;;  %12936 = vrot.lane.b32.xlu1 %v12913_v59, %s13924_s30  ;;  %v12583_v12 = vpop.permute.xlu0 %12582  ;;  %v13120_v59 = vld [vmem:[#allocation4 + $0x35] sm:$0x1] }
 0xa1c   : > { %12600 = vst.msk [vmem:[%s17037_s14 + $0x19] sm:$0x1] %vm591_vm1, %v12583_v12 }
 0xa1d   : > { %v12585_v42 = vpop.permute.xlu1 %12584  ;;  %12616 = vst.msk [vmem:[%s17037_s14 + $0x19] sm:$0x1] %vm3352_vm2, %v12608_v22  ;;  %12970 = vrot.lane.b32.xlu0 %v12954_v19, %s13923_s29  ;;  %v13121_v22 = vld [vmem:[#allocation4 + $0x3d] sm:$0x1] }
 0xa1e   : > { %12601 = vst.msk [vmem:[%s17037_s14 + $0x1d] sm:$0x1] %vm591_vm1, %v12585_v42  ;;  %v13162_v42 = vld [vmem:[#allocation4 + $0x6] sm:$0x1] }
 0xa1f   : > { %12617 = vst.msk [vmem:[%s17037_s14 + $0x1d] sm:$0x1] %vm3352_vm2, %v12609_v32  ;;  %12972 = vrot.lane.b32.xlu1 %v12955_v28, %s13923_s29  ;;  %v12635_v51 = vpop.permute.xlu0 %12634  ;;  %v13163_v28 = vld [vmem:[#allocation4 + $0xe] sm:$0x1] }
 0xa20   : > { %12658 = vst.msk [vmem:[%s17037_s14 + $0x1] sm:$0x1] %vm5969_vm3, %v12635_v51 }
 0xa21   : > { %v12637_v20 = vpop.permute.xlu1 %12636  ;;  %12974 = vrot.lane.b32.xlu0 %v12956_v55, %s13923_s29  ;;  %v13164_v55 = vld [vmem:[#allocation4 + $0x16] sm:$0x1] }
 0xa22   : > { %12659 = vst.msk [vmem:[%s17037_s14 + $0x5] sm:$0x1] %vm5969_vm3, %v12637_v20 }
 0xa23   : > { %12976 = vrot.lane.b32.xlu1 %v12957_v49, %s13923_s29  ;;  %v12639_v9 = vpop.permute.xlu0 %12638  ;;  %v13165_v49 = vld [vmem:[#allocation4 + $0x1e] sm:$0x1] }
 0xa24   : > { %12660 = vst.msk [vmem:[%s17037_s14 + $0x9] sm:$0x1] %vm5969_vm3, %v12639_v9 }
 0xa25   : > { %v12641_v26 = vpop.permute.xlu1 %12640  ;;  %12978 = vrot.lane.b32.xlu0 %v12958_v10, %s13923_s29  ;;  %v13166_v10 = vld [vmem:[#allocation4 + $0x26] sm:$0x1] }
 0xa26   : > { %12661 = vst.msk [vmem:[%s17037_s14 + $0xd] sm:$0x1] %vm5969_vm3, %v12641_v26 }
 0xa27   : > { %12980 = vrot.lane.b32.xlu1 %v12959_v13, %s13923_s29  ;;  %v12643_v3 = vpop.permute.xlu0 %12642  ;;  %v13167_v13 = vld [vmem:[#allocation4 + $0x2e] sm:$0x1] }
 0xa28   : > { %12662 = vst.msk [vmem:[%s17037_s14 + $0x11] sm:$0x1] %vm5969_vm3, %v12643_v3 }
 0xa29   : > { %v12645_v39 = vpop.permute.xlu1 %12644  ;;  %12982 = vrot.lane.b32.xlu0 %v12960_v35, %s13923_s29  ;;  %v13168_v35 = vld [vmem:[#allocation4 + $0x36] sm:$0x1] }
 0xa2a   : > { %12663 = vst.msk [vmem:[%s17037_s14 + $0x15] sm:$0x1] %vm5969_vm3, %v12645_v39 }
 0xa2b   : > { %12984 = vrot.lane.b32.xlu1 %v12961_v18, %s13923_s29  ;;  %v12647_v2 = vpop.permute.xlu0 %12646  ;;  %v13169_v18 = vld [vmem:[#allocation4 + $0x3e] sm:$0x1] }
 0xa2c   : > { %12664 = vst.msk [vmem:[%s17037_s14 + $0x19] sm:$0x1] %vm5969_vm3, %v12647_v2 }
 0xa2d   : > { %v12649_v53 = vpop.permute.xlu1 %12648  ;;  %13034 = vrot.lane.b32.xlu0 %v13018_v60, %s13929_s8  ;;  %v13210_v60 = vld [vmem:[#allocation4 + $0x7] sm:$0x1] }
 0xa2e   : > { %12665 = vst.msk [vmem:[%s17037_s14 + $0x1d] sm:$0x1] %vm5969_vm3, %v12649_v53 }
 0xa2f   : > { %13036 = vrot.lane.b32.xlu1 %v13019_v30, %s13929_s8  ;;  %v12683_v33 = vpop.permute.xlu0 %12682  ;;  %v13211_v30 = vld [vmem:[#allocation4 + $0xf] sm:$0x1] }
 0xa30   : > { %12706 = vst.msk [vmem:[%s17037_s14 + $0x1] sm:$0x1] %vm8586_vm4, %v12683_v33 }
 0xa31   : > { %v12685_v15 = vpop.permute.xlu1 %12684  ;;  %13038 = vrot.lane.b32.xlu0 %v13020_v56, %s13929_s8  ;;  %v13212_v56 = vld [vmem:[#allocation4 + $0x17] sm:$0x1] }
 0xa32   : > { %12707 = vst.msk [vmem:[%s17037_s14 + $0x5] sm:$0x1] %vm8586_vm4, %v12685_v15 }
 0xa33   : > { %13040 = vrot.lane.b32.xlu1 %v13021_v16, %s13929_s8  ;;  %v12687_v0 = vpop.permute.xlu0 %12686  ;;  %v13213_v16 = vld [vmem:[#allocation4 + $0x1f] sm:$0x1] }
 0xa34   : > { %12708 = vst.msk [vmem:[%s17037_s14 + $0x9] sm:$0x1] %vm8586_vm4, %v12687_v0 }
 0xa35   : > { %v12689_v7 = vpop.permute.xlu1 %12688  ;;  %13042 = vrot.lane.b32.xlu0 %v13022_v63, %s13929_s8  ;;  %v13214_v63 = vld [vmem:[#allocation4 + $0x27] sm:$0x1] }
 0xa36   : > { %12709 = vst.msk [vmem:[%s17037_s14 + $0xd] sm:$0x1] %vm8586_vm4, %v12689_v7 }
 0xa37   : > { %13044 = vrot.lane.b32.xlu1 %v13023_v58, %s13929_s8  ;;  %v12691_v57 = vpop.permute.xlu0 %12690  ;;  %v13215_v58 = vld [vmem:[#allocation4 + $0x2f] sm:$0x1] }
 0xa38   : > { %12710 = vst.msk [vmem:[%s17037_s14 + $0x11] sm:$0x1] %vm8586_vm4, %v12691_v57 }
 0xa39   : > { %v12693_v25 = vpop.permute.xlu1 %12692  ;;  %13046 = vrot.lane.b32.xlu0 %v13024_v1, %s13929_s8  ;;  %v13216_v1 = vld [vmem:[#allocation4 + $0x37] sm:$0x1] }
 0xa3a   : > { %12711 = vst.msk [vmem:[%s17037_s14 + $0x15] sm:$0x1] %vm8586_vm4, %v12693_v25 }
 0xa3b   : > { %13048 = vrot.lane.b32.xlu1 %v13025_v24, %s13929_s8  ;;  %v12695_v54 = vpop.permute.xlu0 %12694  ;;  %v13217_v24 = vld [vmem:[#allocation4 + $0x3f] sm:$0x1] }
 0xa3c   : > { %12712 = vst.msk [vmem:[%s17037_s14 + $0x19] sm:$0x1] %vm8586_vm4, %v12695_v54 }
 0xa3d   : > { %v12697_v23 = vpop.permute.xlu1 %12696  ;;  %13082 = vrot.lane.b32.xlu0 %v13066_v62, %s13928_s7  ;;  %v13258_v62 = vld [vmem:[#allocation4] sm:$0x1] }
 0xa3e   : > { %12713 = vst.msk [vmem:[%s17037_s14 + $0x1d] sm:$0x1] %vm8586_vm4, %v12697_v23 }
 0xa3f   : > { %13084 = vrot.lane.b32.xlu1 %v13067_v5, %s13928_s7  ;;  %v12731_v6 = vpop.permute.xlu0 %12730  ;;  %v13259_v5 = vld [vmem:[#allocation4 + $0x8] sm:$0x1] }
 0xa40   : > { %12754 = vst.msk [vmem:[%s17037_s14 + $0x1] sm:$0x1] %vm12398_vm8, %v12731_v6 }
 0xa41   : > { %v12733_v40 = vpop.permute.xlu1 %12732  ;;  %13086 = vrot.lane.b32.xlu0 %v13068_v37, %s13928_s7  ;;  %v13260_v37 = vld [vmem:[#allocation4 + $0x10] sm:$0x1] }
 0xa42   : > { %12755 = vst.msk [vmem:[%s17037_s14 + $0x5] sm:$0x1] %vm12398_vm8, %v12733_v40 }
 0xa43   : > { %13088 = vrot.lane.b32.xlu1 %v13069_v46, %s13928_s7  ;;  %v12735_v8 = vpop.permute.xlu0 %12734  ;;  %v13261_v46 = vld [vmem:[#allocation4 + $0x18] sm:$0x1] }
 0xa44   : > { %12756 = vst.msk [vmem:[%s17037_s14 + $0x9] sm:$0x1] %vm12398_vm8, %v12735_v8 }
 0xa45   : > { %v12737_v21 = vpop.permute.xlu1 %12736  ;;  %13090 = vrot.lane.b32.xlu0 %v13070_v4, %s13928_s7  ;;  %v13262_v4 = vld [vmem:[#allocation4 + $0x20] sm:$0x1] }
 0xa46   : > { %12757 = vst.msk [vmem:[%s17037_s14 + $0xd] sm:$0x1] %vm12398_vm8, %v12737_v21 }
 0xa47   : > { %13092 = vrot.lane.b32.xlu1 %v13071_v27, %s13928_s7  ;;  %v12739_v61 = vpop.permute.xlu0 %12738  ;;  %v13263_v27 = vld [vmem:[#allocation4 + $0x28] sm:$0x1] }
 0xa48   : > { %12758 = vst.msk [vmem:[%s17037_s14 + $0x11] sm:$0x1] %vm12398_vm8, %v12739_v61 }
 0xa49   : > { %v12741_v36 = vpop.permute.xlu1 %12740  ;;  %13094 = vrot.lane.b32.xlu0 %v13072_v14, %s13928_s7  ;;  %v13264_v14 = vld [vmem:[#allocation4 + $0x30] sm:$0x1] }
 0xa4a   : > { %12759 = vst.msk [vmem:[%s17037_s14 + $0x15] sm:$0x1] %vm12398_vm8, %v12741_v36 }
 0xa4b   : > { %13096 = vrot.lane.b32.xlu1 %v13073_v17, %s13928_s7  ;;  %v12743_v34 = vpop.permute.xlu0 %12742  ;;  %v13265_v17 = vld [vmem:[#allocation4 + $0x38] sm:$0x1] }
 0xa4c   : > { %12760 = vst.msk [vmem:[%s17037_s14 + $0x19] sm:$0x1] %vm12398_vm8, %v12743_v34 }
 0xa4d   : > { %v12745_v41 = vpop.permute.xlu1 %12744  ;;  %13130 = vrot.lane.b32.xlu0 %v13114_v45, %s13927_s6  ;;  %v13306_v45 = vld [vmem:[#allocation4 + $0x1] sm:$0x1] }
 0xa4e   : > { %12761 = vst.msk [vmem:[%s17037_s14 + $0x1d] sm:$0x1] %vm12398_vm8, %v12745_v41 }
 0xa4f   : > { %13132 = vrot.lane.b32.xlu1 %v13115_v38, %s13927_s6  ;;  %v12779_v31 = vpop.permute.xlu0 %12778  ;;  %v13307_v38 = vld [vmem:[#allocation4 + $0x9] sm:$0x1] }
 0xa50   : > { %12802 = vst.msk [vmem:[%s17037_s14 + $0x1] sm:$0x1] %vm12447_vm9, %v12779_v31 }
 0xa51   : > { %v12781_v48 = vpop.permute.xlu1 %12780  ;;  %13134 = vrot.lane.b32.xlu0 %v13116_v43, %s13927_s6  ;;  %v13308_v43 = vld [vmem:[#allocation4 + $0x11] sm:$0x1] }
 0xa52   : > { %12803 = vst.msk [vmem:[%s17037_s14 + $0x5] sm:$0x1] %vm12447_vm9, %v12781_v48 }
 0xa53   : > { %13136 = vrot.lane.b32.xlu1 %v13117_v50, %s13927_s6  ;;  %v12783_v29 = vpop.permute.xlu0 %12782  ;;  %v13002_v50 = vld [vmem:[#allocation4 + $0x2] sm:$0x1] }
 0xa54   : > { %12804 = vst.msk [vmem:[%s17037_s14 + $0x9] sm:$0x1] %vm12447_vm9, %v12783_v29  ;;  %v13309_v29 = vld [vmem:[#allocation4 + $0x19] sm:$0x1] }
 0xa55   : > { %v12785_v11 = vpop.permute.xlu1 %12784  ;;  %13138 = vrot.lane.b32.xlu0 %v13118_v47, %s13927_s6  ;;  %v13003_v47 = vld [vmem:[#allocation4 + $0xa] sm:$0x1] }
 0xa56   : > { %12805 = vst.msk [vmem:[%s17037_s14 + $0xd] sm:$0x1] %vm12447_vm9, %v12785_v11 }
 0xa57   : > { %13140 = vrot.lane.b32.xlu1 %v13119_v52, %s13927_s6  ;;  %v12787_v44 = vpop.permute.xlu0 %12786  ;;  %v13310_v52 = vld [vmem:[#allocation4 + $0x21] sm:$0x1] }
 0xa58   : > { %12806 = vst.msk [vmem:[%s17037_s14 + $0x11] sm:$0x1] %vm12447_vm9, %v12787_v44 }
 0xa59   : > { %v12789_v12 = vpop.permute.xlu1 %12788  ;;  %13142 = vrot.lane.b32.xlu0 %v13120_v59, %s13927_s6  ;;  %v13004_v59 = vld [vmem:[#allocation4 + $0x12] sm:$0x1] }
 0xa5a   : > { %12807 = vst.msk [vmem:[%s17037_s14 + $0x15] sm:$0x1] %vm12447_vm9, %v12789_v12  ;;  %v13311_v12 = vld [vmem:[#allocation4 + $0x29] sm:$0x1] }
 0xa5b   : > { %13144 = vrot.lane.b32.xlu1 %v13121_v22, %s13927_s6  ;;  %v12791_v19 = vpop.permute.xlu0 %12790  ;;  %v13005_v22 = vld [vmem:[#allocation4 + $0x1a] sm:$0x1] }
 0xa5c   : > { %12808 = vst.msk [vmem:[%s17037_s14 + $0x19] sm:$0x1] %vm12447_vm9, %v12791_v19 }
 0xa5d   : > { %v12793_v32 = vpop.permute.xlu1 %12792  ;;  %13178 = vrot.lane.b32.xlu0 %v13162_v42, %s13926_s5  ;;  %v13312_v42 = vld [vmem:[#allocation4 + $0x31] sm:$0x1] }
 0xa5e   : > { %12809 = vst.msk [vmem:[%s17037_s14 + $0x1d] sm:$0x1] %vm12447_vm9, %v12793_v32 }
 0xa5f   : > { %13180 = vrot.lane.b32.xlu1 %v13163_v28, %s13926_s5  ;;  %v12827_v51 = vpop.permute.xlu0 %12826  ;;  %v13006_v28 = vld [vmem:[#allocation4 + $0x22] sm:$0x1] }
 0xa60   : > { %12850 = vst.msk [vmem:[%s17037_s14 + $0x1] sm:$0x1] %vm12496_vm10, %v12827_v51  ;;  %v13313_v51 = vld [vmem:[#allocation4 + $0x39] sm:$0x1] }
 0xa61   : > { %v12829_v20 = vpop.permute.xlu1 %12828  ;;  %13182 = vrot.lane.b32.xlu0 %v13164_v55, %s13926_s5  ;;  %v13007_v55 = vld [vmem:[#allocation4 + $0x2a] sm:$0x1] }
 0xa62   : > { %12851 = vst.msk [vmem:[%s17037_s14 + $0x5] sm:$0x1] %vm12496_vm10, %v12829_v20 }
 0xa63   : > { %13184 = vrot.lane.b32.xlu1 %v13165_v49, %s13926_s5  ;;  %v12831_v9 = vpop.permute.xlu0 %12830  ;;  %v13354_v49 = vld [vmem:[#allocation4 + $0x2] sm:$0x1] }
 0xa64   : > { %12852 = vst.msk [vmem:[%s17037_s14 + $0x9] sm:$0x1] %vm12496_vm10, %v12831_v9 }
 0xa65   : > { %v12833_v26 = vpop.permute.xlu1 %12832  ;;  %13186 = vrot.lane.b32.xlu0 %v13166_v10, %s13926_s5  ;;  %v13008_v10 = vld [vmem:[#allocation4 + $0x32] sm:$0x1] }
 0xa66   : > { %12853 = vst.msk [vmem:[%s17037_s14 + $0xd] sm:$0x1] %vm12496_vm10, %v12833_v26  ;;  %v13355_v26 = vld [vmem:[#allocation4 + $0xa] sm:$0x1] }
 0xa67   : > { %13188 = vrot.lane.b32.xlu1 %v13167_v13, %s13926_s5  ;;  %v12835_v3 = vpop.permute.xlu0 %12834  ;;  %v13009_v13 = vld [vmem:[#allocation4 + $0x3a] sm:$0x1] }
 0xa68   : > { %12854 = vst.msk [vmem:[%s17037_s14 + $0x11] sm:$0x1] %vm12496_vm10, %v12835_v3 }
 0xa69   : > { %v12837_v39 = vpop.permute.xlu1 %12836  ;;  %13190 = vrot.lane.b32.xlu0 %v13168_v35, %s13926_s5  ;;  %v13356_v35 = vld [vmem:[#allocation4 + $0x12] sm:$0x1] }
 0xa6a   : > { %12855 = vst.msk [vmem:[%s17037_s14 + $0x15] sm:$0x1] %vm12496_vm10, %v12837_v39 }
 0xa6b   : > { %13192 = vrot.lane.b32.xlu1 %v13169_v18, %s13926_s5  ;;  %v12839_v2 = vpop.permute.xlu0 %12838  ;;  %v13357_v18 = vld [vmem:[#allocation4 + $0x1a] sm:$0x1] }
 0xa6c   : > { %12856 = vst.msk [vmem:[%s17037_s14 + $0x19] sm:$0x1] %vm12496_vm10, %v12839_v2 }
 0xa6d   : > { %v12841_v53 = vpop.permute.xlu1 %12840  ;;  %13226 = vrot.lane.b32.xlu0 %v13210_v60, %s13925_s4  ;;  %v13358_v60 = vld [vmem:[#allocation4 + $0x22] sm:$0x1] }
 0xa6e   : > { %12857 = vst.msk [vmem:[%s17037_s14 + $0x1d] sm:$0x1] %vm12496_vm10, %v12841_v53 }
 0xa6f   : > { %13228 = vrot.lane.b32.xlu1 %v13211_v30, %s13925_s4  ;;  %v12875_v33 = vpop.permute.xlu0 %12874  ;;  %v13359_v30 = vld [vmem:[#allocation4 + $0x2a] sm:$0x1] }
 0xa70   : > { %12898 = vst.msk [vmem:[%s17037_s14 + $0x1] sm:$0x1] %vm12545_vm11, %v12875_v33 }
 0xa71   : > { %v12877_v15 = vpop.permute.xlu1 %12876  ;;  %13230 = vrot.lane.b32.xlu0 %v13212_v56, %s13925_s4  ;;  %v13360_v56 = vld [vmem:[#allocation4 + $0x32] sm:$0x1] }
 0xa72   : > { %12899 = vst.msk [vmem:[%s17037_s14 + $0x5] sm:$0x1] %vm12545_vm11, %v12877_v15 }
 0xa73   : > { %13232 = vrot.lane.b32.xlu1 %v13213_v16, %s13925_s4  ;;  %v12879_v0 = vpop.permute.xlu0 %12878  ;;  %v13361_v16 = vld [vmem:[#allocation4 + $0x3a] sm:$0x1] }
 0xa74   : > { %12900 = vst.msk [vmem:[%s17037_s14 + $0x9] sm:$0x1] %vm12545_vm11, %v12879_v0 }
 0xa75   : > { %v12881_v7 = vpop.permute.xlu1 %12880  ;;  %13234 = vrot.lane.b32.xlu0 %v13214_v63, %s13925_s4  ;;  %v13418_v63 = vld [vmem:[#allocation4 + $0x4] sm:$0x1] }
 0xa76   : > { %12901 = vst.msk [vmem:[%s17037_s14 + $0xd] sm:$0x1] %vm12545_vm11, %v12881_v7 }
 0xa77   : > { %13236 = vrot.lane.b32.xlu1 %v13215_v58, %s13925_s4  ;;  %v12883_v57 = vpop.permute.xlu0 %12882  ;;  %v13419_v58 = vld [vmem:[#allocation4 + $0xc] sm:$0x1] }
 0xa78   : > { %12902 = vst.msk [vmem:[%s17037_s14 + $0x11] sm:$0x1] %vm12545_vm11, %v12883_v57 }
 0xa79   : > { %v12885_v25 = vpop.permute.xlu1 %12884  ;;  %13238 = vrot.lane.b32.xlu0 %v13216_v1, %s13925_s4  ;;  %v13420_v1 = vld [vmem:[#allocation4 + $0x14] sm:$0x1] }
 0xa7a   : > { %12903 = vst.msk [vmem:[%s17037_s14 + $0x15] sm:$0x1] %vm12545_vm11, %v12885_v25 }
 0xa7b   : > { %13240 = vrot.lane.b32.xlu1 %v13217_v24, %s13925_s4  ;;  %v12887_v54 = vpop.permute.xlu0 %12886  ;;  %v13421_v24 = vld [vmem:[#allocation4 + $0x1c] sm:$0x1] }
 0xa7c   : > { %12904 = vst.msk [vmem:[%s17037_s14 + $0x19] sm:$0x1] %vm12545_vm11, %v12887_v54 }
 0xa7d   : > { %v12889_v23 = vpop.permute.xlu1 %12888  ;;  %13274 = vrot.lane.b32.xlu0 %v13258_v62, %s13925_s4  ;;  %v13422_v62 = vld [vmem:[#allocation4 + $0x24] sm:$0x1] }
 0xa7e   : > { %12905 = vst.msk [vmem:[%s17037_s14 + $0x1d] sm:$0x1] %vm12545_vm11, %v12889_v23 }
 0xa7f   : > { %13276 = vrot.lane.b32.xlu1 %v13259_v5, %s13925_s4  ;;  %v12923_v6 = vpop.permute.xlu0 %12922  ;;  %v13423_v5 = vld [vmem:[#allocation4 + $0x2c] sm:$0x1] }
 0xa80   : > { %12946 = vst.msk [vmem:[%s17037_s14 + $0x2] sm:$0x1] %vm591_vm1, %v12923_v6 }
 0xa81   : > { %v12925_v40 = vpop.permute.xlu1 %12924  ;;  %13278 = vrot.lane.b32.xlu0 %v13260_v37, %s13925_s4  ;;  %v13424_v37 = vld [vmem:[#allocation4 + $0x34] sm:$0x1] }
 0xa82   : > { %12947 = vst.msk [vmem:[%s17037_s14 + $0x6] sm:$0x1] %vm591_vm1, %v12925_v40 }
 0xa83   : > { %13280 = vrot.lane.b32.xlu1 %v13261_v46, %s13925_s4  ;;  %v12927_v8 = vpop.permute.xlu0 %12926  ;;  %v13425_v46 = vld [vmem:[#allocation4 + $0x3c] sm:$0x1] }
 0xa84   : > { %12948 = vst.msk [vmem:[%s17037_s14 + $0xa] sm:$0x1] %vm591_vm1, %v12927_v8 }
 0xa85   : > { %v12929_v21 = vpop.permute.xlu1 %12928  ;;  %13282 = vrot.lane.b32.xlu0 %v13262_v4, %s13925_s4  ;;  %v13466_v4 = vld [vmem:[#allocation4 + $0x5] sm:$0x1] }
 0xa86   : > { %12949 = vst.msk [vmem:[%s17037_s14 + $0xe] sm:$0x1] %vm591_vm1, %v12929_v21 }
 0xa87   : > { %13284 = vrot.lane.b32.xlu1 %v13263_v27, %s13925_s4  ;;  %v12931_v61 = vpop.permute.xlu0 %12930  ;;  %v13467_v27 = vld [vmem:[#allocation4 + $0xd] sm:$0x1] }
 0xa88   : > { %12950 = vst.msk [vmem:[%s17037_s14 + $0x12] sm:$0x1] %vm591_vm1, %v12931_v61 }
 0xa89   : > { %v12933_v36 = vpop.permute.xlu1 %12932  ;;  %13286 = vrot.lane.b32.xlu0 %v13264_v14, %s13925_s4  ;;  %v13468_v14 = vld [vmem:[#allocation4 + $0x15] sm:$0x1] }
 0xa8a   : > { %12951 = vst.msk [vmem:[%s17037_s14 + $0x16] sm:$0x1] %vm591_vm1, %v12933_v36 }
 0xa8b   : > { %13288 = vrot.lane.b32.xlu1 %v13265_v17, %s13925_s4  ;;  %v12935_v34 = vpop.permute.xlu0 %12934  ;;  %v13469_v17 = vld [vmem:[#allocation4 + $0x1d] sm:$0x1] }
 0xa8c   : > { %12952 = vst.msk [vmem:[%s17037_s14 + $0x1a] sm:$0x1] %vm591_vm1, %v12935_v34 }
 0xa8d   : > { %v12937_v41 = vpop.permute.xlu1 %12936  ;;  %13322 = vrot.lane.b32.xlu0 %v13306_v45, %s13924_s30  ;;  %v13470_v45 = vld [vmem:[#allocation4 + $0x25] sm:$0x1] }
 0xa8e   : > { %12953 = vst.msk [vmem:[%s17037_s14 + $0x1e] sm:$0x1] %vm591_vm1, %v12937_v41 }
 0xa8f   : > { %13324 = vrot.lane.b32.xlu1 %v13307_v38, %s13924_s30  ;;  %v12971_v31 = vpop.permute.xlu0 %12970  ;;  %v13471_v38 = vld [vmem:[#allocation4 + $0x2d] sm:$0x1] }
 0xa90   : > { %12994 = vst.msk [vmem:[%s17037_s14 + $0x2] sm:$0x1] %vm3352_vm2, %v12971_v31 }
 0xa91   : > { %v12973_v48 = vpop.permute.xlu1 %12972  ;;  %13326 = vrot.lane.b32.xlu0 %v13308_v43, %s13924_s30  ;;  %13010 = vst.msk [vmem:[%s17037_s14 + $0x2] sm:$0x1] %vm5969_vm3, %v13002_v50  ;;  %v13472_v43 = vld [vmem:[#allocation4 + $0x35] sm:$0x1]  ;;  %v13473_v50 = vld [vmem:[#allocation4 + $0x3d] sm:$0x1] }
 0xa92   : > { %12995 = vst.msk [vmem:[%s17037_s14 + $0x6] sm:$0x1] %vm3352_vm2, %v12973_v48 }
 0xa93   : > { %13328 = vrot.lane.b32.xlu1 %v13309_v29, %s13924_s30  ;;  %13011 = vst.msk [vmem:[%s17037_s14 + $0x6] sm:$0x1] %vm5969_vm3, %v13003_v47  ;;  %v12975_v11 = vpop.permute.xlu0 %12974  ;;  %v13514_v47 = vld [vmem:[#allocation4 + $0x6] sm:$0x1] }
 0xa94   : > { %12996 = vst.msk [vmem:[%s17037_s14 + $0xa] sm:$0x1] %vm3352_vm2, %v12975_v11 }
 0xa95   : > { %v12977_v44 = vpop.permute.xlu1 %12976  ;;  %13330 = vrot.lane.b32.xlu0 %v13310_v52, %s13924_s30  ;;  %13012 = vst.msk [vmem:[%s17037_s14 + $0xa] sm:$0x1] %vm5969_vm3, %v13004_v59  ;;  %v13515_v52 = vld [vmem:[#allocation4 + $0xe] sm:$0x1]  ;;  %v13516_v59 = vld [vmem:[#allocation4 + $0x16] sm:$0x1] }
 0xa96   : > { %12997 = vst.msk [vmem:[%s17037_s14 + $0xe] sm:$0x1] %vm3352_vm2, %v12977_v44 }
 0xa97   : > { %13332 = vrot.lane.b32.xlu1 %v13311_v12, %s13924_s30  ;;  %13013 = vst.msk [vmem:[%s17037_s14 + $0xe] sm:$0x1] %vm5969_vm3, %v13005_v22  ;;  %v12979_v19 = vpop.permute.xlu0 %12978  ;;  %v13517_v22 = vld [vmem:[#allocation4 + $0x1e] sm:$0x1] }
 0xa98   : > { %12998 = vst.msk [vmem:[%s17037_s14 + $0x12] sm:$0x1] %vm3352_vm2, %v12979_v19 }
 0xa99   : > { %v12981_v32 = vpop.permute.xlu1 %12980  ;;  %13334 = vrot.lane.b32.xlu0 %v13312_v42, %s13924_s30  ;;  %13014 = vst.msk [vmem:[%s17037_s14 + $0x12] sm:$0x1] %vm5969_vm3, %v13006_v28  ;;  %v13518_v42 = vld [vmem:[#allocation4 + $0x26] sm:$0x1]  ;;  %v13519_v28 = vld [vmem:[#allocation4 + $0x2e] sm:$0x1] }
 0xa9a   : > { %12999 = vst.msk [vmem:[%s17037_s14 + $0x16] sm:$0x1] %vm3352_vm2, %v12981_v32 }
 0xa9b   : > { %13336 = vrot.lane.b32.xlu1 %v13313_v51, %s13924_s30  ;;  %13015 = vst.msk [vmem:[%s17037_s14 + $0x16] sm:$0x1] %vm5969_vm3, %v13007_v55  ;;  %v12983_v20 = vpop.permute.xlu0 %12982  ;;  %v13520_v55 = vld [vmem:[#allocation4 + $0x36] sm:$0x1] }
 0xa9c   : > { %13000 = vst.msk [vmem:[%s17037_s14 + $0x1a] sm:$0x1] %vm3352_vm2, %v12983_v20 }
 0xa9d   : > { %v12985_v9 = vpop.permute.xlu1 %12984  ;;  %13370 = vrot.lane.b32.xlu0 %v13354_v49, %s13923_s29  ;;  %13016 = vst.msk [vmem:[%s17037_s14 + $0x1a] sm:$0x1] %vm5969_vm3, %v13008_v10  ;;  %v13521_v49 = vld [vmem:[#allocation4 + $0x3e] sm:$0x1]  ;;  %v13562_v10 = vld [vmem:[#allocation4 + $0x7] sm:$0x1] }
 0xa9e   : > { %13001 = vst.msk [vmem:[%s17037_s14 + $0x1e] sm:$0x1] %vm3352_vm2, %v12985_v9 }
 0xa9f   : > { %13372 = vrot.lane.b32.xlu1 %v13355_v26, %s13923_s29  ;;  %13017 = vst.msk [vmem:[%s17037_s14 + $0x1e] sm:$0x1] %vm5969_vm3, %v13009_v13  ;;  %v13035_v3 = vpop.permute.xlu0 %13034  ;;  %v13563_v13 = vld [vmem:[#allocation4 + $0xf] sm:$0x1] }
 0xaa0   : > { %13058 = vst.msk [vmem:[%s17037_s14 + $0x2] sm:$0x1] %vm8586_vm4, %v13035_v3 }
 0xaa1   : > { %v13037_v39 = vpop.permute.xlu1 %13036  ;;  %13374 = vrot.lane.b32.xlu0 %v13356_v35, %s13923_s29  ;;  %v13564_v35 = vld [vmem:[#allocation4 + $0x17] sm:$0x1] }
 0xaa2   : > { %13059 = vst.msk [vmem:[%s17037_s14 + $0x6] sm:$0x1] %vm8586_vm4, %v13037_v39 }
 0xaa3   : > { %13376 = vrot.lane.b32.xlu1 %v13357_v18, %s13923_s29  ;;  %v13039_v2 = vpop.permute.xlu0 %13038  ;;  %v13565_v18 = vld [vmem:[#allocation4 + $0x1f] sm:$0x1] }
 0xaa4   : > { %13060 = vst.msk [vmem:[%s17037_s14 + $0xa] sm:$0x1] %vm8586_vm4, %v13039_v2 }
 0xaa5   : > { %v13041_v53 = vpop.permute.xlu1 %13040  ;;  %13378 = vrot.lane.b32.xlu0 %v13358_v60, %s13923_s29  ;;  %v13566_v60 = vld [vmem:[#allocation4 + $0x27] sm:$0x1] }
 0xaa6   : > { %13061 = vst.msk [vmem:[%s17037_s14 + $0xe] sm:$0x1] %vm8586_vm4, %v13041_v53 }
 0xaa7   : > { %13380 = vrot.lane.b32.xlu1 %v13359_v30, %s13923_s29  ;;  %v13043_v33 = vpop.permute.xlu0 %13042  ;;  %v13567_v30 = vld [vmem:[#allocation4 + $0x2f] sm:$0x1] }
 0xaa8   : > { %13062 = vst.msk [vmem:[%s17037_s14 + $0x12] sm:$0x1] %vm8586_vm4, %v13043_v33 }
 0xaa9   : > { %v13045_v15 = vpop.permute.xlu1 %13044  ;;  %13382 = vrot.lane.b32.xlu0 %v13360_v56, %s13923_s29  ;;  %v13568_v56 = vld [vmem:[#allocation4 + $0x37] sm:$0x1] }
 0xaaa   : > { %13063 = vst.msk [vmem:[%s17037_s14 + $0x16] sm:$0x1] %vm8586_vm4, %v13045_v15 }
 0xaab   : > { %13384 = vrot.lane.b32.xlu1 %v13361_v16, %s13923_s29  ;;  %v13047_v0 = vpop.permute.xlu0 %13046  ;;  %v13569_v16 = vld [vmem:[#allocation4 + $0x3f] sm:$0x1] }
 0xaac   : > { %13064 = vst.msk [vmem:[%s17037_s14 + $0x1a] sm:$0x1] %vm8586_vm4, %v13047_v0 }
 0xaad   : > { %v13049_v7 = vpop.permute.xlu1 %13048  ;;  %13434 = vrot.lane.b32.xlu0 %v13418_v63, %s13929_s8 }
 0xaae   : > { %13065 = vst.msk [vmem:[%s17037_s14 + $0x1e] sm:$0x1] %vm8586_vm4, %v13049_v7 }
 0xaaf   : > { %13436 = vrot.lane.b32.xlu1 %v13419_v58, %s13929_s8  ;;  %v13083_v57 = vpop.permute.xlu0 %13082 }
 0xab0   : > { %13106 = vst.msk [vmem:[%s17037_s14 + $0x2] sm:$0x1] %vm12398_vm8, %v13083_v57 }
 0xab1   : > { %v13085_v25 = vpop.permute.xlu1 %13084  ;;  %13438 = vrot.lane.b32.xlu0 %v13420_v1, %s13929_s8 }
 0xab2   : > { %13107 = vst.msk [vmem:[%s17037_s14 + $0x6] sm:$0x1] %vm12398_vm8, %v13085_v25 }
 0xab3   : > { %13440 = vrot.lane.b32.xlu1 %v13421_v24, %s13929_s8  ;;  %v13087_v54 = vpop.permute.xlu0 %13086 }
 0xab4   : > { %13108 = vst.msk [vmem:[%s17037_s14 + $0xa] sm:$0x1] %vm12398_vm8, %v13087_v54 }
 0xab5   : > { %v13089_v23 = vpop.permute.xlu1 %13088  ;;  %13442 = vrot.lane.b32.xlu0 %v13422_v62, %s13929_s8 }
 0xab6   : > { %13109 = vst.msk [vmem:[%s17037_s14 + $0xe] sm:$0x1] %vm12398_vm8, %v13089_v23 }
 0xab7   : > { %13444 = vrot.lane.b32.xlu1 %v13423_v5, %s13929_s8  ;;  %v13091_v6 = vpop.permute.xlu0 %13090 }
 0xab8   : > { %13110 = vst.msk [vmem:[%s17037_s14 + $0x12] sm:$0x1] %vm12398_vm8, %v13091_v6 }
 0xab9   : > { %v13093_v40 = vpop.permute.xlu1 %13092  ;;  %13446 = vrot.lane.b32.xlu0 %v13424_v37, %s13929_s8 }
 0xaba   : > { %13111 = vst.msk [vmem:[%s17037_s14 + $0x16] sm:$0x1] %vm12398_vm8, %v13093_v40 }
 0xabb   : > { %13448 = vrot.lane.b32.xlu1 %v13425_v46, %s13929_s8  ;;  %v13095_v8 = vpop.permute.xlu0 %13094 }
 0xabc   : > { %13112 = vst.msk [vmem:[%s17037_s14 + $0x1a] sm:$0x1] %vm12398_vm8, %v13095_v8 }
 0xabd   : > { %v13097_v21 = vpop.permute.xlu1 %13096  ;;  %13482 = vrot.lane.b32.xlu0 %v13466_v4, %s13928_s7 }
 0xabe   : > { %13113 = vst.msk [vmem:[%s17037_s14 + $0x1e] sm:$0x1] %vm12398_vm8, %v13097_v21 }
 0xabf   : > { %13484 = vrot.lane.b32.xlu1 %v13467_v27, %s13928_s7  ;;  %v13131_v61 = vpop.permute.xlu0 %13130 }
 0xac0   : > { %13154 = vst.msk [vmem:[%s17037_s14 + $0x2] sm:$0x1] %vm12447_vm9, %v13131_v61  ;;  %v13402_v61 = vld [vmem:[#allocation4 + $0x3] sm:$0x1] }
 0xac1   : > { %v13133_v36 = vpop.permute.xlu1 %13132  ;;  %13486 = vrot.lane.b32.xlu0 %v13468_v14, %s13928_s7  ;;  %v13403_v14 = vld [vmem:[#allocation4 + $0xb] sm:$0x1] }
 0xac2   : > { %13155 = vst.msk [vmem:[%s17037_s14 + $0x6] sm:$0x1] %vm12447_vm9, %v13133_v36 }
 0xac3   : > { %13488 = vrot.lane.b32.xlu1 %v13469_v17, %s13928_s7  ;;  %v13135_v34 = vpop.permute.xlu0 %13134 }
 0xac4   : > { %13156 = vst.msk [vmem:[%s17037_s14 + $0xa] sm:$0x1] %vm12447_vm9, %v13135_v34  ;;  %v13404_v34 = vld [vmem:[#allocation4 + $0x13] sm:$0x1] }
 0xac5   : > { %v13137_v41 = vpop.permute.xlu1 %13136  ;;  %13490 = vrot.lane.b32.xlu0 %v13470_v45, %s13928_s7  ;;  %v13405_v45 = vld [vmem:[#allocation4 + $0x1b] sm:$0x1] }
 0xac6   : > { %13157 = vst.msk [vmem:[%s17037_s14 + $0xe] sm:$0x1] %vm12447_vm9, %v13137_v41 }
 0xac7   : > { %13492 = vrot.lane.b32.xlu1 %v13471_v38, %s13928_s7  ;;  %v13139_v31 = vpop.permute.xlu0 %13138 }
 0xac8   : > { %13158 = vst.msk [vmem:[%s17037_s14 + $0x12] sm:$0x1] %vm12447_vm9, %v13139_v31  ;;  %v13406_v31 = vld [vmem:[#allocation4 + $0x23] sm:$0x1] }
 0xac9   : > { %v13141_v48 = vpop.permute.xlu1 %13140  ;;  %13494 = vrot.lane.b32.xlu0 %v13472_v43, %s13928_s7  ;;  %v13407_v43 = vld [vmem:[#allocation4 + $0x2b] sm:$0x1] }
 0xaca   : > { %13159 = vst.msk [vmem:[%s17037_s14 + $0x16] sm:$0x1] %vm12447_vm9, %v13141_v48 }
 0xacb   : > { %13496 = vrot.lane.b32.xlu1 %v13473_v50, %s13928_s7  ;;  %v13143_v29 = vpop.permute.xlu0 %13142 }
 0xacc   : > { %13160 = vst.msk [vmem:[%s17037_s14 + $0x1a] sm:$0x1] %vm12447_vm9, %v13143_v29  ;;  %v13408_v29 = vld [vmem:[#allocation4 + $0x33] sm:$0x1] }
 0xacd   : > { %v13145_v11 = vpop.permute.xlu1 %13144  ;;  %13530 = vrot.lane.b32.xlu0 %v13514_v47, %s13927_s6  ;;  %v13409_v47 = vld [vmem:[#allocation4 + $0x3b] sm:$0x1] }
 0xace   : > { %13161 = vst.msk [vmem:[%s17037_s14 + $0x1e] sm:$0x1] %vm12447_vm9, %v13145_v11 }
 0xacf   : > { %13532 = vrot.lane.b32.xlu1 %v13515_v52, %s13927_s6  ;;  %v13179_v44 = vpop.permute.xlu0 %13178 }
 0xad0   : > { %13202 = vst.msk [vmem:[%s17037_s14 + $0x2] sm:$0x1] %vm12496_vm10, %v13179_v44 }
 0xad1   : > { %v13181_v12 = vpop.permute.xlu1 %13180  ;;  %13534 = vrot.lane.b32.xlu0 %v13516_v59, %s13927_s6 }
 0xad2   : > { %13203 = vst.msk [vmem:[%s17037_s14 + $0x6] sm:$0x1] %vm12496_vm10, %v13181_v12 }
 0xad3   : > { %13536 = vrot.lane.b32.xlu1 %v13517_v22, %s13927_s6  ;;  %v13183_v19 = vpop.permute.xlu0 %13182 }
 0xad4   : > { %13204 = vst.msk [vmem:[%s17037_s14 + $0xa] sm:$0x1] %vm12496_vm10, %v13183_v19 }
 0xad5   : > { %v13185_v32 = vpop.permute.xlu1 %13184  ;;  %13538 = vrot.lane.b32.xlu0 %v13518_v42, %s13927_s6 }
 0xad6   : > { %13205 = vst.msk [vmem:[%s17037_s14 + $0xe] sm:$0x1] %vm12496_vm10, %v13185_v32 }
 0xad7   : > { %13540 = vrot.lane.b32.xlu1 %v13519_v28, %s13927_s6  ;;  %v13187_v51 = vpop.permute.xlu0 %13186 }
 0xad8   : > { %13206 = vst.msk [vmem:[%s17037_s14 + $0x12] sm:$0x1] %vm12496_vm10, %v13187_v51 }
 0xad9   : > { %v13189_v20 = vpop.permute.xlu1 %13188  ;;  %13542 = vrot.lane.b32.xlu0 %v13520_v55, %s13927_s6 }
 0xada   : > { %13207 = vst.msk [vmem:[%s17037_s14 + $0x16] sm:$0x1] %vm12496_vm10, %v13189_v20 }
 0xadb   : > { %13544 = vrot.lane.b32.xlu1 %v13521_v49, %s13927_s6  ;;  %v13191_v9 = vpop.permute.xlu0 %13190 }
 0xadc   : > { %13208 = vst.msk [vmem:[%s17037_s14 + $0x1a] sm:$0x1] %vm12496_vm10, %v13191_v9 }
 0xadd   : > { %v13193_v26 = vpop.permute.xlu1 %13192  ;;  %13578 = vrot.lane.b32.xlu0 %v13562_v10, %s13926_s5 }
 0xade   : > { %13209 = vst.msk [vmem:[%s17037_s14 + $0x1e] sm:$0x1] %vm12496_vm10, %v13193_v26 }
 0xadf   : > { %13580 = vrot.lane.b32.xlu1 %v13563_v13, %s13926_s5  ;;  %v13227_v3 = vpop.permute.xlu0 %13226 }
 0xae0   : > { %13250 = vst.msk [vmem:[%s17037_s14 + $0x2] sm:$0x1] %vm12545_vm11, %v13227_v3 }
 0xae1   : > { %v13229_v39 = vpop.permute.xlu1 %13228  ;;  %13582 = vrot.lane.b32.xlu0 %v13564_v35, %s13926_s5 }
 0xae2   : > { %13251 = vst.msk [vmem:[%s17037_s14 + $0x6] sm:$0x1] %vm12545_vm11, %v13229_v39 }
 0xae3   : > { %13584 = vrot.lane.b32.xlu1 %v13565_v18, %s13926_s5  ;;  %v13231_v2 = vpop.permute.xlu0 %13230 }
 0xae4   : > { %13252 = vst.msk [vmem:[%s17037_s14 + $0xa] sm:$0x1] %vm12545_vm11, %v13231_v2 }
 0xae5   : > { %v13233_v53 = vpop.permute.xlu1 %13232  ;;  %13586 = vrot.lane.b32.xlu0 %v13566_v60, %s13926_s5 }
 0xae6   : > { %13253 = vst.msk [vmem:[%s17037_s14 + $0xe] sm:$0x1] %vm12545_vm11, %v13233_v53 }
 0xae7   : > { %13588 = vrot.lane.b32.xlu1 %v13567_v30, %s13926_s5  ;;  %v13235_v33 = vpop.permute.xlu0 %13234 }
 0xae8   : > { %13254 = vst.msk [vmem:[%s17037_s14 + $0x12] sm:$0x1] %vm12545_vm11, %v13235_v33 }
 0xae9   : > { %v13237_v15 = vpop.permute.xlu1 %13236  ;;  %13590 = vrot.lane.b32.xlu0 %v13568_v56, %s13926_s5 }
 0xaea   : > { %13255 = vst.msk [vmem:[%s17037_s14 + $0x16] sm:$0x1] %vm12545_vm11, %v13237_v15 }
 0xaeb   : > { %13592 = vrot.lane.b32.xlu1 %v13569_v16, %s13926_s5  ;;  %v13239_v0 = vpop.permute.xlu0 %13238 }
 0xaec   : > { %13256 = vst.msk [vmem:[%s17037_s14 + $0x1a] sm:$0x1] %vm12545_vm11, %v13239_v0 }
 0xaed   : > { %v13241_v63 = vpop.permute.xlu1 %13240 }
 0xaee   : > { %13257 = vst.msk [vmem:[%s17037_s14 + $0x1e] sm:$0x1] %vm12545_vm11, %v13241_v63 }
 0xaef   : > { %v13275_v7 = vpop.permute.xlu0 %13274 }
 0xaf0   : > { %13298 = vst.msk [vmem:[%s17037_s14 + $0x3] sm:$0x1] %vm591_vm1, %v13275_v7 }
 0xaf1   : > { %v13277_v58 = vpop.permute.xlu1 %13276 }
 0xaf2   : > { %13299 = vst.msk [vmem:[%s17037_s14 + $0x7] sm:$0x1] %vm591_vm1, %v13277_v58 }
 0xaf3   : > { %v13279_v57 = vpop.permute.xlu0 %13278 }
 0xaf4   : > { %13300 = vst.msk [vmem:[%s17037_s14 + $0xb] sm:$0x1] %vm591_vm1, %v13279_v57 }
 0xaf5   : > { %v13281_v1 = vpop.permute.xlu1 %13280 }
 0xaf6   : > { %13301 = vst.msk [vmem:[%s17037_s14 + $0xf] sm:$0x1] %vm591_vm1, %v13281_v1 }
 0xaf7   : > { %v13283_v25 = vpop.permute.xlu0 %13282 }
 0xaf8   : > { %13302 = vst.msk [vmem:[%s17037_s14 + $0x13] sm:$0x1] %vm591_vm1, %v13283_v25 }
 0xaf9   : > { %v13285_v24 = vpop.permute.xlu1 %13284 }
 0xafa   : > { %13303 = vst.msk [vmem:[%s17037_s14 + $0x17] sm:$0x1] %vm591_vm1, %v13285_v24 }
 0xafb   : > { %v13287_v54 = vpop.permute.xlu0 %13286 }
 0xafc   : > { %13304 = vst.msk [vmem:[%s17037_s14 + $0x1b] sm:$0x1] %vm591_vm1, %v13287_v54 }
 0xafd   : > { %v13289_v62 = vpop.permute.xlu1 %13288 }
 0xafe   : > { %13305 = vst.msk [vmem:[%s17037_s14 + $0x1f] sm:$0x1] %vm591_vm1, %v13289_v62 }
 0xaff   : > { %v13323_v23 = vpop.permute.xlu0 %13322 }
 0xb00   : > { %13346 = vst.msk [vmem:[%s17037_s14 + $0x3] sm:$0x1] %vm3352_vm2, %v13323_v23 }
 0xb01   : > { %v13325_v5 = vpop.permute.xlu1 %13324 }
 0xb02   : > { %13347 = vst.msk [vmem:[%s17037_s14 + $0x7] sm:$0x1] %vm3352_vm2, %v13325_v5 }
 0xb03   : > { %v13327_v6 = vpop.permute.xlu0 %13326 }
 0xb04   : > { %13348 = vst.msk [vmem:[%s17037_s14 + $0xb] sm:$0x1] %vm3352_vm2, %v13327_v6 }
 0xb05   : > { %v13329_v37 = vpop.permute.xlu1 %13328 }
 0xb06   : > { %13349 = vst.msk [vmem:[%s17037_s14 + $0xf] sm:$0x1] %vm3352_vm2, %v13329_v37 }
 0xb07   : > { %v13331_v40 = vpop.permute.xlu0 %13330 }
 0xb08   : > { %13350 = vst.msk [vmem:[%s17037_s14 + $0x13] sm:$0x1] %vm3352_vm2, %v13331_v40 }
 0xb09   : > { %v13333_v46 = vpop.permute.xlu1 %13332 }
 0xb0a   : > { %13351 = vst.msk [vmem:[%s17037_s14 + $0x17] sm:$0x1] %vm3352_vm2, %v13333_v46 }
 0xb0b   : > { %v13335_v8 = vpop.permute.xlu0 %13334 }
 0xb0c   : > { %13352 = vst.msk [vmem:[%s17037_s14 + $0x1b] sm:$0x1] %vm3352_vm2, %v13335_v8 }
 0xb0d   : > { %v13337_v4 = vpop.permute.xlu1 %13336 }
 0xb0e   : > { %13353 = vst.msk [vmem:[%s17037_s14 + $0x1f] sm:$0x1] %vm3352_vm2, %v13337_v4 }
 0xb0f   : > { %v13371_v21 = vpop.permute.xlu0 %13370 }
 0xb10   : > { %13394 = vst.msk [vmem:[%s17037_s14 + $0x3] sm:$0x1] %vm5969_vm3, %v13371_v21 }
 0xb11   : > { %v13373_v27 = vpop.permute.xlu1 %13372  ;;  %13410 = vst.msk [vmem:[%s17037_s14 + $0x3] sm:$0x1] %vm8586_vm4, %v13402_v61 }
 0xb12   : > { %13395 = vst.msk [vmem:[%s17037_s14 + $0x7] sm:$0x1] %vm5969_vm3, %v13373_v27 }
 0xb13   : > { %13411 = vst.msk [vmem:[%s17037_s14 + $0x7] sm:$0x1] %vm8586_vm4, %v13403_v14  ;;  %v13375_v36 = vpop.permute.xlu0 %13374 }
 0xb14   : > { %13396 = vst.msk [vmem:[%s17037_s14 + $0xb] sm:$0x1] %vm5969_vm3, %v13375_v36 }
 0xb15   : > { %v13377_v17 = vpop.permute.xlu1 %13376  ;;  %13412 = vst.msk [vmem:[%s17037_s14 + $0xb] sm:$0x1] %vm8586_vm4, %v13404_v34 }
 0xb16   : > { %13397 = vst.msk [vmem:[%s17037_s14 + $0xf] sm:$0x1] %vm5969_vm3, %v13377_v17 }
 0xb17   : > { %13413 = vst.msk [vmem:[%s17037_s14 + $0xf] sm:$0x1] %vm8586_vm4, %v13405_v45  ;;  %v13379_v41 = vpop.permute.xlu0 %13378 }
 0xb18   : > { %13398 = vst.msk [vmem:[%s17037_s14 + $0x13] sm:$0x1] %vm5969_vm3, %v13379_v41 }
 0xb19   : > { %v13381_v38 = vpop.permute.xlu1 %13380  ;;  %13414 = vst.msk [vmem:[%s17037_s14 + $0x13] sm:$0x1] %vm8586_vm4, %v13406_v31 }
 0xb1a   : > { %13399 = vst.msk [vmem:[%s17037_s14 + $0x17] sm:$0x1] %vm5969_vm3, %v13381_v38 }
 0xb1b   : > { %13415 = vst.msk [vmem:[%s17037_s14 + $0x17] sm:$0x1] %vm8586_vm4, %v13407_v43  ;;  %v13383_v48 = vpop.permute.xlu0 %13382 }
 0xb1c   : > { %13400 = vst.msk [vmem:[%s17037_s14 + $0x1b] sm:$0x1] %vm5969_vm3, %v13383_v48 }
 0xb1d   : > { %v13385_v50 = vpop.permute.xlu1 %13384  ;;  %13416 = vst.msk [vmem:[%s17037_s14 + $0x1b] sm:$0x1] %vm8586_vm4, %v13408_v29 }
 0xb1e   : > { %13401 = vst.msk [vmem:[%s17037_s14 + $0x1f] sm:$0x1] %vm5969_vm3, %v13385_v50 }
 0xb1f   : > { %13417 = vst.msk [vmem:[%s17037_s14 + $0x1f] sm:$0x1] %vm8586_vm4, %v13409_v47  ;;  %v13435_v11 = vpop.permute.xlu0 %13434 }
 0xb20   : > { %13458 = vst.msk [vmem:[%s17037_s14 + $0x3] sm:$0x1] %vm12398_vm8, %v13435_v11 }
 0xb21   : > { %v13437_v52 = vpop.permute.xlu1 %13436 }
 0xb22   : > { %13459 = vst.msk [vmem:[%s17037_s14 + $0x7] sm:$0x1] %vm12398_vm8, %v13437_v52 }
 0xb23   : > { %v13439_v44 = vpop.permute.xlu0 %13438 }
 0xb24   : > { %13460 = vst.msk [vmem:[%s17037_s14 + $0xb] sm:$0x1] %vm12398_vm8, %v13439_v44 }
 0xb25   : > { %v13441_v59 = vpop.permute.xlu1 %13440 }
 0xb26   : > { %13461 = vst.msk [vmem:[%s17037_s14 + $0xf] sm:$0x1] %vm12398_vm8, %v13441_v59 }
 0xb27   : > { %v13443_v12 = vpop.permute.xlu0 %13442 }
 0xb28   : > { %13462 = vst.msk [vmem:[%s17037_s14 + $0x13] sm:$0x1] %vm12398_vm8, %v13443_v12 }
 0xb29   : > { %v13445_v22 = vpop.permute.xlu1 %13444 }
 0xb2a   : > { %13463 = vst.msk [vmem:[%s17037_s14 + $0x17] sm:$0x1] %vm12398_vm8, %v13445_v22 }
 0xb2b   : > { %v13447_v19 = vpop.permute.xlu0 %13446 }
 0xb2c   : > { %13464 = vst.msk [vmem:[%s17037_s14 + $0x1b] sm:$0x1] %vm12398_vm8, %v13447_v19 }
 0xb2d   : > { %v13449_v42 = vpop.permute.xlu1 %13448 }
 0xb2e   : > { %13465 = vst.msk [vmem:[%s17037_s14 + $0x1f] sm:$0x1] %vm12398_vm8, %v13449_v42 }
 0xb2f   : > { %v13483_v32 = vpop.permute.xlu0 %13482 }
 0xb30   : > { %13506 = vst.msk [vmem:[%s17037_s14 + $0x3] sm:$0x1] %vm12447_vm9, %v13483_v32 }
 0xb31   : > { %v13485_v28 = vpop.permute.xlu1 %13484 }
 0xb32   : > { %13507 = vst.msk [vmem:[%s17037_s14 + $0x7] sm:$0x1] %vm12447_vm9, %v13485_v28 }
 0xb33   : > { %v13487_v51 = vpop.permute.xlu0 %13486 }
 0xb34   : > { %13508 = vst.msk [vmem:[%s17037_s14 + $0xb] sm:$0x1] %vm12447_vm9, %v13487_v51 }
 0xb35   : > { %v13489_v55 = vpop.permute.xlu1 %13488 }
 0xb36   : > { %13509 = vst.msk [vmem:[%s17037_s14 + $0xf] sm:$0x1] %vm12447_vm9, %v13489_v55 }
 0xb37   : > { %v13491_v20 = vpop.permute.xlu0 %13490 }
 0xb38   : > { %13510 = vst.msk [vmem:[%s17037_s14 + $0x13] sm:$0x1] %vm12447_vm9, %v13491_v20 }
 0xb39   : > { %v13493_v49 = vpop.permute.xlu1 %13492 }
 0xb3a   : > { %13511 = vst.msk [vmem:[%s17037_s14 + $0x17] sm:$0x1] %vm12447_vm9, %v13493_v49 }
 0xb3b   : > { %v13495_v9 = vpop.permute.xlu0 %13494 }
 0xb3c   : > { %13512 = vst.msk [vmem:[%s17037_s14 + $0x1b] sm:$0x1] %vm12447_vm9, %v13495_v9 }
 0xb3d   : > { %v13497_v10 = vpop.permute.xlu1 %13496 }
 0xb3e   : > { %13513 = vst.msk [vmem:[%s17037_s14 + $0x1f] sm:$0x1] %vm12447_vm9, %v13497_v10 }
 0xb3f   : > { %v13531_v26 = vpop.permute.xlu0 %13530 }
 0xb40   : > { %13554 = vst.msk [vmem:[%s17037_s14 + $0x3] sm:$0x1] %vm12496_vm10, %v13531_v26 }
 0xb41   : > { %v13533_v13 = vpop.permute.xlu1 %13532 }
 0xb42   : > { %13555 = vst.msk [vmem:[%s17037_s14 + $0x7] sm:$0x1] %vm12496_vm10, %v13533_v13 }
 0xb43   : > { %v13535_v3 = vpop.permute.xlu0 %13534 }
 0xb44   : > { %13556 = vst.msk [vmem:[%s17037_s14 + $0xb] sm:$0x1] %vm12496_vm10, %v13535_v3 }
 0xb45   : > { %v13537_v35 = vpop.permute.xlu1 %13536 }
 0xb46   : > { %13557 = vst.msk [vmem:[%s17037_s14 + $0xf] sm:$0x1] %vm12496_vm10, %v13537_v35 }
 0xb47   : > { %v13539_v39 = vpop.permute.xlu0 %13538 }
 0xb48   : > { %13558 = vst.msk [vmem:[%s17037_s14 + $0x13] sm:$0x1] %vm12496_vm10, %v13539_v39 }
 0xb49   : > { %v13541_v18 = vpop.permute.xlu1 %13540 }
 0xb4a   : > { %13559 = vst.msk [vmem:[%s17037_s14 + $0x17] sm:$0x1] %vm12496_vm10, %v13541_v18 }
 0xb4b   : > { %v13543_v2 = vpop.permute.xlu0 %13542 }
 0xb4c   : > { %13560 = vst.msk [vmem:[%s17037_s14 + $0x1b] sm:$0x1] %vm12496_vm10, %v13543_v2 }
 0xb4d   : > { %v13545_v60 = vpop.permute.xlu1 %13544 }
 0xb4e   : > { %13561 = vst.msk [vmem:[%s17037_s14 + $0x1f] sm:$0x1] %vm12496_vm10, %v13545_v60 }
 0xb4f   : > { %v13579_v53 = vpop.permute.xlu0 %13578 }
 0xb50   : > { %13602 = vst.msk [vmem:[%s17037_s14 + $0x3] sm:$0x1] %vm12545_vm11, %v13579_v53 }
 0xb51   : > { %v13581_v30 = vpop.permute.xlu1 %13580 }
 0xb52   : > { %13603 = vst.msk [vmem:[%s17037_s14 + $0x7] sm:$0x1] %vm12545_vm11, %v13581_v30 }
 0xb53   : > { %v13583_v33 = vpop.permute.xlu0 %13582 }
 0xb54   : > { %13604 = vst.msk [vmem:[%s17037_s14 + $0xb] sm:$0x1] %vm12545_vm11, %v13583_v33 }
 0xb55   : > { %v13585_v56 = vpop.permute.xlu1 %13584 }
 0xb56   : > { %13605 = vst.msk [vmem:[%s17037_s14 + $0xf] sm:$0x1] %vm12545_vm11, %v13585_v56 }
 0xb57   : > { %v13587_v15 = vpop.permute.xlu0 %13586 }
 0xb58   : > { %13606 = vst.msk [vmem:[%s17037_s14 + $0x13] sm:$0x1] %vm12545_vm11, %v13587_v15 }
 0xb59   : > { %v13589_v16 = vpop.permute.xlu1 %13588 }
 0xb5a   : > { %13607 = vst.msk [vmem:[%s17037_s14 + $0x17] sm:$0x1] %vm12545_vm11, %v13589_v16 }
 0xb5b   : > { %v13591_v0 = vpop.permute.xlu0 %13590 }
 0xb5c   : > { %13608 = vst.msk [vmem:[%s17037_s14 + $0x1b] sm:$0x1] %vm12545_vm11, %v13591_v0 }
 0xb5d   : > { %v13593_v63 = vpop.permute.xlu1 %13592 }
 0xb5e   : > { %13609 = vst.msk [vmem:[%s17037_s14 + $0x1f] sm:$0x1] %vm12545_vm11, %v13593_v63 }
 0xb5f PF: > { %s13_s12 = sadd.s32 1, %s13919_s12  }
 0xb60   : > { %p10_p4 = scmp.ge.s32.totalorder %s13_s12, 4  }
 0xb62   :  { %12 = sbr.rel (!%p10_p4) target bundleno = 1 (0x1), region = 64 }

</bundles_post_ra>
